<compile_context>
chip_gen: v5e
topology: v5e:2x2
jax: 0.10.0
libtpu: 0.0.40
codegen_flags: <defaults>
</compile_context>

<pallas_src>
import functools

import jax
import jax.numpy as jnp
from jax.experimental import pallas as pl
from jax.experimental.pallas import tpu as pltpu

EPS = 1e-5              # BatchNorm3d eps (PyTorch default)
FUSION_KERNEL = 2       # ConvTranspose3d temporal fusion kernel/stride
LANES = 128             # TPU lane width; channel axis is padded to this


def _round_up(x, m):
    return (x + m - 1) // m * m


# --------------------------------------------------------------------------
# Pallas kernel: bf16 matmul + fused BN-affine (+ residual) (+ ReLU) epilogue
# --------------------------------------------------------------------------

def _mm_affine_kernel(a_ref, b_ref, s_ref, t_ref, o_ref, *, relu):
    acc = jnp.dot(a_ref[...], b_ref[...], preferred_element_type=jnp.float32)
    y = acc * s_ref[...] + t_ref[...]
    if relu:
        y = jnp.maximum(y, 0.0)
    o_ref[...] = y.astype(o_ref.dtype)


def _mm_affine_res_kernel(a_ref, b_ref, s_ref, t_ref, r_ref, o_ref, *, relu):
    acc = jnp.dot(a_ref[...], b_ref[...], preferred_element_type=jnp.float32)
    y = acc * s_ref[...] + t_ref[...] + r_ref[...].astype(jnp.float32)
    if relu:
        y = jnp.maximum(y, 0.0)
    o_ref[...] = y.astype(o_ref.dtype)


def matmul_affine(a, b, scale, shift, *, residual=None, relu=True,
                  out_dtype=jnp.bfloat16):
    """out = maybe_relu((A @ B) * scale + shift [+ residual]).

    a:           (M, K)   bf16 (K <= Kp; padded here only if needed)
    b:           (Kp, Np) bf16, pre-padded at parameter-build time (Np % 128 == 0)
    scale/shift: (1, Np)  f32
    residual:    (M, Np)  bf16 or None
    """
    M, K = a.shape
    Kp, Np = b.shape
    TM = min(512, _round_up(M, 8))
    Mp = _round_up(M, TM)
    if (Mp, Kp) != (M, K):
        a = jnp.pad(a, ((0, Mp - M), (0, Kp - K)))
    if residual is not None and Mp != M:
        residual = jnp.pad(residual, ((0, Mp - M), (0, 0)))

    in_specs = [
        pl.BlockSpec((TM, Kp), lambda i: (i, 0)),
        pl.BlockSpec((Kp, Np), lambda i: (0, 0)),
        pl.BlockSpec((1, Np), lambda i: (0, 0)),
        pl.BlockSpec((1, Np), lambda i: (0, 0)),
    ]
    args = [a, b, scale, shift]
    if residual is None:
        kernel = functools.partial(_mm_affine_kernel, relu=relu)
    else:
        in_specs.append(pl.BlockSpec((TM, Np), lambda i: (i, 0)))
        args.append(residual)
        kernel = functools.partial(_mm_affine_res_kernel, relu=relu)

    out = pl.pallas_call(
        kernel,
        out_shape=jax.ShapeDtypeStruct((Mp, Np), out_dtype),
        grid=(Mp // TM,),
        in_specs=in_specs,
        out_specs=pl.BlockSpec((TM, Np), lambda i: (i, 0)),
        compiler_params=pltpu.CompilerParams(
            dimension_semantics=("parallel",)),
    )(*args)
    if Mp != M:
        out = out[:M]
    return out


# --------------------------------------------------------------------------
# Activation container: (act2d (M, 128) bf16, (N, T, H, W), C)
# --------------------------------------------------------------------------

def init_act(x_ncdhw):
    """NCDHW f32 -> channels-last, lane-padded bf16 2-D activation slab."""
    N, C, T, H, W = x_ncdhw.shape
    x = jnp.transpose(x_ncdhw, (0, 2, 3, 4, 1)).astype(jnp.bfloat16)
    x = jnp.pad(x, ((0, 0),) * 4 + ((0, LANES - C),))
    return (x.reshape(-1, LANES), (N, T, H, W), C)


def to_ncdhw(act):
    x2d, (N, T, H, W), C = act
    x = x2d.reshape(N, T, H, W, LANES)[..., :C]
    return jnp.transpose(x, (0, 4, 1, 2, 3)).astype(jnp.float32)


# --------------------------------------------------------------------------
# Conv3d(bias=False) + folded BN (+ fused residual) (+ ReLU)
# --------------------------------------------------------------------------

def apply_conv(act, p, stride, padding, relu=True, residual=None):
    x2d, (N, T, H, W), _C = act
    kt, kh, kw = p['ksize']
    st, sh, sw = stride
    pt, ph, pw = padding
    To = (T + 2 * pt - kt) // st + 1
    Ho = (H + 2 * ph - kh) // sh + 1
    Wo = (W + 2 * pw - kw) // sw + 1

    if (kt, kh, kw) == (1, 1, 1):
        # 1x1x1 conv: feed the lane-padded activation directly (K = 128);
        # weight rows for pad lanes are zero, so no slicing/padding needed.
        if stride == (1, 1, 1):
            a = x2d
        else:
            x5 = x2d.reshape(N, T, H, W, LANES)
            a = x5[:, ::st, ::sh, ::sw, :].reshape(-1, LANES)
    else:
        cin_p = p['cin_p']
        x5 = x2d.reshape(N, T, H, W, LANES)[..., :cin_p]
        xp = jnp.pad(x5, ((0, 0), (pt, pt), (ph, ph), (pw, pw), (0, 0)))
        taps = []
        for it in range(kt):
            for ih in range(kh):
                for iw in range(kw):
                    taps.append(xp[:,
                                   it: it + (To - 1) * st + 1: st,
                                   ih: ih + (Ho - 1) * sh + 1: sh,
                                   iw: iw + (Wo - 1) * sw + 1: sw, :])
        # TODO(synk): bf16 im2col still materialized JAX-side; in-kernel
        # halo-DMA patch gather would remove the kt*kh*kw HBM amplification.
        a = jnp.stack(taps, axis=4).reshape(N * To * Ho * Wo,
                                            kt * kh * kw * cin_p)

    r2d = residual[0] if residual is not None else None
    out2d = matmul_affine(a, p['b'], p['scale'], p['shift'],
                          residual=r2d, relu=relu)
    return (out2d, (N, To, Ho, Wo), p['cout'])


def maxpool_133(act):
    """MaxPool3d(kernel=(1,3,3), stride=(1,2,2), padding=(0,1,1)).

    Running maximum over the 9 strided views (no 9x buffer); XLA fuses it.
    """
    x2d, (N, T, H, W), C = act
    Ho = (H + 2 - 3) // 2 + 1
    Wo = (W + 2 - 3) // 2 + 1
    x5 = x2d.reshape(N, T, H, W, LANES)
    xp = jnp.pad(x5, ((0, 0), (0, 0), (1, 1), (1, 1), (0, 0)),
                 constant_values=-jnp.inf)
    out = None
    for ih in range(3):
        for iw in range(3):
            v = xp[:, :,
                   ih: ih + (Ho - 1) * 2 + 1: 2,
                   iw: iw + (Wo - 1) * 2 + 1: 2, :]
            out = v if out is None else jnp.maximum(out, v)
    return (out.reshape(-1, LANES), (N, T, Ho, Wo), C)


def lateral_fuse(act_rgb, act_ske, p):
    """ConvTranspose3d((kt,1,1), stride=(kt,1,1), bias=True) + channel concat.

    The lateral weight is packed so its output channels land at lanes
    [offset, offset+cout); the torch.cat along C becomes a lane-disjoint add.
    """
    x2d, (N, T, H, W), _Cs = act_ske
    kt = p['kt']
    out = matmul_affine(x2d, p['b'], p['scale'], p['shift'], relu=False)
    out = out.reshape(N, T, H, W, kt, LANES)
    out = jnp.transpose(out, (0, 1, 4, 2, 3, 5)).reshape(-1, LANES)
    r2d, (Nr, Tr, Hr, Wr), Cr = act_rgb
    assert (Nr, Tr, Hr, Wr) == (N, T * kt, H, W)
    assert Cr == p['lane_offset']
    return (r2d + out, (Nr, Tr, Hr, Wr), Cr + p['cout'])


# --------------------------------------------------------------------------
# Residual blocks / layers (BasicBlock3d semantics from mmaction ResNet3d)
# --------------------------------------------------------------------------

def basic_block3d(act, blk):
    ss, ts = blk['spatial_stride'], blk['temporal_stride']
    pt = 1 if blk['inflate'] else 0         # inflate -> 3x3x3, else 1x3x3
    out = apply_conv(act, blk['conv1'], stride=(ts, ss, ss),
                     padding=(pt, 1, 1), relu=True)
    if blk['downsample'] is not None:
        identity = apply_conv(act, blk['downsample'], stride=(ts, ss, ss),
                              padding=(0, 0, 0), relu=False)
    else:
        identity = act
    # conv2 with the residual add + final ReLU fused into the matmul epilogue.
    return apply_conv(out, blk['conv2'], stride=(1, 1, 1),
                      padding=(pt, 1, 1), relu=True, residual=identity)


def res_layer(act, blocks):
    for blk in blocks:
        act = basic_block3d(act, blk)
    return act


# --------------------------------------------------------------------------
# Deterministic parameter construction (synthetic; packed/padded offline)
# --------------------------------------------------------------------------

class _KeyGen:
    def __init__(self, seed=0):
        self._key = jax.random.PRNGKey(seed)

    def __call__(self):
        self._key, sub = jax.random.split(self._key)
        return sub


def pack_conv_bn(kg, cin, cout, ksize):
    """Conv3d(bias=False) + BN(inference): fold, transpose, pad -- all offline."""
    kt, kh, kw = ksize
    fan_in = cin * kt * kh * kw
    w = jax.random.normal(kg(), (cout, cin, kt, kh, kw), jnp.float32) / jnp.sqrt(fan_in)
    gamma = jax.random.uniform(kg(), (cout,), jnp.float32, 0.5, 1.5)
    beta = 0.1 * jax.random.normal(kg(), (cout,), jnp.float32)
    mean = 0.1 * jax.random.normal(kg(), (cout,), jnp.float32)
    var = jax.random.uniform(kg(), (cout,), jnp.float32, 0.5, 1.5)
    scale = gamma / jnp.sqrt(var + EPS)
    shift = beta - mean * scale

    cin_p = LANES if ksize == (1, 1, 1) else _round_up(cin, 8)
    K = kt * kh * kw * cin_p
    Kp = _round_up(K, LANES)
    wt = jnp.transpose(w, (2, 3, 4, 1, 0))            # (kt, kh, kw, cin, cout)
    wt = jnp.pad(wt, ((0, 0), (0, 0), (0, 0),
                      (0, cin_p - cin), (0, LANES - cout)))
    b = jnp.pad(wt.reshape(K, LANES), ((0, Kp - K), (0, 0))).astype(jnp.bfloat16)
    s = jnp.zeros((1, LANES), jnp.float32).at[0, :cout].set(scale)
    t = jnp.zeros((1, LANES), jnp.float32).at[0, :cout].set(shift)
    return dict(b=b, scale=s, shift=t, ksize=ksize, cin_p=cin_p, cout=cout)


def pack_lateral(kg, cin, cout, kt, lane_offset):
    """ConvTranspose3d(cin, cout, (kt,1,1), stride=(kt,1,1), bias=True)."""
    w = jax.random.normal(kg(), (cin, cout, kt, 1, 1), jnp.float32) / jnp.sqrt(cin)
    bias = 0.1 * jax.random.normal(kg(), (cout,), jnp.float32)
    Np = kt * LANES
    b = jnp.zeros((LANES, Np), jnp.float32)
    t = jnp.zeros((1, Np), jnp.float32)
    for j in range(kt):
        lo = j * LANES + lane_offset
        b = b.at[:cin, lo: lo + cout].set(w[:, :, j, 0, 0])
        t = t.at[0, lo: lo + cout].set(bias)
    return dict(b=b.astype(jnp.bfloat16),
                scale=jnp.ones((1, Np), jnp.float32),
                shift=t, kt=kt, cout=cout, lane_offset=lane_offset)


def build_block(kg, cin, planes, spatial_stride, temporal_stride, inflate,
                downsample):
    kconv = (3, 3, 3) if inflate else (1, 3, 3)
    return dict(
        conv1=pack_conv_bn(kg, cin, planes, kconv),
        conv2=pack_conv_bn(kg, planes, planes, kconv),
        downsample=pack_conv_bn(kg, cin, planes, (1, 1, 1)) if downsample else None,
        spatial_stride=spatial_stride,
        temporal_stride=temporal_stride,
        inflate=inflate,
    )


def build_params():
    # rgb pathway: lateral=True, base_channels=8, lateral_channels=4 (=ske base),
    #              stage_blocks=(2,2), spatial_strides=(1,2), inflate=(0,1)
    # ske pathway: lateral=False, base_channels=4, stage_blocks=(2,2),
    #              spatial_strides=(1,2), inflate=(1,1)
    kg = _KeyGen(0)
    rgb = dict(
        stem=pack_conv_bn(kg, 3, 8, (1, 7, 7)),
        conv1_lateral=pack_lateral(kg, 4, 4, FUSION_KERNEL, lane_offset=8),
        layer1_lateral=pack_lateral(kg, 4, 4, FUSION_KERNEL, lane_offset=8),
        # layer1: in = base(8)+lateral(4)=12 != planes*exp(8) -> downsample
        layer1=[build_block(kg, 12, 8, 1, 1, False, True),
                build_block(kg, 8, 8, 1, 1, False, False)],
        # layer2: in = 8+lateral(4)=12, planes=16, spatial stride 2 -> downsample
        layer2=[build_block(kg, 12, 16, 2, 1, True, True),
                build_block(kg, 16, 16, 1, 1, True, False)],
    )
    ske = dict(
        stem=pack_conv_bn(kg, 3, 4, (1, 7, 7)),
        layer1=[build_block(kg, 4, 4, 1, 1, True, False),
                build_block(kg, 4, 4, 1, 1, True, False)],
        layer2=[build_block(kg, 4, 8, 2, 1, True, True),
                build_block(kg, 8, 8, 1, 1, True, False)],
    )
    return dict(rgb=rgb, ske=ske)


# --------------------------------------------------------------------------
# DREAM.forward
# --------------------------------------------------------------------------

def dream_forward(params, rgb, ske):
    rp, sp = params['rgb'], params['ske']
    a_rgb = init_act(rgb)
    a_ske = init_act(ske)

    # stems: ConvModule((1,7,7), stride (1,2,2), pad (0,3,3)) + MaxPool3d
    a_rgb = apply_conv(a_rgb, rp['stem'], stride=(1, 2, 2), padding=(0, 3, 3))
    a_rgb = maxpool_133(a_rgb)
    a_ske = apply_conv(a_ske, sp['stem'], stride=(1, 2, 2), padding=(0, 3, 3))
    a_ske = maxpool_133(a_ske)

    # lateral fusion after stem: conv1_lateral (temporal ConvTranspose3d) + concat
    a_rgb = lateral_fuse(a_rgb, a_ske, rp['conv1_lateral'])

    # stage 1 (both pathways) + lateral fusion
    a_rgb = res_layer(a_rgb, rp['layer1'])
    a_ske = res_layer(a_ske, sp['layer1'])
    a_rgb = lateral_fuse(a_rgb, a_ske, rp['layer1_lateral'])

    # stage 2 (last stage: no lateral connection after it)
    a_rgb = res_layer(a_rgb, rp['layer2'])
    a_ske = res_layer(a_ske, sp['layer2'])
    return to_ncdhw(a_rgb), to_ncdhw(a_ske)


if __name__ == "__main__":
    key = jax.random.PRNGKey(0)
    k_rgb, k_ske = jax.random.split(key)
    # T_rgb = FUSION_KERNEL * T_ske so the temporally-upsampled ske features
    # can be channel-concatenated with rgb features (DREAM lateral fusion).
    rgb = jax.random.normal(k_rgb, (1, 3, 2 * FUSION_KERNEL, 32, 32), jnp.float32)
    ske = jax.random.normal(k_ske, (1, 3, 2, 32, 32), jnp.float32)

    params = build_params()
    fwd = jax.jit(lambda r, s: dream_forward(params, r, s))
    x_rgb, x_ske = fwd(rgb, ske)
    jax.block_until_ready((x_rgb, x_ske))

    assert x_rgb.shape == (1, 16, 4, 4, 4), x_rgb.shape
    assert x_ske.shape == (1, 8, 2, 4, 4), x_ske.shape
    assert jnp.all(jnp.isfinite(x_rgb)) and jnp.all(jnp.isfinite(x_ske))
    print("KERNEL_OK")
</pallas_src>

<mosaic_0001>
module attributes {stable_mosaic.version = 11 : i64} {
  func.func @_mm_affine_kernel(%arg0: i32, %arg1: memref<512x512xbf16, #tpu.memory_space<vmem>>, %arg2: memref<512x128xbf16, #tpu.memory_space<vmem>>, %arg3: memref<1x128xf32, #tpu.memory_space<vmem>>, %arg4: memref<1x128xf32, #tpu.memory_space<vmem>>, %arg5: memref<512x128xbf16, #tpu.memory_space<vmem>>) attributes {dimension_semantics = [#tpu.dimension_semantics<parallel>], iteration_bounds = array<i64: 1>, scalar_prefetch = 0 : i64, scratch_operands = 0 : i64, tpu.core_type = #tpu.core_type<tc>, window_params = [{transform_indices = @transform_0, window_bounds = array<i64: 512, 512>}, {pipeline_mode = #tpu.pipeline_mode<synchronous>, transform_indices = @transform_1, window_bounds = array<i64: 512, 128>}, {pipeline_mode = #tpu.pipeline_mode<synchronous>, transform_indices = @transform_2, window_bounds = array<i64: 1, 128>}, {pipeline_mode = #tpu.pipeline_mode<synchronous>, transform_indices = @transform_3, window_bounds = array<i64: 1, 128>}, {transform_indices = @transform_4, window_bounds = array<i64: 512, 128>}]} {
    %c0 = arith.constant 0 : index
    %c0_0 = arith.constant 0 : index
    %0 = vector.load %arg1[%c0, %c0_0] : memref<512x512xbf16, #tpu.memory_space<vmem>>, vector<512x512xbf16>
    %c0_1 = arith.constant 0 : index
    %c0_2 = arith.constant 0 : index
    %1 = vector.load %arg2[%c0_1, %c0_2] : memref<512x128xbf16, #tpu.memory_space<vmem>>, vector<512x128xbf16>
    %cst = arith.constant dense<0.000000e+00> : vector<512x128xf32>
    %2 = tpu.matmul %0, %1, %cst {dimension_numbers = #tpu.dot_dimension_numbers<[1], [0], [0], [1], [0, 0, 1, 1], [], []>} : vector<512x512xbf16>, vector<512x128xbf16>, vector<512x128xf32> -> vector<512x128xf32>
    %c0_3 = arith.constant 0 : index
    %c0_4 = arith.constant 0 : index
    %3 = vector.load %arg3[%c0_3, %c0_4] : memref<1x128xf32, #tpu.memory_space<vmem>>, vector<1x128xf32>
    %4 = vector.broadcast %3 : vector<1x128xf32> to vector<512x128xf32>
    %5 = arith.mulf %2, %4 : vector<512x128xf32>
    %c0_5 = arith.constant 0 : index
    %c0_6 = arith.constant 0 : index
    %6 = vector.load %arg4[%c0_5, %c0_6] : memref<1x128xf32, #tpu.memory_space<vmem>>, vector<1x128xf32>
    %7 = vector.broadcast %6 : vector<1x128xf32> to vector<512x128xf32>
    %8 = arith.addf %5, %7 : vector<512x128xf32>
    %cst_7 = arith.constant 0.000000e+00 : f32
    %9 = vector.broadcast %cst_7 : f32 to vector<512x128xf32>
    %10 = arith.maximumf %8, %9 : vector<512x128xf32>
    %11 = arith.truncf %10 : vector<512x128xf32> to vector<512x128xbf16>
    %c0_8 = arith.constant 0 : index
    %c0_9 = arith.constant 0 : index
    %12 = vector.load %arg5[%c0_8, %c0_9] : memref<512x128xbf16, #tpu.memory_space<vmem>>, vector<512x128xbf16>
    tpu.vector_store %arg5[%c0_8, %c0_9], %11 {strides = array<i32>} : memref<512x128xbf16, #tpu.memory_space<vmem>>, vector<512x128xbf16>,
    return
  }
  func.func @transform_0(%arg0: i32) -> (i32, i32) {
    %c0_i32 = arith.constant 0 : i32
    %c0_i32_0 = arith.constant 0 : i32
    return %arg0, %c0_i32 : i32, i32
  }
  func.func @transform_1(%arg0: i32) -> (i32, i32) {
    %c0_i32 = arith.constant 0 : i32
    %c0_i32_0 = arith.constant 0 : i32
    %c0_i32_1 = arith.constant 0 : i32
    return %c0_i32, %c0_i32_0 : i32, i32
  }
  func.func @transform_2(%arg0: i32) -> (i32, i32) {
    %c0_i32 = arith.constant 0 : i32
    %c0_i32_0 = arith.constant 0 : i32
    %c0_i32_1 = arith.constant 0 : i32
    return %c0_i32, %c0_i32_0 : i32, i32
  }
  func.func @transform_3(%arg0: i32) -> (i32, i32) {
    %c0_i32 = arith.constant 0 : i32
    %c0_i32_0 = arith.constant 0 : i32
    %c0_i32_1 = arith.constant 0 : i32
    return %c0_i32, %c0_i32_0 : i32, i32
  }
  func.func @transform_4(%arg0: i32) -> (i32, i32) {
    %c0_i32 = arith.constant 0 : i32
    %c0_i32_0 = arith.constant 0 : i32
    return %arg0, %c0_i32 : i32, i32
  }
}

module attributes {stable_mosaic.version = 11 : i64} {
  func.func @_mm_affine_kernel(%arg0: i32, %arg1: memref<128x128xbf16, #tpu.memory_space<vmem>>, %arg2: memref<128x256xbf16, #tpu.memory_space<vmem>>, %arg3: memref<1x256xf32, #tpu.memory_space<vmem>>, %arg4: memref<1x256xf32, #tpu.memory_space<vmem>>, %arg5: memref<128x256xbf16, #tpu.memory_space<vmem>>) attributes {dimension_semantics = [#tpu.dimension_semantics<parallel>], iteration_bounds = array<i64: 1>, scalar_prefetch = 0 : i64, scratch_operands = 0 : i64, tpu.core_type = #tpu.core_type<tc>, window_params = [{transform_indices = @transform_0, window_bounds = array<i64: 128, 128>}, {pipeline_mode = #tpu.pipeline_mode<synchronous>, transform_indices = @transform_1, window_bounds = array<i64: 128, 256>}, {pipeline_mode = #tpu.pipeline_mode<synchronous>, transform_indices = @transform_2, window_bounds = array<i64: 1, 256>}, {pipeline_mode = #tpu.pipeline_mode<synchronous>, transform_indices = @transform_3, window_bounds = array<i64: 1, 256>}, {transform_indices = @transform_4, window_bounds = array<i64: 128, 256>}]} {
    %c0 = arith.constant 0 : index
    %c0_0 = arith.constant 0 : index
    %0 = vector.load %arg1[%c0, %c0_0] : memref<128x128xbf16, #tpu.memory_space<vmem>>, vector<128x128xbf16>
    %c0_1 = arith.constant 0 : index
    %c0_2 = arith.constant 0 : index
    %1 = vector.load %arg2[%c0_1, %c0_2] : memref<128x256xbf16, #tpu.memory_space<vmem>>, vector<128x256xbf16>
    %cst = arith.constant dense<0.000000e+00> : vector<128x256xf32>
    %2 = tpu.matmul %0, %1, %cst {dimension_numbers = #tpu.dot_dimension_numbers<[1], [0], [0], [1], [0, 0, 1, 1], [], []>} : vector<128x128xbf16>, vector<128x256xbf16>, vector<128x256xf32> -> vector<128x256xf32>
    %c0_3 = arith.constant 0 : index
    %c0_4 = arith.constant 0 : index
    %3 = vector.load %arg3[%c0_3, %c0_4] : memref<1x256xf32, #tpu.memory_space<vmem>>, vector<1x256xf32>
    %4 = vector.broadcast %3 : vector<1x256xf32> to vector<128x256xf32>
    %5 = arith.mulf %2, %4 : vector<128x256xf32>
    %c0_5 = arith.constant 0 : index
    %c0_6 = arith.constant 0 : index
    %6 = vector.load %arg4[%c0_5, %c0_6] : memref<1x256xf32, #tpu.memory_space<vmem>>, vector<1x256xf32>
    %7 = vector.broadcast %6 : vector<1x256xf32> to vector<128x256xf32>
    %8 = arith.addf %5, %7 : vector<128x256xf32>
    %9 = arith.truncf %8 : vector<128x256xf32> to vector<128x256xbf16>
    %c0_7 = arith.constant 0 : index
    %c0_8 = arith.constant 0 : index
    %10 = vector.load %arg5[%c0_7, %c0_8] : memref<128x256xbf16, #tpu.memory_space<vmem>>, vector<128x256xbf16>
    tpu.vector_store %arg5[%c0_7, %c0_8], %9 {strides = array<i32>} : memref<128x256xbf16, #tpu.memory_space<vmem>>, vector<128x256xbf16>,
    return
  }
  func.func @transform_0(%arg0: i32) -> (i32, i32) {
    %c0_i32 = arith.constant 0 : i32
    %c0_i32_0 = arith.constant 0 : i32
    return %arg0, %c0_i32 : i32, i32
  }
  func.func @transform_1(%arg0: i32) -> (i32, i32) {
    %c0_i32 = arith.constant 0 : i32
    %c0_i32_0 = arith.constant 0 : i32
    %c0_i32_1 = arith.constant 0 : i32
    return %c0_i32, %c0_i32_0 : i32, i32
  }
  func.func @transform_2(%arg0: i32) -> (i32, i32) {
    %c0_i32 = arith.constant 0 : i32
    %c0_i32_0 = arith.constant 0 : i32
    %c0_i32_1 = arith.constant 0 : i32
    return %c0_i32, %c0_i32_0 : i32, i32
  }
  func.func @transform_3(%arg0: i32) -> (i32, i32) {
    %c0_i32 = arith.constant 0 : i32
    %c0_i32_0 = arith.constant 0 : i32
    %c0_i32_1 = arith.constant 0 : i32
    return %c0_i32, %c0_i32_0 : i32, i32
  }
  func.func @transform_4(%arg0: i32) -> (i32, i32) {
    %c0_i32 = arith.constant 0 : i32
    %c0_i32_0 = arith.constant 0 : i32
    return %arg0, %c0_i32 : i32, i32
  }
}

module attributes {stable_mosaic.version = 11 : i64} {
  func.func @_mm_affine_kernel(%arg0: i32, %arg1: memref<512x512xbf16, #tpu.memory_space<vmem>>, %arg2: memref<512x128xbf16, #tpu.memory_space<vmem>>, %arg3: memref<1x128xf32, #tpu.memory_space<vmem>>, %arg4: memref<1x128xf32, #tpu.memory_space<vmem>>, %arg5: memref<512x128xbf16, #tpu.memory_space<vmem>>) attributes {dimension_semantics = [#tpu.dimension_semantics<parallel>], iteration_bounds = array<i64: 2>, scalar_prefetch = 0 : i64, scratch_operands = 0 : i64, tpu.core_type = #tpu.core_type<tc>, window_params = [{transform_indices = @transform_0, window_bounds = array<i64: 512, 512>}, {pipeline_mode = #tpu.pipeline_mode<synchronous>, transform_indices = @transform_1, window_bounds = array<i64: 512, 128>}, {pipeline_mode = #tpu.pipeline_mode<synchronous>, transform_indices = @transform_2, window_bounds = array<i64: 1, 128>}, {pipeline_mode = #tpu.pipeline_mode<synchronous>, transform_indices = @transform_3, window_bounds = array<i64: 1, 128>}, {transform_indices = @transform_4, window_bounds = array<i64: 512, 128>}]} {
    %c0 = arith.constant 0 : index
    %c0_0 = arith.constant 0 : index
    %0 = vector.load %arg1[%c0, %c0_0] : memref<512x512xbf16, #tpu.memory_space<vmem>>, vector<512x512xbf16>
    %c0_1 = arith.constant 0 : index
    %c0_2 = arith.constant 0 : index
    %1 = vector.load %arg2[%c0_1, %c0_2] : memref<512x128xbf16, #tpu.memory_space<vmem>>, vector<512x128xbf16>
    %cst = arith.constant dense<0.000000e+00> : vector<512x128xf32>
    %2 = tpu.matmul %0, %1, %cst {dimension_numbers = #tpu.dot_dimension_numbers<[1], [0], [0], [1], [0, 0, 1, 1], [], []>} : vector<512x512xbf16>, vector<512x128xbf16>, vector<512x128xf32> -> vector<512x128xf32>
    %c0_3 = arith.constant 0 : index
    %c0_4 = arith.constant 0 : index
    %3 = vector.load %arg3[%c0_3, %c0_4] : memref<1x128xf32, #tpu.memory_space<vmem>>, vector<1x128xf32>
    %4 = vector.broadcast %3 : vector<1x128xf32> to vector<512x128xf32>
    %5 = arith.mulf %2, %4 : vector<512x128xf32>
    %c0_5 = arith.constant 0 : index
    %c0_6 = arith.constant 0 : index
    %6 = vector.load %arg4[%c0_5, %c0_6] : memref<1x128xf32, #tpu.memory_space<vmem>>, vector<1x128xf32>
    %7 = vector.broadcast %6 : vector<1x128xf32> to vector<512x128xf32>
    %8 = arith.addf %5, %7 : vector<512x128xf32>
    %cst_7 = arith.constant 0.000000e+00 : f32
    %9 = vector.broadcast %cst_7 : f32 to vector<512x128xf32>
    %10 = arith.maximumf %8, %9 : vector<512x128xf32>
    %11 = arith.truncf %10 : vector<512x128xf32> to vector<512x128xbf16>
    %c0_8 = arith.constant 0 : index
    %c0_9 = arith.constant 0 : index
    %12 = vector.load %arg5[%c0_8, %c0_9] : memref<512x128xbf16, #tpu.memory_space<vmem>>, vector<512x128xbf16>
    tpu.vector_store %arg5[%c0_8, %c0_9], %11 {strides = array<i32>} : memref<512x128xbf16, #tpu.memory_space<vmem>>, vector<512x128xbf16>,
    return
  }
  func.func @transform_0(%arg0: i32) -> (i32, i32) {
    %c0_i32 = arith.constant 0 : i32
    %c0_i32_0 = arith.constant 0 : i32
    return %arg0, %c0_i32 : i32, i32
  }
  func.func @transform_1(%arg0: i32) -> (i32, i32) {
    %c0_i32 = arith.constant 0 : i32
    %c0_i32_0 = arith.constant 0 : i32
    %c0_i32_1 = arith.constant 0 : i32
    return %c0_i32, %c0_i32_0 : i32, i32
  }
  func.func @transform_2(%arg0: i32) -> (i32, i32) {
    %c0_i32 = arith.constant 0 : i32
    %c0_i32_0 = arith.constant 0 : i32
    %c0_i32_1 = arith.constant 0 : i32
    return %c0_i32, %c0_i32_0 : i32, i32
  }
  func.func @transform_3(%arg0: i32) -> (i32, i32) {
    %c0_i32 = arith.constant 0 : i32
    %c0_i32_0 = arith.constant 0 : i32
    %c0_i32_1 = arith.constant 0 : i32
    return %c0_i32, %c0_i32_0 : i32, i32
  }
  func.func @transform_4(%arg0: i32) -> (i32, i32) {
    %c0_i32 = arith.constant 0 : i32
    %c0_i32_0 = arith.constant 0 : i32
    return %arg0, %c0_i32 : i32, i32
  }
}

module attributes {stable_mosaic.version = 11 : i64} {
  func.func @_mm_affine_kernel(%arg0: i32, %arg1: memref<256x256xbf16, #tpu.memory_space<vmem>>, %arg2: memref<256x128xbf16, #tpu.memory_space<vmem>>, %arg3: memref<1x128xf32, #tpu.memory_space<vmem>>, %arg4: memref<1x128xf32, #tpu.memory_space<vmem>>, %arg5: memref<256x128xbf16, #tpu.memory_space<vmem>>) attributes {dimension_semantics = [#tpu.dimension_semantics<parallel>], iteration_bounds = array<i64: 1>, scalar_prefetch = 0 : i64, scratch_operands = 0 : i64, tpu.core_type = #tpu.core_type<tc>, window_params = [{transform_indices = @transform_0, window_bounds = array<i64: 256, 256>}, {pipeline_mode = #tpu.pipeline_mode<synchronous>, transform_indices = @transform_1, window_bounds = array<i64: 256, 128>}, {pipeline_mode = #tpu.pipeline_mode<synchronous>, transform_indices = @transform_2, window_bounds = array<i64: 1, 128>}, {pipeline_mode = #tpu.pipeline_mode<synchronous>, transform_indices = @transform_3, window_bounds = array<i64: 1, 128>}, {transform_indices = @transform_4, window_bounds = array<i64: 256, 128>}]} {
    %c0 = arith.constant 0 : index
    %c0_0 = arith.constant 0 : index
    %0 = vector.load %arg1[%c0, %c0_0] : memref<256x256xbf16, #tpu.memory_space<vmem>>, vector<256x256xbf16>
    %c0_1 = arith.constant 0 : index
    %c0_2 = arith.constant 0 : index
    %1 = vector.load %arg2[%c0_1, %c0_2] : memref<256x128xbf16, #tpu.memory_space<vmem>>, vector<256x128xbf16>
    %cst = arith.constant dense<0.000000e+00> : vector<256x128xf32>
    %2 = tpu.matmul %0, %1, %cst {dimension_numbers = #tpu.dot_dimension_numbers<[1], [0], [0], [1], [0, 0, 1, 1], [], []>} : vector<256x256xbf16>, vector<256x128xbf16>, vector<256x128xf32> -> vector<256x128xf32>
    %c0_3 = arith.constant 0 : index
    %c0_4 = arith.constant 0 : index
    %3 = vector.load %arg3[%c0_3, %c0_4] : memref<1x128xf32, #tpu.memory_space<vmem>>, vector<1x128xf32>
    %4 = vector.broadcast %3 : vector<1x128xf32> to vector<256x128xf32>
    %5 = arith.mulf %2, %4 : vector<256x128xf32>
    %c0_5 = arith.constant 0 : index
    %c0_6 = arith.constant 0 : index
    %6 = vector.load %arg4[%c0_5, %c0_6] : memref<1x128xf32, #tpu.memory_space<vmem>>, vector<1x128xf32>
    %7 = vector.broadcast %6 : vector<1x128xf32> to vector<256x128xf32>
    %8 = arith.addf %5, %7 : vector<256x128xf32>
    %cst_7 = arith.constant 0.000000e+00 : f32
    %9 = vector.broadcast %cst_7 : f32 to vector<256x128xf32>
    %10 = arith.maximumf %8, %9 : vector<256x128xf32>
    %11 = arith.truncf %10 : vector<256x128xf32> to vector<256x128xbf16>
    %c0_8 = arith.constant 0 : index
    %c0_9 = arith.constant 0 : index
    %12 = vector.load %arg5[%c0_8, %c0_9] : memref<256x128xbf16, #tpu.memory_space<vmem>>, vector<256x128xbf16>
    tpu.vector_store %arg5[%c0_8, %c0_9], %11 {strides = array<i32>} : memref<256x128xbf16, #tpu.memory_space<vmem>>, vector<256x128xbf16>,
    return
  }
  func.func @transform_0(%arg0: i32) -> (i32, i32) {
    %c0_i32 = arith.constant 0 : i32
    %c0_i32_0 = arith.constant 0 : i32
    return %arg0, %c0_i32 : i32, i32
  }
  func.func @transform_1(%arg0: i32) -> (i32, i32) {
    %c0_i32 = arith.constant 0 : i32
    %c0_i32_0 = arith.constant 0 : i32
    %c0_i32_1 = arith.constant 0 : i32
    return %c0_i32, %c0_i32_0 : i32, i32
  }
  func.func @transform_2(%arg0: i32) -> (i32, i32) {
    %c0_i32 = arith.constant 0 : i32
    %c0_i32_0 = arith.constant 0 : i32
    %c0_i32_1 = arith.constant 0 : i32
    return %c0_i32, %c0_i32_0 : i32, i32
  }
  func.func @transform_3(%arg0: i32) -> (i32, i32) {
    %c0_i32 = arith.constant 0 : i32
    %c0_i32_0 = arith.constant 0 : i32
    %c0_i32_1 = arith.constant 0 : i32
    return %c0_i32, %c0_i32_0 : i32, i32
  }
  func.func @transform_4(%arg0: i32) -> (i32, i32) {
    %c0_i32 = arith.constant 0 : i32
    %c0_i32_0 = arith.constant 0 : i32
    return %arg0, %c0_i32 : i32, i32
  }
}

module attributes {stable_mosaic.version = 11 : i64} {
  func.func @_mm_affine_kernel(%arg0: i32, %arg1: memref<256x128xbf16, #tpu.memory_space<vmem>>, %arg2: memref<128x128xbf16, #tpu.memory_space<vmem>>, %arg3: memref<1x128xf32, #tpu.memory_space<vmem>>, %arg4: memref<1x128xf32, #tpu.memory_space<vmem>>, %arg5: memref<256x128xbf16, #tpu.memory_space<vmem>>) attributes {dimension_semantics = [#tpu.dimension_semantics<parallel>], iteration_bounds = array<i64: 1>, scalar_prefetch = 0 : i64, scratch_operands = 0 : i64, tpu.core_type = #tpu.core_type<tc>, window_params = [{transform_indices = @transform_0, window_bounds = array<i64: 256, 128>}, {pipeline_mode = #tpu.pipeline_mode<synchronous>, transform_indices = @transform_1, window_bounds = array<i64: 128, 128>}, {pipeline_mode = #tpu.pipeline_mode<synchronous>, transform_indices = @transform_2, window_bounds = array<i64: 1, 128>}, {pipeline_mode = #tpu.pipeline_mode<synchronous>, transform_indices = @transform_3, window_bounds = array<i64: 1, 128>}, {transform_indices = @transform_4, window_bounds = array<i64: 256, 128>}]} {
    %c0 = arith.constant 0 : index
    %c0_0 = arith.constant 0 : index
    %0 = vector.load %arg1[%c0, %c0_0] : memref<256x128xbf16, #tpu.memory_space<vmem>>, vector<256x128xbf16>
    %c0_1 = arith.constant 0 : index
    %c0_2 = arith.constant 0 : index
    %1 = vector.load %arg2[%c0_1, %c0_2] : memref<128x128xbf16, #tpu.memory_space<vmem>>, vector<128x128xbf16>
    %cst = arith.constant dense<0.000000e+00> : vector<256x128xf32>
    %2 = tpu.matmul %0, %1, %cst {dimension_numbers = #tpu.dot_dimension_numbers<[1], [0], [0], [1], [0, 0, 1, 1], [], []>} : vector<256x128xbf16>, vector<128x128xbf16>, vector<256x128xf32> -> vector<256x128xf32>
    %c0_3 = arith.constant 0 : index
    %c0_4 = arith.constant 0 : index
    %3 = vector.load %arg3[%c0_3, %c0_4] : memref<1x128xf32, #tpu.memory_space<vmem>>, vector<1x128xf32>
    %4 = vector.broadcast %3 : vector<1x128xf32> to vector<256x128xf32>
    %5 = arith.mulf %2, %4 : vector<256x128xf32>
    %c0_5 = arith.constant 0 : index
    %c0_6 = arith.constant 0 : index
    %6 = vector.load %arg4[%c0_5, %c0_6] : memref<1x128xf32, #tpu.memory_space<vmem>>, vector<1x128xf32>
    %7 = vector.broadcast %6 : vector<1x128xf32> to vector<256x128xf32>
    %8 = arith.addf %5, %7 : vector<256x128xf32>
    %9 = arith.truncf %8 : vector<256x128xf32> to vector<256x128xbf16>
    %c0_7 = arith.constant 0 : index
    %c0_8 = arith.constant 0 : index
    %10 = vector.load %arg5[%c0_7, %c0_8] : memref<256x128xbf16, #tpu.memory_space<vmem>>, vector<256x128xbf16>
    tpu.vector_store %arg5[%c0_7, %c0_8], %9 {strides = array<i32>} : memref<256x128xbf16, #tpu.memory_space<vmem>>, vector<256x128xbf16>,
    return
  }
  func.func @transform_0(%arg0: i32) -> (i32, i32) {
    %c0_i32 = arith.constant 0 : i32
    %c0_i32_0 = arith.constant 0 : i32
    return %arg0, %c0_i32 : i32, i32
  }
  func.func @transform_1(%arg0: i32) -> (i32, i32) {
    %c0_i32 = arith.constant 0 : i32
    %c0_i32_0 = arith.constant 0 : i32
    %c0_i32_1 = arith.constant 0 : i32
    return %c0_i32, %c0_i32_0 : i32, i32
  }
  func.func @transform_2(%arg0: i32) -> (i32, i32) {
    %c0_i32 = arith.constant 0 : i32
    %c0_i32_0 = arith.constant 0 : i32
    %c0_i32_1 = arith.constant 0 : i32
    return %c0_i32, %c0_i32_0 : i32, i32
  }
  func.func @transform_3(%arg0: i32) -> (i32, i32) {
    %c0_i32 = arith.constant 0 : i32
    %c0_i32_0 = arith.constant 0 : i32
    %c0_i32_1 = arith.constant 0 : i32
    return %c0_i32, %c0_i32_0 : i32, i32
  }
  func.func @transform_4(%arg0: i32) -> (i32, i32) {
    %c0_i32 = arith.constant 0 : i32
    %c0_i32_0 = arith.constant 0 : i32
    return %arg0, %c0_i32 : i32, i32
  }
}

module attributes {stable_mosaic.version = 11 : i64} {
  func.func @_mm_affine_kernel(%arg0: i32, %arg1: memref<256x128xbf16, #tpu.memory_space<vmem>>, %arg2: memref<128x128xbf16, #tpu.memory_space<vmem>>, %arg3: memref<1x128xf32, #tpu.memory_space<vmem>>, %arg4: memref<1x128xf32, #tpu.memory_space<vmem>>, %arg5: memref<256x128xbf16, #tpu.memory_space<vmem>>) attributes {dimension_semantics = [#tpu.dimension_semantics<parallel>], iteration_bounds = array<i64: 1>, scalar_prefetch = 0 : i64, scratch_operands = 0 : i64, tpu.core_type = #tpu.core_type<tc>, window_params = [{transform_indices = @transform_0, window_bounds = array<i64: 256, 128>}, {pipeline_mode = #tpu.pipeline_mode<synchronous>, transform_indices = @transform_1, window_bounds = array<i64: 128, 128>}, {pipeline_mode = #tpu.pipeline_mode<synchronous>, transform_indices = @transform_2, window_bounds = array<i64: 1, 128>}, {pipeline_mode = #tpu.pipeline_mode<synchronous>, transform_indices = @transform_3, window_bounds = array<i64: 1, 128>}, {transform_indices = @transform_4, window_bounds = array<i64: 256, 128>}]} {
    %c0 = arith.constant 0 : index
    %c0_0 = arith.constant 0 : index
    %0 = vector.load %arg1[%c0, %c0_0] : memref<256x128xbf16, #tpu.memory_space<vmem>>, vector<256x128xbf16>
    %c0_1 = arith.constant 0 : index
    %c0_2 = arith.constant 0 : index
    %1 = vector.load %arg2[%c0_1, %c0_2] : memref<128x128xbf16, #tpu.memory_space<vmem>>, vector<128x128xbf16>
    %cst = arith.constant dense<0.000000e+00> : vector<256x128xf32>
    %2 = tpu.matmul %0, %1, %cst {dimension_numbers = #tpu.dot_dimension_numbers<[1], [0], [0], [1], [0, 0, 1, 1], [], []>} : vector<256x128xbf16>, vector<128x128xbf16>, vector<256x128xf32> -> vector<256x128xf32>
    %c0_3 = arith.constant 0 : index
    %c0_4 = arith.constant 0 : index
    %3 = vector.load %arg3[%c0_3, %c0_4] : memref<1x128xf32, #tpu.memory_space<vmem>>, vector<1x128xf32>
    %4 = vector.broadcast %3 : vector<1x128xf32> to vector<256x128xf32>
    %5 = arith.mulf %2, %4 : vector<256x128xf32>
    %c0_5 = arith.constant 0 : index
    %c0_6 = arith.constant 0 : index
    %6 = vector.load %arg4[%c0_5, %c0_6] : memref<1x128xf32, #tpu.memory_space<vmem>>, vector<1x128xf32>
    %7 = vector.broadcast %6 : vector<1x128xf32> to vector<256x128xf32>
    %8 = arith.addf %5, %7 : vector<256x128xf32>
    %cst_7 = arith.constant 0.000000e+00 : f32
    %9 = vector.broadcast %cst_7 : f32 to vector<256x128xf32>
    %10 = arith.maximumf %8, %9 : vector<256x128xf32>
    %11 = arith.truncf %10 : vector<256x128xf32> to vector<256x128xbf16>
    %c0_8 = arith.constant 0 : index
    %c0_9 = arith.constant 0 : index
    %12 = vector.load %arg5[%c0_8, %c0_9] : memref<256x128xbf16, #tpu.memory_space<vmem>>, vector<256x128xbf16>
    tpu.vector_store %arg5[%c0_8, %c0_9], %11 {strides = array<i32>} : memref<256x128xbf16, #tpu.memory_space<vmem>>, vector<256x128xbf16>,
    return
  }
  func.func @transform_0(%arg0: i32) -> (i32, i32) {
    %c0_i32 = arith.constant 0 : i32
    %c0_i32_0 = arith.constant 0 : i32
    return %arg0, %c0_i32 : i32, i32
  }
  func.func @transform_1(%arg0: i32) -> (i32, i32) {
    %c0_i32 = arith.constant 0 : i32
    %c0_i32_0 = arith.constant 0 : i32
    %c0_i32_1 = arith.constant 0 : i32
    return %c0_i32, %c0_i32_0 : i32, i32
  }
  func.func @transform_2(%arg0: i32) -> (i32, i32) {
    %c0_i32 = arith.constant 0 : i32
    %c0_i32_0 = arith.constant 0 : i32
    %c0_i32_1 = arith.constant 0 : i32
    return %c0_i32, %c0_i32_0 : i32, i32
  }
  func.func @transform_3(%arg0: i32) -> (i32, i32) {
    %c0_i32 = arith.constant 0 : i32
    %c0_i32_0 = arith.constant 0 : i32
    %c0_i32_1 = arith.constant 0 : i32
    return %c0_i32, %c0_i32_0 : i32, i32
  }
  func.func @transform_4(%arg0: i32) -> (i32, i32) {
    %c0_i32 = arith.constant 0 : i32
    %c0_i32_0 = arith.constant 0 : i32
    return %arg0, %c0_i32 : i32, i32
  }
}

module attributes {stable_mosaic.version = 11 : i64} {
  func.func @_mm_affine_res_kernel(%arg0: i32, %arg1: memref<256x128xbf16, #tpu.memory_space<vmem>>, %arg2: memref<128x128xbf16, #tpu.memory_space<vmem>>, %arg3: memref<1x128xf32, #tpu.memory_space<vmem>>, %arg4: memref<1x128xf32, #tpu.memory_space<vmem>>, %arg5: memref<256x128xbf16, #tpu.memory_space<vmem>>, %arg6: memref<256x128xbf16, #tpu.memory_space<vmem>>) attributes {dimension_semantics = [#tpu.dimension_semantics<parallel>], iteration_bounds = array<i64: 1>, scalar_prefetch = 0 : i64, scratch_operands = 0 : i64, tpu.core_type = #tpu.core_type<tc>, window_params = [{transform_indices = @transform_0, window_bounds = array<i64: 256, 128>}, {pipeline_mode = #tpu.pipeline_mode<synchronous>, transform_indices = @transform_1, window_bounds = array<i64: 128, 128>}, {pipeline_mode = #tpu.pipeline_mode<synchronous>, transform_indices = @transform_2, window_bounds = array<i64: 1, 128>}, {pipeline_mode = #tpu.pipeline_mode<synchronous>, transform_indices = @transform_3, window_bounds = array<i64: 1, 128>}, {transform_indices = @transform_4, window_bounds = array<i64: 256, 128>}, {transform_indices = @transform_5, window_bounds = array<i64: 256, 128>}]} {
    %c0 = arith.constant 0 : index
    %c0_0 = arith.constant 0 : index
    %0 = vector.load %arg1[%c0, %c0_0] : memref<256x128xbf16, #tpu.memory_space<vmem>>, vector<256x128xbf16>
    %c0_1 = arith.constant 0 : index
    %c0_2 = arith.constant 0 : index
    %1 = vector.load %arg2[%c0_1, %c0_2] : memref<128x128xbf16, #tpu.memory_space<vmem>>, vector<128x128xbf16>
    %cst = arith.constant dense<0.000000e+00> : vector<256x128xf32>
    %2 = tpu.matmul %0, %1, %cst {dimension_numbers = #tpu.dot_dimension_numbers<[1], [0], [0], [1], [0, 0, 1, 1], [], []>} : vector<256x128xbf16>, vector<128x128xbf16>, vector<256x128xf32> -> vector<256x128xf32>
    %c0_3 = arith.constant 0 : index
    %c0_4 = arith.constant 0 : index
    %3 = vector.load %arg3[%c0_3, %c0_4] : memref<1x128xf32, #tpu.memory_space<vmem>>, vector<1x128xf32>
    %4 = vector.broadcast %3 : vector<1x128xf32> to vector<256x128xf32>
    %5 = arith.mulf %2, %4 : vector<256x128xf32>
    %c0_5 = arith.constant 0 : index
    %c0_6 = arith.constant 0 : index
    %6 = vector.load %arg4[%c0_5, %c0_6] : memref<1x128xf32, #tpu.memory_space<vmem>>, vector<1x128xf32>
    %7 = vector.broadcast %6 : vector<1x128xf32> to vector<256x128xf32>
    %8 = arith.addf %5, %7 : vector<256x128xf32>
    %c0_7 = arith.constant 0 : index
    %c0_8 = arith.constant 0 : index
    %9 = vector.load %arg5[%c0_7, %c0_8] : memref<256x128xbf16, #tpu.memory_space<vmem>>, vector<256x128xbf16>
    %10 = arith.extf %9 : vector<256x128xbf16> to vector<256x128xf32>
    %11 = arith.addf %8, %10 : vector<256x128xf32>
    %cst_9 = arith.constant 0.000000e+00 : f32
    %12 = vector.broadcast %cst_9 : f32 to vector<256x128xf32>
    %13 = arith.maximumf %11, %12 : vector<256x128xf32>
    %14 = arith.truncf %13 : vector<256x128xf32> to vector<256x128xbf16>
    %c0_10 = arith.constant 0 : index
    %c0_11 = arith.constant 0 : index
    %15 = vector.load %arg6[%c0_10, %c0_11] : memref<256x128xbf16, #tpu.memory_space<vmem>>, vector<256x128xbf16>
    tpu.vector_store %arg6[%c0_10, %c0_11], %14 {strides = array<i32>} : memref<256x128xbf16, #tpu.memory_space<vmem>>, vector<256x128xbf16>,
    return
  }
  func.func @transform_0(%arg0: i32) -> (i32, i32) {
    %c0_i32 = arith.constant 0 : i32
    %c0_i32_0 = arith.constant 0 : i32
    return %arg0, %c0_i32 : i32, i32
  }
  func.func @transform_1(%arg0: i32) -> (i32, i32) {
    %c0_i32 = arith.constant 0 : i32
    %c0_i32_0 = arith.constant 0 : i32
    %c0_i32_1 = arith.constant 0 : i32
    return %c0_i32, %c0_i32_0 : i32, i32
  }
  func.func @transform_2(%arg0: i32) -> (i32, i32) {
    %c0_i32 = arith.constant 0 : i32
    %c0_i32_0 = arith.constant 0 : i32
    %c0_i32_1 = arith.constant 0 : i32
    return %c0_i32, %c0_i32_0 : i32, i32
  }
  func.func @transform_3(%arg0: i32) -> (i32, i32) {
    %c0_i32 = arith.constant 0 : i32
    %c0_i32_0 = arith.constant 0 : i32
    %c0_i32_1 = arith.constant 0 : i32
    return %c0_i32, %c0_i32_0 : i32, i32
  }
  func.func @transform_4(%arg0: i32) -> (i32, i32) {
    %c0_i32 = arith.constant 0 : i32
    %c0_i32_0 = arith.constant 0 : i32
    return %arg0, %c0_i32 : i32, i32
  }
  func.func @transform_5(%arg0: i32) -> (i32, i32) {
    %c0_i32 = arith.constant 0 : i32
    %c0_i32_0 = arith.constant 0 : i32
    return %arg0, %c0_i32 : i32, i32
  }
}

module attributes {stable_mosaic.version = 11 : i64} {
  func.func @_mm_affine_kernel(%arg0: i32, %arg1: memref<128x256xbf16, #tpu.memory_space<vmem>>, %arg2: memref<256x128xbf16, #tpu.memory_space<vmem>>, %arg3: memref<1x128xf32, #tpu.memory_space<vmem>>, %arg4: memref<1x128xf32, #tpu.memory_space<vmem>>, %arg5: memref<128x128xbf16, #tpu.memory_space<vmem>>) attributes {dimension_semantics = [#tpu.dimension_semantics<parallel>], iteration_bounds = array<i64: 1>, scalar_prefetch = 0 : i64, scratch_operands = 0 : i64, tpu.core_type = #tpu.core_type<tc>, window_params = [{transform_indices = @transform_0, window_bounds = array<i64: 128, 256>}, {pipeline_mode = #tpu.pipeline_mode<synchronous>, transform_indices = @transform_1, window_bounds = array<i64: 256, 128>}, {pipeline_mode = #tpu.pipeline_mode<synchronous>, transform_indices = @transform_2, window_bounds = array<i64: 1, 128>}, {pipeline_mode = #tpu.pipeline_mode<synchronous>, transform_indices = @transform_3, window_bounds = array<i64: 1, 128>}, {transform_indices = @transform_4, window_bounds = array<i64: 128, 128>}]} {
    %c0 = arith.constant 0 : index
    %c0_0 = arith.constant 0 : index
    %0 = vector.load %arg1[%c0, %c0_0] : memref<128x256xbf16, #tpu.memory_space<vmem>>, vector<128x256xbf16>
    %c0_1 = arith.constant 0 : index
    %c0_2 = arith.constant 0 : index
    %1 = vector.load %arg2[%c0_1, %c0_2] : memref<256x128xbf16, #tpu.memory_space<vmem>>, vector<256x128xbf16>
    %cst = arith.constant dense<0.000000e+00> : vector<128x128xf32>
    %2 = tpu.matmul %0, %1, %cst {dimension_numbers = #tpu.dot_dimension_numbers<[1], [0], [0], [1], [0, 0, 1, 1], [], []>} : vector<128x256xbf16>, vector<256x128xbf16>, vector<128x128xf32> -> vector<128x128xf32>
    %c0_3 = arith.constant 0 : index
    %c0_4 = arith.constant 0 : index
    %3 = vector.load %arg3[%c0_3, %c0_4] : memref<1x128xf32, #tpu.memory_space<vmem>>, vector<1x128xf32>
    %4 = vector.broadcast %3 : vector<1x128xf32> to vector<128x128xf32>
    %5 = arith.mulf %2, %4 : vector<128x128xf32>
    %c0_5 = arith.constant 0 : index
    %c0_6 = arith.constant 0 : index
    %6 = vector.load %arg4[%c0_5, %c0_6] : memref<1x128xf32, #tpu.memory_space<vmem>>, vector<1x128xf32>
    %7 = vector.broadcast %6 : vector<1x128xf32> to vector<128x128xf32>
    %8 = arith.addf %5, %7 : vector<128x128xf32>
    %cst_7 = arith.constant 0.000000e+00 : f32
    %9 = vector.broadcast %cst_7 : f32 to vector<128x128xf32>
    %10 = arith.maximumf %8, %9 : vector<128x128xf32>
    %11 = arith.truncf %10 : vector<128x128xf32> to vector<128x128xbf16>
    %c0_8 = arith.constant 0 : index
    %c0_9 = arith.constant 0 : index
    %12 = vector.load %arg5[%c0_8, %c0_9] : memref<128x128xbf16, #tpu.memory_space<vmem>>, vector<128x128xbf16>
    tpu.vector_store %arg5[%c0_8, %c0_9], %11 {strides = array<i32>} : memref<128x128xbf16, #tpu.memory_space<vmem>>, vector<128x128xbf16>,
    return
  }
  func.func @transform_0(%arg0: i32) -> (i32, i32) {
    %c0_i32 = arith.constant 0 : i32
    %c0_i32_0 = arith.constant 0 : i32
    return %arg0, %c0_i32 : i32, i32
  }
  func.func @transform_1(%arg0: i32) -> (i32, i32) {
    %c0_i32 = arith.constant 0 : i32
    %c0_i32_0 = arith.constant 0 : i32
    %c0_i32_1 = arith.constant 0 : i32
    return %c0_i32, %c0_i32_0 : i32, i32
  }
  func.func @transform_2(%arg0: i32) -> (i32, i32) {
    %c0_i32 = arith.constant 0 : i32
    %c0_i32_0 = arith.constant 0 : i32
    %c0_i32_1 = arith.constant 0 : i32
    return %c0_i32, %c0_i32_0 : i32, i32
  }
  func.func @transform_3(%arg0: i32) -> (i32, i32) {
    %c0_i32 = arith.constant 0 : i32
    %c0_i32_0 = arith.constant 0 : i32
    %c0_i32_1 = arith.constant 0 : i32
    return %c0_i32, %c0_i32_0 : i32, i32
  }
  func.func @transform_4(%arg0: i32) -> (i32, i32) {
    %c0_i32 = arith.constant 0 : i32
    %c0_i32_0 = arith.constant 0 : i32
    return %arg0, %c0_i32 : i32, i32
  }
}

module attributes {stable_mosaic.version = 11 : i64} {
  func.func @_mm_affine_res_kernel(%arg0: i32, %arg1: memref<128x256xbf16, #tpu.memory_space<vmem>>, %arg2: memref<256x128xbf16, #tpu.memory_space<vmem>>, %arg3: memref<1x128xf32, #tpu.memory_space<vmem>>, %arg4: memref<1x128xf32, #tpu.memory_space<vmem>>, %arg5: memref<128x128xbf16, #tpu.memory_space<vmem>>, %arg6: memref<128x128xbf16, #tpu.memory_space<vmem>>) attributes {dimension_semantics = [#tpu.dimension_semantics<parallel>], iteration_bounds = array<i64: 1>, scalar_prefetch = 0 : i64, scratch_operands = 0 : i64, tpu.core_type = #tpu.core_type<tc>, window_params = [{transform_indices = @transform_0, window_bounds = array<i64: 128, 256>}, {pipeline_mode = #tpu.pipeline_mode<synchronous>, transform_indices = @transform_1, window_bounds = array<i64: 256, 128>}, {pipeline_mode = #tpu.pipeline_mode<synchronous>, transform_indices = @transform_2, window_bounds = array<i64: 1, 128>}, {pipeline_mode = #tpu.pipeline_mode<synchronous>, transform_indices = @transform_3, window_bounds = array<i64: 1, 128>}, {transform_indices = @transform_4, window_bounds = array<i64: 128, 128>}, {transform_indices = @transform_5, window_bounds = array<i64: 128, 128>}]} {
    %c0 = arith.constant 0 : index
    %c0_0 = arith.constant 0 : index
    %0 = vector.load %arg1[%c0, %c0_0] : memref<128x256xbf16, #tpu.memory_space<vmem>>, vector<128x256xbf16>
    %c0_1 = arith.constant 0 : index
    %c0_2 = arith.constant 0 : index
    %1 = vector.load %arg2[%c0_1, %c0_2] : memref<256x128xbf16, #tpu.memory_space<vmem>>, vector<256x128xbf16>
    %cst = arith.constant dense<0.000000e+00> : vector<128x128xf32>
    %2 = tpu.matmul %0, %1, %cst {dimension_numbers = #tpu.dot_dimension_numbers<[1], [0], [0], [1], [0, 0, 1, 1], [], []>} : vector<128x256xbf16>, vector<256x128xbf16>, vector<128x128xf32> -> vector<128x128xf32>
    %c0_3 = arith.constant 0 : index
    %c0_4 = arith.constant 0 : index
    %3 = vector.load %arg3[%c0_3, %c0_4] : memref<1x128xf32, #tpu.memory_space<vmem>>, vector<1x128xf32>
    %4 = vector.broadcast %3 : vector<1x128xf32> to vector<128x128xf32>
    %5 = arith.mulf %2, %4 : vector<128x128xf32>
    %c0_5 = arith.constant 0 : index
    %c0_6 = arith.constant 0 : index
    %6 = vector.load %arg4[%c0_5, %c0_6] : memref<1x128xf32, #tpu.memory_space<vmem>>, vector<1x128xf32>
    %7 = vector.broadcast %6 : vector<1x128xf32> to vector<128x128xf32>
    %8 = arith.addf %5, %7 : vector<128x128xf32>
    %c0_7 = arith.constant 0 : index
    %c0_8 = arith.constant 0 : index
    %9 = vector.load %arg5[%c0_7, %c0_8] : memref<128x128xbf16, #tpu.memory_space<vmem>>, vector<128x128xbf16>
    %10 = arith.extf %9 : vector<128x128xbf16> to vector<128x128xf32>
    %11 = arith.addf %8, %10 : vector<128x128xf32>
    %cst_9 = arith.constant 0.000000e+00 : f32
    %12 = vector.broadcast %cst_9 : f32 to vector<128x128xf32>
    %13 = arith.maximumf %11, %12 : vector<128x128xf32>
    %14 = arith.truncf %13 : vector<128x128xf32> to vector<128x128xbf16>
    %c0_10 = arith.constant 0 : index
    %c0_11 = arith.constant 0 : index
    %15 = vector.load %arg6[%c0_10, %c0_11] : memref<128x128xbf16, #tpu.memory_space<vmem>>, vector<128x128xbf16>
    tpu.vector_store %arg6[%c0_10, %c0_11], %14 {strides = array<i32>} : memref<128x128xbf16, #tpu.memory_space<vmem>>, vector<128x128xbf16>,
    return
  }
  func.func @transform_0(%arg0: i32) -> (i32, i32) {
    %c0_i32 = arith.constant 0 : i32
    %c0_i32_0 = arith.constant 0 : i32
    return %arg0, %c0_i32 : i32, i32
  }
  func.func @transform_1(%arg0: i32) -> (i32, i32) {
    %c0_i32 = arith.constant 0 : i32
    %c0_i32_0 = arith.constant 0 : i32
    %c0_i32_1 = arith.constant 0 : i32
    return %c0_i32, %c0_i32_0 : i32, i32
  }
  func.func @transform_2(%arg0: i32) -> (i32, i32) {
    %c0_i32 = arith.constant 0 : i32
    %c0_i32_0 = arith.constant 0 : i32
    %c0_i32_1 = arith.constant 0 : i32
    return %c0_i32, %c0_i32_0 : i32, i32
  }
  func.func @transform_3(%arg0: i32) -> (i32, i32) {
    %c0_i32 = arith.constant 0 : i32
    %c0_i32_0 = arith.constant 0 : i32
    %c0_i32_1 = arith.constant 0 : i32
    return %c0_i32, %c0_i32_0 : i32, i32
  }
  func.func @transform_4(%arg0: i32) -> (i32, i32) {
    %c0_i32 = arith.constant 0 : i32
    %c0_i32_0 = arith.constant 0 : i32
    return %arg0, %c0_i32 : i32, i32
  }
  func.func @transform_5(%arg0: i32) -> (i32, i32) {
    %c0_i32 = arith.constant 0 : i32
    %c0_i32_0 = arith.constant 0 : i32
    return %arg0, %c0_i32 : i32, i32
  }
}

module attributes {stable_mosaic.version = 11 : i64} {
  func.func @_mm_affine_kernel(%arg0: i32, %arg1: memref<64x512xbf16, #tpu.memory_space<vmem>>, %arg2: memref<512x128xbf16, #tpu.memory_space<vmem>>, %arg3: memref<1x128xf32, #tpu.memory_space<vmem>>, %arg4: memref<1x128xf32, #tpu.memory_space<vmem>>, %arg5: memref<64x128xbf16, #tpu.memory_space<vmem>>) attributes {dimension_semantics = [#tpu.dimension_semantics<parallel>], iteration_bounds = array<i64: 1>, scalar_prefetch = 0 : i64, scratch_operands = 0 : i64, tpu.core_type = #tpu.core_type<tc>, window_params = [{transform_indices = @transform_0, window_bounds = array<i64: 64, 512>}, {pipeline_mode = #tpu.pipeline_mode<synchronous>, transform_indices = @transform_1, window_bounds = array<i64: 512, 128>}, {pipeline_mode = #tpu.pipeline_mode<synchronous>, transform_indices = @transform_2, window_bounds = array<i64: 1, 128>}, {pipeline_mode = #tpu.pipeline_mode<synchronous>, transform_indices = @transform_3, window_bounds = array<i64: 1, 128>}, {transform_indices = @transform_4, window_bounds = array<i64: 64, 128>}]} {
    %c0 = arith.constant 0 : index
    %c0_0 = arith.constant 0 : index
    %0 = vector.load %arg1[%c0, %c0_0] : memref<64x512xbf16, #tpu.memory_space<vmem>>, vector<64x512xbf16>
    %c0_1 = arith.constant 0 : index
    %c0_2 = arith.constant 0 : index
    %1 = vector.load %arg2[%c0_1, %c0_2] : memref<512x128xbf16, #tpu.memory_space<vmem>>, vector<512x128xbf16>
    %cst = arith.constant dense<0.000000e+00> : vector<64x128xf32>
    %2 = tpu.matmul %0, %1, %cst {dimension_numbers = #tpu.dot_dimension_numbers<[1], [0], [0], [1], [0, 0, 1, 1], [], []>} : vector<64x512xbf16>, vector<512x128xbf16>, vector<64x128xf32> -> vector<64x128xf32>
    %c0_3 = arith.constant 0 : index
    %c0_4 = arith.constant 0 : index
    %3 = vector.load %arg3[%c0_3, %c0_4] : memref<1x128xf32, #tpu.memory_space<vmem>>, vector<1x128xf32>
    %4 = vector.broadcast %3 : vector<1x128xf32> to vector<64x128xf32>
    %5 = arith.mulf %2, %4 : vector<64x128xf32>
    %c0_5 = arith.constant 0 : index
    %c0_6 = arith.constant 0 : index
    %6 = vector.load %arg4[%c0_5, %c0_6] : memref<1x128xf32, #tpu.memory_space<vmem>>, vector<1x128xf32>
    %7 = vector.broadcast %6 : vector<1x128xf32> to vector<64x128xf32>
    %8 = arith.addf %5, %7 : vector<64x128xf32>
    %cst_7 = arith.constant 0.000000e+00 : f32
    %9 = vector.broadcast %cst_7 : f32 to vector<64x128xf32>
    %10 = arith.maximumf %8, %9 : vector<64x128xf32>
    %11 = arith.truncf %10 : vector<64x128xf32> to vector<64x128xbf16>
    %c0_8 = arith.constant 0 : index
    %c0_9 = arith.constant 0 : index
    %12 = vector.load %arg5[%c0_8, %c0_9] : memref<64x128xbf16, #tpu.memory_space<vmem>>, vector<64x128xbf16>
    tpu.vector_store %arg5[%c0_8, %c0_9], %11 {strides = array<i32>} : memref<64x128xbf16, #tpu.memory_space<vmem>>, vector<64x128xbf16>,
    return
  }
  func.func @transform_0(%arg0: i32) -> (i32, i32) {
    %c0_i32 = arith.constant 0 : i32
    %c0_i32_0 = arith.constant 0 : i32
    return %arg0, %c0_i32 : i32, i32
  }
  func.func @transform_1(%arg0: i32) -> (i32, i32) {
    %c0_i32 = arith.constant 0 : i32
    %c0_i32_0 = arith.constant 0 : i32
    %c0_i32_1 = arith.constant 0 : i32
    return %c0_i32, %c0_i32_0 : i32, i32
  }
  func.func @transform_2(%arg0: i32) -> (i32, i32) {
    %c0_i32 = arith.constant 0 : i32
    %c0_i32_0 = arith.constant 0 : i32
    %c0_i32_1 = arith.constant 0 : i32
    return %c0_i32, %c0_i32_0 : i32, i32
  }
  func.func @transform_3(%arg0: i32) -> (i32, i32) {
    %c0_i32 = arith.constant 0 : i32
    %c0_i32_0 = arith.constant 0 : i32
    %c0_i32_1 = arith.constant 0 : i32
    return %c0_i32, %c0_i32_0 : i32, i32
  }
  func.func @transform_4(%arg0: i32) -> (i32, i32) {
    %c0_i32 = arith.constant 0 : i32
    %c0_i32_0 = arith.constant 0 : i32
    return %arg0, %c0_i32 : i32, i32
  }
}

module attributes {stable_mosaic.version = 11 : i64} {
  func.func @_mm_affine_kernel(%arg0: i32, %arg1: memref<64x128xbf16, #tpu.memory_space<vmem>>, %arg2: memref<128x128xbf16, #tpu.memory_space<vmem>>, %arg3: memref<1x128xf32, #tpu.memory_space<vmem>>, %arg4: memref<1x128xf32, #tpu.memory_space<vmem>>, %arg5: memref<64x128xbf16, #tpu.memory_space<vmem>>) attributes {dimension_semantics = [#tpu.dimension_semantics<parallel>], iteration_bounds = array<i64: 1>, scalar_prefetch = 0 : i64, scratch_operands = 0 : i64, tpu.core_type = #tpu.core_type<tc>, window_params = [{transform_indices = @transform_0, window_bounds = array<i64: 64, 128>}, {pipeline_mode = #tpu.pipeline_mode<synchronous>, transform_indices = @transform_1, window_bounds = array<i64: 128, 128>}, {pipeline_mode = #tpu.pipeline_mode<synchronous>, transform_indices = @transform_2, window_bounds = array<i64: 1, 128>}, {pipeline_mode = #tpu.pipeline_mode<synchronous>, transform_indices = @transform_3, window_bounds = array<i64: 1, 128>}, {transform_indices = @transform_4, window_bounds = array<i64: 64, 128>}]} {
    %c0 = arith.constant 0 : index
    %c0_0 = arith.constant 0 : index
    %0 = vector.load %arg1[%c0, %c0_0] : memref<64x128xbf16, #tpu.memory_space<vmem>>, vector<64x128xbf16>
    %c0_1 = arith.constant 0 : index
    %c0_2 = arith.constant 0 : index
    %1 = vector.load %arg2[%c0_1, %c0_2] : memref<128x128xbf16, #tpu.memory_space<vmem>>, vector<128x128xbf16>
    %cst = arith.constant dense<0.000000e+00> : vector<64x128xf32>
    %2 = tpu.matmul %0, %1, %cst {dimension_numbers = #tpu.dot_dimension_numbers<[1], [0], [0], [1], [0, 0, 1, 1], [], []>} : vector<64x128xbf16>, vector<128x128xbf16>, vector<64x128xf32> -> vector<64x128xf32>
    %c0_3 = arith.constant 0 : index
    %c0_4 = arith.constant 0 : index
    %3 = vector.load %arg3[%c0_3, %c0_4] : memref<1x128xf32, #tpu.memory_space<vmem>>, vector<1x128xf32>
    %4 = vector.broadcast %3 : vector<1x128xf32> to vector<64x128xf32>
    %5 = arith.mulf %2, %4 : vector<64x128xf32>
    %c0_5 = arith.constant 0 : index
    %c0_6 = arith.constant 0 : index
    %6 = vector.load %arg4[%c0_5, %c0_6] : memref<1x128xf32, #tpu.memory_space<vmem>>, vector<1x128xf32>
    %7 = vector.broadcast %6 : vector<1x128xf32> to vector<64x128xf32>
    %8 = arith.addf %5, %7 : vector<64x128xf32>
    %9 = arith.truncf %8 : vector<64x128xf32> to vector<64x128xbf16>
    %c0_7 = arith.constant 0 : index
    %c0_8 = arith.constant 0 : index
    %10 = vector.load %arg5[%c0_7, %c0_8] : memref<64x128xbf16, #tpu.memory_space<vmem>>, vector<64x128xbf16>
    tpu.vector_store %arg5[%c0_7, %c0_8], %9 {strides = array<i32>} : memref<64x128xbf16, #tpu.memory_space<vmem>>, vector<64x128xbf16>,
    return
  }
  func.func @transform_0(%arg0: i32) -> (i32, i32) {
    %c0_i32 = arith.constant 0 : i32
    %c0_i32_0 = arith.constant 0 : i32
    return %arg0, %c0_i32 : i32, i32
  }
  func.func @transform_1(%arg0: i32) -> (i32, i32) {
    %c0_i32 = arith.constant 0 : i32
    %c0_i32_0 = arith.constant 0 : i32
    %c0_i32_1 = arith.constant 0 : i32
    return %c0_i32, %c0_i32_0 : i32, i32
  }
  func.func @transform_2(%arg0: i32) -> (i32, i32) {
    %c0_i32 = arith.constant 0 : i32
    %c0_i32_0 = arith.constant 0 : i32
    %c0_i32_1 = arith.constant 0 : i32
    return %c0_i32, %c0_i32_0 : i32, i32
  }
  func.func @transform_3(%arg0: i32) -> (i32, i32) {
    %c0_i32 = arith.constant 0 : i32
    %c0_i32_0 = arith.constant 0 : i32
    %c0_i32_1 = arith.constant 0 : i32
    return %c0_i32, %c0_i32_0 : i32, i32
  }
  func.func @transform_4(%arg0: i32) -> (i32, i32) {
    %c0_i32 = arith.constant 0 : i32
    %c0_i32_0 = arith.constant 0 : i32
    return %arg0, %c0_i32 : i32, i32
  }
}

module attributes {stable_mosaic.version = 11 : i64} {
  func.func @_mm_affine_res_kernel(%arg0: i32, %arg1: memref<64x512xbf16, #tpu.memory_space<vmem>>, %arg2: memref<512x128xbf16, #tpu.memory_space<vmem>>, %arg3: memref<1x128xf32, #tpu.memory_space<vmem>>, %arg4: memref<1x128xf32, #tpu.memory_space<vmem>>, %arg5: memref<64x128xbf16, #tpu.memory_space<vmem>>, %arg6: memref<64x128xbf16, #tpu.memory_space<vmem>>) attributes {dimension_semantics = [#tpu.dimension_semantics<parallel>], iteration_bounds = array<i64: 1>, scalar_prefetch = 0 : i64, scratch_operands = 0 : i64, tpu.core_type = #tpu.core_type<tc>, window_params = [{transform_indices = @transform_0, window_bounds = array<i64: 64, 512>}, {pipeline_mode = #tpu.pipeline_mode<synchronous>, transform_indices = @transform_1, window_bounds = array<i64: 512, 128>}, {pipeline_mode = #tpu.pipeline_mode<synchronous>, transform_indices = @transform_2, window_bounds = array<i64: 1, 128>}, {pipeline_mode = #tpu.pipeline_mode<synchronous>, transform_indices = @transform_3, window_bounds = array<i64: 1, 128>}, {transform_indices = @transform_4, window_bounds = array<i64: 64, 128>}, {transform_indices = @transform_5, window_bounds = array<i64: 64, 128>}]} {
    %c0 = arith.constant 0 : index
    %c0_0 = arith.constant 0 : index
    %0 = vector.load %arg1[%c0, %c0_0] : memref<64x512xbf16, #tpu.memory_space<vmem>>, vector<64x512xbf16>
    %c0_1 = arith.constant 0 : index
    %c0_2 = arith.constant 0 : index
    %1 = vector.load %arg2[%c0_1, %c0_2] : memref<512x128xbf16, #tpu.memory_space<vmem>>, vector<512x128xbf16>
    %cst = arith.constant dense<0.000000e+00> : vector<64x128xf32>
    %2 = tpu.matmul %0, %1, %cst {dimension_numbers = #tpu.dot_dimension_numbers<[1], [0], [0], [1], [0, 0, 1, 1], [], []>} : vector<64x512xbf16>, vector<512x128xbf16>, vector<64x128xf32> -> vector<64x128xf32>
    %c0_3 = arith.constant 0 : index
    %c0_4 = arith.constant 0 : index
    %3 = vector.load %arg3[%c0_3, %c0_4] : memref<1x128xf32, #tpu.memory_space<vmem>>, vector<1x128xf32>
    %4 = vector.broadcast %3 : vector<1x128xf32> to vector<64x128xf32>
    %5 = arith.mulf %2, %4 : vector<64x128xf32>
    %c0_5 = arith.constant 0 : index
    %c0_6 = arith.constant 0 : index
    %6 = vector.load %arg4[%c0_5, %c0_6] : memref<1x128xf32, #tpu.memory_space<vmem>>, vector<1x128xf32>
    %7 = vector.broadcast %6 : vector<1x128xf32> to vector<64x128xf32>
    %8 = arith.addf %5, %7 : vector<64x128xf32>
    %c0_7 = arith.constant 0 : index
    %c0_8 = arith.constant 0 : index
    %9 = vector.load %arg5[%c0_7, %c0_8] : memref<64x128xbf16, #tpu.memory_space<vmem>>, vector<64x128xbf16>
    %10 = arith.extf %9 : vector<64x128xbf16> to vector<64x128xf32>
    %11 = arith.addf %8, %10 : vector<64x128xf32>
    %cst_9 = arith.constant 0.000000e+00 : f32
    %12 = vector.broadcast %cst_9 : f32 to vector<64x128xf32>
    %13 = arith.maximumf %11, %12 : vector<64x128xf32>
    %14 = arith.truncf %13 : vector<64x128xf32> to vector<64x128xbf16>
    %c0_10 = arith.constant 0 : index
    %c0_11 = arith.constant 0 : index
    %15 = vector.load %arg6[%c0_10, %c0_11] : memref<64x128xbf16, #tpu.memory_space<vmem>>, vector<64x128xbf16>
    tpu.vector_store %arg6[%c0_10, %c0_11], %14 {strides = array<i32>} : memref<64x128xbf16, #tpu.memory_space<vmem>>, vector<64x128xbf16>,
    return
  }
  func.func @transform_0(%arg0: i32) -> (i32, i32) {
    %c0_i32 = arith.constant 0 : i32
    %c0_i32_0 = arith.constant 0 : i32
    return %arg0, %c0_i32 : i32, i32
  }
  func.func @transform_1(%arg0: i32) -> (i32, i32) {
    %c0_i32 = arith.constant 0 : i32
    %c0_i32_0 = arith.constant 0 : i32
    %c0_i32_1 = arith.constant 0 : i32
    return %c0_i32, %c0_i32_0 : i32, i32
  }
  func.func @transform_2(%arg0: i32) -> (i32, i32) {
    %c0_i32 = arith.constant 0 : i32
    %c0_i32_0 = arith.constant 0 : i32
    %c0_i32_1 = arith.constant 0 : i32
    return %c0_i32, %c0_i32_0 : i32, i32
  }
  func.func @transform_3(%arg0: i32) -> (i32, i32) {
    %c0_i32 = arith.constant 0 : i32
    %c0_i32_0 = arith.constant 0 : i32
    %c0_i32_1 = arith.constant 0 : i32
    return %c0_i32, %c0_i32_0 : i32, i32
  }
  func.func @transform_4(%arg0: i32) -> (i32, i32) {
    %c0_i32 = arith.constant 0 : i32
    %c0_i32_0 = arith.constant 0 : i32
    return %arg0, %c0_i32 : i32, i32
  }
  func.func @transform_5(%arg0: i32) -> (i32, i32) {
    %c0_i32 = arith.constant 0 : i32
    %c0_i32_0 = arith.constant 0 : i32
    return %arg0, %c0_i32 : i32, i32
  }
}

module attributes {stable_mosaic.version = 11 : i64} {
  func.func @_mm_affine_kernel(%arg0: i32, %arg1: memref<32x256xbf16, #tpu.memory_space<vmem>>, %arg2: memref<256x128xbf16, #tpu.memory_space<vmem>>, %arg3: memref<1x128xf32, #tpu.memory_space<vmem>>, %arg4: memref<1x128xf32, #tpu.memory_space<vmem>>, %arg5: memref<32x128xbf16, #tpu.memory_space<vmem>>) attributes {dimension_semantics = [#tpu.dimension_semantics<parallel>], iteration_bounds = array<i64: 1>, scalar_prefetch = 0 : i64, scratch_operands = 0 : i64, tpu.core_type = #tpu.core_type<tc>, window_params = [{transform_indices = @transform_0, window_bounds = array<i64: 32, 256>}, {pipeline_mode = #tpu.pipeline_mode<synchronous>, transform_indices = @transform_1, window_bounds = array<i64: 256, 128>}, {pipeline_mode = #tpu.pipeline_mode<synchronous>, transform_indices = @transform_2, window_bounds = array<i64: 1, 128>}, {pipeline_mode = #tpu.pipeline_mode<synchronous>, transform_indices = @transform_3, window_bounds = array<i64: 1, 128>}, {transform_indices = @transform_4, window_bounds = array<i64: 32, 128>}]} {
    %c0 = arith.constant 0 : index
    %c0_0 = arith.constant 0 : index
    %0 = vector.load %arg1[%c0, %c0_0] : memref<32x256xbf16, #tpu.memory_space<vmem>>, vector<32x256xbf16>
    %c0_1 = arith.constant 0 : index
    %c0_2 = arith.constant 0 : index
    %1 = vector.load %arg2[%c0_1, %c0_2] : memref<256x128xbf16, #tpu.memory_space<vmem>>, vector<256x128xbf16>
    %cst = arith.constant dense<0.000000e+00> : vector<32x128xf32>
    %2 = tpu.matmul %0, %1, %cst {dimension_numbers = #tpu.dot_dimension_numbers<[1], [0], [0], [1], [0, 0, 1, 1], [], []>} : vector<32x256xbf16>, vector<256x128xbf16>, vector<32x128xf32> -> vector<32x128xf32>
    %c0_3 = arith.constant 0 : index
    %c0_4 = arith.constant 0 : index
    %3 = vector.load %arg3[%c0_3, %c0_4] : memref<1x128xf32, #tpu.memory_space<vmem>>, vector<1x128xf32>
    %4 = vector.broadcast %3 : vector<1x128xf32> to vector<32x128xf32>
    %5 = arith.mulf %2, %4 : vector<32x128xf32>
    %c0_5 = arith.constant 0 : index
    %c0_6 = arith.constant 0 : index
    %6 = vector.load %arg4[%c0_5, %c0_6] : memref<1x128xf32, #tpu.memory_space<vmem>>, vector<1x128xf32>
    %7 = vector.broadcast %6 : vector<1x128xf32> to vector<32x128xf32>
    %8 = arith.addf %5, %7 : vector<32x128xf32>
    %cst_7 = arith.constant 0.000000e+00 : f32
    %9 = vector.broadcast %cst_7 : f32 to vector<32x128xf32>
    %10 = arith.maximumf %8, %9 : vector<32x128xf32>
    %11 = arith.truncf %10 : vector<32x128xf32> to vector<32x128xbf16>
    %c0_8 = arith.constant 0 : index
    %c0_9 = arith.constant 0 : index
    %12 = vector.load %arg5[%c0_8, %c0_9] : memref<32x128xbf16, #tpu.memory_space<vmem>>, vector<32x128xbf16>
    tpu.vector_store %arg5[%c0_8, %c0_9], %11 {strides = array<i32>} : memref<32x128xbf16, #tpu.memory_space<vmem>>, vector<32x128xbf16>,
    return
  }
  func.func @transform_0(%arg0: i32) -> (i32, i32) {
    %c0_i32 = arith.constant 0 : i32
    %c0_i32_0 = arith.constant 0 : i32
    return %arg0, %c0_i32 : i32, i32
  }
  func.func @transform_1(%arg0: i32) -> (i32, i32) {
    %c0_i32 = arith.constant 0 : i32
    %c0_i32_0 = arith.constant 0 : i32
    %c0_i32_1 = arith.constant 0 : i32
    return %c0_i32, %c0_i32_0 : i32, i32
  }
  func.func @transform_2(%arg0: i32) -> (i32, i32) {
    %c0_i32 = arith.constant 0 : i32
    %c0_i32_0 = arith.constant 0 : i32
    %c0_i32_1 = arith.constant 0 : i32
    return %c0_i32, %c0_i32_0 : i32, i32
  }
  func.func @transform_3(%arg0: i32) -> (i32, i32) {
    %c0_i32 = arith.constant 0 : i32
    %c0_i32_0 = arith.constant 0 : i32
    %c0_i32_1 = arith.constant 0 : i32
    return %c0_i32, %c0_i32_0 : i32, i32
  }
  func.func @transform_4(%arg0: i32) -> (i32, i32) {
    %c0_i32 = arith.constant 0 : i32
    %c0_i32_0 = arith.constant 0 : i32
    return %arg0, %c0_i32 : i32, i32
  }
}

module attributes {stable_mosaic.version = 11 : i64} {
  func.func @_mm_affine_kernel(%arg0: i32, %arg1: memref<32x128xbf16, #tpu.memory_space<vmem>>, %arg2: memref<128x128xbf16, #tpu.memory_space<vmem>>, %arg3: memref<1x128xf32, #tpu.memory_space<vmem>>, %arg4: memref<1x128xf32, #tpu.memory_space<vmem>>, %arg5: memref<32x128xbf16, #tpu.memory_space<vmem>>) attributes {dimension_semantics = [#tpu.dimension_semantics<parallel>], iteration_bounds = array<i64: 1>, scalar_prefetch = 0 : i64, scratch_operands = 0 : i64, tpu.core_type = #tpu.core_type<tc>, window_params = [{transform_indices = @transform_0, window_bounds = array<i64: 32, 128>}, {pipeline_mode = #tpu.pipeline_mode<synchronous>, transform_indices = @transform_1, window_bounds = array<i64: 128, 128>}, {pipeline_mode = #tpu.pipeline_mode<synchronous>, transform_indices = @transform_2, window_bounds = array<i64: 1, 128>}, {pipeline_mode = #tpu.pipeline_mode<synchronous>, transform_indices = @transform_3, window_bounds = array<i64: 1, 128>}, {transform_indices = @transform_4, window_bounds = array<i64: 32, 128>}]} {
    %c0 = arith.constant 0 : index
    %c0_0 = arith.constant 0 : index
    %0 = vector.load %arg1[%c0, %c0_0] : memref<32x128xbf16, #tpu.memory_space<vmem>>, vector<32x128xbf16>
    %c0_1 = arith.constant 0 : index
    %c0_2 = arith.constant 0 : index
    %1 = vector.load %arg2[%c0_1, %c0_2] : memref<128x128xbf16, #tpu.memory_space<vmem>>, vector<128x128xbf16>
    %cst = arith.constant dense<0.000000e+00> : vector<32x128xf32>
    %2 = tpu.matmul %0, %1, %cst {dimension_numbers = #tpu.dot_dimension_numbers<[1], [0], [0], [1], [0, 0, 1, 1], [], []>} : vector<32x128xbf16>, vector<128x128xbf16>, vector<32x128xf32> -> vector<32x128xf32>
    %c0_3 = arith.constant 0 : index
    %c0_4 = arith.constant 0 : index
    %3 = vector.load %arg3[%c0_3, %c0_4] : memref<1x128xf32, #tpu.memory_space<vmem>>, vector<1x128xf32>
    %4 = vector.broadcast %3 : vector<1x128xf32> to vector<32x128xf32>
    %5 = arith.mulf %2, %4 : vector<32x128xf32>
    %c0_5 = arith.constant 0 : index
    %c0_6 = arith.constant 0 : index
    %6 = vector.load %arg4[%c0_5, %c0_6] : memref<1x128xf32, #tpu.memory_space<vmem>>, vector<1x128xf32>
    %7 = vector.broadcast %6 : vector<1x128xf32> to vector<32x128xf32>
    %8 = arith.addf %5, %7 : vector<32x128xf32>
    %9 = arith.truncf %8 : vector<32x128xf32> to vector<32x128xbf16>
    %c0_7 = arith.constant 0 : index
    %c0_8 = arith.constant 0 : index
    %10 = vector.load %arg5[%c0_7, %c0_8] : memref<32x128xbf16, #tpu.memory_space<vmem>>, vector<32x128xbf16>
    tpu.vector_store %arg5[%c0_7, %c0_8], %9 {strides = array<i32>} : memref<32x128xbf16, #tpu.memory_space<vmem>>, vector<32x128xbf16>,
    return
  }
  func.func @transform_0(%arg0: i32) -> (i32, i32) {
    %c0_i32 = arith.constant 0 : i32
    %c0_i32_0 = arith.constant 0 : i32
    return %arg0, %c0_i32 : i32, i32
  }
  func.func @transform_1(%arg0: i32) -> (i32, i32) {
    %c0_i32 = arith.constant 0 : i32
    %c0_i32_0 = arith.constant 0 : i32
    %c0_i32_1 = arith.constant 0 : i32
    return %c0_i32, %c0_i32_0 : i32, i32
  }
  func.func @transform_2(%arg0: i32) -> (i32, i32) {
    %c0_i32 = arith.constant 0 : i32
    %c0_i32_0 = arith.constant 0 : i32
    %c0_i32_1 = arith.constant 0 : i32
    return %c0_i32, %c0_i32_0 : i32, i32
  }
  func.func @transform_3(%arg0: i32) -> (i32, i32) {
    %c0_i32 = arith.constant 0 : i32
    %c0_i32_0 = arith.constant 0 : i32
    %c0_i32_1 = arith.constant 0 : i32
    return %c0_i32, %c0_i32_0 : i32, i32
  }
  func.func @transform_4(%arg0: i32) -> (i32, i32) {
    %c0_i32 = arith.constant 0 : i32
    %c0_i32_0 = arith.constant 0 : i32
    return %arg0, %c0_i32 : i32, i32
  }
}

module attributes {stable_mosaic.version = 11 : i64} {
  func.func @_mm_affine_res_kernel(%arg0: i32, %arg1: memref<32x256xbf16, #tpu.memory_space<vmem>>, %arg2: memref<256x128xbf16, #tpu.memory_space<vmem>>, %arg3: memref<1x128xf32, #tpu.memory_space<vmem>>, %arg4: memref<1x128xf32, #tpu.memory_space<vmem>>, %arg5: memref<32x128xbf16, #tpu.memory_space<vmem>>, %arg6: memref<32x128xbf16, #tpu.memory_space<vmem>>) attributes {dimension_semantics = [#tpu.dimension_semantics<parallel>], iteration_bounds = array<i64: 1>, scalar_prefetch = 0 : i64, scratch_operands = 0 : i64, tpu.core_type = #tpu.core_type<tc>, window_params = [{transform_indices = @transform_0, window_bounds = array<i64: 32, 256>}, {pipeline_mode = #tpu.pipeline_mode<synchronous>, transform_indices = @transform_1, window_bounds = array<i64: 256, 128>}, {pipeline_mode = #tpu.pipeline_mode<synchronous>, transform_indices = @transform_2, window_bounds = array<i64: 1, 128>}, {pipeline_mode = #tpu.pipeline_mode<synchronous>, transform_indices = @transform_3, window_bounds = array<i64: 1, 128>}, {transform_indices = @transform_4, window_bounds = array<i64: 32, 128>}, {transform_indices = @transform_5, window_bounds = array<i64: 32, 128>}]} {
    %c0 = arith.constant 0 : index
    %c0_0 = arith.constant 0 : index
    %0 = vector.load %arg1[%c0, %c0_0] : memref<32x256xbf16, #tpu.memory_space<vmem>>, vector<32x256xbf16>
    %c0_1 = arith.constant 0 : index
    %c0_2 = arith.constant 0 : index
    %1 = vector.load %arg2[%c0_1, %c0_2] : memref<256x128xbf16, #tpu.memory_space<vmem>>, vector<256x128xbf16>
    %cst = arith.constant dense<0.000000e+00> : vector<32x128xf32>
    %2 = tpu.matmul %0, %1, %cst {dimension_numbers = #tpu.dot_dimension_numbers<[1], [0], [0], [1], [0, 0, 1, 1], [], []>} : vector<32x256xbf16>, vector<256x128xbf16>, vector<32x128xf32> -> vector<32x128xf32>
    %c0_3 = arith.constant 0 : index
    %c0_4 = arith.constant 0 : index
    %3 = vector.load %arg3[%c0_3, %c0_4] : memref<1x128xf32, #tpu.memory_space<vmem>>, vector<1x128xf32>
    %4 = vector.broadcast %3 : vector<1x128xf32> to vector<32x128xf32>
    %5 = arith.mulf %2, %4 : vector<32x128xf32>
    %c0_5 = arith.constant 0 : index
    %c0_6 = arith.constant 0 : index
    %6 = vector.load %arg4[%c0_5, %c0_6] : memref<1x128xf32, #tpu.memory_space<vmem>>, vector<1x128xf32>
    %7 = vector.broadcast %6 : vector<1x128xf32> to vector<32x128xf32>
    %8 = arith.addf %5, %7 : vector<32x128xf32>
    %c0_7 = arith.constant 0 : index
    %c0_8 = arith.constant 0 : index
    %9 = vector.load %arg5[%c0_7, %c0_8] : memref<32x128xbf16, #tpu.memory_space<vmem>>, vector<32x128xbf16>
    %10 = arith.extf %9 : vector<32x128xbf16> to vector<32x128xf32>
    %11 = arith.addf %8, %10 : vector<32x128xf32>
    %cst_9 = arith.constant 0.000000e+00 : f32
    %12 = vector.broadcast %cst_9 : f32 to vector<32x128xf32>
    %13 = arith.maximumf %11, %12 : vector<32x128xf32>
    %14 = arith.truncf %13 : vector<32x128xf32> to vector<32x128xbf16>
    %c0_10 = arith.constant 0 : index
    %c0_11 = arith.constant 0 : index
    %15 = vector.load %arg6[%c0_10, %c0_11] : memref<32x128xbf16, #tpu.memory_space<vmem>>, vector<32x128xbf16>
    tpu.vector_store %arg6[%c0_10, %c0_11], %14 {strides = array<i32>} : memref<32x128xbf16, #tpu.memory_space<vmem>>, vector<32x128xbf16>,
    return
  }
  func.func @transform_0(%arg0: i32) -> (i32, i32) {
    %c0_i32 = arith.constant 0 : i32
    %c0_i32_0 = arith.constant 0 : i32
    return %arg0, %c0_i32 : i32, i32
  }
  func.func @transform_1(%arg0: i32) -> (i32, i32) {
    %c0_i32 = arith.constant 0 : i32
    %c0_i32_0 = arith.constant 0 : i32
    %c0_i32_1 = arith.constant 0 : i32
    return %c0_i32, %c0_i32_0 : i32, i32
  }
  func.func @transform_2(%arg0: i32) -> (i32, i32) {
    %c0_i32 = arith.constant 0 : i32
    %c0_i32_0 = arith.constant 0 : i32
    %c0_i32_1 = arith.constant 0 : i32
    return %c0_i32, %c0_i32_0 : i32, i32
  }
  func.func @transform_3(%arg0: i32) -> (i32, i32) {
    %c0_i32 = arith.constant 0 : i32
    %c0_i32_0 = arith.constant 0 : i32
    %c0_i32_1 = arith.constant 0 : i32
    return %c0_i32, %c0_i32_0 : i32, i32
  }
  func.func @transform_4(%arg0: i32) -> (i32, i32) {
    %c0_i32 = arith.constant 0 : i32
    %c0_i32_0 = arith.constant 0 : i32
    return %arg0, %c0_i32 : i32, i32
  }
  func.func @transform_5(%arg0: i32) -> (i32, i32) {
    %c0_i32 = arith.constant 0 : i32
    %c0_i32_0 = arith.constant 0 : i32
    return %arg0, %c0_i32 : i32, i32
  }
}

</mosaic_0001>

<bundles_post_ra>
// kernel: _lambda_.25
= control target key start
LH: loop header
LB: loop body
LE: loop exit
PB: predicated region body
PF: predicated region fallthrough
CT: control target
= control target key end

     0   :  { %s794_s1 = inlined_call_operand.vmem [shape: bf16[128,256], index: 1, kind: input, shape index: {}]   ;;  %s795_s0 = inlined_call_operand.vmem [shape: bf16[128,128], index: 0, kind: input, shape index: {}]   ;;  %s796_s2 = inlined_call_operand.vmem [shape: f32[1,256], index: 2, kind: input, shape index: {}]   ;;  %s797_s3 = inlined_call_operand.vmem [shape: f32[1,256], index: 3, kind: input, shape index: {}]   ;;  %s798_s4 = inlined_call_operand.vmem [shape: bf16[128,256], index: 4, kind: output, shape index: {}]  }
   0x1   :  { %v477_v0 = vld [vmem:[%s794_s1 + $0x70] sm:$0xf]  ;;  %v506_v1 = vld [vmem:[%s794_s1 + $0x74] sm:$0xf0]  ;;  %v505_v2 = vld [vmem:[%s794_s1 + $0x74] sm:$0xf] }
   0x2   :  { %v478_v3 = vor.u32 %v506_v1, %v477_v0  ;;  %v479_v4 = vld [vmem:[%s794_s1 + $0x78] sm:$0xf0]  ;;  %v469_v5 = vld [vmem:[%s794_s1 + $0x60] sm:$0xf]  ;;  %v504_v6 = vld [vmem:[%s794_s1 + $0x64] sm:$0xf0] }
   0x3   :  { %v482_v7 = vor.u32 %v505_v2, %v479_v4  ;;  %v503_v8 = vld [vmem:[%s794_s1 + $0x64] sm:$0xf]  ;;  %v471_v9 = vld [vmem:[%s794_s1 + $0x68] sm:$0xf0]  ;;  %v470_v10 = vor.u32 %v504_v6, %v469_v5  ;;  %v461_v12 = vld [vmem:[%s794_s1 + $0x50] sm:$0xf] }
   0x4   :  { %177 = vmatpush.bf16.msra.mxu0 %v478_v3  ;;  %507 = vmatpush.bf16.msra.mxu2 %v478_v3  ;;  %v474_v11 = vor.u32 %v503_v8, %v471_v9  ;;  %v502_v13 = vld [vmem:[%s794_s1 + $0x54] sm:$0xf0]  ;;  %v501_v14 = vld [vmem:[%s794_s1 + $0x54] sm:$0xf]  ;;  %v463_v15 = vld [vmem:[%s794_s1 + $0x58] sm:$0xf0] }
   0x5   :  { %226 = vmatpush.bf16.msra.mxu1 %v482_v7  ;;  %515 = vmatpush.bf16.msra.mxu3 %v482_v7  ;;  %v462_v16 = vor.u32 %v502_v13, %v461_v12  ;;  %v466_v17 = vor.u32 %v501_v14, %v463_v15  ;;  %v453_v18 = vld [vmem:[%s794_s1 + $0x40] sm:$0xf]  ;;  %v500_v19 = vld [vmem:[%s794_s1 + $0x44] sm:$0xf0]  ;;  %v499_v20 = vld [vmem:[%s794_s1 + $0x44] sm:$0xf] }
   0x6   :  { %v455_v21 = vld [vmem:[%s794_s1 + $0x48] sm:$0xf0]  ;;  %v454_v22 = vor.u32 %v500_v19, %v453_v18  ;;  %v445_v24 = vld [vmem:[%s794_s1 + $0x30] sm:$0xf]  ;;  %v498_v25 = vld [vmem:[%s794_s1 + $0x34] sm:$0xf0] }
   0x7   :  { %v458_v23 = vor.u32 %v499_v20, %v455_v21  ;;  %v497_v26 = vld [vmem:[%s794_s1 + $0x34] sm:$0xf]  ;;  %v447_v27 = vld [vmem:[%s794_s1 + $0x38] sm:$0xf0]  ;;  %v446_v28 = vor.u32 %v498_v25, %v445_v24  ;;  %v437_v30 = vld [vmem:[%s794_s1 + $0x20] sm:$0xf] }
   0x8   :  { %178 = vmatpush.bf16.msra.mxu0 %v470_v10  ;;  %508 = vmatpush.bf16.msra.mxu2 %v470_v10  ;;  %v450_v29 = vor.u32 %v497_v26, %v447_v27  ;;  %v496_v31 = vld [vmem:[%s794_s1 + $0x24] sm:$0xf0]  ;;  %v495_v32 = vld [vmem:[%s794_s1 + $0x24] sm:$0xf]  ;;  %v439_v33 = vld [vmem:[%s794_s1 + $0x28] sm:$0xf0] }
   0x9   :  { %227 = vmatpush.bf16.msra.mxu1 %v474_v11  ;;  %516 = vmatpush.bf16.msra.mxu3 %v474_v11  ;;  %v438_v34 = vor.u32 %v496_v31, %v437_v30  ;;  %v442_v35 = vor.u32 %v495_v32, %v439_v33  ;;  %v429_v36 = vld [vmem:[%s794_s1 + $0x10] sm:$0xf]  ;;  %v494_v37 = vld [vmem:[%s794_s1 + $0x14] sm:$0xf0]  ;;  %v493_v38 = vld [vmem:[%s794_s1 + $0x14] sm:$0xf] }
   0xa   :  { %v431_v39 = vld [vmem:[%s794_s1 + $0x18] sm:$0xf0]  ;;  %v430_v40 = vor.u32 %v494_v37, %v429_v36  ;;  %v421_v42 = vld [vmem:[%s794_s1] sm:$0xf]  ;;  %v492_v43 = vld [vmem:[%s794_s1 + $0x4] sm:$0xf0] }
   0xb   :  { %v434_v41 = vor.u32 %v493_v38, %v431_v39  ;;  %v491_v44 = vld [vmem:[%s794_s1 + $0x4] sm:$0xf]  ;;  %v423_v45 = vld [vmem:[%s794_s1 + $0x8] sm:$0xf0]  ;;  %v422_v46 = vor.u32 %v492_v43, %v421_v42  ;;  %v485_v52 = vld [vmem:[%s795_s0 + $0x10] sm:$0xff] }
   0xc   :  { %179 = vmatpush.bf16.msra.mxu0 %v462_v16  ;;  %509 = vmatpush.bf16.msra.mxu2 %v462_v16  ;;  %v426_v47 = vor.u32 %v491_v44, %v423_v45  ;;  %v483_v48 = vld [vmem:[%s795_s0] sm:$0xff]  ;;  %v484_v50 = vld [vmem:[%s795_s0 + $0x8] sm:$0xff]  ;;  %v489_v53 = vld [vmem:[%s795_s0 + $0x30] sm:$0xff] }
   0xd   :  { %228 = vmatpush.bf16.msra.mxu1 %v466_v17  ;;  %517 = vmatpush.bf16.msra.mxu3 %v466_v17  ;;  %v487_v49 = vld [vmem:[%s795_s0 + $0x20] sm:$0xff]  ;;  %v488_v51 = vld [vmem:[%s795_s0 + $0x28] sm:$0xff]  ;;  %v486_v54 = vld [vmem:[%s795_s0 + $0x18] sm:$0xff] }
   0xe   :  { %v490_v55 = vld [vmem:[%s795_s0 + $0x38] sm:$0xff]  ;;  %v275_v56 = vld [vmem:[%s796_s2] sm:$0x3] }
   0xf   :  { %v313_v57 = vld [vmem:[%s797_s3] sm:$0x3]  ;;  %v674_v58 = vperm.slane %v275_v56, 0  ;;  %v676_v59 = vperm.slane %v275_v56, 1 }
  0x10   :  { %180 = vmatpush.bf16.msra.mxu0 %v454_v22  ;;  %510 = vmatpush.bf16.msra.mxu2 %v454_v22  ;;  %v678_v60 = vperm.slane %v313_v57, 0  ;;  %v680_v62 = vperm.slane %v313_v57, 1 }
  0x11   :  { %229 = vmatpush.bf16.msra.mxu1 %v458_v23  ;;  %518 = vmatpush.bf16.msra.mxu3 %v458_v23 }
  0x14   :  { %181 = vmatpush.bf16.msra.mxu0 %v446_v28  ;;  %511 = vmatpush.bf16.msra.mxu2 %v446_v28 }
  0x15   :  { %230 = vmatpush.bf16.msra.mxu1 %v450_v29  ;;  %519 = vmatpush.bf16.msra.mxu3 %v450_v29 }
  0x18   :  { %182 = vmatpush.bf16.msra.mxu0 %v438_v34  ;;  %512 = vmatpush.bf16.msra.mxu2 %v438_v34 }
  0x19   :  { %231 = vmatpush.bf16.msra.mxu1 %v442_v35  ;;  %520 = vmatpush.bf16.msra.mxu3 %v442_v35 }
  0x1c   :  { %183 = vmatpush.bf16.msra.mxu0 %v430_v40  ;;  %513 = vmatpush.bf16.msra.mxu2 %v430_v40 }
  0x1d   :  { %232 = vmatpush.bf16.msra.mxu1 %v434_v41  ;;  %521 = vmatpush.bf16.msra.mxu3 %v434_v41 }
  0x20   :  { %184 = vmatpush.bf16.msra.mxu0 %v422_v46  ;;  %514 = vmatpush.bf16.msra.mxu2 %v422_v46 }
  0x21   :  { %233 = vmatpush.bf16.msra.mxu1 %v426_v47  ;;  %522 = vmatpush.bf16.msra.mxu3 %v426_v47 }
  0x23   :  { %185 = vmatmul.bf16.vlgmr.msra.gmra.mxu0 %v483_v48  ;;  %205 = vmatmul.bf16.vlgmr.msra.gmra.mxu2 %v487_v49 }
  0x24   :  { %234 = vmatmul.bf16.vlgmr.msra.gmra.mxu1 %v483_v48  ;;  %254 = vmatmul.bf16.vlgmr.msra.gmra.mxu3 %v487_v49 }
  0x33   :  { %190 = vmatmul.bf16.gmra.mxu0 %v484_v50  ;;  %210 = vmatmul.bf16.gmra.mxu2 %v488_v51 }
  0x34   :  { %239 = vmatmul.bf16.gmra.mxu1 %v484_v50  ;;  %259 = vmatmul.bf16.gmra.mxu3 %v488_v51 }
  0x43   :  { %195 = vmatmul.bf16.gmra.mxu0 %v485_v52  ;;  %215 = vmatmul.bf16.gmra.mxu2 %v489_v53 }
  0x44   :  { %244 = vmatmul.bf16.gmra.mxu1 %v485_v52  ;;  %264 = vmatmul.bf16.gmra.mxu3 %v489_v53 }
  0x53   :  { %200 = vmatmul.bf16.gmra.mxu0 %v486_v54  ;;  %220 = vmatmul.bf16.gmra.mxu2 %v490_v55 }
  0x54   :  { %249 = vmatmul.bf16.gmra.mxu1 %v486_v54  ;;  %269 = vmatmul.bf16.gmra.mxu3 %v490_v55 }
  0xa0   :  { %v186_v61 = vpop.f32.mrf.mxu0 }
  0xa1   :  { %v281_v63 = vmul.f32 %v674_v58, %v186_v61  ;;  %v235_v0 = vpop.f32.mrf.mxu1 }
  0xa2   :  { %v282_v1 = vmul.f32 %v676_v59, %v235_v0 }
  0xa3   :  { %v319_v2 = vadd.f32 %v678_v60, %v281_v63 }
  0xa4   :  { %v320_v3 = vadd.f32 %v680_v62, %v282_v1 }
  0xa6   :  { %v351_v4 = vpack.c.bf16 %v320_v3, %v319_v2  ;;  %v206_v5 = vpop.f32.mrf.mxu2 }
  0xa7   :  { %v297_v6 = vmul.f32 %v674_v58, %v206_v5  ;;  %v255_v7 = vpop.f32.mrf.mxu3 }
  0xa8   :  { %367 = vst [vmem:[%s798_s4] sm:$0xff] %v351_v4  ;;  %v298_v8 = vmul.f32 %v676_v59, %v255_v7  ;;  %v188_v9 = vpop.f32.mrf.mxu0 }
  0xa9   :  { %v335_v10 = vadd.f32 %v678_v60, %v297_v6  ;;  %v283_v11 = vmul.f32 %v674_v58, %v188_v9  ;;  %v237_v12 = vpop.f32.mrf.mxu1 }
  0xaa   :  { %v336_v13 = vadd.f32 %v680_v62, %v298_v8  ;;  %v284_v14 = vmul.f32 %v676_v59, %v237_v12 }
  0xab   :  { %v321_v15 = vadd.f32 %v678_v60, %v283_v11 }
  0xac   :  { %v359_v16 = vpack.c.bf16 %v336_v13, %v335_v10  ;;  %v322_v17 = vadd.f32 %v680_v62, %v284_v14 }
  0xae   :  { %375 = vst [vmem:[%s798_s4 + $0x40] sm:$0xff] %v359_v16  ;;  %v352_v18 = vpack.c.bf16 %v322_v17, %v321_v15  ;;  %v208_v19 = vpop.f32.mrf.mxu2 }
  0xaf   :  { %v299_v20 = vmul.f32 %v674_v58, %v208_v19  ;;  %v257_v21 = vpop.f32.mrf.mxu3 }
  0xb0   :  { %368 = vst [vmem:[%s798_s4 + $0x8] sm:$0xff] %v352_v18  ;;  %v300_v22 = vmul.f32 %v676_v59, %v257_v21  ;;  %v191_v23 = vpop.f32.mrf.mxu0 }
  0xb1   :  { %v337_v24 = vadd.f32 %v678_v60, %v299_v20  ;;  %v285_v25 = vmul.f32 %v674_v58, %v191_v23  ;;  %v240_v26 = vpop.f32.mrf.mxu1 }
  0xb2   :  { %v338_v27 = vadd.f32 %v680_v62, %v300_v22  ;;  %v286_v28 = vmul.f32 %v676_v59, %v240_v26 }
  0xb3   :  { %v323_v29 = vadd.f32 %v678_v60, %v285_v25 }
  0xb4   :  { %v360_v30 = vpack.c.bf16 %v338_v27, %v337_v24  ;;  %v324_v31 = vadd.f32 %v680_v62, %v286_v28 }
  0xb6   :  { %376 = vst [vmem:[%s798_s4 + $0x48] sm:$0xff] %v360_v30  ;;  %v353_v32 = vpack.c.bf16 %v324_v31, %v323_v29  ;;  %v211_v33 = vpop.f32.mrf.mxu2 }
  0xb7   :  { %v301_v34 = vmul.f32 %v674_v58, %v211_v33  ;;  %v260_v35 = vpop.f32.mrf.mxu3 }
  0xb8   :  { %369 = vst [vmem:[%s798_s4 + $0x10] sm:$0xff] %v353_v32  ;;  %v302_v36 = vmul.f32 %v676_v59, %v260_v35  ;;  %v193_v37 = vpop.f32.mrf.mxu0 }
  0xb9   :  { %v339_v38 = vadd.f32 %v678_v60, %v301_v34  ;;  %v287_v39 = vmul.f32 %v674_v58, %v193_v37  ;;  %v242_v40 = vpop.f32.mrf.mxu1 }
  0xba   :  { %v340_v41 = vadd.f32 %v680_v62, %v302_v36  ;;  %v288_v42 = vmul.f32 %v676_v59, %v242_v40 }
  0xbb   :  { %v325_v43 = vadd.f32 %v678_v60, %v287_v39 }
  0xbc   :  { %v361_v44 = vpack.c.bf16 %v340_v41, %v339_v38  ;;  %v326_v45 = vadd.f32 %v680_v62, %v288_v42 }
  0xbe   :  { %377 = vst [vmem:[%s798_s4 + $0x50] sm:$0xff] %v361_v44  ;;  %v354_v46 = vpack.c.bf16 %v326_v45, %v325_v43  ;;  %v213_v47 = vpop.f32.mrf.mxu2 }
  0xbf   :  { %v303_v48 = vmul.f32 %v674_v58, %v213_v47  ;;  %v262_v49 = vpop.f32.mrf.mxu3 }
  0xc0   :  { %370 = vst [vmem:[%s798_s4 + $0x18] sm:$0xff] %v354_v46  ;;  %v304_v50 = vmul.f32 %v676_v59, %v262_v49  ;;  %v196_v51 = vpop.f32.mrf.mxu0 }
  0xc1   :  { %v341_v52 = vadd.f32 %v678_v60, %v303_v48  ;;  %v289_v53 = vmul.f32 %v674_v58, %v196_v51  ;;  %v245_v54 = vpop.f32.mrf.mxu1 }
  0xc2   :  { %v342_v55 = vadd.f32 %v680_v62, %v304_v50  ;;  %v290_v56 = vmul.f32 %v676_v59, %v245_v54 }
  0xc3   :  { %v327_v57 = vadd.f32 %v678_v60, %v289_v53 }
  0xc4   :  { %v362_v61 = vpack.c.bf16 %v342_v55, %v341_v52  ;;  %v328_v63 = vadd.f32 %v680_v62, %v290_v56 }
  0xc6   :  { %378 = vst [vmem:[%s798_s4 + $0x58] sm:$0xff] %v362_v61  ;;  %v355_v0 = vpack.c.bf16 %v328_v63, %v327_v57  ;;  %v216_v1 = vpop.f32.mrf.mxu2 }
  0xc7   :  { %v305_v2 = vmul.f32 %v674_v58, %v216_v1  ;;  %v265_v3 = vpop.f32.mrf.mxu3 }
  0xc8   :  { %371 = vst [vmem:[%s798_s4 + $0x20] sm:$0xff] %v355_v0  ;;  %v306_v4 = vmul.f32 %v676_v59, %v265_v3  ;;  %v198_v5 = vpop.f32.mrf.mxu0 }
  0xc9   :  { %v343_v6 = vadd.f32 %v678_v60, %v305_v2  ;;  %v291_v7 = vmul.f32 %v674_v58, %v198_v5  ;;  %v247_v8 = vpop.f32.mrf.mxu1 }
  0xca   :  { %v344_v9 = vadd.f32 %v680_v62, %v306_v4  ;;  %v292_v10 = vmul.f32 %v676_v59, %v247_v8 }
  0xcb   :  { %v329_v11 = vadd.f32 %v678_v60, %v291_v7 }
  0xcc   :  { %v363_v12 = vpack.c.bf16 %v344_v9, %v343_v6  ;;  %v330_v13 = vadd.f32 %v680_v62, %v292_v10 }
  0xce   :  { %379 = vst [vmem:[%s798_s4 + $0x60] sm:$0xff] %v363_v12  ;;  %v356_v14 = vpack.c.bf16 %v330_v13, %v329_v11  ;;  %v218_v15 = vpop.f32.mrf.mxu2 }
  0xcf   :  { %v307_v16 = vmul.f32 %v674_v58, %v218_v15  ;;  %v267_v17 = vpop.f32.mrf.mxu3 }
  0xd0   :  { %372 = vst [vmem:[%s798_s4 + $0x28] sm:$0xff] %v356_v14  ;;  %v308_v18 = vmul.f32 %v676_v59, %v267_v17  ;;  %v201_v19 = vpop.f32.mrf.mxu0 }
  0xd1   :  { %v345_v20 = vadd.f32 %v678_v60, %v307_v16  ;;  %v293_v21 = vmul.f32 %v674_v58, %v201_v19  ;;  %v250_v22 = vpop.f32.mrf.mxu1 }
  0xd2   :  { %v346_v23 = vadd.f32 %v680_v62, %v308_v18  ;;  %v294_v24 = vmul.f32 %v676_v59, %v250_v22 }
  0xd3   :  { %v331_v25 = vadd.f32 %v678_v60, %v293_v21 }
  0xd4   :  { %v364_v26 = vpack.c.bf16 %v346_v23, %v345_v20  ;;  %v332_v27 = vadd.f32 %v680_v62, %v294_v24 }
  0xd6   :  { %380 = vst [vmem:[%s798_s4 + $0x68] sm:$0xff] %v364_v26  ;;  %v357_v28 = vpack.c.bf16 %v332_v27, %v331_v25  ;;  %v221_v29 = vpop.f32.mrf.mxu2 }
  0xd7   :  { %v309_v30 = vmul.f32 %v674_v58, %v221_v29  ;;  %v270_v31 = vpop.f32.mrf.mxu3 }
  0xd8   :  { %373 = vst [vmem:[%s798_s4 + $0x30] sm:$0xff] %v357_v28  ;;  %v310_v32 = vmul.f32 %v676_v59, %v270_v31  ;;  %v203_v33 = vpop.f32.mrf.mxu0 }
  0xd9   :  { %v347_v34 = vadd.f32 %v678_v60, %v309_v30  ;;  %v295_v35 = vmul.f32 %v674_v58, %v203_v33  ;;  %v252_v36 = vpop.f32.mrf.mxu1 }
  0xda   :  { %v348_v37 = vadd.f32 %v680_v62, %v310_v32  ;;  %v296_v38 = vmul.f32 %v676_v59, %v252_v36 }
  0xdb   :  { %v333_v39 = vadd.f32 %v678_v60, %v295_v35 }
  0xdc   :  { %v365_v40 = vpack.c.bf16 %v348_v37, %v347_v34  ;;  %v334_v41 = vadd.f32 %v680_v62, %v296_v38 }
  0xde   :  { %381 = vst [vmem:[%s798_s4 + $0x70] sm:$0xff] %v365_v40  ;;  %v358_v42 = vpack.c.bf16 %v334_v41, %v333_v39  ;;  %v223_v43 = vpop.f32.mrf.mxu2 }
  0xdf   :  { %v311_v44 = vmul.f32 %v674_v58, %v223_v43  ;;  %v272_v45 = vpop.f32.mrf.mxu3 }
  0xe0   :  { %374 = vst [vmem:[%s798_s4 + $0x38] sm:$0xff] %v358_v42  ;;  %v312_v46 = vmul.f32 %v676_v59, %v272_v45 }
  0xe1   :  { %v349_v47 = vadd.f32 %v678_v60, %v311_v44 }
  0xe2   :  { %v350_v48 = vadd.f32 %v680_v62, %v312_v46 }
  0xe4   :  { %v366_v49 = vpack.c.bf16 %v350_v48, %v349_v47 }
  0xe6   :  { %382 = vst [vmem:[%s798_s4 + $0x78] sm:$0xff] %v366_v49 }

// kernel: _lambda_.24
= control target key start
LH: loop header
LB: loop body
LE: loop exit
PB: predicated region body
PF: predicated region fallthrough
CT: control target
= control target key end

     0   :  { %s4177_s1 = inlined_call_operand.vmem [shape: bf16[512,128], index: 1, kind: input, shape index: {}]   ;;  %s4178_s0 = inlined_call_operand.vmem [shape: bf16[512,512], index: 0, kind: input, shape index: {}]   ;;  %s4179_s2 = inlined_call_operand.vmem [shape: f32[1,128], index: 2, kind: input, shape index: {}]   ;;  %s4180_s3 = inlined_call_operand.vmem [shape: f32[1,128], index: 3, kind: input, shape index: {}]   ;;  %s4181_s4 = inlined_call_operand.vmem [shape: bf16[512,128], index: 4, kind: output, shape index: {}]  }
   0x1   :  { %v2824_v0 = vld [vmem:[%s4177_s1 + $0x38] sm:$0xff]  ;;  %v2823_v4 = vld [vmem:[%s4177_s1 + $0x30] sm:$0xff]  ;;  %v2822_v8 = vld [vmem:[%s4177_s1 + $0x28] sm:$0xff] }
   0x2   :  { %v2832_v1 = vld [vmem:[%s4177_s1 + $0x78] sm:$0xff]  ;;  %1041 = vmatpush.bf16.msra.mxu0 %v2824_v0  ;;  %v2831_v5 = vld [vmem:[%s4177_s1 + $0x70] sm:$0xff]  ;;  %v2830_v9 = vld [vmem:[%s4177_s1 + $0x68] sm:$0xff] }
   0x3   :  { %v2840_v2 = vld [vmem:[%s4177_s1 + $0xb8] sm:$0xff]  ;;  %1210 = vmatpush.bf16.msra.mxu1 %v2832_v1  ;;  %v2839_v6 = vld [vmem:[%s4177_s1 + $0xb0] sm:$0xff]  ;;  %v2838_v10 = vld [vmem:[%s4177_s1 + $0xa8] sm:$0xff] }
   0x4   :  { %v2848_v3 = vld [vmem:[%s4177_s1 + $0xf8] sm:$0xff]  ;;  %1379 = vmatpush.bf16.msra.mxu2 %v2840_v2  ;;  %v2847_v7 = vld [vmem:[%s4177_s1 + $0xf0] sm:$0xff]  ;;  %v2846_v11 = vld [vmem:[%s4177_s1 + $0xe8] sm:$0xff] }
   0x5   :  { %1548 = vmatpush.bf16.msra.mxu3 %v2848_v3  ;;  %v2821_v12 = vld [vmem:[%s4177_s1 + $0x20] sm:$0xff]  ;;  %v2820_v16 = vld [vmem:[%s4177_s1 + $0x18] sm:$0xff]  ;;  %v2819_v20 = vld [vmem:[%s4177_s1 + $0x10] sm:$0xff] }
   0x6   :  { %1042 = vmatpush.bf16.msra.mxu0 %v2823_v4  ;;  %v2829_v13 = vld [vmem:[%s4177_s1 + $0x60] sm:$0xff]  ;;  %v2828_v17 = vld [vmem:[%s4177_s1 + $0x58] sm:$0xff]  ;;  %v2827_v21 = vld [vmem:[%s4177_s1 + $0x50] sm:$0xff] }
   0x7   :  { %1211 = vmatpush.bf16.msra.mxu1 %v2831_v5  ;;  %v2837_v14 = vld [vmem:[%s4177_s1 + $0xa0] sm:$0xff]  ;;  %v2836_v18 = vld [vmem:[%s4177_s1 + $0x98] sm:$0xff]  ;;  %v2835_v22 = vld [vmem:[%s4177_s1 + $0x90] sm:$0xff] }
   0x8   :  { %1380 = vmatpush.bf16.msra.mxu2 %v2839_v6  ;;  %v2845_v15 = vld [vmem:[%s4177_s1 + $0xe0] sm:$0xff]  ;;  %v2844_v19 = vld [vmem:[%s4177_s1 + $0xd8] sm:$0xff]  ;;  %v2843_v23 = vld [vmem:[%s4177_s1 + $0xd0] sm:$0xff] }
   0x9   :  { %1549 = vmatpush.bf16.msra.mxu3 %v2847_v7  ;;  %v2818_v24 = vld [vmem:[%s4177_s1 + $0x8] sm:$0xff]  ;;  %v2817_v28 = vld [vmem:[%s4177_s1] sm:$0xff]  ;;  %v2691_v33 = vld [vmem:[%s4178_s0 + $0xc] sm:$0xf0] }
   0xa   :  { %1043 = vmatpush.bf16.msra.mxu0 %v2822_v8  ;;  %v2826_v25 = vld [vmem:[%s4177_s1 + $0x48] sm:$0xff]  ;;  %v2825_v29 = vld [vmem:[%s4177_s1 + $0x40] sm:$0xff]  ;;  %v2053_v35 = vld [vmem:[%s4178_s0 + $0x10] sm:$0xf0] }
   0xb   :  { %1212 = vmatpush.bf16.msra.mxu1 %v2830_v9  ;;  %v2834_v26 = vld [vmem:[%s4177_s1 + $0x88] sm:$0xff]  ;;  %v2833_v30 = vld [vmem:[%s4177_s1 + $0x80] sm:$0xff]  ;;  %v2692_v37 = vld [vmem:[%s4178_s0 + $0x14] sm:$0xf0] }
   0xc   :  { %1381 = vmatpush.bf16.msra.mxu2 %v2838_v10  ;;  %v2842_v27 = vld [vmem:[%s4177_s1 + $0xc8] sm:$0xff]  ;;  %v2841_v31 = vld [vmem:[%s4177_s1 + $0xc0] sm:$0xff]  ;;  %v2061_v39 = vld [vmem:[%s4178_s0 + $0x18] sm:$0xf0] }
   0xd   :  { %1550 = vmatpush.bf16.msra.mxu3 %v2846_v11  ;;  %v2051_v32 = vld [vmem:[%s4178_s0] sm:$0xf]  ;;  %v2689_v34 = vld [vmem:[%s4178_s0 + $0x4] sm:$0xf]  ;;  %v2059_v36 = vld [vmem:[%s4178_s0 + $0x8] sm:$0xf] }
   0xe   :  { %1044 = vmatpush.bf16.msra.mxu0 %v2821_v12  ;;  %v2690_v38 = vld [vmem:[%s4178_s0 + $0xc] sm:$0xf]  ;;  %v2052_v40 = vor.u32 %v2691_v33, %v2051_v32  ;;  %v2056_v41 = vor.u32 %v2689_v34, %v2053_v35  ;;  %v2060_v42 = vor.u32 %v2692_v37, %v2059_v36  ;;  %v2067_v44 = vld [vmem:[%s4178_s0 + $0x20] sm:$0xf]  ;;  %v2695_v45 = vld [vmem:[%s4178_s0 + $0x2c] sm:$0xf0] }
   0xf   :  { %1213 = vmatpush.bf16.msra.mxu1 %v2829_v13  ;;  %v2064_v43 = vor.u32 %v2690_v38, %v2061_v39  ;;  %v2693_v46 = vld [vmem:[%s4178_s0 + $0x24] sm:$0xf]  ;;  %v2069_v47 = vld [vmem:[%s4178_s0 + $0x30] sm:$0xf0]  ;;  %v2075_v48 = vld [vmem:[%s4178_s0 + $0x28] sm:$0xf]  ;;  %v2068_v52 = vor.u32 %v2695_v45, %v2067_v44 }
  0x10   :  { %1382 = vmatpush.bf16.msra.mxu2 %v2837_v14  ;;  %v2696_v49 = vld [vmem:[%s4178_s0 + $0x34] sm:$0xf0]  ;;  %v2694_v50 = vld [vmem:[%s4178_s0 + $0x2c] sm:$0xf]  ;;  %v2077_v51 = vld [vmem:[%s4178_s0 + $0x38] sm:$0xf0]  ;;  %v2072_v53 = vor.u32 %v2693_v46, %v2069_v47 }
  0x11   :  { %1551 = vmatpush.bf16.msra.mxu3 %v2845_v15  ;;  %v2076_v54 = vor.u32 %v2696_v49, %v2075_v48  ;;  %v2080_v55 = vor.u32 %v2694_v50, %v2077_v51  ;;  %v2083_v56 = vld [vmem:[%s4178_s0 + $0x40] sm:$0xf]  ;;  %v2699_v57 = vld [vmem:[%s4178_s0 + $0x4c] sm:$0xf0]  ;;  %v2697_v58 = vld [vmem:[%s4178_s0 + $0x44] sm:$0xf] }
  0x12   :  { %1045 = vmatpush.bf16.msra.mxu0 %v2820_v16  ;;  %v2085_v59 = vld [vmem:[%s4178_s0 + $0x50] sm:$0xf0]  ;;  %v2091_v60 = vld [vmem:[%s4178_s0 + $0x48] sm:$0xf]  ;;  %v2700_v61 = vld [vmem:[%s4178_s0 + $0x54] sm:$0xf0]  ;;  %v2084_v0 = vor.u32 %v2699_v57, %v2083_v56 }
  0x13   :  { %1214 = vmatpush.bf16.msra.mxu1 %v2828_v17  ;;  %v2698_v62 = vld [vmem:[%s4178_s0 + $0x4c] sm:$0xf]  ;;  %v2093_v63 = vld [vmem:[%s4178_s0 + $0x58] sm:$0xf0]  ;;  %v2088_v1 = vor.u32 %v2697_v58, %v2085_v59  ;;  %v2092_v2 = vor.u32 %v2700_v61, %v2091_v60  ;;  %v2099_v4 = vld [vmem:[%s4178_s0 + $0x60] sm:$0xf] }
  0x14   :  { %1383 = vmatpush.bf16.msra.mxu2 %v2836_v18  ;;  %v2096_v3 = vor.u32 %v2698_v62, %v2093_v63  ;;  %v2703_v5 = vld [vmem:[%s4178_s0 + $0x6c] sm:$0xf0]  ;;  %v2701_v6 = vld [vmem:[%s4178_s0 + $0x64] sm:$0xf]  ;;  %v2101_v7 = vld [vmem:[%s4178_s0 + $0x70] sm:$0xf0] }
  0x15   :  { %1552 = vmatpush.bf16.msra.mxu3 %v2844_v19  ;;  %v2107_v8 = vld [vmem:[%s4178_s0 + $0x68] sm:$0xf]  ;;  %v2704_v9 = vld [vmem:[%s4178_s0 + $0x74] sm:$0xf0]  ;;  %v2702_v10 = vld [vmem:[%s4178_s0 + $0x6c] sm:$0xf]  ;;  %v2100_v12 = vor.u32 %v2703_v5, %v2099_v4  ;;  %v2104_v13 = vor.u32 %v2701_v6, %v2101_v7 }
  0x16   :  { %1046 = vmatpush.bf16.msra.mxu0 %v2819_v20  ;;  %v2109_v11 = vld [vmem:[%s4178_s0 + $0x78] sm:$0xf0]  ;;  %v2108_v14 = vor.u32 %v2704_v9, %v2107_v8  ;;  %v2115_v16 = vld [vmem:[%s4178_s0 + $0x80] sm:$0xf]  ;;  %v2707_v17 = vld [vmem:[%s4178_s0 + $0x8c] sm:$0xf0] }
  0x17   :  { %1215 = vmatpush.bf16.msra.mxu1 %v2827_v21  ;;  %v2112_v15 = vor.u32 %v2702_v10, %v2109_v11  ;;  %v2705_v18 = vld [vmem:[%s4178_s0 + $0x84] sm:$0xf]  ;;  %v2117_v19 = vld [vmem:[%s4178_s0 + $0x90] sm:$0xf0]  ;;  %v2123_v20 = vld [vmem:[%s4178_s0 + $0x88] sm:$0xf] }
  0x18   :  { %1384 = vmatpush.bf16.msra.mxu2 %v2835_v22  ;;  %v2708_v21 = vld [vmem:[%s4178_s0 + $0x94] sm:$0xf0]  ;;  %v2706_v22 = vld [vmem:[%s4178_s0 + $0x8c] sm:$0xf]  ;;  %v2139_v32 = vld [vmem:[%s4178_s0 + $0xa8] sm:$0xf] }
  0x19   :  { %1553 = vmatpush.bf16.msra.mxu3 %v2843_v23  ;;  %v2125_v23 = vld [vmem:[%s4178_s0 + $0x98] sm:$0xf0]  ;;  %v2712_v33 = vld [vmem:[%s4178_s0 + $0xb4] sm:$0xf0]  ;;  %v2710_v34 = vld [vmem:[%s4178_s0 + $0xac] sm:$0xf] }
  0x1a   :  { %1047 = vmatpush.bf16.msra.mxu0 %v2818_v24  ;;  %v2116_v24 = vor.u32 %v2707_v17, %v2115_v16  ;;  %v2141_v35 = vld [vmem:[%s4178_s0 + $0xb8] sm:$0xf0]  ;;  %v2140_v38 = vor.u32 %v2712_v33, %v2139_v32  ;;  %v2155_v44 = vld [vmem:[%s4178_s0 + $0xc8] sm:$0xf]  ;;  %v2716_v45 = vld [vmem:[%s4178_s0 + $0xd4] sm:$0xf0] }
  0x1b   :  { %1216 = vmatpush.bf16.msra.mxu1 %v2826_v25  ;;  %v2120_v25 = vor.u32 %v2705_v18, %v2117_v19  ;;  %v2144_v39 = vor.u32 %v2710_v34, %v2141_v35  ;;  %v2714_v46 = vld [vmem:[%s4178_s0 + $0xcc] sm:$0xf]  ;;  %v2157_v47 = vld [vmem:[%s4178_s0 + $0xd8] sm:$0xf0]  ;;  %v2156_v50 = vor.u32 %v2716_v45, %v2155_v44  ;;  %v2171_v56 = vld [vmem:[%s4178_s0 + $0xe8] sm:$0xf] }
  0x1c   :  { %1385 = vmatpush.bf16.msra.mxu2 %v2834_v26  ;;  %v2124_v26 = vor.u32 %v2708_v21, %v2123_v20  ;;  %v2160_v51 = vor.u32 %v2714_v46, %v2157_v47  ;;  %v2720_v57 = vld [vmem:[%s4178_s0 + $0xf4] sm:$0xf0]  ;;  %v2718_v58 = vld [vmem:[%s4178_s0 + $0xec] sm:$0xf]  ;;  %v2173_v59 = vld [vmem:[%s4178_s0 + $0xf8] sm:$0xf0] }
  0x1d   :  { %1554 = vmatpush.bf16.msra.mxu3 %v2842_v27  ;;  %v2128_v27 = vor.u32 %v2706_v22, %v2125_v23  ;;  %v2172_v62 = vor.u32 %v2720_v57, %v2171_v56  ;;  %v2176_v63 = vor.u32 %v2718_v58, %v2173_v59  ;;  %v2187_v4 = vld [vmem:[%s4178_s0 + $0x108] sm:$0xf]  ;;  %v2724_v5 = vld [vmem:[%s4178_s0 + $0x114] sm:$0xf0]  ;;  %v2722_v6 = vld [vmem:[%s4178_s0 + $0x10c] sm:$0xf] }
  0x1e   :  { %1048 = vmatpush.bf16.msra.mxu0 %v2817_v28  ;;  %v2131_v28 = vld [vmem:[%s4178_s0 + $0xa0] sm:$0xf]  ;;  %v2189_v7 = vld [vmem:[%s4178_s0 + $0x118] sm:$0xf0]  ;;  %v2727_v22 = vld [vmem:[%s4178_s0 + $0x12c] sm:$0xf0] }
  0x1f   :  { %1217 = vmatpush.bf16.msra.mxu1 %v2825_v29  ;;  %v2711_v29 = vld [vmem:[%s4178_s0 + $0xac] sm:$0xf0]  ;;  %v3385_v20 = vld [vmem:[%s4179_s2] ss:$0 sm:$0xff]  ;;  %v2729_v58 = vld [vmem:[%s4178_s0 + $0x144] sm:$0xf] }
  0x20   :  { %1386 = vmatpush.bf16.msra.mxu2 %v2833_v30  ;;  %v2709_v30 = vld [vmem:[%s4178_s0 + $0xa4] sm:$0xf]  ;;  %v2132_v36 = vor.u32 %v2711_v29, %v2131_v28  ;;  %v2195_v21 = vld [vmem:[%s4178_s0 + $0x120] sm:$0xf]  ;;  %v2726_v28 = vld [vmem:[%s4178_s0 + $0x12c] sm:$0xf] }
  0x21   :  { %1555 = vmatpush.bf16.msra.mxu3 %v2841_v31  ;;  %1049 = vmatmul.bf16.vlgmr.msra.gmra.mxu0 %v2052_v40  ;;  %v2133_v31 = vld [vmem:[%s4178_s0 + $0xb0] sm:$0xf0]  ;;  %v2147_v40 = vld [vmem:[%s4178_s0 + $0xc0] sm:$0xf]  ;;  %v2205_v29 = vld [vmem:[%s4178_s0 + $0x138] sm:$0xf0]  ;;  %v2196_v33 = vor.u32 %v2727_v22, %v2195_v21 }
  0x22   :  { %1218 = vmatmul.bf16.vlgmr.msra.gmra.mxu1 %v2056_v41  ;;  %v2136_v37 = vor.u32 %v2709_v30, %v2133_v31  ;;  %v2715_v41 = vld [vmem:[%s4178_s0 + $0xcc] sm:$0xf0]  ;;  %v2213_v59 = vld [vmem:[%s4178_s0 + $0x150] sm:$0xf0] }
  0x23   :  { %1387 = vmatmul.bf16.vlgmr.msra.gmra.mxu2 %v2060_v42  ;;  %v2713_v42 = vld [vmem:[%s4178_s0 + $0xc4] sm:$0xf]  ;;  %v2148_v48 = vor.u32 %v2715_v41, %v2147_v40  ;;  %v2208_v41 = vor.u32 %v2726_v28, %v2205_v29  ;;  %v2731_v56 = vld [vmem:[%s4178_s0 + $0x14c] sm:$0xf0]  ;;  %v2229_v29 = vld [vmem:[%s4178_s0 + $0x170] sm:$0xf0] }
  0x24   :  { %1556 = vmatmul.bf16.vlgmr.msra.gmra.mxu3 %v2064_v43  ;;  %v2149_v43 = vld [vmem:[%s4178_s0 + $0xd0] sm:$0xf0] }
  0x25   :  { %v2152_v49 = vor.u32 %v2713_v42, %v2149_v43 }
  0x31   :  { %1054 = vmatmul.bf16.gmra.mxu0 %v2068_v52  ;;  %v2163_v52 = vld [vmem:[%s4178_s0 + $0xe0] sm:$0xf] }
  0x32   :  { %1223 = vmatmul.bf16.gmra.mxu1 %v2072_v53  ;;  %v2719_v53 = vld [vmem:[%s4178_s0 + $0xec] sm:$0xf0] }
  0x33   :  { %1392 = vmatmul.bf16.gmra.mxu2 %v2076_v54  ;;  %v2717_v54 = vld [vmem:[%s4178_s0 + $0xe4] sm:$0xf]  ;;  %v2164_v60 = vor.u32 %v2719_v53, %v2163_v52 }
  0x34   :  { %1561 = vmatmul.bf16.gmra.mxu3 %v2080_v55  ;;  %v2165_v55 = vld [vmem:[%s4178_s0 + $0xf0] sm:$0xf0] }
  0x35   :  { %v2168_v61 = vor.u32 %v2717_v54, %v2165_v55  ;;  %v2211_v55 = vld [vmem:[%s4178_s0 + $0x140] sm:$0xf] }
  0x41   :  { %1059 = vmatmul.bf16.gmra.mxu0 %v2084_v0  ;;  %v2179_v0 = vld [vmem:[%s4178_s0 + $0x100] sm:$0xf] }
  0x42   :  { %1228 = vmatmul.bf16.gmra.mxu1 %v2088_v1  ;;  %v2723_v1 = vld [vmem:[%s4178_s0 + $0x10c] sm:$0xf0] }
  0x43   :  { %1397 = vmatmul.bf16.gmra.mxu2 %v2092_v2  ;;  %v2721_v2 = vld [vmem:[%s4178_s0 + $0x104] sm:$0xf]  ;;  %v2180_v8 = vor.u32 %v2723_v1, %v2179_v0 }
  0x44   :  { %1566 = vmatmul.bf16.gmra.mxu3 %v2096_v3  ;;  %v2181_v3 = vld [vmem:[%s4178_s0 + $0x110] sm:$0xf0] }
  0x45   :  { %v2184_v9 = vor.u32 %v2721_v2, %v2181_v3  ;;  %v2212_v3 = vor.u32 %v2731_v56, %v2211_v55 }
  0x51   :  { %1064 = vmatmul.bf16.gmra.mxu0 %v2100_v12  ;;  %v2188_v12 = vor.u32 %v2724_v5, %v2187_v4  ;;  %v2216_v4 = vor.u32 %v2729_v58, %v2213_v59  ;;  %v2243_v59 = vld [vmem:[%s4178_s0 + $0x180] sm:$0xf] }
  0x52   :  { %1233 = vmatmul.bf16.gmra.mxu1 %v2104_v13  ;;  %v2192_v13 = vor.u32 %v2722_v6, %v2189_v7 }
  0x53   :  { %1402 = vmatmul.bf16.gmra.mxu2 %v2108_v14 }
  0x54   :  { %1571 = vmatmul.bf16.gmra.mxu3 %v2112_v15 }
  0x61   :  { %1069 = vmatmul.bf16.gmra.mxu0 %v2116_v24  ;;  %v2725_v24 = vld [vmem:[%s4178_s0 + $0x124] sm:$0xf] }
  0x62   :  { %1238 = vmatmul.bf16.gmra.mxu1 %v2120_v25  ;;  %v2197_v25 = vld [vmem:[%s4178_s0 + $0x130] sm:$0xf0] }
  0x63   :  { %1407 = vmatmul.bf16.gmra.mxu2 %v2124_v26  ;;  %v2203_v26 = vld [vmem:[%s4178_s0 + $0x128] sm:$0xf]  ;;  %v2200_v34 = vor.u32 %v2725_v24, %v2197_v25  ;;  %v2227_v25 = vld [vmem:[%s4178_s0 + $0x160] sm:$0xf] }
  0x64   :  { %1576 = vmatmul.bf16.gmra.mxu3 %v2128_v27  ;;  %v2728_v27 = vld [vmem:[%s4178_s0 + $0x134] sm:$0xf0] }
  0x65   :  { %v2204_v40 = vor.u32 %v2728_v27, %v2203_v26  ;;  %v2735_v26 = vld [vmem:[%s4178_s0 + $0x16c] sm:$0xf0]  ;;  %v2733_v27 = vld [vmem:[%s4178_s0 + $0x164] sm:$0xf] }
  0x71   :  { %1074 = vmatmul.bf16.gmra.mxu0 %v2132_v36  ;;  %v3415_v36 = vld [vmem:[%s4180_s3] ss:$0 sm:$0xff] }
  0x72   :  { %1243 = vmatmul.bf16.gmra.mxu1 %v2136_v37 }
  0x73   :  { %1412 = vmatmul.bf16.gmra.mxu2 %v2140_v38 }
  0x74   :  { %1581 = vmatmul.bf16.gmra.mxu3 %v2144_v39 }
  0x81   :  { %1079 = vmatmul.bf16.gmra.mxu0 %v2148_v48 }
  0x82   :  { %1248 = vmatmul.bf16.gmra.mxu1 %v2152_v49 }
  0x83   :  { %1417 = vmatmul.bf16.gmra.mxu2 %v2156_v50 }
  0x84   :  { %1586 = vmatmul.bf16.gmra.mxu3 %v2160_v51 }
  0x91   :  { %1084 = vmatmul.bf16.gmra.mxu0 %v2164_v60  ;;  %v2219_v60 = vld [vmem:[%s4178_s0 + $0x148] sm:$0xf] }
  0x92   :  { %1253 = vmatmul.bf16.gmra.mxu1 %v2168_v61  ;;  %v2732_v61 = vld [vmem:[%s4178_s0 + $0x154] sm:$0xf0] }
  0x93   :  { %1422 = vmatmul.bf16.gmra.mxu2 %v2172_v62  ;;  %v2730_v62 = vld [vmem:[%s4178_s0 + $0x14c] sm:$0xf] }
  0x94   :  { %1591 = vmatmul.bf16.gmra.mxu3 %v2176_v63  ;;  %v2221_v63 = vld [vmem:[%s4178_s0 + $0x158] sm:$0xf0] }
  0x9e   :  { %v1050_v10 = vpop.f32.mrf.mxu0 }
  0x9f   :  { %v1219_v11 = vpop.f32.mrf.mxu1 }
  0xa0   :  { %v1220_v14 = vadd.f32 %v1219_v11, %v1050_v10  ;;  %v2224_v10 = vor.u32 %v2730_v62, %v2221_v63  ;;  %v2245_v63 = vld [vmem:[%s4178_s0 + $0x190] sm:$0xf0] }
  0xa1   :  { %1089 = vmatmul.bf16.gmra.mxu0 %v2180_v8 }
  0xa2   :  { %1258 = vmatmul.bf16.gmra.mxu1 %v2184_v9  ;;  %v2220_v9 = vor.u32 %v2732_v61, %v2219_v60  ;;  %v2739_v60 = vld [vmem:[%s4178_s0 + $0x18c] sm:$0xf0]  ;;  %v2737_v61 = vld [vmem:[%s4178_s0 + $0x184] sm:$0xf] }
  0xa3   :  { %1427 = vmatmul.bf16.gmra.mxu2 %v2188_v12 }
  0xa4   :  { %1596 = vmatmul.bf16.gmra.mxu3 %v2192_v13 }
  0xa6   :  { %v1388_v15 = vpop.f32.mrf.mxu2  ;;  %v1052_v18 = vpop.f32.mrf.mxu0 }
  0xa7   :  { %v1557_v16 = vpop.f32.mrf.mxu3  ;;  %v1389_v17 = vadd.f32 %v1388_v15, %v1220_v14  ;;  %v1221_v19 = vpop.f32.mrf.mxu1 }
  0xa8   :  { %v1222_v30 = vadd.f32 %v1221_v19, %v1052_v18 }
  0xa9   :  { %v1558_v23 = vadd.f32 %v1557_v16, %v1389_v17 }
  0xab   :  { %v1721_v35 = vmul.f32 %v3385_v20, %v1558_v23 }
  0xad   :  { %v1789_v43 = vadd.f32 %v3415_v36, %v1721_v35 }
  0xae   :  { %v1390_v31 = vpop.f32.mrf.mxu2  ;;  %v1055_v38 = vpop.f32.mrf.mxu0 }
  0xaf   :  { %v1559_v32 = vpop.f32.mrf.mxu3  ;;  %v1391_v37 = vadd.f32 %v1390_v31, %v1222_v30  ;;  %v1224_v39 = vpop.f32.mrf.mxu1  ;;  %v1853_v49 = vmax.f32 %v1789_v43, 0.0  ;;  %v2235_v30 = vld [vmem:[%s4178_s0 + $0x168] sm:$0xf]  ;;  %v2736_v31 = vld [vmem:[%s4178_s0 + $0x174] sm:$0xf0] }
  0xb0   :  { %v1225_v45 = vadd.f32 %v1224_v39, %v1055_v38  ;;  %v2228_v38 = vor.u32 %v2735_v26, %v2227_v25  ;;  %v2232_v39 = vor.u32 %v2733_v27, %v2229_v29  ;;  %v2259_v29 = vld [vmem:[%s4178_s0 + $0x1a0] sm:$0xf] }
  0xb1   :  { %v1560_v42 = vadd.f32 %v1559_v32, %v1391_v37  ;;  %1094 = vmatmul.bf16.gmra.mxu0 %v2196_v33  ;;  %v2734_v32 = vld [vmem:[%s4178_s0 + $0x16c] sm:$0xf]  ;;  %v2237_v33 = vld [vmem:[%s4178_s0 + $0x178] sm:$0xf0] }
  0xb2   :  { %1263 = vmatmul.bf16.gmra.mxu1 %v2200_v34 }
  0xb3   :  { %v1722_v44 = vmul.f32 %v3385_v20, %v1560_v42  ;;  %1432 = vmatmul.bf16.gmra.mxu2 %v2204_v40 }
  0xb4   :  { %1601 = vmatmul.bf16.gmra.mxu3 %v2208_v41 }
  0xb5   :  { %v1790_v46 = vadd.f32 %v3415_v36, %v1722_v44  ;;  %v2236_v44 = vor.u32 %v2736_v31, %v2235_v30  ;;  %v2743_v30 = vld [vmem:[%s4178_s0 + $0x1ac] sm:$0xf0]  ;;  %v2741_v31 = vld [vmem:[%s4178_s0 + $0x1a4] sm:$0xf] }
  0xb6   :  { %v1393_v47 = vpop.f32.mrf.mxu2  ;;  %v1057_v52 = vpop.f32.mrf.mxu0 }
  0xb7   :  { %v1562_v48 = vpop.f32.mrf.mxu3  ;;  %v1854_v50 = vmax.f32 %v1790_v46, 0.0  ;;  %v1394_v51 = vadd.f32 %v1393_v47, %v1225_v45  ;;  %v1226_v53 = vpop.f32.mrf.mxu1  ;;  %v2240_v45 = vor.u32 %v2734_v32, %v2237_v33  ;;  %v2261_v33 = vld [vmem:[%s4178_s0 + $0x1b0] sm:$0xf0] }
  0xb8   :  { %v1227_v0 = vadd.f32 %v1226_v53, %v1057_v52 }
  0xb9   :  { %v2852_v54 = vpack.c.bf16 %v1854_v50, %v1853_v49  ;;  %v1563_v57 = vadd.f32 %v1562_v48, %v1394_v51 }
  0xbb   :  { %2853 = vst [vmem:[%s4181_s4] sm:$0xff] %v2852_v54   ;;  %v1723_v5 = vmul.f32 %v3385_v20, %v1563_v57 }
  0xbd   :  { %v1791_v12 = vadd.f32 %v3415_v36, %v1723_v5 }
  0xbe   :  { %v1395_v1 = vpop.f32.mrf.mxu2  ;;  %v1060_v7 = vpop.f32.mrf.mxu0 }
  0xbf   :  { %v1564_v2 = vpop.f32.mrf.mxu3  ;;  %v1396_v6 = vadd.f32 %v1395_v1, %v1227_v0  ;;  %v1229_v8 = vpop.f32.mrf.mxu1  ;;  %v1855_v18 = vmax.f32 %v1791_v12, 0.0  ;;  %v2251_v0 = vld [vmem:[%s4178_s0 + $0x188] sm:$0xf]  ;;  %v2740_v1 = vld [vmem:[%s4178_s0 + $0x194] sm:$0xf0] }
  0xc0   :  { %v1230_v14 = vadd.f32 %v1229_v8, %v1060_v7  ;;  %v2244_v7 = vor.u32 %v2739_v60, %v2243_v59  ;;  %v2248_v8 = vor.u32 %v2737_v61, %v2245_v63  ;;  %v2275_v63 = vld [vmem:[%s4178_s0 + $0x1c0] sm:$0xf] }
  0xc1   :  { %v1565_v11 = vadd.f32 %v1564_v2, %v1396_v6  ;;  %1099 = vmatmul.bf16.gmra.mxu0 %v2212_v3  ;;  %v2738_v2 = vld [vmem:[%s4178_s0 + $0x18c] sm:$0xf]  ;;  %v2253_v3 = vld [vmem:[%s4178_s0 + $0x198] sm:$0xf0] }
  0xc2   :  { %1268 = vmatmul.bf16.gmra.mxu1 %v2216_v4 }
  0xc3   :  { %v1724_v13 = vmul.f32 %v3385_v20, %v1565_v11  ;;  %1437 = vmatmul.bf16.gmra.mxu2 %v2220_v9 }
  0xc4   :  { %1606 = vmatmul.bf16.gmra.mxu3 %v2224_v10 }
  0xc5   :  { %v1792_v15 = vadd.f32 %v3415_v36, %v1724_v13  ;;  %v2252_v13 = vor.u32 %v2740_v1, %v2251_v0  ;;  %v2747_v0 = vld [vmem:[%s4178_s0 + $0x1cc] sm:$0xf0]  ;;  %v2745_v1 = vld [vmem:[%s4178_s0 + $0x1c4] sm:$0xf] }
  0xc6   :  { %v1398_v16 = vpop.f32.mrf.mxu2  ;;  %v1062_v22 = vpop.f32.mrf.mxu0 }
  0xc7   :  { %v1567_v17 = vpop.f32.mrf.mxu3  ;;  %v1856_v19 = vmax.f32 %v1792_v15, 0.0  ;;  %v1399_v21 = vadd.f32 %v1398_v16, %v1230_v14  ;;  %v1231_v23 = vpop.f32.mrf.mxu1  ;;  %v2256_v14 = vor.u32 %v2738_v2, %v2253_v3  ;;  %v2277_v3 = vld [vmem:[%s4178_s0 + $0x1d0] sm:$0xf0] }
  0xc8   :  { %v1232_v34 = vadd.f32 %v1231_v23, %v1062_v22 }
  0xc9   :  { %v2857_v24 = vpack.c.bf16 %v1856_v19, %v1855_v18  ;;  %v1568_v28 = vadd.f32 %v1567_v17, %v1399_v21 }
  0xcb   :  { %3009 = vst [vmem:[%s4181_s4 + $0x8] sm:$0xff] %v2857_v24   ;;  %v1725_v40 = vmul.f32 %v3385_v20, %v1568_v28 }
  0xcd   :  { %v1793_v47 = vadd.f32 %v3415_v36, %v1725_v40 }
  0xce   :  { %v1400_v35 = vpop.f32.mrf.mxu2  ;;  %v1065_v42 = vpop.f32.mrf.mxu0 }
  0xcf   :  { %v1569_v37 = vpop.f32.mrf.mxu3  ;;  %v1401_v41 = vadd.f32 %v1400_v35, %v1232_v34  ;;  %v1234_v43 = vpop.f32.mrf.mxu1  ;;  %v1857_v53 = vmax.f32 %v1793_v47, 0.0  ;;  %v2267_v34 = vld [vmem:[%s4178_s0 + $0x1a8] sm:$0xf]  ;;  %v2744_v35 = vld [vmem:[%s4178_s0 + $0x1b4] sm:$0xf0] }
  0xd0   :  { %v1235_v49 = vadd.f32 %v1234_v43, %v1065_v42  ;;  %v2260_v42 = vor.u32 %v2743_v30, %v2259_v29  ;;  %v2264_v43 = vor.u32 %v2741_v31, %v2261_v33  ;;  %v2291_v33 = vld [vmem:[%s4178_s0 + $0x1e0] sm:$0xf] }
  0xd1   :  { %v1570_v46 = vadd.f32 %v1569_v37, %v1401_v41  ;;  %1104 = vmatmul.bf16.gmra.mxu0 %v2228_v38  ;;  %v2742_v37 = vld [vmem:[%s4178_s0 + $0x1ac] sm:$0xf]  ;;  %v2269_v38 = vld [vmem:[%s4178_s0 + $0x1b8] sm:$0xf0] }
  0xd2   :  { %1273 = vmatmul.bf16.gmra.mxu1 %v2232_v39 }
  0xd3   :  { %v1726_v48 = vmul.f32 %v3385_v20, %v1570_v46  ;;  %1442 = vmatmul.bf16.gmra.mxu2 %v2236_v44 }
  0xd4   :  { %1611 = vmatmul.bf16.gmra.mxu3 %v2240_v45 }
  0xd5   :  { %v1794_v50 = vadd.f32 %v3415_v36, %v1726_v48  ;;  %v2268_v48 = vor.u32 %v2744_v35, %v2267_v34  ;;  %v2751_v34 = vld [vmem:[%s4178_s0 + $0x1ec] sm:$0xf0]  ;;  %v2749_v35 = vld [vmem:[%s4178_s0 + $0x1e4] sm:$0xf] }
  0xd6   :  { %v1403_v51 = vpop.f32.mrf.mxu2  ;;  %v1067_v56 = vpop.f32.mrf.mxu0 }
  0xd7   :  { %v1572_v52 = vpop.f32.mrf.mxu3  ;;  %v1858_v54 = vmax.f32 %v1794_v50, 0.0  ;;  %v1404_v55 = vadd.f32 %v1403_v51, %v1235_v49  ;;  %v1236_v57 = vpop.f32.mrf.mxu1  ;;  %v2272_v49 = vor.u32 %v2742_v37, %v2269_v38  ;;  %v2293_v38 = vld [vmem:[%s4178_s0 + $0x1f0] sm:$0xf0] }
  0xd8   :  { %v1237_v4 = vadd.f32 %v1236_v57, %v1067_v56 }
  0xd9   :  { %v2862_v58 = vpack.c.bf16 %v1858_v54, %v1857_v53  ;;  %v1573_v62 = vadd.f32 %v1572_v52, %v1404_v55 }
  0xdb   :  { %3010 = vst [vmem:[%s4181_s4 + $0x10] sm:$0xff] %v2862_v58   ;;  %v1727_v9 = vmul.f32 %v3385_v20, %v1573_v62 }
  0xdd   :  { %v1795_v16 = vadd.f32 %v3415_v36, %v1727_v9 }
  0xde   :  { %v1405_v5 = vpop.f32.mrf.mxu2  ;;  %v1070_v11 = vpop.f32.mrf.mxu0 }
  0xdf   :  { %v1574_v6 = vpop.f32.mrf.mxu3  ;;  %v1406_v10 = vadd.f32 %v1405_v5, %v1237_v4  ;;  %v1239_v12 = vpop.f32.mrf.mxu1  ;;  %v1859_v23 = vmax.f32 %v1795_v16, 0.0  ;;  %v2283_v4 = vld [vmem:[%s4178_s0 + $0x1c8] sm:$0xf]  ;;  %v2748_v5 = vld [vmem:[%s4178_s0 + $0x1d4] sm:$0xf0] }
  0xe0   :  { %v1240_v18 = vadd.f32 %v1239_v12, %v1070_v11  ;;  %v2276_v11 = vor.u32 %v2747_v0, %v2275_v63  ;;  %v2280_v12 = vor.u32 %v2745_v1, %v2277_v3  ;;  %v2307_v3 = vld [vmem:[%s4178_s0 + $0x200] sm:$0xf] }
  0xe1   :  { %v1575_v15 = vadd.f32 %v1574_v6, %v1406_v10  ;;  %1109 = vmatmul.bf16.gmra.mxu0 %v2244_v7  ;;  %v2746_v6 = vld [vmem:[%s4178_s0 + $0x1cc] sm:$0xf]  ;;  %v2285_v7 = vld [vmem:[%s4178_s0 + $0x1d8] sm:$0xf0] }
  0xe2   :  { %1278 = vmatmul.bf16.gmra.mxu1 %v2248_v8 }
  0xe3   :  { %v1728_v17 = vmul.f32 %v3385_v20, %v1575_v15  ;;  %1447 = vmatmul.bf16.gmra.mxu2 %v2252_v13 }
  0xe4   :  { %1616 = vmatmul.bf16.gmra.mxu3 %v2256_v14 }
  0xe5   :  { %v1796_v19 = vadd.f32 %v3415_v36, %v1728_v17  ;;  %v2284_v17 = vor.u32 %v2748_v5, %v2283_v4  ;;  %v2755_v4 = vld [vmem:[%s4178_s0 + $0x20c] sm:$0xf0]  ;;  %v2753_v5 = vld [vmem:[%s4178_s0 + $0x204] sm:$0xf] }
  0xe6   :  { %v1408_v21 = vpop.f32.mrf.mxu2  ;;  %v1072_v26 = vpop.f32.mrf.mxu0 }
  0xe7   :  { %v1577_v22 = vpop.f32.mrf.mxu3  ;;  %v1860_v24 = vmax.f32 %v1796_v19, 0.0  ;;  %v1409_v25 = vadd.f32 %v1408_v21, %v1240_v18  ;;  %v1241_v27 = vpop.f32.mrf.mxu1  ;;  %v2288_v18 = vor.u32 %v2746_v6, %v2285_v7  ;;  %v2309_v7 = vld [vmem:[%s4178_s0 + $0x210] sm:$0xf0] }
  0xe8   :  { %v1242_v39 = vadd.f32 %v1241_v27, %v1072_v26 }
  0xe9   :  { %v2867_v28 = vpack.c.bf16 %v1860_v24, %v1859_v23  ;;  %v1578_v32 = vadd.f32 %v1577_v22, %v1409_v25 }
  0xeb   :  { %3011 = vst [vmem:[%s4181_s4 + $0x18] sm:$0xff] %v2867_v28   ;;  %v1729_v44 = vmul.f32 %v3385_v20, %v1578_v32 }
  0xed   :  { %v1797_v51 = vadd.f32 %v3415_v36, %v1729_v44 }
  0xee   :  { %v1410_v40 = vpop.f32.mrf.mxu2  ;;  %v1075_v46 = vpop.f32.mrf.mxu0 }
  0xef   :  { %v1579_v41 = vpop.f32.mrf.mxu3  ;;  %v1411_v45 = vadd.f32 %v1410_v40, %v1242_v39  ;;  %v1244_v47 = vpop.f32.mrf.mxu1  ;;  %v1861_v57 = vmax.f32 %v1797_v51, 0.0  ;;  %v2299_v39 = vld [vmem:[%s4178_s0 + $0x1e8] sm:$0xf]  ;;  %v2752_v40 = vld [vmem:[%s4178_s0 + $0x1f4] sm:$0xf0] }
  0xf0   :  { %v1245_v53 = vadd.f32 %v1244_v47, %v1075_v46  ;;  %v2292_v46 = vor.u32 %v2751_v34, %v2291_v33  ;;  %v2296_v47 = vor.u32 %v2749_v35, %v2293_v38  ;;  %v2323_v38 = vld [vmem:[%s4178_s0 + $0x220] sm:$0xf] }
  0xf1   :  { %v1580_v50 = vadd.f32 %v1579_v41, %v1411_v45  ;;  %1114 = vmatmul.bf16.gmra.mxu0 %v2260_v42  ;;  %v2750_v41 = vld [vmem:[%s4178_s0 + $0x1ec] sm:$0xf]  ;;  %v2301_v42 = vld [vmem:[%s4178_s0 + $0x1f8] sm:$0xf0] }
  0xf2   :  { %1283 = vmatmul.bf16.gmra.mxu1 %v2264_v43 }
  0xf3   :  { %v1730_v52 = vmul.f32 %v3385_v20, %v1580_v50  ;;  %1452 = vmatmul.bf16.gmra.mxu2 %v2268_v48 }
  0xf4   :  { %1621 = vmatmul.bf16.gmra.mxu3 %v2272_v49 }
  0xf5   :  { %v1798_v54 = vadd.f32 %v3415_v36, %v1730_v52  ;;  %v2300_v52 = vor.u32 %v2752_v40, %v2299_v39  ;;  %v2759_v39 = vld [vmem:[%s4178_s0 + $0x22c] sm:$0xf0]  ;;  %v2757_v40 = vld [vmem:[%s4178_s0 + $0x224] sm:$0xf] }
  0xf6   :  { %v1413_v55 = vpop.f32.mrf.mxu2  ;;  %v1077_v60 = vpop.f32.mrf.mxu0 }
  0xf7   :  { %v1582_v56 = vpop.f32.mrf.mxu3  ;;  %v1862_v58 = vmax.f32 %v1798_v54, 0.0  ;;  %v1414_v59 = vadd.f32 %v1413_v55, %v1245_v53  ;;  %v1246_v61 = vpop.f32.mrf.mxu1  ;;  %v2304_v53 = vor.u32 %v2750_v41, %v2301_v42  ;;  %v2325_v42 = vld [vmem:[%s4178_s0 + $0x230] sm:$0xf0] }
  0xf8   :  { %v1247_v8 = vadd.f32 %v1246_v61, %v1077_v60 }
  0xf9   :  { %v2872_v62 = vpack.c.bf16 %v1862_v58, %v1861_v57  ;;  %v1583_v2 = vadd.f32 %v1582_v56, %v1414_v59 }
  0xfb   :  { %3012 = vst [vmem:[%s4181_s4 + $0x20] sm:$0xff] %v2872_v62   ;;  %v1731_v13 = vmul.f32 %v3385_v20, %v1583_v2 }
  0xfd   :  { %v1799_v21 = vadd.f32 %v3415_v36, %v1731_v13 }
  0xfe   :  { %v1415_v9 = vpop.f32.mrf.mxu2  ;;  %v1080_v15 = vpop.f32.mrf.mxu0 }
  0xff   :  { %v1584_v10 = vpop.f32.mrf.mxu3  ;;  %v1416_v14 = vadd.f32 %v1415_v9, %v1247_v8  ;;  %v1249_v16 = vpop.f32.mrf.mxu1  ;;  %v1863_v27 = vmax.f32 %v1799_v21, 0.0  ;;  %v2315_v8 = vld [vmem:[%s4178_s0 + $0x208] sm:$0xf]  ;;  %v2756_v9 = vld [vmem:[%s4178_s0 + $0x214] sm:$0xf0] }
 0x100   :  { %v1250_v23 = vadd.f32 %v1249_v16, %v1080_v15  ;;  %v2308_v15 = vor.u32 %v2755_v4, %v2307_v3  ;;  %v2312_v16 = vor.u32 %v2753_v5, %v2309_v7  ;;  %v2339_v7 = vld [vmem:[%s4178_s0 + $0x240] sm:$0xf] }
 0x101   :  { %v1585_v19 = vadd.f32 %v1584_v10, %v1416_v14  ;;  %1119 = vmatmul.bf16.gmra.mxu0 %v2276_v11  ;;  %v2754_v10 = vld [vmem:[%s4178_s0 + $0x20c] sm:$0xf]  ;;  %v2317_v11 = vld [vmem:[%s4178_s0 + $0x218] sm:$0xf0] }
 0x102   :  { %1288 = vmatmul.bf16.gmra.mxu1 %v2280_v12 }
 0x103   :  { %v1732_v22 = vmul.f32 %v3385_v20, %v1585_v19  ;;  %1457 = vmatmul.bf16.gmra.mxu2 %v2284_v17 }
 0x104   :  { %1626 = vmatmul.bf16.gmra.mxu3 %v2288_v18 }
 0x105   :  { %v1800_v24 = vadd.f32 %v3415_v36, %v1732_v22  ;;  %v2316_v22 = vor.u32 %v2756_v9, %v2315_v8  ;;  %v2763_v8 = vld [vmem:[%s4178_s0 + $0x24c] sm:$0xf0]  ;;  %v2761_v9 = vld [vmem:[%s4178_s0 + $0x244] sm:$0xf] }
 0x106   :  { %v1418_v25 = vpop.f32.mrf.mxu2  ;;  %v1082_v30 = vpop.f32.mrf.mxu0 }
 0x107   :  { %v1587_v26 = vpop.f32.mrf.mxu3  ;;  %v1864_v28 = vmax.f32 %v1800_v24, 0.0  ;;  %v1419_v29 = vadd.f32 %v1418_v25, %v1250_v23  ;;  %v1251_v31 = vpop.f32.mrf.mxu1  ;;  %v2320_v23 = vor.u32 %v2754_v10, %v2317_v11  ;;  %v2341_v11 = vld [vmem:[%s4178_s0 + $0x250] sm:$0xf0] }
 0x108   :  { %v1252_v43 = vadd.f32 %v1251_v31, %v1082_v30 }
 0x109   :  { %v2877_v32 = vpack.c.bf16 %v1864_v28, %v1863_v27  ;;  %v1588_v37 = vadd.f32 %v1587_v26, %v1419_v29 }
 0x10b   :  { %3013 = vst [vmem:[%s4181_s4 + $0x28] sm:$0xff] %v2877_v32   ;;  %v1733_v48 = vmul.f32 %v3385_v20, %v1588_v37 }
 0x10d   :  { %v1801_v55 = vadd.f32 %v3415_v36, %v1733_v48 }
 0x10e   :  { %v1420_v44 = vpop.f32.mrf.mxu2  ;;  %v1085_v50 = vpop.f32.mrf.mxu0 }
 0x10f   :  { %v1589_v45 = vpop.f32.mrf.mxu3  ;;  %v1421_v49 = vadd.f32 %v1420_v44, %v1252_v43  ;;  %v1254_v51 = vpop.f32.mrf.mxu1  ;;  %v1865_v61 = vmax.f32 %v1801_v55, 0.0  ;;  %v2331_v43 = vld [vmem:[%s4178_s0 + $0x228] sm:$0xf]  ;;  %v2760_v44 = vld [vmem:[%s4178_s0 + $0x234] sm:$0xf0] }
 0x110   :  { %v1255_v57 = vadd.f32 %v1254_v51, %v1085_v50  ;;  %v2324_v50 = vor.u32 %v2759_v39, %v2323_v38  ;;  %v2328_v51 = vor.u32 %v2757_v40, %v2325_v42  ;;  %v2355_v42 = vld [vmem:[%s4178_s0 + $0x260] sm:$0xf] }
 0x111   :  { %v1590_v54 = vadd.f32 %v1589_v45, %v1421_v49  ;;  %1124 = vmatmul.bf16.gmra.mxu0 %v2292_v46  ;;  %v2758_v45 = vld [vmem:[%s4178_s0 + $0x22c] sm:$0xf]  ;;  %v2333_v46 = vld [vmem:[%s4178_s0 + $0x238] sm:$0xf0] }
 0x112   :  { %1293 = vmatmul.bf16.gmra.mxu1 %v2296_v47 }
 0x113   :  { %v1734_v56 = vmul.f32 %v3385_v20, %v1590_v54  ;;  %1462 = vmatmul.bf16.gmra.mxu2 %v2300_v52 }
 0x114   :  { %1631 = vmatmul.bf16.gmra.mxu3 %v2304_v53 }
 0x115   :  { %v1802_v58 = vadd.f32 %v3415_v36, %v1734_v56  ;;  %v2332_v56 = vor.u32 %v2760_v44, %v2331_v43  ;;  %v2767_v43 = vld [vmem:[%s4178_s0 + $0x26c] sm:$0xf0]  ;;  %v2765_v44 = vld [vmem:[%s4178_s0 + $0x264] sm:$0xf] }
 0x116   :  { %v1423_v59 = vpop.f32.mrf.mxu2  ;;  %v1087_v0 = vpop.f32.mrf.mxu0 }
 0x117   :  { %v1592_v60 = vpop.f32.mrf.mxu3  ;;  %v1866_v62 = vmax.f32 %v1802_v58, 0.0  ;;  %v1424_v63 = vadd.f32 %v1423_v59, %v1255_v57  ;;  %v1256_v1 = vpop.f32.mrf.mxu1  ;;  %v2336_v57 = vor.u32 %v2758_v45, %v2333_v46  ;;  %v2357_v46 = vld [vmem:[%s4178_s0 + $0x270] sm:$0xf0] }
 0x118   :  { %v1257_v12 = vadd.f32 %v1256_v1, %v1087_v0 }
 0x119   :  { %v2882_v2 = vpack.c.bf16 %v1866_v62, %v1865_v61  ;;  %v1593_v6 = vadd.f32 %v1592_v60, %v1424_v63 }
 0x11b   :  { %3014 = vst [vmem:[%s4181_s4 + $0x30] sm:$0xff] %v2882_v2   ;;  %v1735_v17 = vmul.f32 %v3385_v20, %v1593_v6 }
 0x11d   :  { %v1803_v25 = vadd.f32 %v3415_v36, %v1735_v17 }
 0x11e   :  { %v1425_v13 = vpop.f32.mrf.mxu2  ;;  %v1090_v19 = vpop.f32.mrf.mxu0 }
 0x11f   :  { %v1594_v14 = vpop.f32.mrf.mxu3  ;;  %v1426_v18 = vadd.f32 %v1425_v13, %v1257_v12  ;;  %v1259_v21 = vpop.f32.mrf.mxu1  ;;  %v1867_v31 = vmax.f32 %v1803_v25, 0.0  ;;  %v2347_v12 = vld [vmem:[%s4178_s0 + $0x248] sm:$0xf]  ;;  %v2764_v13 = vld [vmem:[%s4178_s0 + $0x254] sm:$0xf0] }
 0x120   :  { %v1260_v27 = vadd.f32 %v1259_v21, %v1090_v19  ;;  %v2340_v19 = vor.u32 %v2763_v8, %v2339_v7  ;;  %v2344_v21 = vor.u32 %v2761_v9, %v2341_v11  ;;  %v2371_v11 = vld [vmem:[%s4178_s0 + $0x280] sm:$0xf] }
 0x121   :  { %v1595_v24 = vadd.f32 %v1594_v14, %v1426_v18  ;;  %1129 = vmatmul.bf16.gmra.mxu0 %v2308_v15  ;;  %v2762_v14 = vld [vmem:[%s4178_s0 + $0x24c] sm:$0xf]  ;;  %v2349_v15 = vld [vmem:[%s4178_s0 + $0x258] sm:$0xf0] }
 0x122   :  { %1298 = vmatmul.bf16.gmra.mxu1 %v2312_v16 }
 0x123   :  { %v1736_v26 = vmul.f32 %v3385_v20, %v1595_v24  ;;  %1467 = vmatmul.bf16.gmra.mxu2 %v2316_v22 }
 0x124   :  { %1636 = vmatmul.bf16.gmra.mxu3 %v2320_v23 }
 0x125   :  { %v1804_v28 = vadd.f32 %v3415_v36, %v1736_v26  ;;  %v2348_v26 = vor.u32 %v2764_v13, %v2347_v12  ;;  %v2771_v12 = vld [vmem:[%s4178_s0 + $0x28c] sm:$0xf0]  ;;  %v2769_v13 = vld [vmem:[%s4178_s0 + $0x284] sm:$0xf] }
 0x126   :  { %v1428_v29 = vpop.f32.mrf.mxu2  ;;  %v1092_v34 = vpop.f32.mrf.mxu0 }
 0x127   :  { %v1597_v30 = vpop.f32.mrf.mxu3  ;;  %v1868_v32 = vmax.f32 %v1804_v28, 0.0  ;;  %v1429_v33 = vadd.f32 %v1428_v29, %v1260_v27  ;;  %v1261_v35 = vpop.f32.mrf.mxu1  ;;  %v2352_v27 = vor.u32 %v2762_v14, %v2349_v15  ;;  %v2373_v15 = vld [vmem:[%s4178_s0 + $0x290] sm:$0xf0] }
 0x128   :  { %v1262_v47 = vadd.f32 %v1261_v35, %v1092_v34 }
 0x129   :  { %v2887_v37 = vpack.c.bf16 %v1868_v32, %v1867_v31  ;;  %v1598_v41 = vadd.f32 %v1597_v30, %v1429_v33 }
 0x12b   :  { %3015 = vst [vmem:[%s4181_s4 + $0x38] sm:$0xff] %v2887_v37   ;;  %v1737_v52 = vmul.f32 %v3385_v20, %v1598_v41 }
 0x12d   :  { %v1805_v59 = vadd.f32 %v3415_v36, %v1737_v52 }
 0x12e   :  { %v1430_v48 = vpop.f32.mrf.mxu2  ;;  %v1095_v54 = vpop.f32.mrf.mxu0 }
 0x12f   :  { %v1599_v49 = vpop.f32.mrf.mxu3  ;;  %v1431_v53 = vadd.f32 %v1430_v48, %v1262_v47  ;;  %v1264_v55 = vpop.f32.mrf.mxu1  ;;  %v1869_v1 = vmax.f32 %v1805_v59, 0.0  ;;  %v2363_v47 = vld [vmem:[%s4178_s0 + $0x268] sm:$0xf]  ;;  %v2768_v48 = vld [vmem:[%s4178_s0 + $0x274] sm:$0xf0] }
 0x130   :  { %v1265_v61 = vadd.f32 %v1264_v55, %v1095_v54  ;;  %v2356_v54 = vor.u32 %v2767_v43, %v2355_v42  ;;  %v2360_v55 = vor.u32 %v2765_v44, %v2357_v46  ;;  %v2387_v46 = vld [vmem:[%s4178_s0 + $0x2a0] sm:$0xf] }
 0x131   :  { %v1600_v58 = vadd.f32 %v1599_v49, %v1431_v53  ;;  %1134 = vmatmul.bf16.gmra.mxu0 %v2324_v50  ;;  %v2766_v49 = vld [vmem:[%s4178_s0 + $0x26c] sm:$0xf]  ;;  %v2365_v50 = vld [vmem:[%s4178_s0 + $0x278] sm:$0xf0] }
 0x132   :  { %1303 = vmatmul.bf16.gmra.mxu1 %v2328_v51 }
 0x133   :  { %v1738_v60 = vmul.f32 %v3385_v20, %v1600_v58  ;;  %1472 = vmatmul.bf16.gmra.mxu2 %v2332_v56 }
 0x134   :  { %1641 = vmatmul.bf16.gmra.mxu3 %v2336_v57 }
 0x135   :  { %v1806_v62 = vadd.f32 %v3415_v36, %v1738_v60  ;;  %v2364_v60 = vor.u32 %v2768_v48, %v2363_v47  ;;  %v2775_v47 = vld [vmem:[%s4178_s0 + $0x2ac] sm:$0xf0]  ;;  %v2773_v48 = vld [vmem:[%s4178_s0 + $0x2a4] sm:$0xf] }
 0x136   :  { %v1433_v63 = vpop.f32.mrf.mxu2  ;;  %v1097_v4 = vpop.f32.mrf.mxu0 }
 0x137   :  { %v1602_v0 = vpop.f32.mrf.mxu3  ;;  %v1870_v2 = vmax.f32 %v1806_v62, 0.0  ;;  %v1434_v3 = vadd.f32 %v1433_v63, %v1265_v61  ;;  %v1266_v5 = vpop.f32.mrf.mxu1  ;;  %v2368_v61 = vor.u32 %v2766_v49, %v2365_v50  ;;  %v2389_v50 = vld [vmem:[%s4178_s0 + $0x2b0] sm:$0xf0] }
 0x138   :  { %v1267_v16 = vadd.f32 %v1266_v5, %v1097_v4 }
 0x139   :  { %v2892_v6 = vpack.c.bf16 %v1870_v2, %v1869_v1  ;;  %v1603_v10 = vadd.f32 %v1602_v0, %v1434_v3 }
 0x13b   :  { %3016 = vst [vmem:[%s4181_s4 + $0x40] sm:$0xff] %v2892_v6   ;;  %v1739_v22 = vmul.f32 %v3385_v20, %v1603_v10 }
 0x13d   :  { %v1807_v29 = vadd.f32 %v3415_v36, %v1739_v22 }
 0x13e   :  { %v1435_v17 = vpop.f32.mrf.mxu2  ;;  %v1100_v24 = vpop.f32.mrf.mxu0 }
 0x13f   :  { %v1604_v18 = vpop.f32.mrf.mxu3  ;;  %v1436_v23 = vadd.f32 %v1435_v17, %v1267_v16  ;;  %v1269_v25 = vpop.f32.mrf.mxu1  ;;  %v1871_v35 = vmax.f32 %v1807_v29, 0.0  ;;  %v2379_v16 = vld [vmem:[%s4178_s0 + $0x288] sm:$0xf]  ;;  %v2772_v17 = vld [vmem:[%s4178_s0 + $0x294] sm:$0xf0] }
 0x140   :  { %v1270_v31 = vadd.f32 %v1269_v25, %v1100_v24  ;;  %v2372_v24 = vor.u32 %v2771_v12, %v2371_v11  ;;  %v2376_v25 = vor.u32 %v2769_v13, %v2373_v15  ;;  %v2403_v15 = vld [vmem:[%s4178_s0 + $0x2c0] sm:$0xf] }
 0x141   :  { %v1605_v28 = vadd.f32 %v1604_v18, %v1436_v23  ;;  %1139 = vmatmul.bf16.gmra.mxu0 %v2340_v19  ;;  %v2770_v18 = vld [vmem:[%s4178_s0 + $0x28c] sm:$0xf]  ;;  %v2381_v19 = vld [vmem:[%s4178_s0 + $0x298] sm:$0xf0] }
 0x142   :  { %1308 = vmatmul.bf16.gmra.mxu1 %v2344_v21 }
 0x143   :  { %v1740_v30 = vmul.f32 %v3385_v20, %v1605_v28  ;;  %1477 = vmatmul.bf16.gmra.mxu2 %v2348_v26 }
 0x144   :  { %1646 = vmatmul.bf16.gmra.mxu3 %v2352_v27 }
 0x145   :  { %v1808_v32 = vadd.f32 %v3415_v36, %v1740_v30  ;;  %v2380_v30 = vor.u32 %v2772_v17, %v2379_v16  ;;  %v2779_v16 = vld [vmem:[%s4178_s0 + $0x2cc] sm:$0xf0]  ;;  %v2777_v17 = vld [vmem:[%s4178_s0 + $0x2c4] sm:$0xf] }
 0x146   :  { %v1438_v33 = vpop.f32.mrf.mxu2  ;;  %v1102_v39 = vpop.f32.mrf.mxu0 }
 0x147   :  { %v1607_v34 = vpop.f32.mrf.mxu3  ;;  %v1872_v37 = vmax.f32 %v1808_v32, 0.0  ;;  %v1439_v38 = vadd.f32 %v1438_v33, %v1270_v31  ;;  %v1271_v40 = vpop.f32.mrf.mxu1  ;;  %v2384_v31 = vor.u32 %v2770_v18, %v2381_v19  ;;  %v2405_v19 = vld [vmem:[%s4178_s0 + $0x2d0] sm:$0xf0] }
 0x148   :  { %v1272_v51 = vadd.f32 %v1271_v40, %v1102_v39 }
 0x149   :  { %v2897_v41 = vpack.c.bf16 %v1872_v37, %v1871_v35  ;;  %v1608_v45 = vadd.f32 %v1607_v34, %v1439_v38 }
 0x14b   :  { %3017 = vst [vmem:[%s4181_s4 + $0x48] sm:$0xff] %v2897_v41   ;;  %v1741_v56 = vmul.f32 %v3385_v20, %v1608_v45 }
 0x14d   :  { %v1809_v63 = vadd.f32 %v3415_v36, %v1741_v56 }
 0x14e   :  { %v1440_v52 = vpop.f32.mrf.mxu2  ;;  %v1105_v58 = vpop.f32.mrf.mxu0 }
 0x14f   :  { %v1609_v53 = vpop.f32.mrf.mxu3  ;;  %v1441_v57 = vadd.f32 %v1440_v52, %v1272_v51  ;;  %v1274_v59 = vpop.f32.mrf.mxu1  ;;  %v1873_v5 = vmax.f32 %v1809_v63, 0.0  ;;  %v2395_v51 = vld [vmem:[%s4178_s0 + $0x2a8] sm:$0xf]  ;;  %v2776_v52 = vld [vmem:[%s4178_s0 + $0x2b4] sm:$0xf0] }
 0x150   :  { %v1275_v1 = vadd.f32 %v1274_v59, %v1105_v58  ;;  %v2388_v58 = vor.u32 %v2775_v47, %v2387_v46  ;;  %v2392_v59 = vor.u32 %v2773_v48, %v2389_v50  ;;  %v2419_v50 = vld [vmem:[%s4178_s0 + $0x2e0] sm:$0xf] }
 0x151   :  { %v1610_v62 = vadd.f32 %v1609_v53, %v1441_v57  ;;  %1144 = vmatmul.bf16.gmra.mxu0 %v2356_v54  ;;  %v2774_v53 = vld [vmem:[%s4178_s0 + $0x2ac] sm:$0xf]  ;;  %v2397_v54 = vld [vmem:[%s4178_s0 + $0x2b8] sm:$0xf0] }
 0x152   :  { %1313 = vmatmul.bf16.gmra.mxu1 %v2360_v55 }
 0x153   :  { %v1742_v0 = vmul.f32 %v3385_v20, %v1610_v62  ;;  %1482 = vmatmul.bf16.gmra.mxu2 %v2364_v60 }
 0x154   :  { %1651 = vmatmul.bf16.gmra.mxu3 %v2368_v61 }
 0x155   :  { %v1810_v2 = vadd.f32 %v3415_v36, %v1742_v0  ;;  %v2396_v0 = vor.u32 %v2776_v52, %v2395_v51  ;;  %v2783_v51 = vld [vmem:[%s4178_s0 + $0x2ec] sm:$0xf0] }
 0x156   :  { %v1443_v3 = vpop.f32.mrf.mxu2  ;;  %v1107_v8 = vpop.f32.mrf.mxu0 }
 0x157   :  { %v1612_v4 = vpop.f32.mrf.mxu3  ;;  %v1874_v6 = vmax.f32 %v1810_v2, 0.0  ;;  %v1444_v7 = vadd.f32 %v1443_v3, %v1275_v1  ;;  %v1276_v9 = vpop.f32.mrf.mxu1  ;;  %v2400_v1 = vor.u32 %v2774_v53, %v2397_v54  ;;  %v2421_v53 = vld [vmem:[%s4178_s0 + $0x2f0] sm:$0xf0]  ;;  %v2427_v54 = vld [vmem:[%s4178_s0 + $0x2e8] sm:$0xf] }
 0x158   :  { %v1277_v21 = vadd.f32 %v1276_v9, %v1107_v8 }
 0x159   :  { %v2902_v10 = vpack.c.bf16 %v1874_v6, %v1873_v5  ;;  %v1613_v14 = vadd.f32 %v1612_v4, %v1444_v7 }
 0x15b   :  { %3018 = vst [vmem:[%s4181_s4 + $0x50] sm:$0xff] %v2902_v10   ;;  %v1743_v26 = vmul.f32 %v3385_v20, %v1613_v14 }
 0x15d   :  { %v1811_v33 = vadd.f32 %v3415_v36, %v1743_v26 }
 0x15e   :  { %v1445_v22 = vpop.f32.mrf.mxu2  ;;  %v1110_v28 = vpop.f32.mrf.mxu0 }
 0x15f   :  { %v1614_v23 = vpop.f32.mrf.mxu3  ;;  %v1446_v27 = vadd.f32 %v1445_v22, %v1277_v21  ;;  %v1279_v29 = vpop.f32.mrf.mxu1  ;;  %v1875_v40 = vmax.f32 %v1811_v33, 0.0  ;;  %v2411_v21 = vld [vmem:[%s4178_s0 + $0x2c8] sm:$0xf]  ;;  %v2780_v22 = vld [vmem:[%s4178_s0 + $0x2d4] sm:$0xf0] }
 0x160   :  { %v1280_v35 = vadd.f32 %v1279_v29, %v1110_v28  ;;  %v2404_v28 = vor.u32 %v2779_v16, %v2403_v15  ;;  %v2408_v29 = vor.u32 %v2777_v17, %v2405_v19  ;;  %v2435_v19 = vld [vmem:[%s4178_s0 + $0x300] sm:$0xf] }
 0x161   :  { %v1615_v32 = vadd.f32 %v1614_v23, %v1446_v27  ;;  %1149 = vmatmul.bf16.gmra.mxu0 %v2372_v24  ;;  %v2778_v23 = vld [vmem:[%s4178_s0 + $0x2cc] sm:$0xf]  ;;  %v2413_v24 = vld [vmem:[%s4178_s0 + $0x2d8] sm:$0xf0] }
 0x162   :  { %1318 = vmatmul.bf16.gmra.mxu1 %v2376_v25 }
 0x163   :  { %v1744_v34 = vmul.f32 %v3385_v20, %v1615_v32  ;;  %1487 = vmatmul.bf16.gmra.mxu2 %v2380_v30 }
 0x164   :  { %1656 = vmatmul.bf16.gmra.mxu3 %v2384_v31 }
 0x165   :  { %v1812_v37 = vadd.f32 %v3415_v36, %v1744_v34  ;;  %v2412_v34 = vor.u32 %v2780_v22, %v2411_v21  ;;  %v2787_v21 = vld [vmem:[%s4178_s0 + $0x30c] sm:$0xf0]  ;;  %v2785_v22 = vld [vmem:[%s4178_s0 + $0x304] sm:$0xf] }
 0x166   :  { %v1448_v38 = vpop.f32.mrf.mxu2  ;;  %v1112_v43 = vpop.f32.mrf.mxu0 }
 0x167   :  { %v1617_v39 = vpop.f32.mrf.mxu3  ;;  %v1876_v41 = vmax.f32 %v1812_v37, 0.0  ;;  %v1449_v42 = vadd.f32 %v1448_v38, %v1280_v35  ;;  %v1281_v44 = vpop.f32.mrf.mxu1  ;;  %v2416_v35 = vor.u32 %v2778_v23, %v2413_v24  ;;  %v2437_v24 = vld [vmem:[%s4178_s0 + $0x310] sm:$0xf0] }
 0x168   :  { %v1282_v55 = vadd.f32 %v1281_v44, %v1112_v43 }
 0x169   :  { %v2907_v45 = vpack.c.bf16 %v1876_v41, %v1875_v40  ;;  %v1618_v49 = vadd.f32 %v1617_v39, %v1449_v42  ;;  %v3824_v39 = vld [vmem:[%s4179_s2] ss:$0 sm:$0xff] }
 0x16b   :  { %3019 = vst [vmem:[%s4181_s4 + $0x58] sm:$0xff] %v2907_v45   ;;  %v1745_v60 = vmul.f32 %v3385_v20, %v1618_v49 }
 0x16d   :  { %v1813_v3 = vadd.f32 %v3415_v36, %v1745_v60 }
 0x16e   :  { %v1450_v56 = vpop.f32.mrf.mxu2  ;;  %v1115_v62 = vpop.f32.mrf.mxu0 }
 0x16f   :  { %v1619_v57 = vpop.f32.mrf.mxu3  ;;  %v1451_v61 = vadd.f32 %v1450_v56, %v1282_v55  ;;  %v1284_v63 = vpop.f32.mrf.mxu1  ;;  %v1877_v9 = vmax.f32 %v1813_v3, 0.0  ;;  %v2784_v55 = vld [vmem:[%s4178_s0 + $0x2f4] sm:$0xf0]  ;;  %v2782_v56 = vld [vmem:[%s4178_s0 + $0x2ec] sm:$0xf] }
 0x170   :  { %v1285_v5 = vadd.f32 %v1284_v63, %v1115_v62  ;;  %v2428_v3 = vor.u32 %v2784_v55, %v2427_v54  ;;  %v2791_v54 = vld [vmem:[%s4178_s0 + $0x32c] sm:$0xf0]  ;;  %v2789_v55 = vld [vmem:[%s4178_s0 + $0x324] sm:$0xf] }
 0x171   :  { %v1620_v2 = vadd.f32 %v1619_v57, %v1451_v61  ;;  %1154 = vmatmul.bf16.gmra.mxu0 %v2388_v58  ;;  %v2429_v57 = vld [vmem:[%s4178_s0 + $0x2f8] sm:$0xf0]  ;;  %v2420_v61 = vor.u32 %v2783_v51, %v2419_v50 }
 0x172   :  { %1323 = vmatmul.bf16.gmra.mxu1 %v2392_v59 }
 0x173   :  { %v1746_v4 = vmul.f32 %v3385_v20, %v1620_v2  ;;  %1492 = vmatmul.bf16.gmra.mxu2 %v2396_v0 }
 0x174   :  { %1661 = vmatmul.bf16.gmra.mxu3 %v2400_v1 }
 0x175   :  { %v1814_v6 = vadd.f32 %v3415_v36, %v1746_v4  ;;  %v2432_v4 = vor.u32 %v2782_v56, %v2429_v57  ;;  %v2453_v57 = vld [vmem:[%s4178_s0 + $0x330] sm:$0xf0] }
 0x176   :  { %v1453_v7 = vpop.f32.mrf.mxu2  ;;  %v1117_v12 = vpop.f32.mrf.mxu0 }
 0x177   :  { %v1622_v8 = vpop.f32.mrf.mxu3  ;;  %v1878_v10 = vmax.f32 %v1814_v6, 0.0  ;;  %v1454_v11 = vadd.f32 %v1453_v7, %v1285_v5  ;;  %v1286_v13 = vpop.f32.mrf.mxu1  ;;  %v3859_v6 = vld [vmem:[%s4180_s3] ss:$0 sm:$0xff] }
 0x178   :  { %v1287_v25 = vadd.f32 %v1286_v13, %v1117_v12 }
 0x179   :  { %v2912_v14 = vpack.c.bf16 %v1878_v10, %v1877_v9  ;;  %v1623_v18 = vadd.f32 %v1622_v8, %v1454_v11 }
 0x17b   :  { %3020 = vst [vmem:[%s4181_s4 + $0x60] sm:$0xff] %v2912_v14   ;;  %v1747_v30 = vmul.f32 %v3385_v20, %v1623_v18 }
 0x17d   :  { %v1815_v38 = vadd.f32 %v3415_v36, %v1747_v30 }
 0x17e   :  { %v1455_v26 = vpop.f32.mrf.mxu2  ;;  %v1120_v32 = vpop.f32.mrf.mxu0 }
 0x17f   :  { %v1624_v27 = vpop.f32.mrf.mxu3  ;;  %v1456_v31 = vadd.f32 %v1455_v26, %v1287_v25  ;;  %v1289_v33 = vpop.f32.mrf.mxu1  ;;  %v1879_v44 = vmax.f32 %v1815_v38, 0.0  ;;  %v2443_v25 = vld [vmem:[%s4178_s0 + $0x308] sm:$0xf]  ;;  %v2788_v26 = vld [vmem:[%s4178_s0 + $0x314] sm:$0xf0] }
 0x180   :  { %v1290_v41 = vadd.f32 %v1289_v33, %v1120_v32  ;;  %v2436_v32 = vor.u32 %v2787_v21, %v2435_v19  ;;  %v2440_v33 = vor.u32 %v2785_v22, %v2437_v24  ;;  %v2467_v24 = vld [vmem:[%s4178_s0 + $0x340] sm:$0xf] }
 0x181   :  { %v1625_v37 = vadd.f32 %v1624_v27, %v1456_v31  ;;  %1159 = vmatmul.bf16.gmra.mxu0 %v2404_v28  ;;  %v2786_v27 = vld [vmem:[%s4178_s0 + $0x30c] sm:$0xf]  ;;  %v2445_v28 = vld [vmem:[%s4178_s0 + $0x318] sm:$0xf0] }
 0x182   :  { %1328 = vmatmul.bf16.gmra.mxu1 %v2408_v29 }
 0x183   :  { %v1748_v40 = vmul.f32 %v3824_v39, %v1625_v37  ;;  %1497 = vmatmul.bf16.gmra.mxu2 %v2412_v34 }
 0x184   :  { %1666 = vmatmul.bf16.gmra.mxu3 %v2416_v35 }
 0x185   :  { %v1816_v20 = vadd.f32 %v3415_v36, %v1748_v40  ;;  %v2781_v36 = vld [vmem:[%s4178_s0 + $0x2e4] sm:$0xf]  ;;  %v2444_v40 = vor.u32 %v2788_v26, %v2443_v25  ;;  %v2795_v25 = vld [vmem:[%s4178_s0 + $0x34c] sm:$0xf0] }
 0x186   :  { %v1458_v42 = vpop.f32.mrf.mxu2  ;;  %v1122_v47 = vpop.f32.mrf.mxu0  ;;  %v2424_v62 = vor.u32 %v2781_v36, %v2421_v53  ;;  %v2451_v53 = vld [vmem:[%s4178_s0 + $0x320] sm:$0xf]  ;;  %v2793_v26 = vld [vmem:[%s4178_s0 + $0x344] sm:$0xf] }
 0x187   :  { %v1627_v43 = vpop.f32.mrf.mxu3  ;;  %v1880_v45 = vmax.f32 %v1816_v20, 0.0  ;;  %v1459_v46 = vadd.f32 %v1458_v42, %v1290_v41  ;;  %v1291_v48 = vpop.f32.mrf.mxu1  ;;  %v2448_v41 = vor.u32 %v2786_v27, %v2445_v28  ;;  %v2469_v28 = vld [vmem:[%s4178_s0 + $0x350] sm:$0xf0] }
 0x188   :  { %v1292_v58 = vadd.f32 %v1291_v48, %v1122_v47 }
 0x189   :  { %v2917_v49 = vpack.c.bf16 %v1880_v45, %v1879_v44  ;;  %v1628_v52 = vadd.f32 %v1627_v43, %v1459_v46 }
 0x18b   :  { %3021 = vst [vmem:[%s4181_s4 + $0x68] sm:$0xff] %v2917_v49   ;;  %v1749_v63 = vmul.f32 %v3824_v39, %v1628_v52 }
 0x18d   :  { %v1817_v7 = vadd.f32 %v3859_v6, %v1749_v63 }
 0x18e   :  { %v1460_v59 = vpop.f32.mrf.mxu2  ;;  %v1125_v1 = vpop.f32.mrf.mxu0 }
 0x18f   :  { %v1629_v60 = vpop.f32.mrf.mxu3  ;;  %v1461_v0 = vadd.f32 %v1460_v59, %v1292_v58  ;;  %v1294_v2 = vpop.f32.mrf.mxu1  ;;  %v1881_v13 = vmax.f32 %v1817_v7, 0.0  ;;  %v2459_v58 = vld [vmem:[%s4178_s0 + $0x328] sm:$0xf]  ;;  %v2792_v59 = vld [vmem:[%s4178_s0 + $0x334] sm:$0xf0] }
 0x190   :  { %v1295_v9 = vadd.f32 %v1294_v2, %v1125_v1  ;;  %v2452_v1 = vor.u32 %v2791_v54, %v2451_v53  ;;  %v2456_v2 = vor.u32 %v2789_v55, %v2453_v57  ;;  %v2483_v57 = vld [vmem:[%s4178_s0 + $0x360] sm:$0xf] }
 0x191   :  { %v1630_v5 = vadd.f32 %v1629_v60, %v1461_v0  ;;  %1164 = vmatmul.bf16.gmra.mxu0 %v2420_v61  ;;  %v2790_v60 = vld [vmem:[%s4178_s0 + $0x32c] sm:$0xf]  ;;  %v2461_v61 = vld [vmem:[%s4178_s0 + $0x338] sm:$0xf0] }
 0x192   :  { %1333 = vmatmul.bf16.gmra.mxu1 %v2424_v62 }
 0x193   :  { %v1750_v8 = vmul.f32 %v3824_v39, %v1630_v5  ;;  %1502 = vmatmul.bf16.gmra.mxu2 %v2428_v3 }
 0x194   :  { %1671 = vmatmul.bf16.gmra.mxu3 %v2432_v4 }
 0x195   :  { %v1818_v10 = vadd.f32 %v3859_v6, %v1750_v8  ;;  %v2460_v8 = vor.u32 %v2792_v59, %v2459_v58  ;;  %v2799_v58 = vld [vmem:[%s4178_s0 + $0x36c] sm:$0xf0]  ;;  %v2797_v59 = vld [vmem:[%s4178_s0 + $0x364] sm:$0xf] }
 0x196   :  { %v1463_v11 = vpop.f32.mrf.mxu2  ;;  %v1127_v16 = vpop.f32.mrf.mxu0 }
 0x197   :  { %v1632_v12 = vpop.f32.mrf.mxu3  ;;  %v1882_v14 = vmax.f32 %v1818_v10, 0.0  ;;  %v1464_v15 = vadd.f32 %v1463_v11, %v1295_v9  ;;  %v1296_v17 = vpop.f32.mrf.mxu1  ;;  %v2464_v9 = vor.u32 %v2790_v60, %v2461_v61  ;;  %v2485_v61 = vld [vmem:[%s4178_s0 + $0x370] sm:$0xf0] }
 0x198   :  { %v1297_v29 = vadd.f32 %v1296_v17, %v1127_v16 }
 0x199   :  { %v2922_v18 = vpack.c.bf16 %v1882_v14, %v1881_v13  ;;  %v1633_v23 = vadd.f32 %v1632_v12, %v1464_v15 }
 0x19b   :  { %3022 = vst [vmem:[%s4181_s4 + $0x70] sm:$0xff] %v2922_v18   ;;  %v1751_v34 = vmul.f32 %v3824_v39, %v1633_v23 }
 0x19d   :  { %v1819_v42 = vadd.f32 %v3859_v6, %v1751_v34 }
 0x19e   :  { %v1465_v30 = vpop.f32.mrf.mxu2  ;;  %v1130_v37 = vpop.f32.mrf.mxu0 }
 0x19f   :  { %v1634_v31 = vpop.f32.mrf.mxu3  ;;  %v1466_v35 = vadd.f32 %v1465_v30, %v1297_v29  ;;  %v1299_v38 = vpop.f32.mrf.mxu1  ;;  %v1883_v48 = vmax.f32 %v1819_v42, 0.0  ;;  %v2475_v29 = vld [vmem:[%s4178_s0 + $0x348] sm:$0xf]  ;;  %v2796_v30 = vld [vmem:[%s4178_s0 + $0x354] sm:$0xf0] }
 0x1a0   :  { %v1300_v44 = vadd.f32 %v1299_v38, %v1130_v37  ;;  %v2468_v37 = vor.u32 %v2795_v25, %v2467_v24  ;;  %v2472_v38 = vor.u32 %v2793_v26, %v2469_v28  ;;  %v2499_v28 = vld [vmem:[%s4178_s0 + $0x380] sm:$0xf] }
 0x1a1   :  { %v1635_v20 = vadd.f32 %v1634_v31, %v1466_v35  ;;  %1169 = vmatmul.bf16.gmra.mxu0 %v2436_v32  ;;  %v2794_v31 = vld [vmem:[%s4178_s0 + $0x34c] sm:$0xf]  ;;  %v2477_v32 = vld [vmem:[%s4178_s0 + $0x358] sm:$0xf0] }
 0x1a2   :  { %1338 = vmatmul.bf16.gmra.mxu1 %v2440_v33 }
 0x1a3   :  { %v1752_v43 = vmul.f32 %v3824_v39, %v1635_v20  ;;  %1507 = vmatmul.bf16.gmra.mxu2 %v2444_v40 }
 0x1a4   :  { %1676 = vmatmul.bf16.gmra.mxu3 %v2448_v41 }
 0x1a5   :  { %v1820_v45 = vadd.f32 %v3859_v6, %v1752_v43  ;;  %v2476_v43 = vor.u32 %v2796_v30, %v2475_v29  ;;  %v2803_v29 = vld [vmem:[%s4178_s0 + $0x38c] sm:$0xf0]  ;;  %v2801_v30 = vld [vmem:[%s4178_s0 + $0x384] sm:$0xf] }
 0x1a6   :  { %v1468_v46 = vpop.f32.mrf.mxu2  ;;  %v1132_v51 = vpop.f32.mrf.mxu0 }
 0x1a7   :  { %v1637_v47 = vpop.f32.mrf.mxu3  ;;  %v1884_v49 = vmax.f32 %v1820_v45, 0.0  ;;  %v1469_v50 = vadd.f32 %v1468_v46, %v1300_v44  ;;  %v1301_v36 = vpop.f32.mrf.mxu1  ;;  %v2480_v44 = vor.u32 %v2794_v31, %v2477_v32  ;;  %v2501_v32 = vld [vmem:[%s4178_s0 + $0x390] sm:$0xf0] }
 0x1a8   :  { %v1302_v62 = vadd.f32 %v1301_v36, %v1132_v51 }
 0x1a9   :  { %v2927_v52 = vpack.c.bf16 %v1884_v49, %v1883_v48  ;;  %v1638_v56 = vadd.f32 %v1637_v47, %v1469_v50 }
 0x1ab   :  { %3023 = vst [vmem:[%s4181_s4 + $0x78] sm:$0xff] %v2927_v52   ;;  %v1753_v3 = vmul.f32 %v3824_v39, %v1638_v56 }
 0x1ad   :  { %v1821_v11 = vadd.f32 %v3859_v6, %v1753_v3 }
 0x1ae   :  { %v1470_v63 = vpop.f32.mrf.mxu2  ;;  %v1135_v5 = vpop.f32.mrf.mxu0 }
 0x1af   :  { %v1639_v0 = vpop.f32.mrf.mxu3  ;;  %v1471_v4 = vadd.f32 %v1470_v63, %v1302_v62  ;;  %v1304_v7 = vpop.f32.mrf.mxu1  ;;  %v1885_v17 = vmax.f32 %v1821_v11, 0.0  ;;  %v2491_v62 = vld [vmem:[%s4178_s0 + $0x368] sm:$0xf]  ;;  %v2800_v63 = vld [vmem:[%s4178_s0 + $0x374] sm:$0xf0] }
 0x1b0   :  { %v1305_v13 = vadd.f32 %v1304_v7, %v1135_v5  ;;  %v2484_v5 = vor.u32 %v2799_v58, %v2483_v57  ;;  %v2488_v7 = vor.u32 %v2797_v59, %v2485_v61  ;;  %v2515_v61 = vld [vmem:[%s4178_s0 + $0x3a0] sm:$0xf] }
 0x1b1   :  { %v1640_v10 = vadd.f32 %v1639_v0, %v1471_v4  ;;  %1174 = vmatmul.bf16.gmra.mxu0 %v2452_v1  ;;  %v2798_v0 = vld [vmem:[%s4178_s0 + $0x36c] sm:$0xf]  ;;  %v2493_v1 = vld [vmem:[%s4178_s0 + $0x378] sm:$0xf0] }
 0x1b2   :  { %1343 = vmatmul.bf16.gmra.mxu1 %v2456_v2 }
 0x1b3   :  { %v1754_v12 = vmul.f32 %v3824_v39, %v1640_v10  ;;  %1512 = vmatmul.bf16.gmra.mxu2 %v2460_v8 }
 0x1b4   :  { %1681 = vmatmul.bf16.gmra.mxu3 %v2464_v9 }
 0x1b5   :  { %v1822_v14 = vadd.f32 %v3859_v6, %v1754_v12  ;;  %v2492_v12 = vor.u32 %v2800_v63, %v2491_v62  ;;  %v2807_v62 = vld [vmem:[%s4178_s0 + $0x3ac] sm:$0xf0]  ;;  %v2805_v63 = vld [vmem:[%s4178_s0 + $0x3a4] sm:$0xf] }
 0x1b6   :  { %v1473_v15 = vpop.f32.mrf.mxu2  ;;  %v1137_v21 = vpop.f32.mrf.mxu0 }
 0x1b7   :  { %v1642_v16 = vpop.f32.mrf.mxu3  ;;  %v1886_v18 = vmax.f32 %v1822_v14, 0.0  ;;  %v1474_v19 = vadd.f32 %v1473_v15, %v1305_v13  ;;  %v1306_v22 = vpop.f32.mrf.mxu1  ;;  %v2496_v13 = vor.u32 %v2798_v0, %v2493_v1  ;;  %v2517_v1 = vld [vmem:[%s4178_s0 + $0x3b0] sm:$0xf0] }
 0x1b8   :  { %v1307_v33 = vadd.f32 %v1306_v22, %v1137_v21 }
 0x1b9   :  { %v2932_v23 = vpack.c.bf16 %v1886_v18, %v1885_v17  ;;  %v1643_v27 = vadd.f32 %v1642_v16, %v1474_v19 }
 0x1bb   :  { %3024 = vst [vmem:[%s4181_s4 + $0x80] sm:$0xff] %v2932_v23   ;;  %v1755_v40 = vmul.f32 %v3824_v39, %v1643_v27 }
 0x1bd   :  { %v1823_v46 = vadd.f32 %v3859_v6, %v1755_v40 }
 0x1be   :  { %v1475_v34 = vpop.f32.mrf.mxu2  ;;  %v1140_v20 = vpop.f32.mrf.mxu0 }
 0x1bf   :  { %v1644_v35 = vpop.f32.mrf.mxu3  ;;  %v1476_v41 = vadd.f32 %v1475_v34, %v1307_v33  ;;  %v1309_v42 = vpop.f32.mrf.mxu1  ;;  %v1887_v36 = vmax.f32 %v1823_v46, 0.0  ;;  %v2507_v33 = vld [vmem:[%s4178_s0 + $0x388] sm:$0xf]  ;;  %v2804_v34 = vld [vmem:[%s4178_s0 + $0x394] sm:$0xf0] }
 0x1c0   :  { %v1310_v48 = vadd.f32 %v1309_v42, %v1140_v20  ;;  %v2500_v20 = vor.u32 %v2803_v29, %v2499_v28  ;;  %v2504_v42 = vor.u32 %v2801_v30, %v2501_v32  ;;  %v2531_v32 = vld [vmem:[%s4178_s0 + $0x3c0] sm:$0xf] }
 0x1c1   :  { %v1645_v45 = vadd.f32 %v1644_v35, %v1476_v41  ;;  %1179 = vmatmul.bf16.gmra.mxu0 %v2468_v37  ;;  %v2802_v35 = vld [vmem:[%s4178_s0 + $0x38c] sm:$0xf]  ;;  %v2509_v37 = vld [vmem:[%s4178_s0 + $0x398] sm:$0xf0] }
 0x1c2   :  { %1348 = vmatmul.bf16.gmra.mxu1 %v2472_v38 }
 0x1c3   :  { %v1756_v47 = vmul.f32 %v3824_v39, %v1645_v45  ;;  %1517 = vmatmul.bf16.gmra.mxu2 %v2476_v43 }
 0x1c4   :  { %1686 = vmatmul.bf16.gmra.mxu3 %v2480_v44 }
 0x1c5   :  { %v1824_v49 = vadd.f32 %v3859_v6, %v1756_v47  ;;  %v2508_v47 = vor.u32 %v2804_v34, %v2507_v33  ;;  %v2811_v33 = vld [vmem:[%s4178_s0 + $0x3cc] sm:$0xf0]  ;;  %v2809_v34 = vld [vmem:[%s4178_s0 + $0x3c4] sm:$0xf] }
 0x1c6   :  { %v1478_v50 = vpop.f32.mrf.mxu2  ;;  %v1142_v54 = vpop.f32.mrf.mxu0 }
 0x1c7   :  { %v1647_v51 = vpop.f32.mrf.mxu3  ;;  %v1888_v52 = vmax.f32 %v1824_v49, 0.0  ;;  %v1479_v53 = vadd.f32 %v1478_v50, %v1310_v48  ;;  %v1311_v55 = vpop.f32.mrf.mxu1  ;;  %v2512_v48 = vor.u32 %v2802_v35, %v2509_v37  ;;  %v2533_v37 = vld [vmem:[%s4178_s0 + $0x3d0] sm:$0xf0] }
 0x1c8   :  { %v1312_v2 = vadd.f32 %v1311_v55, %v1142_v54 }
 0x1c9   :  { %v2937_v56 = vpack.c.bf16 %v1888_v52, %v1887_v36  ;;  %v1648_v60 = vadd.f32 %v1647_v51, %v1479_v53 }
 0x1cb   :  { %3025 = vst [vmem:[%s4181_s4 + $0x88] sm:$0xff] %v2937_v56   ;;  %v1757_v8 = vmul.f32 %v3824_v39, %v1648_v60 }
 0x1cd   :  { %v1825_v15 = vadd.f32 %v3859_v6, %v1757_v8 }
 0x1ce   :  { %v1480_v3 = vpop.f32.mrf.mxu2  ;;  %v1145_v10 = vpop.f32.mrf.mxu0 }
 0x1cf   :  { %v1649_v4 = vpop.f32.mrf.mxu3  ;;  %v1481_v9 = vadd.f32 %v1480_v3, %v1312_v2  ;;  %v1314_v11 = vpop.f32.mrf.mxu1  ;;  %v1889_v22 = vmax.f32 %v1825_v15, 0.0  ;;  %v2523_v2 = vld [vmem:[%s4178_s0 + $0x3a8] sm:$0xf]  ;;  %v2808_v3 = vld [vmem:[%s4178_s0 + $0x3b4] sm:$0xf0] }
 0x1d0   :  { %v1315_v17 = vadd.f32 %v1314_v11, %v1145_v10  ;;  %v2516_v10 = vor.u32 %v2807_v62, %v2515_v61  ;;  %v2520_v11 = vor.u32 %v2805_v63, %v2517_v1  ;;  %v2547_v1 = vld [vmem:[%s4178_s0 + $0x3e0] sm:$0xf] }
 0x1d1   :  { %v1650_v14 = vadd.f32 %v1649_v4, %v1481_v9  ;;  %1184 = vmatmul.bf16.gmra.mxu0 %v2484_v5  ;;  %v2806_v4 = vld [vmem:[%s4178_s0 + $0x3ac] sm:$0xf]  ;;  %v2525_v5 = vld [vmem:[%s4178_s0 + $0x3b8] sm:$0xf0] }
 0x1d2   :  { %1353 = vmatmul.bf16.gmra.mxu1 %v2488_v7 }
 0x1d3   :  { %v1758_v16 = vmul.f32 %v3824_v39, %v1650_v14  ;;  %1522 = vmatmul.bf16.gmra.mxu2 %v2492_v12 }
 0x1d4   :  { %1691 = vmatmul.bf16.gmra.mxu3 %v2496_v13 }
 0x1d5   :  { %v1826_v18 = vadd.f32 %v3859_v6, %v1758_v16  ;;  %v2524_v16 = vor.u32 %v2808_v3, %v2523_v2  ;;  %v2815_v2 = vld [vmem:[%s4178_s0 + $0x3ec] sm:$0xf0]  ;;  %v2813_v3 = vld [vmem:[%s4178_s0 + $0x3e4] sm:$0xf] }
 0x1d6   :  { %v1483_v19 = vpop.f32.mrf.mxu2  ;;  %v1147_v25 = vpop.f32.mrf.mxu0 }
 0x1d7   :  { %v1652_v21 = vpop.f32.mrf.mxu3  ;;  %v1890_v23 = vmax.f32 %v1826_v18, 0.0  ;;  %v1484_v24 = vadd.f32 %v1483_v19, %v1315_v17  ;;  %v1316_v26 = vpop.f32.mrf.mxu1  ;;  %v2528_v17 = vor.u32 %v2806_v4, %v2525_v5  ;;  %v2549_v5 = vld [vmem:[%s4178_s0 + $0x3f0] sm:$0xf0] }
 0x1d8   :  { %v1317_v38 = vadd.f32 %v1316_v26, %v1147_v25 }
 0x1d9   :  { %v2942_v27 = vpack.c.bf16 %v1890_v23, %v1889_v22  ;;  %v1653_v31 = vadd.f32 %v1652_v21, %v1484_v24 }
 0x1db   :  { %3026 = vst [vmem:[%s4181_s4 + $0x90] sm:$0xff] %v2942_v27   ;;  %v1759_v43 = vmul.f32 %v3824_v39, %v1653_v31 }
 0x1dd   :  { %v1827_v50 = vadd.f32 %v3859_v6, %v1759_v43 }
 0x1de   :  { %v1485_v40 = vpop.f32.mrf.mxu2  ;;  %v1150_v45 = vpop.f32.mrf.mxu0 }
 0x1df   :  { %v1654_v41 = vpop.f32.mrf.mxu3  ;;  %v1486_v44 = vadd.f32 %v1485_v40, %v1317_v38  ;;  %v1319_v46 = vpop.f32.mrf.mxu1  ;;  %v1891_v55 = vmax.f32 %v1827_v50, 0.0  ;;  %v2539_v38 = vld [vmem:[%s4178_s0 + $0x3c8] sm:$0xf]  ;;  %v2812_v40 = vld [vmem:[%s4178_s0 + $0x3d4] sm:$0xf0] }
 0x1e0   :  { %v1320_v36 = vadd.f32 %v1319_v46, %v1150_v45  ;;  %v2532_v45 = vor.u32 %v2811_v33, %v2531_v32  ;;  %v2536_v46 = vor.u32 %v2809_v34, %v2533_v37 }
 0x1e1   :  { %v1655_v49 = vadd.f32 %v1654_v41, %v1486_v44  ;;  %1189 = vmatmul.bf16.gmra.mxu0 %v2500_v20  ;;  %v2810_v41 = vld [vmem:[%s4178_s0 + $0x3cc] sm:$0xf]  ;;  %v2541_v20 = vld [vmem:[%s4178_s0 + $0x3d8] sm:$0xf0] }
 0x1e2   :  { %1358 = vmatmul.bf16.gmra.mxu1 %v2504_v42 }
 0x1e3   :  { %v1760_v51 = vmul.f32 %v3824_v39, %v1655_v49  ;;  %1527 = vmatmul.bf16.gmra.mxu2 %v2508_v47 }
 0x1e4   :  { %1696 = vmatmul.bf16.gmra.mxu3 %v2512_v48 }
 0x1e5   :  { %v1828_v52 = vadd.f32 %v3859_v6, %v1760_v51  ;;  %v2540_v51 = vor.u32 %v2812_v40, %v2539_v38 }
 0x1e6   :  { %v1488_v53 = vpop.f32.mrf.mxu2  ;;  %v1152_v58 = vpop.f32.mrf.mxu0 }
 0x1e7   :  { %v1657_v54 = vpop.f32.mrf.mxu3  ;;  %v1892_v56 = vmax.f32 %v1828_v52, 0.0  ;;  %v1489_v57 = vadd.f32 %v1488_v53, %v1320_v36  ;;  %v1321_v59 = vpop.f32.mrf.mxu1  ;;  %v2544_v36 = vor.u32 %v2810_v41, %v2541_v20 }
 0x1e8   :  { %v1322_v7 = vadd.f32 %v1321_v59, %v1152_v58 }
 0x1e9   :  { %v2947_v60 = vpack.c.bf16 %v1892_v56, %v1891_v55  ;;  %v1658_v0 = vadd.f32 %v1657_v54, %v1489_v57 }
 0x1eb   :  { %3027 = vst [vmem:[%s4181_s4 + $0x98] sm:$0xff] %v2947_v60   ;;  %v1761_v12 = vmul.f32 %v3824_v39, %v1658_v0 }
 0x1ed   :  { %v1829_v19 = vadd.f32 %v3859_v6, %v1761_v12 }
 0x1ee   :  { %v1490_v8 = vpop.f32.mrf.mxu2  ;;  %v1155_v14 = vpop.f32.mrf.mxu0 }
 0x1ef   :  { %v1659_v9 = vpop.f32.mrf.mxu3  ;;  %v1491_v13 = vadd.f32 %v1490_v8, %v1322_v7  ;;  %v1324_v15 = vpop.f32.mrf.mxu1  ;;  %v1893_v26 = vmax.f32 %v1829_v19, 0.0  ;;  %v2555_v7 = vld [vmem:[%s4178_s0 + $0x3e8] sm:$0xf]  ;;  %v2816_v8 = vld [vmem:[%s4178_s0 + $0x3f4] sm:$0xf0] }
 0x1f0   :  { %v1325_v22 = vadd.f32 %v1324_v15, %v1155_v14  ;;  %v2548_v14 = vor.u32 %v2815_v2, %v2547_v1  ;;  %v2552_v15 = vor.u32 %v2813_v3, %v2549_v5 }
 0x1f1   :  { %v1660_v18 = vadd.f32 %v1659_v9, %v1491_v13  ;;  %1194 = vmatmul.bf16.gmra.mxu0 %v2516_v10  ;;  %v2814_v9 = vld [vmem:[%s4178_s0 + $0x3ec] sm:$0xf]  ;;  %v2557_v10 = vld [vmem:[%s4178_s0 + $0x3f8] sm:$0xf0] }
 0x1f2   :  { %1363 = vmatmul.bf16.gmra.mxu1 %v2520_v11 }
 0x1f3   :  { %v1762_v21 = vmul.f32 %v3824_v39, %v1660_v18  ;;  %1532 = vmatmul.bf16.gmra.mxu2 %v2524_v16 }
 0x1f4   :  { %1701 = vmatmul.bf16.gmra.mxu3 %v2528_v17 }
 0x1f5   :  { %v1830_v23 = vadd.f32 %v3859_v6, %v1762_v21  ;;  %v2556_v21 = vor.u32 %v2816_v8, %v2555_v7 }
 0x1f6   :  { %v1493_v24 = vpop.f32.mrf.mxu2  ;;  %v1157_v29 = vpop.f32.mrf.mxu0 }
 0x1f7   :  { %v1662_v25 = vpop.f32.mrf.mxu3  ;;  %v1894_v27 = vmax.f32 %v1830_v23, 0.0  ;;  %v1494_v28 = vadd.f32 %v1493_v24, %v1325_v22  ;;  %v1326_v30 = vpop.f32.mrf.mxu1  ;;  %v2560_v22 = vor.u32 %v2814_v9, %v2557_v10 }
 0x1f8   :  { %v1327_v42 = vadd.f32 %v1326_v30, %v1157_v29 }
 0x1f9   :  { %v2952_v31 = vpack.c.bf16 %v1894_v27, %v1893_v26  ;;  %v1663_v35 = vadd.f32 %v1662_v25, %v1494_v28 }
 0x1fb   :  { %3028 = vst [vmem:[%s4181_s4 + $0xa0] sm:$0xff] %v2952_v31   ;;  %v1763_v47 = vmul.f32 %v3824_v39, %v1663_v35 }
 0x1fd   :  { %v1831_v53 = vadd.f32 %v3859_v6, %v1763_v47 }
 0x1fe   :  { %v1495_v43 = vpop.f32.mrf.mxu2  ;;  %v1160_v49 = vpop.f32.mrf.mxu0 }
 0x1ff   :  { %v1664_v44 = vpop.f32.mrf.mxu3  ;;  %v1496_v48 = vadd.f32 %v1495_v43, %v1327_v42  ;;  %v1329_v50 = vpop.f32.mrf.mxu1  ;;  %v1895_v59 = vmax.f32 %v1831_v53, 0.0 }
 0x200   :  { %v1330_v55 = vadd.f32 %v1329_v50, %v1160_v49 }
 0x201   :  { %v1665_v52 = vadd.f32 %v1664_v44, %v1496_v48  ;;  %1199 = vmatmul.bf16.gmra.mxu0 %v2532_v45 }
 0x202   :  { %1368 = vmatmul.bf16.gmra.mxu1 %v2536_v46 }
 0x203   :  { %v1764_v54 = vmul.f32 %v3824_v39, %v1665_v52  ;;  %1537 = vmatmul.bf16.gmra.mxu2 %v2540_v51 }
 0x204   :  { %1706 = vmatmul.bf16.gmra.mxu3 %v2544_v36 }
 0x205   :  { %v1832_v56 = vadd.f32 %v3859_v6, %v1764_v54 }
 0x206   :  { %v1498_v57 = vpop.f32.mrf.mxu2  ;;  %v1162_v62 = vpop.f32.mrf.mxu0 }
 0x207   :  { %v1667_v58 = vpop.f32.mrf.mxu3  ;;  %v1896_v60 = vmax.f32 %v1832_v56, 0.0  ;;  %v1499_v61 = vadd.f32 %v1498_v57, %v1330_v55  ;;  %v1331_v63 = vpop.f32.mrf.mxu1 }
 0x208   :  { %v1332_v11 = vadd.f32 %v1331_v63, %v1162_v62 }
 0x209   :  { %v2957_v0 = vpack.c.bf16 %v1896_v60, %v1895_v59  ;;  %v1668_v4 = vadd.f32 %v1667_v58, %v1499_v61 }
 0x20b   :  { %3029 = vst [vmem:[%s4181_s4 + $0xa8] sm:$0xff] %v2957_v0   ;;  %v1765_v16 = vmul.f32 %v3824_v39, %v1668_v4 }
 0x20d   :  { %v1833_v24 = vadd.f32 %v3859_v6, %v1765_v16 }
 0x20e   :  { %v1500_v12 = vpop.f32.mrf.mxu2  ;;  %v1165_v18 = vpop.f32.mrf.mxu0 }
 0x20f   :  { %v1669_v13 = vpop.f32.mrf.mxu3  ;;  %v1501_v17 = vadd.f32 %v1500_v12, %v1332_v11  ;;  %v1334_v19 = vpop.f32.mrf.mxu1  ;;  %v1897_v30 = vmax.f32 %v1833_v24, 0.0 }
 0x210   :  { %v1335_v26 = vadd.f32 %v1334_v19, %v1165_v18 }
 0x211   :  { %v1670_v23 = vadd.f32 %v1669_v13, %v1501_v17  ;;  %1204 = vmatmul.bf16.gmra.mxu0 %v2548_v14 }
 0x212   :  { %1373 = vmatmul.bf16.gmra.mxu1 %v2552_v15 }
 0x213   :  { %v1766_v25 = vmul.f32 %v3824_v39, %v1670_v23  ;;  %1542 = vmatmul.bf16.gmra.mxu2 %v2556_v21 }
 0x214   :  { %1711 = vmatmul.bf16.gmra.mxu3 %v2560_v22 }
 0x215   :  { %v1834_v27 = vadd.f32 %v3859_v6, %v1766_v25 }
 0x216   :  { %v1503_v28 = vpop.f32.mrf.mxu2  ;;  %v1167_v33 = vpop.f32.mrf.mxu0 }
 0x217   :  { %v1672_v29 = vpop.f32.mrf.mxu3  ;;  %v1898_v31 = vmax.f32 %v1834_v27, 0.0  ;;  %v1504_v32 = vadd.f32 %v1503_v28, %v1335_v26  ;;  %v1336_v34 = vpop.f32.mrf.mxu1 }
 0x218   :  { %v1337_v38 = vadd.f32 %v1336_v34, %v1167_v33 }
 0x219   :  { %v2962_v35 = vpack.c.bf16 %v1898_v31, %v1897_v30  ;;  %v1673_v37 = vadd.f32 %v1672_v29, %v1504_v32 }
 0x21b   :  { %3030 = vst [vmem:[%s4181_s4 + $0xb0] sm:$0xff] %v2962_v35   ;;  %v1767_v20 = vmul.f32 %v3824_v39, %v1673_v37 }
 0x21d   :  { %v1835_v46 = vadd.f32 %v3859_v6, %v1767_v20 }
 0x21e   :  { %v1505_v40 = vpop.f32.mrf.mxu2  ;;  %v1170_v43 = vpop.f32.mrf.mxu0 }
 0x21f   :  { %v1674_v41 = vpop.f32.mrf.mxu3  ;;  %v1506_v42 = vadd.f32 %v1505_v40, %v1337_v38  ;;  %v1339_v44 = vpop.f32.mrf.mxu1  ;;  %v1899_v36 = vmax.f32 %v1835_v46, 0.0 }
 0x220   :  { %v1340_v48 = vadd.f32 %v1339_v44, %v1170_v43 }
 0x221   :  { %v1675_v45 = vadd.f32 %v1674_v41, %v1506_v42 }
 0x223   :  { %v1768_v47 = vmul.f32 %v3824_v39, %v1675_v45 }
 0x225   :  { %v1836_v49 = vadd.f32 %v3859_v6, %v1768_v47 }
 0x226   :  { %v1508_v50 = vpop.f32.mrf.mxu2  ;;  %v1172_v54 = vpop.f32.mrf.mxu0 }
 0x227   :  { %v1677_v51 = vpop.f32.mrf.mxu3  ;;  %v1900_v52 = vmax.f32 %v1836_v49, 0.0  ;;  %v1509_v53 = vadd.f32 %v1508_v50, %v1340_v48  ;;  %v1341_v55 = vpop.f32.mrf.mxu1 }
 0x228   :  { %v1342_v58 = vadd.f32 %v1341_v55, %v1172_v54 }
 0x229   :  { %v2967_v56 = vpack.c.bf16 %v1900_v52, %v1899_v36  ;;  %v1678_v57 = vadd.f32 %v1677_v51, %v1509_v53 }
 0x22b   :  { %3031 = vst [vmem:[%s4181_s4 + $0xb8] sm:$0xff] %v2967_v56   ;;  %v1769_v61 = vmul.f32 %v3824_v39, %v1678_v57 }
 0x22d   :  { %v1837_v2 = vadd.f32 %v3859_v6, %v1769_v61 }
 0x22e   :  { %v1510_v59 = vpop.f32.mrf.mxu2  ;;  %v1175_v63 = vpop.f32.mrf.mxu0 }
 0x22f   :  { %v1679_v60 = vpop.f32.mrf.mxu3  ;;  %v1511_v62 = vadd.f32 %v1510_v59, %v1342_v58  ;;  %v1344_v0 = vpop.f32.mrf.mxu1  ;;  %v1901_v9 = vmax.f32 %v1837_v2, 0.0 }
 0x230   :  { %v1345_v4 = vadd.f32 %v1344_v0, %v1175_v63 }
 0x231   :  { %v1680_v1 = vadd.f32 %v1679_v60, %v1511_v62 }
 0x233   :  { %v1770_v3 = vmul.f32 %v3824_v39, %v1680_v1 }
 0x235   :  { %v1838_v5 = vadd.f32 %v3859_v6, %v1770_v3 }
 0x236   :  { %v1513_v7 = vpop.f32.mrf.mxu2  ;;  %v1177_v12 = vpop.f32.mrf.mxu0 }
 0x237   :  { %v1682_v8 = vpop.f32.mrf.mxu3  ;;  %v1902_v10 = vmax.f32 %v1838_v5, 0.0  ;;  %v1514_v11 = vadd.f32 %v1513_v7, %v1345_v4  ;;  %v1346_v13 = vpop.f32.mrf.mxu1 }
 0x238   :  { %v1347_v16 = vadd.f32 %v1346_v13, %v1177_v12 }
 0x239   :  { %v2972_v14 = vpack.c.bf16 %v1902_v10, %v1901_v9  ;;  %v1683_v15 = vadd.f32 %v1682_v8, %v1514_v11 }
 0x23b   :  { %3032 = vst [vmem:[%s4181_s4 + $0xc0] sm:$0xff] %v2972_v14   ;;  %v1771_v19 = vmul.f32 %v3824_v39, %v1683_v15 }
 0x23d   :  { %v1839_v25 = vadd.f32 %v3859_v6, %v1771_v19 }
 0x23e   :  { %v1515_v17 = vpop.f32.mrf.mxu2  ;;  %v1180_v22 = vpop.f32.mrf.mxu0 }
 0x23f   :  { %v1684_v18 = vpop.f32.mrf.mxu3  ;;  %v1516_v21 = vadd.f32 %v1515_v17, %v1347_v16  ;;  %v1349_v23 = vpop.f32.mrf.mxu1  ;;  %v1903_v31 = vmax.f32 %v1839_v25, 0.0 }
 0x240   :  { %v1350_v27 = vadd.f32 %v1349_v23, %v1180_v22 }
 0x241   :  { %v1685_v24 = vadd.f32 %v1684_v18, %v1516_v21 }
 0x243   :  { %v1772_v26 = vmul.f32 %v3824_v39, %v1685_v24 }
 0x245   :  { %v1840_v28 = vadd.f32 %v3859_v6, %v1772_v26 }
 0x246   :  { %v1518_v29 = vpop.f32.mrf.mxu2  ;;  %v1182_v34 = vpop.f32.mrf.mxu0 }
 0x247   :  { %v1687_v30 = vpop.f32.mrf.mxu3  ;;  %v1904_v32 = vmax.f32 %v1840_v28, 0.0  ;;  %v1519_v33 = vadd.f32 %v1518_v29, %v1350_v27  ;;  %v1351_v35 = vpop.f32.mrf.mxu1 }
 0x248   :  { %v1352_v40 = vadd.f32 %v1351_v35, %v1182_v34 }
 0x249   :  { %v2977_v37 = vpack.c.bf16 %v1904_v32, %v1903_v31  ;;  %v1688_v38 = vadd.f32 %v1687_v30, %v1519_v33 }
 0x24b   :  { %3033 = vst [vmem:[%s4181_s4 + $0xc8] sm:$0xff] %v2977_v37   ;;  %v1773_v42 = vmul.f32 %v3824_v39, %v1688_v38 }
 0x24d   :  { %v1841_v47 = vadd.f32 %v3859_v6, %v1773_v42 }
 0x24e   :  { %v1520_v41 = vpop.f32.mrf.mxu2  ;;  %v1185_v44 = vpop.f32.mrf.mxu0 }
 0x24f   :  { %v1689_v20 = vpop.f32.mrf.mxu3  ;;  %v1521_v43 = vadd.f32 %v1520_v41, %v1352_v40  ;;  %v1354_v45 = vpop.f32.mrf.mxu1  ;;  %v1905_v52 = vmax.f32 %v1841_v47, 0.0 }
 0x250   :  { %v1355_v49 = vadd.f32 %v1354_v45, %v1185_v44 }
 0x251   :  { %v1690_v46 = vadd.f32 %v1689_v20, %v1521_v43 }
 0x253   :  { %v1774_v48 = vmul.f32 %v3824_v39, %v1690_v46 }
 0x255   :  { %v1842_v50 = vadd.f32 %v3859_v6, %v1774_v48 }
 0x256   :  { %v1523_v51 = vpop.f32.mrf.mxu2  ;;  %v1187_v55 = vpop.f32.mrf.mxu0 }
 0x257   :  { %v1692_v36 = vpop.f32.mrf.mxu3  ;;  %v1906_v53 = vmax.f32 %v1842_v50, 0.0  ;;  %v1524_v54 = vadd.f32 %v1523_v51, %v1355_v49  ;;  %v1356_v56 = vpop.f32.mrf.mxu1 }
 0x258   :  { %v1357_v59 = vadd.f32 %v1356_v56, %v1187_v55 }
 0x259   :  { %v2982_v57 = vpack.c.bf16 %v1906_v53, %v1905_v52  ;;  %v1693_v58 = vadd.f32 %v1692_v36, %v1524_v54 }
 0x25b   :  { %3034 = vst [vmem:[%s4181_s4 + $0xd0] sm:$0xff] %v2982_v57   ;;  %v1775_v62 = vmul.f32 %v3824_v39, %v1693_v58 }
 0x25d   :  { %v1843_v3 = vadd.f32 %v3859_v6, %v1775_v62 }
 0x25e   :  { %v1525_v60 = vpop.f32.mrf.mxu2  ;;  %v1190_v0 = vpop.f32.mrf.mxu0 }
 0x25f   :  { %v1694_v61 = vpop.f32.mrf.mxu3  ;;  %v1526_v63 = vadd.f32 %v1525_v60, %v1357_v59  ;;  %v1359_v1 = vpop.f32.mrf.mxu1  ;;  %v1907_v10 = vmax.f32 %v1843_v3, 0.0 }
 0x260   :  { %v1360_v5 = vadd.f32 %v1359_v1, %v1190_v0 }
 0x261   :  { %v1695_v2 = vadd.f32 %v1694_v61, %v1526_v63 }
 0x263   :  { %v1776_v4 = vmul.f32 %v3824_v39, %v1695_v2 }
 0x265   :  { %v1844_v7 = vadd.f32 %v3859_v6, %v1776_v4 }
 0x266   :  { %v1528_v8 = vpop.f32.mrf.mxu2  ;;  %v1192_v13 = vpop.f32.mrf.mxu0 }
 0x267   :  { %v1697_v9 = vpop.f32.mrf.mxu3  ;;  %v1908_v11 = vmax.f32 %v1844_v7, 0.0  ;;  %v1529_v12 = vadd.f32 %v1528_v8, %v1360_v5  ;;  %v1361_v14 = vpop.f32.mrf.mxu1 }
 0x268   :  { %v1362_v17 = vadd.f32 %v1361_v14, %v1192_v13 }
 0x269   :  { %v2987_v15 = vpack.c.bf16 %v1908_v11, %v1907_v10  ;;  %v1698_v16 = vadd.f32 %v1697_v9, %v1529_v12 }
 0x26b   :  { %3035 = vst [vmem:[%s4181_s4 + $0xd8] sm:$0xff] %v2987_v15   ;;  %v1777_v21 = vmul.f32 %v3824_v39, %v1698_v16 }
 0x26d   :  { %v1845_v26 = vadd.f32 %v3859_v6, %v1777_v21 }
 0x26e   :  { %v1530_v18 = vpop.f32.mrf.mxu2  ;;  %v1195_v23 = vpop.f32.mrf.mxu0 }
 0x26f   :  { %v1699_v19 = vpop.f32.mrf.mxu3  ;;  %v1531_v22 = vadd.f32 %v1530_v18, %v1362_v17  ;;  %v1364_v24 = vpop.f32.mrf.mxu1  ;;  %v1909_v32 = vmax.f32 %v1845_v26, 0.0 }
 0x270   :  { %v1365_v28 = vadd.f32 %v1364_v24, %v1195_v23 }
 0x271   :  { %v1700_v25 = vadd.f32 %v1699_v19, %v1531_v22 }
 0x273   :  { %v1778_v27 = vmul.f32 %v3824_v39, %v1700_v25 }
 0x275   :  { %v1846_v29 = vadd.f32 %v3859_v6, %v1778_v27 }
 0x276   :  { %v1533_v30 = vpop.f32.mrf.mxu2  ;;  %v1197_v35 = vpop.f32.mrf.mxu0 }
 0x277   :  { %v1702_v31 = vpop.f32.mrf.mxu3  ;;  %v1910_v33 = vmax.f32 %v1846_v29, 0.0  ;;  %v1534_v34 = vadd.f32 %v1533_v30, %v1365_v28  ;;  %v1366_v37 = vpop.f32.mrf.mxu1 }
 0x278   :  { %v1367_v41 = vadd.f32 %v1366_v37, %v1197_v35 }
 0x279   :  { %v2992_v38 = vpack.c.bf16 %v1910_v33, %v1909_v32  ;;  %v1703_v40 = vadd.f32 %v1702_v31, %v1534_v34 }
 0x27b   :  { %3036 = vst [vmem:[%s4181_s4 + $0xe0] sm:$0xff] %v2992_v38   ;;  %v1779_v43 = vmul.f32 %v3824_v39, %v1703_v40 }
 0x27d   :  { %v1847_v48 = vadd.f32 %v3859_v6, %v1779_v43 }
 0x27e   :  { %v1535_v20 = vpop.f32.mrf.mxu2  ;;  %v1200_v45 = vpop.f32.mrf.mxu0 }
 0x27f   :  { %v1704_v42 = vpop.f32.mrf.mxu3  ;;  %v1536_v44 = vadd.f32 %v1535_v20, %v1367_v41  ;;  %v1369_v46 = vpop.f32.mrf.mxu1  ;;  %v1911_v53 = vmax.f32 %v1847_v48, 0.0 }
 0x280   :  { %v1370_v50 = vadd.f32 %v1369_v46, %v1200_v45 }
 0x281   :  { %v1705_v47 = vadd.f32 %v1704_v42, %v1536_v44 }
 0x283   :  { %v1780_v49 = vmul.f32 %v3824_v39, %v1705_v47  ;;  %v3044_v39 = vld [vmem:[%s4179_s2] ss:$0 sm:$0xff] }
 0x285   :  { %v1848_v51 = vadd.f32 %v3859_v6, %v1780_v49 }
 0x286   :  { %v1538_v36 = vpop.f32.mrf.mxu2  ;;  %v1202_v56 = vpop.f32.mrf.mxu0 }
 0x287   :  { %v1707_v52 = vpop.f32.mrf.mxu3  ;;  %v1912_v54 = vmax.f32 %v1848_v51, 0.0  ;;  %v1539_v55 = vadd.f32 %v1538_v36, %v1370_v50  ;;  %v1371_v57 = vpop.f32.mrf.mxu1 }
 0x288   :  { %v1372_v60 = vadd.f32 %v1371_v57, %v1202_v56 }
 0x289   :  { %v2997_v58 = vpack.c.bf16 %v1912_v54, %v1911_v53  ;;  %v1708_v59 = vadd.f32 %v1707_v52, %v1539_v55 }
 0x28b   :  { %3037 = vst [vmem:[%s4181_s4 + $0xe8] sm:$0xff] %v2997_v58   ;;  %v1781_v63 = vmul.f32 %v3044_v39, %v1708_v59 }
 0x28d   :  { %v1849_v4 = vadd.f32 %v3859_v6, %v1781_v63 }
 0x28e   :  { %v1540_v61 = vpop.f32.mrf.mxu2  ;;  %v1205_v1 = vpop.f32.mrf.mxu0 }
 0x28f   :  { %v1709_v62 = vpop.f32.mrf.mxu3  ;;  %v1541_v0 = vadd.f32 %v1540_v61, %v1372_v60  ;;  %v1374_v2 = vpop.f32.mrf.mxu1  ;;  %v1913_v11 = vmax.f32 %v1849_v4, 0.0 }
 0x290   :  { %v1375_v7 = vadd.f32 %v1374_v2, %v1205_v1 }
 0x291   :  { %v1710_v3 = vadd.f32 %v1709_v62, %v1541_v0 }
 0x293   :  { %v1782_v5 = vmul.f32 %v3044_v39, %v1710_v3 }
 0x295   :  { %v1850_v8 = vadd.f32 %v3859_v6, %v1782_v5 }
 0x296   :  { %v1543_v9 = vpop.f32.mrf.mxu2  ;;  %v1207_v15 = vpop.f32.mrf.mxu0 }
 0x297   :  { %v1712_v10 = vpop.f32.mrf.mxu3  ;;  %v1914_v12 = vmax.f32 %v1850_v8, 0.0  ;;  %v1544_v13 = vadd.f32 %v1543_v9, %v1375_v7  ;;  %v1376_v16 = vpop.f32.mrf.mxu1 }
 0x298   :  { %v1377_v18 = vadd.f32 %v1376_v16, %v1207_v15 }
 0x299   :  { %v3002_v14 = vpack.c.bf16 %v1914_v12, %v1913_v11  ;;  %v1713_v17 = vadd.f32 %v1712_v10, %v1544_v13 }
 0x29b   :  { %3038 = vst [vmem:[%s4181_s4 + $0xf0] sm:$0xff] %v3002_v14   ;;  %v1783_v21 = vmul.f32 %v3044_v39, %v1713_v17 }
 0x29d   :  { %v1851_v25 = vadd.f32 %v3859_v6, %v1783_v21 }
 0x29e   :  { %v1545_v19 = vpop.f32.mrf.mxu2 }
 0x29f   :  { %v1546_v22 = vadd.f32 %v1545_v19, %v1377_v18  ;;  %v1714_v23 = vpop.f32.mrf.mxu3  ;;  %v1915_v28 = vmax.f32 %v1851_v25, 0.0 }
 0x2a1   :  { %v1715_v24 = vadd.f32 %v1714_v23, %v1546_v22 }
 0x2a3   :  { %v1784_v26 = vmul.f32 %v3044_v39, %v1715_v24 }
 0x2a5   :  { %v1852_v27 = vadd.f32 %v3859_v6, %v1784_v26 }
 0x2a7   :  { %v1916_v29 = vmax.f32 %v1852_v27, 0.0 }
 0x2a9   :  { %v3007_v30 = vpack.c.bf16 %v1916_v29, %v1915_v28 }
 0x2ab   :  { %3039 = vst [vmem:[%s4181_s4 + $0xf8] sm:$0xff] %v3007_v30  }

// kernel: _lambda_.23
= control target key start
LH: loop header
LB: loop body
LE: loop exit
PB: predicated region body
PF: predicated region fallthrough
CT: control target
= control target key end

     0   :  { %s3338_s15 = smov 0   ;;  %s3894_s0 = inlined_call_operand.vmem [shape: bf16[1024,512], index: 0, kind: input, shape index: {}]   ;;  %s3895_s1 = inlined_call_operand.vmem [shape: bf16[512,128], index: 1, kind: input, shape index: {}]   ;;  %s3896_s2 = inlined_call_operand.vmem [shape: f32[1,128], index: 2, kind: input, shape index: {}]   ;;  %s3897_s3 = inlined_call_operand.vmem [shape: f32[1,128], index: 3, kind: input, shape index: {}]   ;;  %s3898_s4 = inlined_call_operand.vmem [shape: bf16[1024,128], index: 4, kind: output, shape index: {}]  }
   0x1 LB: > { %s2288_s16 = sadd.s32 4294967295, %s3311_s15   ;;  %p2292_p0 = scmp.ge.s32.totalorder %s3311_s15, 1  ;;  %s3311_s15 = sphi %s3338_s15, %s14_s15  }
   0x2   : > { %p164_p1 = scmp.lt.s32.totalorder %s3311_s15, 3 }
   0x4   : > { %p165_p2 = pnand %p2292_p0, %p164_p1 }
   0x5   : > { %s2293_s17 = sshll.u32 (!%p165_p2), %s2288_s16, 6 }
   0x6   : > { %168 = sbr.rel (%p165_p2) target bundleno = 694 (0x2b6), region = 36  ;;  %p192_p3 = scmp.lt.s32.totalorder (!%p165_p2), %s2293_s17, 127 }
   0xb   : > { %v3076_v0 = vld [vmem:[%s3895_s1 + $0x38] sm:$0xff]  ;;  %v3075_v4 = vld [vmem:[%s3895_s1 + $0x30] sm:$0xff]  ;;  %v3074_v8 = vld [vmem:[%s3895_s1 + $0x28] sm:$0xff]  ;;  %s3900_s17 = smov (!%p192_p3, %s2293_s17), 127 }
   0xc   : > { %v3084_v1 = vld [vmem:[%s3895_s1 + $0x78] sm:$0xff]  ;;  %1228 = vmatpush.bf16.msra.mxu0 %v3076_v0  ;;  %v3083_v5 = vld [vmem:[%s3895_s1 + $0x70] sm:$0xff]  ;;  %v3082_v9 = vld [vmem:[%s3895_s1 + $0x68] sm:$0xff]  ;;  %s2940_s18 = sshll.u32 %s3900_s17, 4 }
   0xd   : > { %v3092_v2 = vld [vmem:[%s3895_s1 + $0xb8] sm:$0xff]  ;;  %1397 = vmatpush.bf16.msra.mxu1 %v3084_v1  ;;  %v3091_v6 = vld [vmem:[%s3895_s1 + $0xb0] sm:$0xff]  ;;  %v3090_v10 = vld [vmem:[%s3895_s1 + $0xa8] sm:$0xff]  ;;  %s3430_s25 = scalar_lea.vmem %s3894_s0, %s2940_s18  ;;  %s2297_s18 = sshll.u32 %s3900_s17, 2 }
   0xe   : > { %v3100_v3 = vld [vmem:[%s3895_s1 + $0xf8] sm:$0xff]  ;;  %1566 = vmatpush.bf16.msra.mxu2 %v3092_v2  ;;  %v3099_v7 = vld [vmem:[%s3895_s1 + $0xf0] sm:$0xff]  ;;  %v3098_v11 = vld [vmem:[%s3895_s1 + $0xe8] sm:$0xff]  ;;  %s3548_s21 = scalar_lea.vmem %s3898_s4, %s2297_s18 }
   0xf   : > { %1735 = vmatpush.bf16.msra.mxu3 %v3100_v3  ;;  %v3073_v12 = vld [vmem:[%s3895_s1 + $0x20] sm:$0xff]  ;;  %v3072_v16 = vld [vmem:[%s3895_s1 + $0x18] sm:$0xff]  ;;  %v3071_v20 = vld [vmem:[%s3895_s1 + $0x10] sm:$0xff] }
  0x10   : > { %1229 = vmatpush.bf16.msra.mxu0 %v3075_v4  ;;  %v3081_v13 = vld [vmem:[%s3895_s1 + $0x60] sm:$0xff]  ;;  %v3080_v17 = vld [vmem:[%s3895_s1 + $0x58] sm:$0xff]  ;;  %v3079_v21 = vld [vmem:[%s3895_s1 + $0x50] sm:$0xff] }
  0x11   : > { %1398 = vmatpush.bf16.msra.mxu1 %v3083_v5  ;;  %v3089_v14 = vld [vmem:[%s3895_s1 + $0xa0] sm:$0xff]  ;;  %v3088_v18 = vld [vmem:[%s3895_s1 + $0x98] sm:$0xff]  ;;  %v3087_v22 = vld [vmem:[%s3895_s1 + $0x90] sm:$0xff] }
  0x12   : > { %1567 = vmatpush.bf16.msra.mxu2 %v3091_v6  ;;  %v3097_v15 = vld [vmem:[%s3895_s1 + $0xe0] sm:$0xff]  ;;  %v3096_v19 = vld [vmem:[%s3895_s1 + $0xd8] sm:$0xff]  ;;  %v3095_v23 = vld [vmem:[%s3895_s1 + $0xd0] sm:$0xff] }
  0x13   : > { %1736 = vmatpush.bf16.msra.mxu3 %v3099_v7  ;;  %v3070_v24 = vld [vmem:[%s3895_s1 + $0x8] sm:$0xff]  ;;  %v3069_v28 = vld [vmem:[%s3895_s1] sm:$0xff]  ;;  %v2943_v33 = vld [vmem:[%s3430_s25 + $0xc] sm:$0xf0] }
  0x14   : > { %1230 = vmatpush.bf16.msra.mxu0 %v3074_v8  ;;  %v3078_v25 = vld [vmem:[%s3895_s1 + $0x48] sm:$0xff]  ;;  %v3077_v29 = vld [vmem:[%s3895_s1 + $0x40] sm:$0xff]  ;;  %v2302_v35 = vld [vmem:[%s3430_s25 + $0x10] sm:$0xf0] }
  0x15   : > { %1399 = vmatpush.bf16.msra.mxu1 %v3082_v9  ;;  %v3086_v26 = vld [vmem:[%s3895_s1 + $0x88] sm:$0xff]  ;;  %v3085_v30 = vld [vmem:[%s3895_s1 + $0x80] sm:$0xff]  ;;  %v2944_v37 = vld [vmem:[%s3430_s25 + $0x14] sm:$0xf0] }
  0x16   : > { %1568 = vmatpush.bf16.msra.mxu2 %v3090_v10  ;;  %v3094_v27 = vld [vmem:[%s3895_s1 + $0xc8] sm:$0xff]  ;;  %v3093_v31 = vld [vmem:[%s3895_s1 + $0xc0] sm:$0xff]  ;;  %v2310_v39 = vld [vmem:[%s3430_s25 + $0x18] sm:$0xf0] }
  0x17   : > { %1737 = vmatpush.bf16.msra.mxu3 %v3098_v11  ;;  %v2300_v32 = vld [vmem:[%s3430_s25] sm:$0xf]  ;;  %v2941_v34 = vld [vmem:[%s3430_s25 + $0x4] sm:$0xf]  ;;  %v2308_v36 = vld [vmem:[%s3430_s25 + $0x8] sm:$0xf] }
  0x18   : > { %1231 = vmatpush.bf16.msra.mxu0 %v3073_v12  ;;  %v2942_v38 = vld [vmem:[%s3430_s25 + $0xc] sm:$0xf]  ;;  %v2301_v40 = vor.u32 %v2943_v33, %v2300_v32  ;;  %v2305_v41 = vor.u32 %v2941_v34, %v2302_v35  ;;  %v2309_v42 = vor.u32 %v2944_v37, %v2308_v36  ;;  %v2316_v44 = vld [vmem:[%s3430_s25 + $0x20] sm:$0xf]  ;;  %v2947_v45 = vld [vmem:[%s3430_s25 + $0x2c] sm:$0xf0] }
  0x19   : > { %1400 = vmatpush.bf16.msra.mxu1 %v3081_v13  ;;  %v2313_v43 = vor.u32 %v2942_v38, %v2310_v39  ;;  %v2945_v46 = vld [vmem:[%s3430_s25 + $0x24] sm:$0xf]  ;;  %v2318_v47 = vld [vmem:[%s3430_s25 + $0x30] sm:$0xf0]  ;;  %v2324_v48 = vld [vmem:[%s3430_s25 + $0x28] sm:$0xf]  ;;  %v2317_v52 = vor.u32 %v2947_v45, %v2316_v44 }
  0x1a   : > { %1569 = vmatpush.bf16.msra.mxu2 %v3089_v14  ;;  %v2948_v49 = vld [vmem:[%s3430_s25 + $0x34] sm:$0xf0]  ;;  %v2946_v50 = vld [vmem:[%s3430_s25 + $0x2c] sm:$0xf]  ;;  %v2326_v51 = vld [vmem:[%s3430_s25 + $0x38] sm:$0xf0]  ;;  %v2321_v53 = vor.u32 %v2945_v46, %v2318_v47 }
  0x1b   : > { %1738 = vmatpush.bf16.msra.mxu3 %v3097_v15  ;;  %v2325_v54 = vor.u32 %v2948_v49, %v2324_v48  ;;  %v2329_v55 = vor.u32 %v2946_v50, %v2326_v51  ;;  %v2332_v56 = vld [vmem:[%s3430_s25 + $0x40] sm:$0xf]  ;;  %v2951_v57 = vld [vmem:[%s3430_s25 + $0x4c] sm:$0xf0]  ;;  %v2949_v58 = vld [vmem:[%s3430_s25 + $0x44] sm:$0xf] }
  0x1c   : > { %1232 = vmatpush.bf16.msra.mxu0 %v3072_v16  ;;  %v2334_v59 = vld [vmem:[%s3430_s25 + $0x50] sm:$0xf0]  ;;  %v2340_v60 = vld [vmem:[%s3430_s25 + $0x48] sm:$0xf]  ;;  %v2952_v61 = vld [vmem:[%s3430_s25 + $0x54] sm:$0xf0]  ;;  %v2333_v0 = vor.u32 %v2951_v57, %v2332_v56 }
  0x1d   : > { %1401 = vmatpush.bf16.msra.mxu1 %v3080_v17  ;;  %v2950_v62 = vld [vmem:[%s3430_s25 + $0x4c] sm:$0xf]  ;;  %v2342_v63 = vld [vmem:[%s3430_s25 + $0x58] sm:$0xf0]  ;;  %v2337_v1 = vor.u32 %v2949_v58, %v2334_v59  ;;  %v2341_v2 = vor.u32 %v2952_v61, %v2340_v60  ;;  %v2348_v4 = vld [vmem:[%s3430_s25 + $0x60] sm:$0xf] }
  0x1e   : > { %1570 = vmatpush.bf16.msra.mxu2 %v3088_v18  ;;  %v2345_v3 = vor.u32 %v2950_v62, %v2342_v63  ;;  %v2955_v5 = vld [vmem:[%s3430_s25 + $0x6c] sm:$0xf0]  ;;  %v2953_v6 = vld [vmem:[%s3430_s25 + $0x64] sm:$0xf]  ;;  %v2350_v7 = vld [vmem:[%s3430_s25 + $0x70] sm:$0xf0] }
  0x1f   : > { %1739 = vmatpush.bf16.msra.mxu3 %v3096_v19  ;;  %v2356_v8 = vld [vmem:[%s3430_s25 + $0x68] sm:$0xf]  ;;  %v2956_v9 = vld [vmem:[%s3430_s25 + $0x74] sm:$0xf0]  ;;  %v2954_v10 = vld [vmem:[%s3430_s25 + $0x6c] sm:$0xf]  ;;  %v2349_v12 = vor.u32 %v2955_v5, %v2348_v4  ;;  %v2353_v13 = vor.u32 %v2953_v6, %v2350_v7 }
  0x20   : > { %1233 = vmatpush.bf16.msra.mxu0 %v3071_v20  ;;  %v2358_v11 = vld [vmem:[%s3430_s25 + $0x78] sm:$0xf0]  ;;  %v2357_v14 = vor.u32 %v2956_v9, %v2356_v8  ;;  %v2364_v16 = vld [vmem:[%s3430_s25 + $0x80] sm:$0xf]  ;;  %v2959_v17 = vld [vmem:[%s3430_s25 + $0x8c] sm:$0xf0] }
  0x21   : > { %1402 = vmatpush.bf16.msra.mxu1 %v3079_v21  ;;  %v2361_v15 = vor.u32 %v2954_v10, %v2358_v11  ;;  %v2957_v18 = vld [vmem:[%s3430_s25 + $0x84] sm:$0xf]  ;;  %v2366_v19 = vld [vmem:[%s3430_s25 + $0x90] sm:$0xf0]  ;;  %v2372_v20 = vld [vmem:[%s3430_s25 + $0x88] sm:$0xf] }
  0x22   : > { %1571 = vmatpush.bf16.msra.mxu2 %v3087_v22  ;;  %v2960_v21 = vld [vmem:[%s3430_s25 + $0x94] sm:$0xf0]  ;;  %v2958_v22 = vld [vmem:[%s3430_s25 + $0x8c] sm:$0xf]  ;;  %v2388_v32 = vld [vmem:[%s3430_s25 + $0xa8] sm:$0xf] }
  0x23   : > { %1740 = vmatpush.bf16.msra.mxu3 %v3095_v23  ;;  %v2374_v23 = vld [vmem:[%s3430_s25 + $0x98] sm:$0xf0]  ;;  %v2964_v33 = vld [vmem:[%s3430_s25 + $0xb4] sm:$0xf0]  ;;  %v2962_v34 = vld [vmem:[%s3430_s25 + $0xac] sm:$0xf] }
  0x24   : > { %1234 = vmatpush.bf16.msra.mxu0 %v3070_v24  ;;  %v2365_v24 = vor.u32 %v2959_v17, %v2364_v16  ;;  %v2390_v35 = vld [vmem:[%s3430_s25 + $0xb8] sm:$0xf0]  ;;  %v2389_v38 = vor.u32 %v2964_v33, %v2388_v32  ;;  %v2404_v44 = vld [vmem:[%s3430_s25 + $0xc8] sm:$0xf]  ;;  %v2968_v45 = vld [vmem:[%s3430_s25 + $0xd4] sm:$0xf0] }
  0x25   : > { %1403 = vmatpush.bf16.msra.mxu1 %v3078_v25  ;;  %v2369_v25 = vor.u32 %v2957_v18, %v2366_v19  ;;  %v2393_v39 = vor.u32 %v2962_v34, %v2390_v35  ;;  %v2966_v46 = vld [vmem:[%s3430_s25 + $0xcc] sm:$0xf]  ;;  %v2406_v47 = vld [vmem:[%s3430_s25 + $0xd8] sm:$0xf0]  ;;  %v2405_v50 = vor.u32 %v2968_v45, %v2404_v44  ;;  %v2420_v56 = vld [vmem:[%s3430_s25 + $0xe8] sm:$0xf] }
  0x26   : > { %1572 = vmatpush.bf16.msra.mxu2 %v3086_v26  ;;  %v2373_v26 = vor.u32 %v2960_v21, %v2372_v20  ;;  %v2409_v51 = vor.u32 %v2966_v46, %v2406_v47  ;;  %v2972_v57 = vld [vmem:[%s3430_s25 + $0xf4] sm:$0xf0]  ;;  %v2970_v58 = vld [vmem:[%s3430_s25 + $0xec] sm:$0xf]  ;;  %v2422_v59 = vld [vmem:[%s3430_s25 + $0xf8] sm:$0xf0] }
  0x27   : > { %1741 = vmatpush.bf16.msra.mxu3 %v3094_v27  ;;  %v2377_v27 = vor.u32 %v2958_v22, %v2374_v23  ;;  %v2421_v62 = vor.u32 %v2972_v57, %v2420_v56  ;;  %v2425_v63 = vor.u32 %v2970_v58, %v2422_v59  ;;  %v2436_v4 = vld [vmem:[%s3430_s25 + $0x108] sm:$0xf]  ;;  %v2976_v5 = vld [vmem:[%s3430_s25 + $0x114] sm:$0xf0]  ;;  %v2974_v6 = vld [vmem:[%s3430_s25 + $0x10c] sm:$0xf] }
  0x28   : > { %1235 = vmatpush.bf16.msra.mxu0 %v3069_v28  ;;  %v2380_v28 = vld [vmem:[%s3430_s25 + $0xa0] sm:$0xf]  ;;  %v2438_v7 = vld [vmem:[%s3430_s25 + $0x118] sm:$0xf0]  ;;  %v2979_v22 = vld [vmem:[%s3430_s25 + $0x12c] sm:$0xf0] }
  0x29   : > { %1404 = vmatpush.bf16.msra.mxu1 %v3077_v29  ;;  %v2963_v29 = vld [vmem:[%s3430_s25 + $0xac] sm:$0xf0]  ;;  %v3525_v20 = vld [vmem:[%s3896_s2] ss:$0 sm:$0xff]  ;;  %v2981_v58 = vld [vmem:[%s3430_s25 + $0x144] sm:$0xf] }
  0x2a   : > { %1573 = vmatpush.bf16.msra.mxu2 %v3085_v30  ;;  %v2961_v30 = vld [vmem:[%s3430_s25 + $0xa4] sm:$0xf]  ;;  %v2381_v36 = vor.u32 %v2963_v29, %v2380_v28  ;;  %v2444_v21 = vld [vmem:[%s3430_s25 + $0x120] sm:$0xf]  ;;  %v2978_v28 = vld [vmem:[%s3430_s25 + $0x12c] sm:$0xf] }
  0x2b   : > { %1742 = vmatpush.bf16.msra.mxu3 %v3093_v31  ;;  %1236 = vmatmul.bf16.vlgmr.msra.gmra.mxu0 %v2301_v40  ;;  %v2382_v31 = vld [vmem:[%s3430_s25 + $0xb0] sm:$0xf0]  ;;  %v2396_v40 = vld [vmem:[%s3430_s25 + $0xc0] sm:$0xf]  ;;  %v2454_v29 = vld [vmem:[%s3430_s25 + $0x138] sm:$0xf0]  ;;  %v2445_v33 = vor.u32 %v2979_v22, %v2444_v21 }
  0x2c   : > { %1405 = vmatmul.bf16.vlgmr.msra.gmra.mxu1 %v2305_v41  ;;  %v2385_v37 = vor.u32 %v2961_v30, %v2382_v31  ;;  %v2967_v41 = vld [vmem:[%s3430_s25 + $0xcc] sm:$0xf0]  ;;  %v2462_v59 = vld [vmem:[%s3430_s25 + $0x150] sm:$0xf0] }
  0x2d   : > { %1574 = vmatmul.bf16.vlgmr.msra.gmra.mxu2 %v2309_v42  ;;  %v2965_v42 = vld [vmem:[%s3430_s25 + $0xc4] sm:$0xf]  ;;  %v2397_v48 = vor.u32 %v2967_v41, %v2396_v40  ;;  %v2457_v41 = vor.u32 %v2978_v28, %v2454_v29  ;;  %v2983_v56 = vld [vmem:[%s3430_s25 + $0x14c] sm:$0xf0]  ;;  %v2478_v29 = vld [vmem:[%s3430_s25 + $0x170] sm:$0xf0] }
  0x2e   : > { %1743 = vmatmul.bf16.vlgmr.msra.gmra.mxu3 %v2313_v43  ;;  %v2398_v43 = vld [vmem:[%s3430_s25 + $0xd0] sm:$0xf0] }
  0x2f   : > { %v2401_v49 = vor.u32 %v2965_v42, %v2398_v43 }
  0x3b   : > { %1241 = vmatmul.bf16.gmra.mxu0 %v2317_v52  ;;  %v2412_v52 = vld [vmem:[%s3430_s25 + $0xe0] sm:$0xf] }
  0x3c   : > { %1410 = vmatmul.bf16.gmra.mxu1 %v2321_v53  ;;  %v2971_v53 = vld [vmem:[%s3430_s25 + $0xec] sm:$0xf0] }
  0x3d   : > { %1579 = vmatmul.bf16.gmra.mxu2 %v2325_v54  ;;  %v2969_v54 = vld [vmem:[%s3430_s25 + $0xe4] sm:$0xf]  ;;  %v2413_v60 = vor.u32 %v2971_v53, %v2412_v52 }
  0x3e   : > { %1748 = vmatmul.bf16.gmra.mxu3 %v2329_v55  ;;  %v2414_v55 = vld [vmem:[%s3430_s25 + $0xf0] sm:$0xf0] }
  0x3f   : > { %v2417_v61 = vor.u32 %v2969_v54, %v2414_v55  ;;  %v2460_v55 = vld [vmem:[%s3430_s25 + $0x140] sm:$0xf] }
  0x4b   : > { %1246 = vmatmul.bf16.gmra.mxu0 %v2333_v0  ;;  %v2428_v0 = vld [vmem:[%s3430_s25 + $0x100] sm:$0xf] }
  0x4c   : > { %1415 = vmatmul.bf16.gmra.mxu1 %v2337_v1  ;;  %v2975_v1 = vld [vmem:[%s3430_s25 + $0x10c] sm:$0xf0] }
  0x4d   : > { %1584 = vmatmul.bf16.gmra.mxu2 %v2341_v2  ;;  %v2973_v2 = vld [vmem:[%s3430_s25 + $0x104] sm:$0xf]  ;;  %v2429_v8 = vor.u32 %v2975_v1, %v2428_v0 }
  0x4e   : > { %1753 = vmatmul.bf16.gmra.mxu3 %v2345_v3  ;;  %v2430_v3 = vld [vmem:[%s3430_s25 + $0x110] sm:$0xf0] }
  0x4f   : > { %v2433_v9 = vor.u32 %v2973_v2, %v2430_v3  ;;  %v2461_v3 = vor.u32 %v2983_v56, %v2460_v55 }
  0x5b   : > { %1251 = vmatmul.bf16.gmra.mxu0 %v2349_v12  ;;  %v2437_v12 = vor.u32 %v2976_v5, %v2436_v4  ;;  %v2465_v4 = vor.u32 %v2981_v58, %v2462_v59  ;;  %v2492_v59 = vld [vmem:[%s3430_s25 + $0x180] sm:$0xf] }
  0x5c   : > { %1420 = vmatmul.bf16.gmra.mxu1 %v2353_v13  ;;  %v2441_v13 = vor.u32 %v2974_v6, %v2438_v7 }
  0x5d   : > { %1589 = vmatmul.bf16.gmra.mxu2 %v2357_v14 }
  0x5e   : > { %1758 = vmatmul.bf16.gmra.mxu3 %v2361_v15 }
  0x6b   : > { %1256 = vmatmul.bf16.gmra.mxu0 %v2365_v24  ;;  %v2977_v24 = vld [vmem:[%s3430_s25 + $0x124] sm:$0xf] }
  0x6c   : > { %1425 = vmatmul.bf16.gmra.mxu1 %v2369_v25  ;;  %v2446_v25 = vld [vmem:[%s3430_s25 + $0x130] sm:$0xf0] }
  0x6d   : > { %1594 = vmatmul.bf16.gmra.mxu2 %v2373_v26  ;;  %v2452_v26 = vld [vmem:[%s3430_s25 + $0x128] sm:$0xf]  ;;  %v2449_v34 = vor.u32 %v2977_v24, %v2446_v25  ;;  %v2476_v25 = vld [vmem:[%s3430_s25 + $0x160] sm:$0xf] }
  0x6e   : > { %1763 = vmatmul.bf16.gmra.mxu3 %v2377_v27  ;;  %v2980_v27 = vld [vmem:[%s3430_s25 + $0x134] sm:$0xf0] }
  0x6f   : > { %v2453_v40 = vor.u32 %v2980_v27, %v2452_v26  ;;  %v2987_v26 = vld [vmem:[%s3430_s25 + $0x16c] sm:$0xf0]  ;;  %v2985_v27 = vld [vmem:[%s3430_s25 + $0x164] sm:$0xf] }
  0x7b   : > { %1261 = vmatmul.bf16.gmra.mxu0 %v2381_v36  ;;  %v3539_v36 = vld [vmem:[%s3897_s3] ss:$0 sm:$0xff] }
  0x7c   : > { %1430 = vmatmul.bf16.gmra.mxu1 %v2385_v37 }
  0x7d   : > { %1599 = vmatmul.bf16.gmra.mxu2 %v2389_v38 }
  0x7e   : > { %1768 = vmatmul.bf16.gmra.mxu3 %v2393_v39 }
  0x8b   : > { %1266 = vmatmul.bf16.gmra.mxu0 %v2397_v48 }
  0x8c   : > { %1435 = vmatmul.bf16.gmra.mxu1 %v2401_v49 }
  0x8d   : > { %1604 = vmatmul.bf16.gmra.mxu2 %v2405_v50 }
  0x8e   : > { %1773 = vmatmul.bf16.gmra.mxu3 %v2409_v51 }
  0x9b   : > { %1271 = vmatmul.bf16.gmra.mxu0 %v2413_v60  ;;  %v2468_v60 = vld [vmem:[%s3430_s25 + $0x148] sm:$0xf] }
  0x9c   : > { %1440 = vmatmul.bf16.gmra.mxu1 %v2417_v61  ;;  %v2984_v61 = vld [vmem:[%s3430_s25 + $0x154] sm:$0xf0] }
  0x9d   : > { %1609 = vmatmul.bf16.gmra.mxu2 %v2421_v62  ;;  %v2982_v62 = vld [vmem:[%s3430_s25 + $0x14c] sm:$0xf] }
  0x9e   : > { %1778 = vmatmul.bf16.gmra.mxu3 %v2425_v63  ;;  %v2470_v63 = vld [vmem:[%s3430_s25 + $0x158] sm:$0xf0] }
  0xa8   : > { %v1237_v10 = vpop.f32.mrf.mxu0 }
  0xa9   : > { %v1406_v11 = vpop.f32.mrf.mxu1 }
  0xaa   : > { %v1407_v14 = vadd.f32 %v1406_v11, %v1237_v10  ;;  %v2473_v10 = vor.u32 %v2982_v62, %v2470_v63  ;;  %v2494_v63 = vld [vmem:[%s3430_s25 + $0x190] sm:$0xf0] }
  0xab   : > { %1276 = vmatmul.bf16.gmra.mxu0 %v2429_v8 }
  0xac   : > { %1445 = vmatmul.bf16.gmra.mxu1 %v2433_v9  ;;  %v2469_v9 = vor.u32 %v2984_v61, %v2468_v60  ;;  %v2991_v60 = vld [vmem:[%s3430_s25 + $0x18c] sm:$0xf0]  ;;  %v2989_v61 = vld [vmem:[%s3430_s25 + $0x184] sm:$0xf] }
  0xad   : > { %1614 = vmatmul.bf16.gmra.mxu2 %v2437_v12 }
  0xae   : > { %1783 = vmatmul.bf16.gmra.mxu3 %v2441_v13 }
  0xb0   : > { %v1575_v15 = vpop.f32.mrf.mxu2  ;;  %v1239_v18 = vpop.f32.mrf.mxu0 }
  0xb1   : > { %v1744_v16 = vpop.f32.mrf.mxu3  ;;  %v1576_v17 = vadd.f32 %v1575_v15, %v1407_v14  ;;  %v1408_v19 = vpop.f32.mrf.mxu1 }
  0xb2   : > { %v1409_v30 = vadd.f32 %v1408_v19, %v1239_v18 }
  0xb3   : > { %v1745_v23 = vadd.f32 %v1744_v16, %v1576_v17 }
  0xb5   : > { %v1908_v35 = vmul.f32 %v3525_v20, %v1745_v23 }
  0xb7   : > { %v1976_v43 = vadd.f32 %v3539_v36, %v1908_v35 }
  0xb8   : > { %v1577_v31 = vpop.f32.mrf.mxu2  ;;  %v1242_v38 = vpop.f32.mrf.mxu0 }
  0xb9   : > { %v1746_v32 = vpop.f32.mrf.mxu3  ;;  %v1578_v37 = vadd.f32 %v1577_v31, %v1409_v30  ;;  %v1411_v39 = vpop.f32.mrf.mxu1  ;;  %v2040_v49 = vmax.f32 %v1976_v43, 0.0  ;;  %v2484_v30 = vld [vmem:[%s3430_s25 + $0x168] sm:$0xf]  ;;  %v2988_v31 = vld [vmem:[%s3430_s25 + $0x174] sm:$0xf0] }
  0xba   : > { %v1412_v45 = vadd.f32 %v1411_v39, %v1242_v38  ;;  %v2477_v38 = vor.u32 %v2987_v26, %v2476_v25  ;;  %v2481_v39 = vor.u32 %v2985_v27, %v2478_v29  ;;  %v2508_v29 = vld [vmem:[%s3430_s25 + $0x1a0] sm:$0xf] }
  0xbb   : > { %v1747_v42 = vadd.f32 %v1746_v32, %v1578_v37  ;;  %1281 = vmatmul.bf16.gmra.mxu0 %v2445_v33  ;;  %v2986_v32 = vld [vmem:[%s3430_s25 + $0x16c] sm:$0xf]  ;;  %v2486_v33 = vld [vmem:[%s3430_s25 + $0x178] sm:$0xf0] }
  0xbc   : > { %1450 = vmatmul.bf16.gmra.mxu1 %v2449_v34 }
  0xbd   : > { %v1909_v44 = vmul.f32 %v3525_v20, %v1747_v42  ;;  %1619 = vmatmul.bf16.gmra.mxu2 %v2453_v40 }
  0xbe   : > { %1788 = vmatmul.bf16.gmra.mxu3 %v2457_v41 }
  0xbf   : > { %v1977_v46 = vadd.f32 %v3539_v36, %v1909_v44  ;;  %v2485_v44 = vor.u32 %v2988_v31, %v2484_v30  ;;  %v2995_v30 = vld [vmem:[%s3430_s25 + $0x1ac] sm:$0xf0]  ;;  %v2993_v31 = vld [vmem:[%s3430_s25 + $0x1a4] sm:$0xf] }
  0xc0   : > { %v1580_v47 = vpop.f32.mrf.mxu2  ;;  %v1244_v52 = vpop.f32.mrf.mxu0 }
  0xc1   : > { %v1749_v48 = vpop.f32.mrf.mxu3  ;;  %v2041_v50 = vmax.f32 %v1977_v46, 0.0  ;;  %v1581_v51 = vadd.f32 %v1580_v47, %v1412_v45  ;;  %v1413_v53 = vpop.f32.mrf.mxu1  ;;  %v2489_v45 = vor.u32 %v2986_v32, %v2486_v33  ;;  %v2510_v33 = vld [vmem:[%s3430_s25 + $0x1b0] sm:$0xf0] }
  0xc2   : > { %v1414_v0 = vadd.f32 %v1413_v53, %v1244_v52 }
  0xc3   : > { %v3104_v54 = vpack.c.bf16 %v2041_v50, %v2040_v49  ;;  %v1750_v57 = vadd.f32 %v1749_v48, %v1581_v51 }
  0xc5   : > { %3105 = vst [vmem:[%s3548_s21] sm:$0xff] %v3104_v54   ;;  %v1910_v5 = vmul.f32 %v3525_v20, %v1750_v57 }
  0xc7   : > { %v1978_v12 = vadd.f32 %v3539_v36, %v1910_v5 }
  0xc8   : > { %v1582_v1 = vpop.f32.mrf.mxu2  ;;  %v1247_v7 = vpop.f32.mrf.mxu0 }
  0xc9   : > { %v1751_v2 = vpop.f32.mrf.mxu3  ;;  %v1583_v6 = vadd.f32 %v1582_v1, %v1414_v0  ;;  %v1416_v8 = vpop.f32.mrf.mxu1  ;;  %v2042_v18 = vmax.f32 %v1978_v12, 0.0  ;;  %v2500_v0 = vld [vmem:[%s3430_s25 + $0x188] sm:$0xf]  ;;  %v2992_v1 = vld [vmem:[%s3430_s25 + $0x194] sm:$0xf0] }
  0xca   : > { %v1417_v14 = vadd.f32 %v1416_v8, %v1247_v7  ;;  %v2493_v7 = vor.u32 %v2991_v60, %v2492_v59  ;;  %v2497_v8 = vor.u32 %v2989_v61, %v2494_v63  ;;  %v2524_v63 = vld [vmem:[%s3430_s25 + $0x1c0] sm:$0xf] }
  0xcb   : > { %v1752_v11 = vadd.f32 %v1751_v2, %v1583_v6  ;;  %1286 = vmatmul.bf16.gmra.mxu0 %v2461_v3  ;;  %v2990_v2 = vld [vmem:[%s3430_s25 + $0x18c] sm:$0xf]  ;;  %v2502_v3 = vld [vmem:[%s3430_s25 + $0x198] sm:$0xf0] }
  0xcc   : > { %1455 = vmatmul.bf16.gmra.mxu1 %v2465_v4 }
  0xcd   : > { %v1911_v13 = vmul.f32 %v3525_v20, %v1752_v11  ;;  %1624 = vmatmul.bf16.gmra.mxu2 %v2469_v9 }
  0xce   : > { %1793 = vmatmul.bf16.gmra.mxu3 %v2473_v10 }
  0xcf   : > { %v1979_v15 = vadd.f32 %v3539_v36, %v1911_v13  ;;  %v2501_v13 = vor.u32 %v2992_v1, %v2500_v0  ;;  %v2999_v0 = vld [vmem:[%s3430_s25 + $0x1cc] sm:$0xf0]  ;;  %v2997_v1 = vld [vmem:[%s3430_s25 + $0x1c4] sm:$0xf] }
  0xd0   : > { %v1585_v16 = vpop.f32.mrf.mxu2  ;;  %v1249_v22 = vpop.f32.mrf.mxu0 }
  0xd1   : > { %v1754_v17 = vpop.f32.mrf.mxu3  ;;  %v2043_v19 = vmax.f32 %v1979_v15, 0.0  ;;  %v1586_v21 = vadd.f32 %v1585_v16, %v1417_v14  ;;  %v1418_v23 = vpop.f32.mrf.mxu1  ;;  %v2505_v14 = vor.u32 %v2990_v2, %v2502_v3  ;;  %v2526_v3 = vld [vmem:[%s3430_s25 + $0x1d0] sm:$0xf0] }
  0xd2   : > { %v1419_v34 = vadd.f32 %v1418_v23, %v1249_v22 }
  0xd3   : > { %v3109_v24 = vpack.c.bf16 %v2043_v19, %v2042_v18  ;;  %v1755_v28 = vadd.f32 %v1754_v17, %v1586_v21 }
  0xd5   : > { %3261 = vst [vmem:[%s3548_s21 + $0x8] sm:$0xff] %v3109_v24   ;;  %v1912_v40 = vmul.f32 %v3525_v20, %v1755_v28 }
  0xd7   : > { %v1980_v47 = vadd.f32 %v3539_v36, %v1912_v40 }
  0xd8   : > { %v1587_v35 = vpop.f32.mrf.mxu2  ;;  %v1252_v42 = vpop.f32.mrf.mxu0 }
  0xd9   : > { %v1756_v37 = vpop.f32.mrf.mxu3  ;;  %v1588_v41 = vadd.f32 %v1587_v35, %v1419_v34  ;;  %v1421_v43 = vpop.f32.mrf.mxu1  ;;  %v2044_v53 = vmax.f32 %v1980_v47, 0.0  ;;  %v2516_v34 = vld [vmem:[%s3430_s25 + $0x1a8] sm:$0xf]  ;;  %v2996_v35 = vld [vmem:[%s3430_s25 + $0x1b4] sm:$0xf0] }
  0xda   : > { %v1422_v49 = vadd.f32 %v1421_v43, %v1252_v42  ;;  %v2509_v42 = vor.u32 %v2995_v30, %v2508_v29  ;;  %v2513_v43 = vor.u32 %v2993_v31, %v2510_v33  ;;  %v2540_v33 = vld [vmem:[%s3430_s25 + $0x1e0] sm:$0xf] }
  0xdb   : > { %v1757_v46 = vadd.f32 %v1756_v37, %v1588_v41  ;;  %1291 = vmatmul.bf16.gmra.mxu0 %v2477_v38  ;;  %v2994_v37 = vld [vmem:[%s3430_s25 + $0x1ac] sm:$0xf]  ;;  %v2518_v38 = vld [vmem:[%s3430_s25 + $0x1b8] sm:$0xf0] }
  0xdc   : > { %1460 = vmatmul.bf16.gmra.mxu1 %v2481_v39 }
  0xdd   : > { %v1913_v48 = vmul.f32 %v3525_v20, %v1757_v46  ;;  %1629 = vmatmul.bf16.gmra.mxu2 %v2485_v44 }
  0xde   : > { %1798 = vmatmul.bf16.gmra.mxu3 %v2489_v45 }
  0xdf   : > { %v1981_v50 = vadd.f32 %v3539_v36, %v1913_v48  ;;  %v2517_v48 = vor.u32 %v2996_v35, %v2516_v34  ;;  %v3003_v34 = vld [vmem:[%s3430_s25 + $0x1ec] sm:$0xf0]  ;;  %v3001_v35 = vld [vmem:[%s3430_s25 + $0x1e4] sm:$0xf] }
  0xe0   : > { %v1590_v51 = vpop.f32.mrf.mxu2  ;;  %v1254_v56 = vpop.f32.mrf.mxu0 }
  0xe1   : > { %v1759_v52 = vpop.f32.mrf.mxu3  ;;  %v2045_v54 = vmax.f32 %v1981_v50, 0.0  ;;  %v1591_v55 = vadd.f32 %v1590_v51, %v1422_v49  ;;  %v1423_v57 = vpop.f32.mrf.mxu1  ;;  %v2521_v49 = vor.u32 %v2994_v37, %v2518_v38  ;;  %v2542_v38 = vld [vmem:[%s3430_s25 + $0x1f0] sm:$0xf0] }
  0xe2   : > { %v1424_v4 = vadd.f32 %v1423_v57, %v1254_v56 }
  0xe3   : > { %v3114_v58 = vpack.c.bf16 %v2045_v54, %v2044_v53  ;;  %v1760_v62 = vadd.f32 %v1759_v52, %v1591_v55 }
  0xe5   : > { %3262 = vst [vmem:[%s3548_s21 + $0x10] sm:$0xff] %v3114_v58   ;;  %v1914_v9 = vmul.f32 %v3525_v20, %v1760_v62 }
  0xe7   : > { %v1982_v16 = vadd.f32 %v3539_v36, %v1914_v9 }
  0xe8   : > { %v1592_v5 = vpop.f32.mrf.mxu2  ;;  %v1257_v11 = vpop.f32.mrf.mxu0 }
  0xe9   : > { %v1761_v6 = vpop.f32.mrf.mxu3  ;;  %v1593_v10 = vadd.f32 %v1592_v5, %v1424_v4  ;;  %v1426_v12 = vpop.f32.mrf.mxu1  ;;  %v2046_v23 = vmax.f32 %v1982_v16, 0.0  ;;  %v2532_v4 = vld [vmem:[%s3430_s25 + $0x1c8] sm:$0xf]  ;;  %v3000_v5 = vld [vmem:[%s3430_s25 + $0x1d4] sm:$0xf0] }
  0xea   : > { %v1427_v18 = vadd.f32 %v1426_v12, %v1257_v11  ;;  %v2525_v11 = vor.u32 %v2999_v0, %v2524_v63  ;;  %v2529_v12 = vor.u32 %v2997_v1, %v2526_v3  ;;  %v2556_v3 = vld [vmem:[%s3430_s25 + $0x200] sm:$0xf] }
  0xeb   : > { %v1762_v15 = vadd.f32 %v1761_v6, %v1593_v10  ;;  %1296 = vmatmul.bf16.gmra.mxu0 %v2493_v7  ;;  %v2998_v6 = vld [vmem:[%s3430_s25 + $0x1cc] sm:$0xf]  ;;  %v2534_v7 = vld [vmem:[%s3430_s25 + $0x1d8] sm:$0xf0] }
  0xec   : > { %1465 = vmatmul.bf16.gmra.mxu1 %v2497_v8 }
  0xed   : > { %v1915_v17 = vmul.f32 %v3525_v20, %v1762_v15  ;;  %1634 = vmatmul.bf16.gmra.mxu2 %v2501_v13 }
  0xee   : > { %1803 = vmatmul.bf16.gmra.mxu3 %v2505_v14 }
  0xef   : > { %v1983_v19 = vadd.f32 %v3539_v36, %v1915_v17  ;;  %v2533_v17 = vor.u32 %v3000_v5, %v2532_v4  ;;  %v3007_v4 = vld [vmem:[%s3430_s25 + $0x20c] sm:$0xf0]  ;;  %v3005_v5 = vld [vmem:[%s3430_s25 + $0x204] sm:$0xf] }
  0xf0   : > { %v1595_v21 = vpop.f32.mrf.mxu2  ;;  %v1259_v26 = vpop.f32.mrf.mxu0 }
  0xf1   : > { %v1764_v22 = vpop.f32.mrf.mxu3  ;;  %v2047_v24 = vmax.f32 %v1983_v19, 0.0  ;;  %v1596_v25 = vadd.f32 %v1595_v21, %v1427_v18  ;;  %v1428_v27 = vpop.f32.mrf.mxu1  ;;  %v2537_v18 = vor.u32 %v2998_v6, %v2534_v7  ;;  %v2558_v7 = vld [vmem:[%s3430_s25 + $0x210] sm:$0xf0] }
  0xf2   : > { %v1429_v39 = vadd.f32 %v1428_v27, %v1259_v26 }
  0xf3   : > { %v3119_v28 = vpack.c.bf16 %v2047_v24, %v2046_v23  ;;  %v1765_v32 = vadd.f32 %v1764_v22, %v1596_v25 }
  0xf5   : > { %3263 = vst [vmem:[%s3548_s21 + $0x18] sm:$0xff] %v3119_v28   ;;  %v1916_v44 = vmul.f32 %v3525_v20, %v1765_v32 }
  0xf7   : > { %v1984_v51 = vadd.f32 %v3539_v36, %v1916_v44 }
  0xf8   : > { %v1597_v40 = vpop.f32.mrf.mxu2  ;;  %v1262_v46 = vpop.f32.mrf.mxu0 }
  0xf9   : > { %v1766_v41 = vpop.f32.mrf.mxu3  ;;  %v1598_v45 = vadd.f32 %v1597_v40, %v1429_v39  ;;  %v1431_v47 = vpop.f32.mrf.mxu1  ;;  %v2048_v57 = vmax.f32 %v1984_v51, 0.0  ;;  %v2548_v39 = vld [vmem:[%s3430_s25 + $0x1e8] sm:$0xf]  ;;  %v3004_v40 = vld [vmem:[%s3430_s25 + $0x1f4] sm:$0xf0] }
  0xfa   : > { %v1432_v53 = vadd.f32 %v1431_v47, %v1262_v46  ;;  %v2541_v46 = vor.u32 %v3003_v34, %v2540_v33  ;;  %v2545_v47 = vor.u32 %v3001_v35, %v2542_v38  ;;  %v2572_v38 = vld [vmem:[%s3430_s25 + $0x220] sm:$0xf] }
  0xfb   : > { %v1767_v50 = vadd.f32 %v1766_v41, %v1598_v45  ;;  %1301 = vmatmul.bf16.gmra.mxu0 %v2509_v42  ;;  %v3002_v41 = vld [vmem:[%s3430_s25 + $0x1ec] sm:$0xf]  ;;  %v2550_v42 = vld [vmem:[%s3430_s25 + $0x1f8] sm:$0xf0] }
  0xfc   : > { %1470 = vmatmul.bf16.gmra.mxu1 %v2513_v43 }
  0xfd   : > { %v1917_v52 = vmul.f32 %v3525_v20, %v1767_v50  ;;  %1639 = vmatmul.bf16.gmra.mxu2 %v2517_v48 }
  0xfe   : > { %1808 = vmatmul.bf16.gmra.mxu3 %v2521_v49 }
  0xff   : > { %v1985_v54 = vadd.f32 %v3539_v36, %v1917_v52  ;;  %v2549_v52 = vor.u32 %v3004_v40, %v2548_v39  ;;  %v3011_v39 = vld [vmem:[%s3430_s25 + $0x22c] sm:$0xf0]  ;;  %v3009_v40 = vld [vmem:[%s3430_s25 + $0x224] sm:$0xf] }
 0x100   : > { %v1600_v55 = vpop.f32.mrf.mxu2  ;;  %v1264_v60 = vpop.f32.mrf.mxu0 }
 0x101   : > { %v1769_v56 = vpop.f32.mrf.mxu3  ;;  %v2049_v58 = vmax.f32 %v1985_v54, 0.0  ;;  %v1601_v59 = vadd.f32 %v1600_v55, %v1432_v53  ;;  %v1433_v61 = vpop.f32.mrf.mxu1  ;;  %v2553_v53 = vor.u32 %v3002_v41, %v2550_v42  ;;  %v2574_v42 = vld [vmem:[%s3430_s25 + $0x230] sm:$0xf0] }
 0x102   : > { %v1434_v8 = vadd.f32 %v1433_v61, %v1264_v60 }
 0x103   : > { %v3124_v62 = vpack.c.bf16 %v2049_v58, %v2048_v57  ;;  %v1770_v2 = vadd.f32 %v1769_v56, %v1601_v59 }
 0x105   : > { %3264 = vst [vmem:[%s3548_s21 + $0x20] sm:$0xff] %v3124_v62   ;;  %v1918_v13 = vmul.f32 %v3525_v20, %v1770_v2 }
 0x107   : > { %v1986_v21 = vadd.f32 %v3539_v36, %v1918_v13 }
 0x108   : > { %v1602_v9 = vpop.f32.mrf.mxu2  ;;  %v1267_v15 = vpop.f32.mrf.mxu0 }
 0x109   : > { %v1771_v10 = vpop.f32.mrf.mxu3  ;;  %v1603_v14 = vadd.f32 %v1602_v9, %v1434_v8  ;;  %v1436_v16 = vpop.f32.mrf.mxu1  ;;  %v2050_v27 = vmax.f32 %v1986_v21, 0.0  ;;  %v2564_v8 = vld [vmem:[%s3430_s25 + $0x208] sm:$0xf]  ;;  %v3008_v9 = vld [vmem:[%s3430_s25 + $0x214] sm:$0xf0] }
 0x10a   : > { %v1437_v23 = vadd.f32 %v1436_v16, %v1267_v15  ;;  %v2557_v15 = vor.u32 %v3007_v4, %v2556_v3  ;;  %v2561_v16 = vor.u32 %v3005_v5, %v2558_v7  ;;  %v2588_v7 = vld [vmem:[%s3430_s25 + $0x240] sm:$0xf] }
 0x10b   : > { %v1772_v19 = vadd.f32 %v1771_v10, %v1603_v14  ;;  %1306 = vmatmul.bf16.gmra.mxu0 %v2525_v11  ;;  %v3006_v10 = vld [vmem:[%s3430_s25 + $0x20c] sm:$0xf]  ;;  %v2566_v11 = vld [vmem:[%s3430_s25 + $0x218] sm:$0xf0] }
 0x10c   : > { %1475 = vmatmul.bf16.gmra.mxu1 %v2529_v12 }
 0x10d   : > { %v1919_v22 = vmul.f32 %v3525_v20, %v1772_v19  ;;  %1644 = vmatmul.bf16.gmra.mxu2 %v2533_v17 }
 0x10e   : > { %1813 = vmatmul.bf16.gmra.mxu3 %v2537_v18 }
 0x10f   : > { %v1987_v24 = vadd.f32 %v3539_v36, %v1919_v22  ;;  %v2565_v22 = vor.u32 %v3008_v9, %v2564_v8  ;;  %v3015_v8 = vld [vmem:[%s3430_s25 + $0x24c] sm:$0xf0]  ;;  %v3013_v9 = vld [vmem:[%s3430_s25 + $0x244] sm:$0xf] }
 0x110   : > { %v1605_v25 = vpop.f32.mrf.mxu2  ;;  %v1269_v30 = vpop.f32.mrf.mxu0 }
 0x111   : > { %v1774_v26 = vpop.f32.mrf.mxu3  ;;  %v2051_v28 = vmax.f32 %v1987_v24, 0.0  ;;  %v1606_v29 = vadd.f32 %v1605_v25, %v1437_v23  ;;  %v1438_v31 = vpop.f32.mrf.mxu1  ;;  %v2569_v23 = vor.u32 %v3006_v10, %v2566_v11  ;;  %v2590_v11 = vld [vmem:[%s3430_s25 + $0x250] sm:$0xf0] }
 0x112   : > { %v1439_v43 = vadd.f32 %v1438_v31, %v1269_v30 }
 0x113   : > { %v3129_v32 = vpack.c.bf16 %v2051_v28, %v2050_v27  ;;  %v1775_v37 = vadd.f32 %v1774_v26, %v1606_v29 }
 0x115   : > { %3265 = vst [vmem:[%s3548_s21 + $0x28] sm:$0xff] %v3129_v32   ;;  %v1920_v48 = vmul.f32 %v3525_v20, %v1775_v37 }
 0x117   : > { %v1988_v55 = vadd.f32 %v3539_v36, %v1920_v48 }
 0x118   : > { %v1607_v44 = vpop.f32.mrf.mxu2  ;;  %v1272_v50 = vpop.f32.mrf.mxu0 }
 0x119   : > { %v1776_v45 = vpop.f32.mrf.mxu3  ;;  %v1608_v49 = vadd.f32 %v1607_v44, %v1439_v43  ;;  %v1441_v51 = vpop.f32.mrf.mxu1  ;;  %v2052_v61 = vmax.f32 %v1988_v55, 0.0  ;;  %v2580_v43 = vld [vmem:[%s3430_s25 + $0x228] sm:$0xf]  ;;  %v3012_v44 = vld [vmem:[%s3430_s25 + $0x234] sm:$0xf0] }
 0x11a   : > { %v1442_v57 = vadd.f32 %v1441_v51, %v1272_v50  ;;  %v2573_v50 = vor.u32 %v3011_v39, %v2572_v38  ;;  %v2577_v51 = vor.u32 %v3009_v40, %v2574_v42  ;;  %v2604_v42 = vld [vmem:[%s3430_s25 + $0x260] sm:$0xf] }
 0x11b   : > { %v1777_v54 = vadd.f32 %v1776_v45, %v1608_v49  ;;  %1311 = vmatmul.bf16.gmra.mxu0 %v2541_v46  ;;  %v3010_v45 = vld [vmem:[%s3430_s25 + $0x22c] sm:$0xf]  ;;  %v2582_v46 = vld [vmem:[%s3430_s25 + $0x238] sm:$0xf0] }
 0x11c   : > { %1480 = vmatmul.bf16.gmra.mxu1 %v2545_v47 }
 0x11d   : > { %v1921_v56 = vmul.f32 %v3525_v20, %v1777_v54  ;;  %1649 = vmatmul.bf16.gmra.mxu2 %v2549_v52 }
 0x11e   : > { %1818 = vmatmul.bf16.gmra.mxu3 %v2553_v53 }
 0x11f   : > { %v1989_v58 = vadd.f32 %v3539_v36, %v1921_v56  ;;  %v2581_v56 = vor.u32 %v3012_v44, %v2580_v43  ;;  %v3019_v43 = vld [vmem:[%s3430_s25 + $0x26c] sm:$0xf0]  ;;  %v3017_v44 = vld [vmem:[%s3430_s25 + $0x264] sm:$0xf] }
 0x120   : > { %v1610_v59 = vpop.f32.mrf.mxu2  ;;  %v1274_v0 = vpop.f32.mrf.mxu0 }
 0x121   : > { %v1779_v60 = vpop.f32.mrf.mxu3  ;;  %v2053_v62 = vmax.f32 %v1989_v58, 0.0  ;;  %v1611_v63 = vadd.f32 %v1610_v59, %v1442_v57  ;;  %v1443_v1 = vpop.f32.mrf.mxu1  ;;  %v2585_v57 = vor.u32 %v3010_v45, %v2582_v46  ;;  %v2606_v46 = vld [vmem:[%s3430_s25 + $0x270] sm:$0xf0] }
 0x122   : > { %v1444_v12 = vadd.f32 %v1443_v1, %v1274_v0 }
 0x123   : > { %v3134_v2 = vpack.c.bf16 %v2053_v62, %v2052_v61  ;;  %v1780_v6 = vadd.f32 %v1779_v60, %v1611_v63 }
 0x125   : > { %3266 = vst [vmem:[%s3548_s21 + $0x30] sm:$0xff] %v3134_v2   ;;  %v1922_v17 = vmul.f32 %v3525_v20, %v1780_v6 }
 0x127   : > { %v1990_v25 = vadd.f32 %v3539_v36, %v1922_v17 }
 0x128   : > { %v1612_v13 = vpop.f32.mrf.mxu2  ;;  %v1277_v19 = vpop.f32.mrf.mxu0 }
 0x129   : > { %v1781_v14 = vpop.f32.mrf.mxu3  ;;  %v1613_v18 = vadd.f32 %v1612_v13, %v1444_v12  ;;  %v1446_v21 = vpop.f32.mrf.mxu1  ;;  %v2054_v31 = vmax.f32 %v1990_v25, 0.0  ;;  %v2596_v12 = vld [vmem:[%s3430_s25 + $0x248] sm:$0xf]  ;;  %v3016_v13 = vld [vmem:[%s3430_s25 + $0x254] sm:$0xf0] }
 0x12a   : > { %v1447_v27 = vadd.f32 %v1446_v21, %v1277_v19  ;;  %v2589_v19 = vor.u32 %v3015_v8, %v2588_v7  ;;  %v2593_v21 = vor.u32 %v3013_v9, %v2590_v11  ;;  %v2620_v11 = vld [vmem:[%s3430_s25 + $0x280] sm:$0xf] }
 0x12b   : > { %v1782_v24 = vadd.f32 %v1781_v14, %v1613_v18  ;;  %1316 = vmatmul.bf16.gmra.mxu0 %v2557_v15  ;;  %v3014_v14 = vld [vmem:[%s3430_s25 + $0x24c] sm:$0xf]  ;;  %v2598_v15 = vld [vmem:[%s3430_s25 + $0x258] sm:$0xf0] }
 0x12c   : > { %1485 = vmatmul.bf16.gmra.mxu1 %v2561_v16 }
 0x12d   : > { %v1923_v26 = vmul.f32 %v3525_v20, %v1782_v24  ;;  %1654 = vmatmul.bf16.gmra.mxu2 %v2565_v22 }
 0x12e   : > { %1823 = vmatmul.bf16.gmra.mxu3 %v2569_v23 }
 0x12f   : > { %v1991_v28 = vadd.f32 %v3539_v36, %v1923_v26  ;;  %v2597_v26 = vor.u32 %v3016_v13, %v2596_v12  ;;  %v3023_v12 = vld [vmem:[%s3430_s25 + $0x28c] sm:$0xf0]  ;;  %v3021_v13 = vld [vmem:[%s3430_s25 + $0x284] sm:$0xf] }
 0x130   : > { %v1615_v29 = vpop.f32.mrf.mxu2  ;;  %v1279_v34 = vpop.f32.mrf.mxu0 }
 0x131   : > { %v1784_v30 = vpop.f32.mrf.mxu3  ;;  %v2055_v32 = vmax.f32 %v1991_v28, 0.0  ;;  %v1616_v33 = vadd.f32 %v1615_v29, %v1447_v27  ;;  %v1448_v35 = vpop.f32.mrf.mxu1  ;;  %v2601_v27 = vor.u32 %v3014_v14, %v2598_v15  ;;  %v2622_v15 = vld [vmem:[%s3430_s25 + $0x290] sm:$0xf0] }
 0x132   : > { %v1449_v47 = vadd.f32 %v1448_v35, %v1279_v34 }
 0x133   : > { %v3139_v37 = vpack.c.bf16 %v2055_v32, %v2054_v31  ;;  %v1785_v41 = vadd.f32 %v1784_v30, %v1616_v33 }
 0x135   : > { %3267 = vst [vmem:[%s3548_s21 + $0x38] sm:$0xff] %v3139_v37   ;;  %v1924_v52 = vmul.f32 %v3525_v20, %v1785_v41 }
 0x137   : > { %v1992_v59 = vadd.f32 %v3539_v36, %v1924_v52 }
 0x138   : > { %v1617_v48 = vpop.f32.mrf.mxu2  ;;  %v1282_v54 = vpop.f32.mrf.mxu0 }
 0x139   : > { %v1786_v49 = vpop.f32.mrf.mxu3  ;;  %v1618_v53 = vadd.f32 %v1617_v48, %v1449_v47  ;;  %v1451_v55 = vpop.f32.mrf.mxu1  ;;  %v2056_v1 = vmax.f32 %v1992_v59, 0.0  ;;  %v2612_v47 = vld [vmem:[%s3430_s25 + $0x268] sm:$0xf]  ;;  %v3020_v48 = vld [vmem:[%s3430_s25 + $0x274] sm:$0xf0] }
 0x13a   : > { %v1452_v61 = vadd.f32 %v1451_v55, %v1282_v54  ;;  %v2605_v54 = vor.u32 %v3019_v43, %v2604_v42  ;;  %v2609_v55 = vor.u32 %v3017_v44, %v2606_v46  ;;  %v2636_v46 = vld [vmem:[%s3430_s25 + $0x2a0] sm:$0xf] }
 0x13b   : > { %v1787_v58 = vadd.f32 %v1786_v49, %v1618_v53  ;;  %1321 = vmatmul.bf16.gmra.mxu0 %v2573_v50  ;;  %v3018_v49 = vld [vmem:[%s3430_s25 + $0x26c] sm:$0xf]  ;;  %v2614_v50 = vld [vmem:[%s3430_s25 + $0x278] sm:$0xf0] }
 0x13c   : > { %1490 = vmatmul.bf16.gmra.mxu1 %v2577_v51 }
 0x13d   : > { %v1925_v60 = vmul.f32 %v3525_v20, %v1787_v58  ;;  %1659 = vmatmul.bf16.gmra.mxu2 %v2581_v56 }
 0x13e   : > { %1828 = vmatmul.bf16.gmra.mxu3 %v2585_v57 }
 0x13f   : > { %v1993_v62 = vadd.f32 %v3539_v36, %v1925_v60  ;;  %v2613_v60 = vor.u32 %v3020_v48, %v2612_v47  ;;  %v3027_v47 = vld [vmem:[%s3430_s25 + $0x2ac] sm:$0xf0]  ;;  %v3025_v48 = vld [vmem:[%s3430_s25 + $0x2a4] sm:$0xf] }
 0x140   : > { %v1620_v63 = vpop.f32.mrf.mxu2  ;;  %v1284_v4 = vpop.f32.mrf.mxu0 }
 0x141   : > { %v1789_v0 = vpop.f32.mrf.mxu3  ;;  %v2057_v2 = vmax.f32 %v1993_v62, 0.0  ;;  %v1621_v3 = vadd.f32 %v1620_v63, %v1452_v61  ;;  %v1453_v5 = vpop.f32.mrf.mxu1  ;;  %v2617_v61 = vor.u32 %v3018_v49, %v2614_v50  ;;  %v2638_v50 = vld [vmem:[%s3430_s25 + $0x2b0] sm:$0xf0] }
 0x142   : > { %v1454_v16 = vadd.f32 %v1453_v5, %v1284_v4 }
 0x143   : > { %v3144_v6 = vpack.c.bf16 %v2057_v2, %v2056_v1  ;;  %v1790_v10 = vadd.f32 %v1789_v0, %v1621_v3 }
 0x145   : > { %3268 = vst [vmem:[%s3548_s21 + $0x40] sm:$0xff] %v3144_v6   ;;  %v1926_v22 = vmul.f32 %v3525_v20, %v1790_v10 }
 0x147   : > { %v1994_v29 = vadd.f32 %v3539_v36, %v1926_v22 }
 0x148   : > { %v1622_v17 = vpop.f32.mrf.mxu2  ;;  %v1287_v24 = vpop.f32.mrf.mxu0 }
 0x149   : > { %v1791_v18 = vpop.f32.mrf.mxu3  ;;  %v1623_v23 = vadd.f32 %v1622_v17, %v1454_v16  ;;  %v1456_v25 = vpop.f32.mrf.mxu1  ;;  %v2058_v35 = vmax.f32 %v1994_v29, 0.0  ;;  %v2628_v16 = vld [vmem:[%s3430_s25 + $0x288] sm:$0xf]  ;;  %v3024_v17 = vld [vmem:[%s3430_s25 + $0x294] sm:$0xf0] }
 0x14a   : > { %v1457_v31 = vadd.f32 %v1456_v25, %v1287_v24  ;;  %v2621_v24 = vor.u32 %v3023_v12, %v2620_v11  ;;  %v2625_v25 = vor.u32 %v3021_v13, %v2622_v15  ;;  %v3031_v15 = vld [vmem:[%s3430_s25 + $0x2cc] sm:$0xf0] }
 0x14b   : > { %v1792_v28 = vadd.f32 %v1791_v18, %v1623_v23  ;;  %1326 = vmatmul.bf16.gmra.mxu0 %v2589_v19  ;;  %v3022_v18 = vld [vmem:[%s3430_s25 + $0x28c] sm:$0xf]  ;;  %v2630_v19 = vld [vmem:[%s3430_s25 + $0x298] sm:$0xf0] }
 0x14c   : > { %1495 = vmatmul.bf16.gmra.mxu1 %v2593_v21 }
 0x14d   : > { %v1927_v30 = vmul.f32 %v3525_v20, %v1792_v28  ;;  %1664 = vmatmul.bf16.gmra.mxu2 %v2597_v26 }
 0x14e   : > { %1833 = vmatmul.bf16.gmra.mxu3 %v2601_v27 }
 0x14f   : > { %v1995_v32 = vadd.f32 %v3539_v36, %v1927_v30  ;;  %v2629_v30 = vor.u32 %v3024_v17, %v2628_v16  ;;  %v3029_v16 = vld [vmem:[%s3430_s25 + $0x2c4] sm:$0xf] }
 0x150   : > { %v1625_v33 = vpop.f32.mrf.mxu2  ;;  %v1289_v39 = vpop.f32.mrf.mxu0 }
 0x151   : > { %v1794_v34 = vpop.f32.mrf.mxu3  ;;  %v2059_v37 = vmax.f32 %v1995_v32, 0.0  ;;  %v1626_v38 = vadd.f32 %v1625_v33, %v1457_v31  ;;  %v1458_v40 = vpop.f32.mrf.mxu1  ;;  %v2633_v31 = vor.u32 %v3022_v18, %v2630_v19  ;;  %v2654_v18 = vld [vmem:[%s3430_s25 + $0x2d0] sm:$0xf0]  ;;  %v2660_v19 = vld [vmem:[%s3430_s25 + $0x2c8] sm:$0xf] }
 0x152   : > { %v1459_v51 = vadd.f32 %v1458_v40, %v1289_v39 }
 0x153   : > { %v3149_v41 = vpack.c.bf16 %v2059_v37, %v2058_v35  ;;  %v1795_v45 = vadd.f32 %v1794_v34, %v1626_v38 }
 0x155   : > { %3269 = vst [vmem:[%s3548_s21 + $0x48] sm:$0xff] %v3149_v41   ;;  %v1928_v56 = vmul.f32 %v3525_v20, %v1795_v45 }
 0x157   : > { %v1996_v63 = vadd.f32 %v3539_v36, %v1928_v56 }
 0x158   : > { %v1627_v52 = vpop.f32.mrf.mxu2  ;;  %v1292_v58 = vpop.f32.mrf.mxu0 }
 0x159   : > { %v1796_v53 = vpop.f32.mrf.mxu3  ;;  %v1628_v57 = vadd.f32 %v1627_v52, %v1459_v51  ;;  %v1461_v59 = vpop.f32.mrf.mxu1  ;;  %v2060_v5 = vmax.f32 %v1996_v63, 0.0  ;;  %v2644_v51 = vld [vmem:[%s3430_s25 + $0x2a8] sm:$0xf]  ;;  %v3028_v52 = vld [vmem:[%s3430_s25 + $0x2b4] sm:$0xf0] }
 0x15a   : > { %v1462_v1 = vadd.f32 %v1461_v59, %v1292_v58  ;;  %v2637_v58 = vor.u32 %v3027_v47, %v2636_v46  ;;  %v2641_v59 = vor.u32 %v3025_v48, %v2638_v50  ;;  %v2668_v50 = vld [vmem:[%s3430_s25 + $0x2e0] sm:$0xf] }
 0x15b   : > { %v1797_v62 = vadd.f32 %v1796_v53, %v1628_v57  ;;  %1331 = vmatmul.bf16.gmra.mxu0 %v2605_v54  ;;  %v3026_v53 = vld [vmem:[%s3430_s25 + $0x2ac] sm:$0xf]  ;;  %v2646_v54 = vld [vmem:[%s3430_s25 + $0x2b8] sm:$0xf0] }
 0x15c   : > { %1500 = vmatmul.bf16.gmra.mxu1 %v2609_v55 }
 0x15d   : > { %v1929_v0 = vmul.f32 %v3525_v20, %v1797_v62  ;;  %1669 = vmatmul.bf16.gmra.mxu2 %v2613_v60 }
 0x15e   : > { %1838 = vmatmul.bf16.gmra.mxu3 %v2617_v61 }
 0x15f   : > { %v1997_v2 = vadd.f32 %v3539_v36, %v1929_v0  ;;  %v2645_v0 = vor.u32 %v3028_v52, %v2644_v51  ;;  %v3035_v51 = vld [vmem:[%s3430_s25 + $0x2ec] sm:$0xf0]  ;;  %v3033_v52 = vld [vmem:[%s3430_s25 + $0x2e4] sm:$0xf] }
 0x160   : > { %v1630_v3 = vpop.f32.mrf.mxu2  ;;  %v1294_v8 = vpop.f32.mrf.mxu0 }
 0x161   : > { %v1799_v4 = vpop.f32.mrf.mxu3  ;;  %v2061_v6 = vmax.f32 %v1997_v2, 0.0  ;;  %v1631_v7 = vadd.f32 %v1630_v3, %v1462_v1  ;;  %v1463_v9 = vpop.f32.mrf.mxu1  ;;  %v2649_v1 = vor.u32 %v3026_v53, %v2646_v54  ;;  %v2670_v54 = vld [vmem:[%s3430_s25 + $0x2f0] sm:$0xf0] }
 0x162   : > { %v1464_v21 = vadd.f32 %v1463_v9, %v1294_v8 }
 0x163   : > { %v3154_v10 = vpack.c.bf16 %v2061_v6, %v2060_v5  ;;  %v1800_v14 = vadd.f32 %v1799_v4, %v1631_v7 }
 0x165   : > { %3270 = vst [vmem:[%s3548_s21 + $0x50] sm:$0xff] %v3154_v10   ;;  %v1930_v26 = vmul.f32 %v3525_v20, %v1800_v14 }
 0x167   : > { %v1998_v33 = vadd.f32 %v3539_v36, %v1930_v26 }
 0x168   : > { %v1632_v22 = vpop.f32.mrf.mxu2  ;;  %v1297_v28 = vpop.f32.mrf.mxu0 }
 0x169   : > { %v1801_v23 = vpop.f32.mrf.mxu3  ;;  %v1633_v27 = vadd.f32 %v1632_v22, %v1464_v21  ;;  %v1466_v29 = vpop.f32.mrf.mxu1  ;;  %v2062_v40 = vmax.f32 %v1998_v33, 0.0  ;;  %v3032_v21 = vld [vmem:[%s3430_s25 + $0x2d4] sm:$0xf0]  ;;  %v3030_v22 = vld [vmem:[%s3430_s25 + $0x2cc] sm:$0xf] }
 0x16a   : > { %v1467_v35 = vadd.f32 %v1466_v29, %v1297_v28  ;;  %v2657_v28 = vor.u32 %v3029_v16, %v2654_v18  ;;  %v3718_v29 = vld [vmem:[%s3896_s2] ss:$0 sm:$0xff] }
 0x16b   : > { %v1802_v32 = vadd.f32 %v1801_v23, %v1633_v27  ;;  %1336 = vmatmul.bf16.gmra.mxu0 %v2621_v24  ;;  %v2662_v23 = vld [vmem:[%s3430_s25 + $0x2d8] sm:$0xf0]  ;;  %v2684_v18 = vld [vmem:[%s3430_s25 + $0x300] sm:$0xf] }
 0x16c   : > { %1505 = vmatmul.bf16.gmra.mxu1 %v2625_v25 }
 0x16d   : > { %v1931_v34 = vmul.f32 %v3525_v20, %v1802_v32  ;;  %1674 = vmatmul.bf16.gmra.mxu2 %v2629_v30 }
 0x16e   : > { %1843 = vmatmul.bf16.gmra.mxu3 %v2633_v31 }
 0x16f   : > { %v1999_v37 = vadd.f32 %v3539_v36, %v1931_v34  ;;  %v2661_v34 = vor.u32 %v3032_v21, %v2660_v19  ;;  %v3039_v19 = vld [vmem:[%s3430_s25 + $0x30c] sm:$0xf0]  ;;  %v3037_v21 = vld [vmem:[%s3430_s25 + $0x304] sm:$0xf] }
 0x170   : > { %v1635_v38 = vpop.f32.mrf.mxu2  ;;  %v1299_v43 = vpop.f32.mrf.mxu0 }
 0x171   : > { %v1804_v39 = vpop.f32.mrf.mxu3  ;;  %v2063_v41 = vmax.f32 %v1999_v37, 0.0  ;;  %v1636_v42 = vadd.f32 %v1635_v38, %v1467_v35  ;;  %v1468_v44 = vpop.f32.mrf.mxu1  ;;  %v2665_v35 = vor.u32 %v3030_v22, %v2662_v23  ;;  %v2686_v23 = vld [vmem:[%s3430_s25 + $0x310] sm:$0xf0] }
 0x172   : > { %v1469_v55 = vadd.f32 %v1468_v44, %v1299_v43 }
 0x173   : > { %v3159_v45 = vpack.c.bf16 %v2063_v41, %v2062_v40  ;;  %v1805_v49 = vadd.f32 %v1804_v39, %v1636_v42 }
 0x175   : > { %3271 = vst [vmem:[%s3548_s21 + $0x58] sm:$0xff] %v3159_v45   ;;  %v1932_v60 = vmul.f32 %v3525_v20, %v1805_v49 }
 0x177   : > { %v2000_v3 = vadd.f32 %v3539_v36, %v1932_v60 }
 0x178   : > { %v1637_v56 = vpop.f32.mrf.mxu2  ;;  %v1302_v62 = vpop.f32.mrf.mxu0 }
 0x179   : > { %v1806_v57 = vpop.f32.mrf.mxu3  ;;  %v1638_v61 = vadd.f32 %v1637_v56, %v1469_v55  ;;  %v1471_v63 = vpop.f32.mrf.mxu1  ;;  %v2064_v9 = vmax.f32 %v2000_v3, 0.0  ;;  %v2676_v55 = vld [vmem:[%s3430_s25 + $0x2e8] sm:$0xf]  ;;  %v3036_v56 = vld [vmem:[%s3430_s25 + $0x2f4] sm:$0xf0] }
 0x17a   : > { %v1472_v5 = vadd.f32 %v1471_v63, %v1302_v62  ;;  %v2673_v62 = vor.u32 %v3033_v52, %v2670_v54  ;;  %v2677_v3 = vor.u32 %v3036_v56, %v2676_v55  ;;  %v2700_v54 = vld [vmem:[%s3430_s25 + $0x320] sm:$0xf]  ;;  %v3043_v55 = vld [vmem:[%s3430_s25 + $0x32c] sm:$0xf0]  ;;  %v3041_v56 = vld [vmem:[%s3430_s25 + $0x324] sm:$0xf] }
 0x17b   : > { %v1807_v2 = vadd.f32 %v1806_v57, %v1638_v61  ;;  %1341 = vmatmul.bf16.gmra.mxu0 %v2637_v58  ;;  %v2678_v57 = vld [vmem:[%s3430_s25 + $0x2f8] sm:$0xf0]  ;;  %v2669_v61 = vor.u32 %v3035_v51, %v2668_v50 }
 0x17c   : > { %1510 = vmatmul.bf16.gmra.mxu1 %v2641_v59 }
 0x17d   : > { %v1933_v4 = vmul.f32 %v3525_v20, %v1807_v2  ;;  %1679 = vmatmul.bf16.gmra.mxu2 %v2645_v0  ;;  %v2652_v20 = vld [vmem:[%s3430_s25 + $0x2c0] sm:$0xf] }
 0x17e   : > { %1848 = vmatmul.bf16.gmra.mxu3 %v2649_v1  ;;  %v2653_v27 = vor.u32 %v3031_v15, %v2652_v20 }
 0x17f   : > { %v2001_v6 = vadd.f32 %v3539_v36, %v1933_v4 }
 0x180   : > { %v1640_v7 = vpop.f32.mrf.mxu2  ;;  %v1304_v12 = vpop.f32.mrf.mxu0 }
 0x181   : > { %v1809_v8 = vpop.f32.mrf.mxu3  ;;  %v2065_v10 = vmax.f32 %v2001_v6, 0.0  ;;  %v1641_v11 = vadd.f32 %v1640_v7, %v1472_v5  ;;  %v1473_v13 = vpop.f32.mrf.mxu1  ;;  %v3737_v6 = vld [vmem:[%s3897_s3] ss:$0 sm:$0xff] }
 0x182   : > { %v1474_v24 = vadd.f32 %v1473_v13, %v1304_v12 }
 0x183   : > { %v3164_v14 = vpack.c.bf16 %v2065_v10, %v2064_v9  ;;  %v1810_v17 = vadd.f32 %v1809_v8, %v1641_v11 }
 0x185   : > { %3272 = vst [vmem:[%s3548_s21 + $0x60] sm:$0xff] %v3164_v14   ;;  %v1934_v30 = vmul.f32 %v3718_v29, %v1810_v17 }
 0x187   : > { %v2002_v38 = vadd.f32 %v3539_v36, %v1934_v30 }
 0x188   : > { %v1642_v25 = vpop.f32.mrf.mxu2  ;;  %v1307_v32 = vpop.f32.mrf.mxu0 }
 0x189   : > { %v1811_v26 = vpop.f32.mrf.mxu3  ;;  %v1643_v31 = vadd.f32 %v1642_v25, %v1474_v24  ;;  %v1476_v33 = vpop.f32.mrf.mxu1  ;;  %v2066_v44 = vmax.f32 %v2002_v38, 0.0  ;;  %v2692_v24 = vld [vmem:[%s3430_s25 + $0x308] sm:$0xf]  ;;  %v3040_v25 = vld [vmem:[%s3430_s25 + $0x314] sm:$0xf0] }
 0x18a   : > { %v1477_v40 = vadd.f32 %v1476_v33, %v1307_v32  ;;  %v2685_v32 = vor.u32 %v3039_v19, %v2684_v18  ;;  %v2689_v33 = vor.u32 %v3037_v21, %v2686_v23  ;;  %v2716_v23 = vld [vmem:[%s3430_s25 + $0x340] sm:$0xf] }
 0x18b   : > { %v1812_v37 = vadd.f32 %v1811_v26, %v1643_v31  ;;  %1346 = vmatmul.bf16.gmra.mxu0 %v2653_v27  ;;  %v3038_v26 = vld [vmem:[%s3430_s25 + $0x30c] sm:$0xf]  ;;  %v2694_v27 = vld [vmem:[%s3430_s25 + $0x318] sm:$0xf0] }
 0x18c   : > { %1515 = vmatmul.bf16.gmra.mxu1 %v2657_v28 }
 0x18d   : > { %v1935_v39 = vmul.f32 %v3718_v29, %v1812_v37  ;;  %1684 = vmatmul.bf16.gmra.mxu2 %v2661_v34 }
 0x18e   : > { %1853 = vmatmul.bf16.gmra.mxu3 %v2665_v35 }
 0x18f   : > { %v2003_v41 = vadd.f32 %v3539_v36, %v1935_v39  ;;  %v3034_v36 = vld [vmem:[%s3430_s25 + $0x2ec] sm:$0xf]  ;;  %v2693_v39 = vor.u32 %v3040_v25, %v2692_v24  ;;  %v3047_v24 = vld [vmem:[%s3430_s25 + $0x34c] sm:$0xf0]  ;;  %v3045_v25 = vld [vmem:[%s3430_s25 + $0x344] sm:$0xf] }
 0x190   : > { %v1645_v42 = vpop.f32.mrf.mxu2  ;;  %v1309_v47 = vpop.f32.mrf.mxu0  ;;  %v2681_v4 = vor.u32 %v3034_v36, %v2678_v57  ;;  %v2702_v57 = vld [vmem:[%s3430_s25 + $0x330] sm:$0xf0] }
 0x191   : > { %v1814_v43 = vpop.f32.mrf.mxu3  ;;  %v2067_v45 = vmax.f32 %v2003_v41, 0.0  ;;  %v1646_v46 = vadd.f32 %v1645_v42, %v1477_v40  ;;  %v1478_v48 = vpop.f32.mrf.mxu1  ;;  %v2697_v40 = vor.u32 %v3038_v26, %v2694_v27  ;;  %v2718_v27 = vld [vmem:[%s3430_s25 + $0x350] sm:$0xf0] }
 0x192   : > { %v1479_v58 = vadd.f32 %v1478_v48, %v1309_v47 }
 0x193   : > { %v3169_v49 = vpack.c.bf16 %v2067_v45, %v2066_v44  ;;  %v1815_v53 = vadd.f32 %v1814_v43, %v1646_v46 }
 0x195   : > { %3273 = vst [vmem:[%s3548_s21 + $0x68] sm:$0xff] %v3169_v49   ;;  %v1936_v63 = vmul.f32 %v3718_v29, %v1815_v53 }
 0x197   : > { %v2004_v7 = vadd.f32 %v3737_v6, %v1936_v63 }
 0x198   : > { %v1647_v59 = vpop.f32.mrf.mxu2  ;;  %v1312_v1 = vpop.f32.mrf.mxu0 }
 0x199   : > { %v1816_v60 = vpop.f32.mrf.mxu3  ;;  %v1648_v0 = vadd.f32 %v1647_v59, %v1479_v58  ;;  %v1481_v2 = vpop.f32.mrf.mxu1  ;;  %v2068_v13 = vmax.f32 %v2004_v7, 0.0  ;;  %v2708_v58 = vld [vmem:[%s3430_s25 + $0x328] sm:$0xf]  ;;  %v3044_v59 = vld [vmem:[%s3430_s25 + $0x334] sm:$0xf0] }
 0x19a   : > { %v1482_v9 = vadd.f32 %v1481_v2, %v1312_v1  ;;  %v2701_v1 = vor.u32 %v3043_v55, %v2700_v54  ;;  %v2705_v2 = vor.u32 %v3041_v56, %v2702_v57  ;;  %v2732_v57 = vld [vmem:[%s3430_s25 + $0x360] sm:$0xf] }
 0x19b   : > { %v1817_v5 = vadd.f32 %v1816_v60, %v1648_v0  ;;  %1351 = vmatmul.bf16.gmra.mxu0 %v2669_v61  ;;  %v3042_v60 = vld [vmem:[%s3430_s25 + $0x32c] sm:$0xf]  ;;  %v2710_v61 = vld [vmem:[%s3430_s25 + $0x338] sm:$0xf0] }
 0x19c   : > { %1520 = vmatmul.bf16.gmra.mxu1 %v2673_v62 }
 0x19d   : > { %v1937_v8 = vmul.f32 %v3718_v29, %v1817_v5  ;;  %1689 = vmatmul.bf16.gmra.mxu2 %v2677_v3 }
 0x19e   : > { %1858 = vmatmul.bf16.gmra.mxu3 %v2681_v4 }
 0x19f   : > { %v2005_v10 = vadd.f32 %v3737_v6, %v1937_v8  ;;  %v2709_v8 = vor.u32 %v3044_v59, %v2708_v58  ;;  %v3051_v58 = vld [vmem:[%s3430_s25 + $0x36c] sm:$0xf0]  ;;  %v3049_v59 = vld [vmem:[%s3430_s25 + $0x364] sm:$0xf] }
 0x1a0   : > { %v1650_v11 = vpop.f32.mrf.mxu2  ;;  %v1314_v15 = vpop.f32.mrf.mxu0 }
 0x1a1   : > { %v1819_v12 = vpop.f32.mrf.mxu3  ;;  %v2069_v14 = vmax.f32 %v2005_v10, 0.0  ;;  %v1651_v20 = vadd.f32 %v1650_v11, %v1482_v9  ;;  %v1483_v16 = vpop.f32.mrf.mxu1  ;;  %v2713_v9 = vor.u32 %v3042_v60, %v2710_v61  ;;  %v2734_v61 = vld [vmem:[%s3430_s25 + $0x370] sm:$0xf0] }
 0x1a2   : > { %v1484_v28 = vadd.f32 %v1483_v16, %v1314_v15 }
 0x1a3   : > { %v3174_v17 = vpack.c.bf16 %v2069_v14, %v2068_v13  ;;  %v1820_v22 = vadd.f32 %v1819_v12, %v1651_v20 }
 0x1a5   : > { %3274 = vst [vmem:[%s3548_s21 + $0x70] sm:$0xff] %v3174_v17   ;;  %v1938_v34 = vmul.f32 %v3718_v29, %v1820_v22 }
 0x1a7   : > { %v2006_v42 = vadd.f32 %v3737_v6, %v1938_v34 }
 0x1a8   : > { %v1652_v30 = vpop.f32.mrf.mxu2  ;;  %v1317_v37 = vpop.f32.mrf.mxu0 }
 0x1a9   : > { %v1821_v31 = vpop.f32.mrf.mxu3  ;;  %v1653_v35 = vadd.f32 %v1652_v30, %v1484_v28  ;;  %v1486_v38 = vpop.f32.mrf.mxu1  ;;  %v2070_v48 = vmax.f32 %v2006_v42, 0.0  ;;  %v2724_v28 = vld [vmem:[%s3430_s25 + $0x348] sm:$0xf]  ;;  %v3048_v30 = vld [vmem:[%s3430_s25 + $0x354] sm:$0xf0] }
 0x1aa   : > { %v1487_v44 = vadd.f32 %v1486_v38, %v1317_v37  ;;  %v2717_v37 = vor.u32 %v3047_v24, %v2716_v23  ;;  %v2721_v38 = vor.u32 %v3045_v25, %v2718_v27  ;;  %v2748_v27 = vld [vmem:[%s3430_s25 + $0x380] sm:$0xf] }
 0x1ab   : > { %v1822_v41 = vadd.f32 %v1821_v31, %v1653_v35  ;;  %1356 = vmatmul.bf16.gmra.mxu0 %v2685_v32  ;;  %v3046_v31 = vld [vmem:[%s3430_s25 + $0x34c] sm:$0xf]  ;;  %v2726_v32 = vld [vmem:[%s3430_s25 + $0x358] sm:$0xf0] }
 0x1ac   : > { %1525 = vmatmul.bf16.gmra.mxu1 %v2689_v33 }
 0x1ad   : > { %v1939_v43 = vmul.f32 %v3718_v29, %v1822_v41  ;;  %1694 = vmatmul.bf16.gmra.mxu2 %v2693_v39 }
 0x1ae   : > { %1863 = vmatmul.bf16.gmra.mxu3 %v2697_v40 }
 0x1af   : > { %v2007_v45 = vadd.f32 %v3737_v6, %v1939_v43  ;;  %v2725_v43 = vor.u32 %v3048_v30, %v2724_v28  ;;  %v3055_v28 = vld [vmem:[%s3430_s25 + $0x38c] sm:$0xf0]  ;;  %v3053_v30 = vld [vmem:[%s3430_s25 + $0x384] sm:$0xf] }
 0x1b0   : > { %v1655_v46 = vpop.f32.mrf.mxu2  ;;  %v1319_v51 = vpop.f32.mrf.mxu0 }
 0x1b1   : > { %v1824_v47 = vpop.f32.mrf.mxu3  ;;  %v2071_v49 = vmax.f32 %v2007_v45, 0.0  ;;  %v1656_v50 = vadd.f32 %v1655_v46, %v1487_v44  ;;  %v1488_v52 = vpop.f32.mrf.mxu1  ;;  %v2729_v44 = vor.u32 %v3046_v31, %v2726_v32  ;;  %v2750_v32 = vld [vmem:[%s3430_s25 + $0x390] sm:$0xf0] }
 0x1b2   : > { %v1489_v62 = vadd.f32 %v1488_v52, %v1319_v51 }
 0x1b3   : > { %v3179_v53 = vpack.c.bf16 %v2071_v49, %v2070_v48  ;;  %v1825_v36 = vadd.f32 %v1824_v47, %v1656_v50 }
 0x1b5   : > { %3275 = vst [vmem:[%s3548_s21 + $0x78] sm:$0xff] %v3179_v53   ;;  %v1940_v3 = vmul.f32 %v3718_v29, %v1825_v36 }
 0x1b7   : > { %v2008_v11 = vadd.f32 %v3737_v6, %v1940_v3 }
 0x1b8   : > { %v1657_v63 = vpop.f32.mrf.mxu2  ;;  %v1322_v5 = vpop.f32.mrf.mxu0 }
 0x1b9   : > { %v1826_v0 = vpop.f32.mrf.mxu3  ;;  %v1658_v4 = vadd.f32 %v1657_v63, %v1489_v62  ;;  %v1491_v7 = vpop.f32.mrf.mxu1  ;;  %v2072_v16 = vmax.f32 %v2008_v11, 0.0  ;;  %v2740_v62 = vld [vmem:[%s3430_s25 + $0x368] sm:$0xf]  ;;  %v3052_v63 = vld [vmem:[%s3430_s25 + $0x374] sm:$0xf0] }
 0x1ba   : > { %v1492_v13 = vadd.f32 %v1491_v7, %v1322_v5  ;;  %v2733_v5 = vor.u32 %v3051_v58, %v2732_v57  ;;  %v2737_v7 = vor.u32 %v3049_v59, %v2734_v61  ;;  %v2764_v61 = vld [vmem:[%s3430_s25 + $0x3a0] sm:$0xf] }
 0x1bb   : > { %v1827_v10 = vadd.f32 %v1826_v0, %v1658_v4  ;;  %1361 = vmatmul.bf16.gmra.mxu0 %v2701_v1  ;;  %v3050_v0 = vld [vmem:[%s3430_s25 + $0x36c] sm:$0xf]  ;;  %v2742_v1 = vld [vmem:[%s3430_s25 + $0x378] sm:$0xf0] }
 0x1bc   : > { %1530 = vmatmul.bf16.gmra.mxu1 %v2705_v2 }
 0x1bd   : > { %v1941_v12 = vmul.f32 %v3718_v29, %v1827_v10  ;;  %1699 = vmatmul.bf16.gmra.mxu2 %v2709_v8 }
 0x1be   : > { %1868 = vmatmul.bf16.gmra.mxu3 %v2713_v9 }
 0x1bf   : > { %v2009_v14 = vadd.f32 %v3737_v6, %v1941_v12  ;;  %v2741_v12 = vor.u32 %v3052_v63, %v2740_v62  ;;  %v3059_v62 = vld [vmem:[%s3430_s25 + $0x3ac] sm:$0xf0]  ;;  %v3057_v63 = vld [vmem:[%s3430_s25 + $0x3a4] sm:$0xf] }
 0x1c0   : > { %v1660_v20 = vpop.f32.mrf.mxu2  ;;  %v1324_v19 = vpop.f32.mrf.mxu0 }
 0x1c1   : > { %v1829_v15 = vpop.f32.mrf.mxu3  ;;  %v2073_v17 = vmax.f32 %v2009_v14, 0.0  ;;  %v1661_v18 = vadd.f32 %v1660_v20, %v1492_v13  ;;  %v1493_v21 = vpop.f32.mrf.mxu1  ;;  %v2745_v13 = vor.u32 %v3050_v0, %v2742_v1  ;;  %v2766_v1 = vld [vmem:[%s3430_s25 + $0x3b0] sm:$0xf0] }
 0x1c2   : > { %v1494_v33 = vadd.f32 %v1493_v21, %v1324_v19 }
 0x1c3   : > { %v3184_v22 = vpack.c.bf16 %v2073_v17, %v2072_v16  ;;  %v1830_v26 = vadd.f32 %v1829_v15, %v1661_v18 }
 0x1c5   : > { %3276 = vst [vmem:[%s3548_s21 + $0x80] sm:$0xff] %v3184_v22   ;;  %v1942_v39 = vmul.f32 %v3718_v29, %v1830_v26 }
 0x1c7   : > { %v2010_v46 = vadd.f32 %v3737_v6, %v1942_v39 }
 0x1c8   : > { %v1662_v34 = vpop.f32.mrf.mxu2  ;;  %v1327_v41 = vpop.f32.mrf.mxu0 }
 0x1c9   : > { %v1831_v35 = vpop.f32.mrf.mxu3  ;;  %v1663_v40 = vadd.f32 %v1662_v34, %v1494_v33  ;;  %v1496_v42 = vpop.f32.mrf.mxu1  ;;  %v2074_v52 = vmax.f32 %v2010_v46, 0.0  ;;  %v2756_v33 = vld [vmem:[%s3430_s25 + $0x388] sm:$0xf]  ;;  %v3056_v34 = vld [vmem:[%s3430_s25 + $0x394] sm:$0xf0] }
 0x1ca   : > { %v1497_v48 = vadd.f32 %v1496_v42, %v1327_v41  ;;  %v2749_v41 = vor.u32 %v3055_v28, %v2748_v27  ;;  %v2753_v42 = vor.u32 %v3053_v30, %v2750_v32  ;;  %v2780_v32 = vld [vmem:[%s3430_s25 + $0x3c0] sm:$0xf] }
 0x1cb   : > { %v1832_v45 = vadd.f32 %v1831_v35, %v1663_v40  ;;  %1366 = vmatmul.bf16.gmra.mxu0 %v2717_v37  ;;  %v3054_v35 = vld [vmem:[%s3430_s25 + $0x38c] sm:$0xf]  ;;  %v2758_v37 = vld [vmem:[%s3430_s25 + $0x398] sm:$0xf0] }
 0x1cc   : > { %1535 = vmatmul.bf16.gmra.mxu1 %v2721_v38 }
 0x1cd   : > { %v1943_v47 = vmul.f32 %v3718_v29, %v1832_v45  ;;  %1704 = vmatmul.bf16.gmra.mxu2 %v2725_v43 }
 0x1ce   : > { %1873 = vmatmul.bf16.gmra.mxu3 %v2729_v44 }
 0x1cf   : > { %v2011_v49 = vadd.f32 %v3737_v6, %v1943_v47  ;;  %v2757_v47 = vor.u32 %v3056_v34, %v2756_v33  ;;  %v3063_v33 = vld [vmem:[%s3430_s25 + $0x3cc] sm:$0xf0]  ;;  %v3061_v34 = vld [vmem:[%s3430_s25 + $0x3c4] sm:$0xf] }
 0x1d0   : > { %v1665_v50 = vpop.f32.mrf.mxu2  ;;  %v1329_v55 = vpop.f32.mrf.mxu0 }
 0x1d1   : > { %v1834_v51 = vpop.f32.mrf.mxu3  ;;  %v2075_v53 = vmax.f32 %v2011_v49, 0.0  ;;  %v1666_v54 = vadd.f32 %v1665_v50, %v1497_v48  ;;  %v1498_v56 = vpop.f32.mrf.mxu1  ;;  %v2761_v48 = vor.u32 %v3054_v35, %v2758_v37  ;;  %v2782_v37 = vld [vmem:[%s3430_s25 + $0x3d0] sm:$0xf0] }
 0x1d2   : > { %v1499_v2 = vadd.f32 %v1498_v56, %v1329_v55 }
 0x1d3   : > { %v3189_v36 = vpack.c.bf16 %v2075_v53, %v2074_v52  ;;  %v1835_v60 = vadd.f32 %v1834_v51, %v1666_v54 }
 0x1d5   : > { %3277 = vst [vmem:[%s3548_s21 + $0x88] sm:$0xff] %v3189_v36   ;;  %v1944_v8 = vmul.f32 %v3718_v29, %v1835_v60 }
 0x1d7   : > { %v2012_v20 = vadd.f32 %v3737_v6, %v1944_v8 }
 0x1d8   : > { %v1667_v3 = vpop.f32.mrf.mxu2  ;;  %v1332_v10 = vpop.f32.mrf.mxu0 }
 0x1d9   : > { %v1836_v4 = vpop.f32.mrf.mxu3  ;;  %v1668_v9 = vadd.f32 %v1667_v3, %v1499_v2  ;;  %v1501_v11 = vpop.f32.mrf.mxu1  ;;  %v2076_v21 = vmax.f32 %v2012_v20, 0.0  ;;  %v2772_v2 = vld [vmem:[%s3430_s25 + $0x3a8] sm:$0xf]  ;;  %v3060_v3 = vld [vmem:[%s3430_s25 + $0x3b4] sm:$0xf0] }
 0x1da   : > { %v1502_v16 = vadd.f32 %v1501_v11, %v1332_v10  ;;  %v2765_v10 = vor.u32 %v3059_v62, %v2764_v61  ;;  %v2769_v11 = vor.u32 %v3057_v63, %v2766_v1  ;;  %v2796_v1 = vld [vmem:[%s3430_s25 + $0x3e0] sm:$0xf] }
 0x1db   : > { %v1837_v14 = vadd.f32 %v1836_v4, %v1668_v9  ;;  %1371 = vmatmul.bf16.gmra.mxu0 %v2733_v5  ;;  %v3058_v4 = vld [vmem:[%s3430_s25 + $0x3ac] sm:$0xf]  ;;  %v2774_v5 = vld [vmem:[%s3430_s25 + $0x3b8] sm:$0xf0] }
 0x1dc   : > { %1540 = vmatmul.bf16.gmra.mxu1 %v2737_v7 }
 0x1dd   : > { %v1945_v15 = vmul.f32 %v3718_v29, %v1837_v14  ;;  %1709 = vmatmul.bf16.gmra.mxu2 %v2741_v12 }
 0x1de   : > { %1878 = vmatmul.bf16.gmra.mxu3 %v2745_v13 }
 0x1df   : > { %v2013_v17 = vadd.f32 %v3737_v6, %v1945_v15  ;;  %v2773_v15 = vor.u32 %v3060_v3, %v2772_v2  ;;  %v3067_v2 = vld [vmem:[%s3430_s25 + $0x3ec] sm:$0xf0]  ;;  %v3065_v3 = vld [vmem:[%s3430_s25 + $0x3e4] sm:$0xf] }
 0x1e0   : > { %v1670_v18 = vpop.f32.mrf.mxu2  ;;  %v1334_v24 = vpop.f32.mrf.mxu0 }
 0x1e1   : > { %v1839_v19 = vpop.f32.mrf.mxu3  ;;  %v2077_v22 = vmax.f32 %v2013_v17, 0.0  ;;  %v1671_v23 = vadd.f32 %v1670_v18, %v1502_v16  ;;  %v1503_v25 = vpop.f32.mrf.mxu1  ;;  %v2777_v16 = vor.u32 %v3058_v4, %v2774_v5  ;;  %v2798_v5 = vld [vmem:[%s3430_s25 + $0x3f0] sm:$0xf0] }
 0x1e2   : > { %v1504_v38 = vadd.f32 %v1503_v25, %v1334_v24 }
 0x1e3   : > { %v3194_v26 = vpack.c.bf16 %v2077_v22, %v2076_v21  ;;  %v1840_v31 = vadd.f32 %v1839_v19, %v1671_v23 }
 0x1e5   : > { %3278 = vst [vmem:[%s3548_s21 + $0x90] sm:$0xff] %v3194_v26   ;;  %v1946_v43 = vmul.f32 %v3718_v29, %v1840_v31 }
 0x1e7   : > { %v2014_v50 = vadd.f32 %v3737_v6, %v1946_v43 }
 0x1e8   : > { %v1672_v39 = vpop.f32.mrf.mxu2  ;;  %v1337_v45 = vpop.f32.mrf.mxu0 }
 0x1e9   : > { %v1841_v40 = vpop.f32.mrf.mxu3  ;;  %v1673_v44 = vadd.f32 %v1672_v39, %v1504_v38  ;;  %v1506_v46 = vpop.f32.mrf.mxu1  ;;  %v2078_v56 = vmax.f32 %v2014_v50, 0.0  ;;  %v2788_v38 = vld [vmem:[%s3430_s25 + $0x3c8] sm:$0xf]  ;;  %v3064_v39 = vld [vmem:[%s3430_s25 + $0x3d4] sm:$0xf0] }
 0x1ea   : > { %v1507_v52 = vadd.f32 %v1506_v46, %v1337_v45  ;;  %v2781_v45 = vor.u32 %v3063_v33, %v2780_v32  ;;  %v2785_v46 = vor.u32 %v3061_v34, %v2782_v37 }
 0x1eb   : > { %v1842_v49 = vadd.f32 %v1841_v40, %v1673_v44  ;;  %1376 = vmatmul.bf16.gmra.mxu0 %v2749_v41  ;;  %v3062_v40 = vld [vmem:[%s3430_s25 + $0x3cc] sm:$0xf]  ;;  %v2790_v41 = vld [vmem:[%s3430_s25 + $0x3d8] sm:$0xf0] }
 0x1ec   : > { %1545 = vmatmul.bf16.gmra.mxu1 %v2753_v42 }
 0x1ed   : > { %v1947_v51 = vmul.f32 %v3718_v29, %v1842_v49  ;;  %1714 = vmatmul.bf16.gmra.mxu2 %v2757_v47 }
 0x1ee   : > { %1883 = vmatmul.bf16.gmra.mxu3 %v2761_v48 }
 0x1ef   : > { %v2015_v53 = vadd.f32 %v3737_v6, %v1947_v51  ;;  %v2789_v51 = vor.u32 %v3064_v39, %v2788_v38 }
 0x1f0   : > { %v1675_v54 = vpop.f32.mrf.mxu2  ;;  %v1339_v58 = vpop.f32.mrf.mxu0 }
 0x1f1   : > { %v1844_v55 = vpop.f32.mrf.mxu3  ;;  %v2079_v36 = vmax.f32 %v2015_v53, 0.0  ;;  %v1676_v57 = vadd.f32 %v1675_v54, %v1507_v52  ;;  %v1508_v59 = vpop.f32.mrf.mxu1  ;;  %v2793_v52 = vor.u32 %v3062_v40, %v2790_v41 }
 0x1f2   : > { %v1509_v7 = vadd.f32 %v1508_v59, %v1339_v58 }
 0x1f3   : > { %v3199_v60 = vpack.c.bf16 %v2079_v36, %v2078_v56  ;;  %v1845_v0 = vadd.f32 %v1844_v55, %v1676_v57 }
 0x1f5   : > { %3279 = vst [vmem:[%s3548_s21 + $0x98] sm:$0xff] %v3199_v60   ;;  %v1948_v12 = vmul.f32 %v3718_v29, %v1845_v0 }
 0x1f7   : > { %v2016_v18 = vadd.f32 %v3737_v6, %v1948_v12 }
 0x1f8   : > { %v1677_v8 = vpop.f32.mrf.mxu2  ;;  %v1342_v14 = vpop.f32.mrf.mxu0 }
 0x1f9   : > { %v1846_v9 = vpop.f32.mrf.mxu3  ;;  %v1678_v13 = vadd.f32 %v1677_v8, %v1509_v7  ;;  %v1511_v20 = vpop.f32.mrf.mxu1  ;;  %v2080_v25 = vmax.f32 %v2016_v18, 0.0  ;;  %v2804_v7 = vld [vmem:[%s3430_s25 + $0x3e8] sm:$0xf]  ;;  %v3068_v8 = vld [vmem:[%s3430_s25 + $0x3f4] sm:$0xf0] }
 0x1fa   : > { %v1512_v21 = vadd.f32 %v1511_v20, %v1342_v14  ;;  %v2797_v14 = vor.u32 %v3067_v2, %v2796_v1  ;;  %v2801_v20 = vor.u32 %v3065_v3, %v2798_v5 }
 0x1fb   : > { %v1847_v17 = vadd.f32 %v1846_v9, %v1678_v13  ;;  %1381 = vmatmul.bf16.gmra.mxu0 %v2765_v10  ;;  %v3066_v9 = vld [vmem:[%s3430_s25 + $0x3ec] sm:$0xf]  ;;  %v2806_v10 = vld [vmem:[%s3430_s25 + $0x3f8] sm:$0xf0] }
 0x1fc   : > { %1550 = vmatmul.bf16.gmra.mxu1 %v2769_v11 }
 0x1fd   : > { %v1949_v19 = vmul.f32 %v3718_v29, %v1847_v17  ;;  %1719 = vmatmul.bf16.gmra.mxu2 %v2773_v15 }
 0x1fe   : > { %1888 = vmatmul.bf16.gmra.mxu3 %v2777_v16 }
 0x1ff   : > { %v2017_v22 = vadd.f32 %v3737_v6, %v1949_v19  ;;  %v2805_v19 = vor.u32 %v3068_v8, %v2804_v7 }
 0x200   : > { %v1680_v23 = vpop.f32.mrf.mxu2  ;;  %v1344_v28 = vpop.f32.mrf.mxu0 }
 0x201   : > { %v1849_v24 = vpop.f32.mrf.mxu3  ;;  %v2081_v26 = vmax.f32 %v2017_v22, 0.0  ;;  %v1681_v27 = vadd.f32 %v1680_v23, %v1512_v21  ;;  %v1513_v30 = vpop.f32.mrf.mxu1  ;;  %v2809_v21 = vor.u32 %v3066_v9, %v2806_v10 }
 0x202   : > { %v1514_v42 = vadd.f32 %v1513_v30, %v1344_v28 }
 0x203   : > { %v3204_v31 = vpack.c.bf16 %v2081_v26, %v2080_v25  ;;  %v1850_v35 = vadd.f32 %v1849_v24, %v1681_v27 }
 0x205   : > { %3280 = vst [vmem:[%s3548_s21 + $0xa0] sm:$0xff] %v3204_v31   ;;  %v1950_v47 = vmul.f32 %v3718_v29, %v1850_v35 }
 0x207   : > { %v2018_v54 = vadd.f32 %v3737_v6, %v1950_v47 }
 0x208   : > { %v1682_v43 = vpop.f32.mrf.mxu2  ;;  %v1347_v49 = vpop.f32.mrf.mxu0 }
 0x209   : > { %v1851_v44 = vpop.f32.mrf.mxu3  ;;  %v1683_v48 = vadd.f32 %v1682_v43, %v1514_v42  ;;  %v1516_v50 = vpop.f32.mrf.mxu1  ;;  %v2082_v59 = vmax.f32 %v2018_v54, 0.0 }
 0x20a   : > { %v1517_v56 = vadd.f32 %v1516_v50, %v1347_v49 }
 0x20b   : > { %v1852_v53 = vadd.f32 %v1851_v44, %v1683_v48  ;;  %1386 = vmatmul.bf16.gmra.mxu0 %v2781_v45 }
 0x20c   : > { %1555 = vmatmul.bf16.gmra.mxu1 %v2785_v46 }
 0x20d   : > { %v1951_v55 = vmul.f32 %v3718_v29, %v1852_v53  ;;  %1724 = vmatmul.bf16.gmra.mxu2 %v2789_v51 }
 0x20e   : > { %1893 = vmatmul.bf16.gmra.mxu3 %v2793_v52 }
 0x20f   : > { %v2019_v36 = vadd.f32 %v3737_v6, %v1951_v55 }
 0x210   : > { %v1685_v57 = vpop.f32.mrf.mxu2  ;;  %v1349_v62 = vpop.f32.mrf.mxu0 }
 0x211   : > { %v1854_v58 = vpop.f32.mrf.mxu3  ;;  %v2083_v60 = vmax.f32 %v2019_v36, 0.0  ;;  %v1686_v61 = vadd.f32 %v1685_v57, %v1517_v56  ;;  %v1518_v63 = vpop.f32.mrf.mxu1 }
 0x212   : > { %v1519_v11 = vadd.f32 %v1518_v63, %v1349_v62 }
 0x213   : > { %v3209_v0 = vpack.c.bf16 %v2083_v60, %v2082_v59  ;;  %v1855_v4 = vadd.f32 %v1854_v58, %v1686_v61 }
 0x215   : > { %3281 = vst [vmem:[%s3548_s21 + $0xa8] sm:$0xff] %v3209_v0   ;;  %v1952_v15 = vmul.f32 %v3718_v29, %v1855_v4 }
 0x217   : > { %v2020_v23 = vadd.f32 %v3737_v6, %v1952_v15 }
 0x218   : > { %v1687_v12 = vpop.f32.mrf.mxu2  ;;  %v1352_v17 = vpop.f32.mrf.mxu0 }
 0x219   : > { %v1856_v13 = vpop.f32.mrf.mxu3  ;;  %v1688_v16 = vadd.f32 %v1687_v12, %v1519_v11  ;;  %v1521_v18 = vpop.f32.mrf.mxu1  ;;  %v2084_v30 = vmax.f32 %v2020_v23, 0.0 }
 0x21a   : > { %v1522_v25 = vadd.f32 %v1521_v18, %v1352_v17 }
 0x21b   : > { %v1857_v22 = vadd.f32 %v1856_v13, %v1688_v16  ;;  %1391 = vmatmul.bf16.gmra.mxu0 %v2797_v14 }
 0x21c   : > { %1560 = vmatmul.bf16.gmra.mxu1 %v2801_v20 }
 0x21d   : > { %v1953_v24 = vmul.f32 %v3718_v29, %v1857_v22  ;;  %1729 = vmatmul.bf16.gmra.mxu2 %v2805_v19 }
 0x21e   : > { %1898 = vmatmul.bf16.gmra.mxu3 %v2809_v21 }
 0x21f   : > { %v2021_v26 = vadd.f32 %v3737_v6, %v1953_v24 }
 0x220   : > { %v1690_v27 = vpop.f32.mrf.mxu2  ;;  %v1354_v33 = vpop.f32.mrf.mxu0 }
 0x221   : > { %v1859_v28 = vpop.f32.mrf.mxu3  ;;  %v2085_v31 = vmax.f32 %v2021_v26, 0.0  ;;  %v1691_v32 = vadd.f32 %v1690_v27, %v1522_v25  ;;  %v1523_v34 = vpop.f32.mrf.mxu1 }
 0x222   : > { %v1524_v38 = vadd.f32 %v1523_v34, %v1354_v33 }
 0x223   : > { %v3214_v35 = vpack.c.bf16 %v2085_v31, %v2084_v30  ;;  %v1860_v37 = vadd.f32 %v1859_v28, %v1691_v32 }
 0x225   : > { %3282 = vst [vmem:[%s3548_s21 + $0xb0] sm:$0xff] %v3214_v35   ;;  %v1954_v41 = vmul.f32 %v3718_v29, %v1860_v37 }
 0x227   : > { %v2022_v46 = vadd.f32 %v3737_v6, %v1954_v41 }
 0x228   : > { %v1692_v39 = vpop.f32.mrf.mxu2  ;;  %v1357_v43 = vpop.f32.mrf.mxu0 }
 0x229   : > { %v1861_v40 = vpop.f32.mrf.mxu3  ;;  %v1693_v42 = vadd.f32 %v1692_v39, %v1524_v38  ;;  %v1526_v44 = vpop.f32.mrf.mxu1  ;;  %v2086_v52 = vmax.f32 %v2022_v46, 0.0 }
 0x22a   : > { %v1527_v48 = vadd.f32 %v1526_v44, %v1357_v43 }
 0x22b   : > { %v1862_v45 = vadd.f32 %v1861_v40, %v1693_v42 }
 0x22d   : > { %v1955_v47 = vmul.f32 %v3718_v29, %v1862_v45 }
 0x22f   : > { %v2023_v49 = vadd.f32 %v3737_v6, %v1955_v47 }
 0x230   : > { %v1695_v50 = vpop.f32.mrf.mxu2  ;;  %v1359_v55 = vpop.f32.mrf.mxu0 }
 0x231   : > { %v1864_v51 = vpop.f32.mrf.mxu3  ;;  %v2087_v53 = vmax.f32 %v2023_v49, 0.0  ;;  %v1696_v54 = vadd.f32 %v1695_v50, %v1527_v48  ;;  %v1528_v56 = vpop.f32.mrf.mxu1 }
 0x232   : > { %v1529_v58 = vadd.f32 %v1528_v56, %v1359_v55 }
 0x233   : > { %v3219_v36 = vpack.c.bf16 %v2087_v53, %v2086_v52  ;;  %v1865_v57 = vadd.f32 %v1864_v51, %v1696_v54 }
 0x235   : > { %3283 = vst [vmem:[%s3548_s21 + $0xb8] sm:$0xff] %v3219_v36   ;;  %v1956_v61 = vmul.f32 %v3718_v29, %v1865_v57 }
 0x237   : > { %v2024_v2 = vadd.f32 %v3737_v6, %v1956_v61 }
 0x238   : > { %v1697_v59 = vpop.f32.mrf.mxu2  ;;  %v1362_v63 = vpop.f32.mrf.mxu0 }
 0x239   : > { %v1866_v60 = vpop.f32.mrf.mxu3  ;;  %v1698_v62 = vadd.f32 %v1697_v59, %v1529_v58  ;;  %v1531_v0 = vpop.f32.mrf.mxu1  ;;  %v2088_v9 = vmax.f32 %v2024_v2, 0.0 }
 0x23a   : > { %v1532_v4 = vadd.f32 %v1531_v0, %v1362_v63 }
 0x23b   : > { %v1867_v1 = vadd.f32 %v1866_v60, %v1698_v62 }
 0x23d   : > { %v1957_v3 = vmul.f32 %v3718_v29, %v1867_v1 }
 0x23f   : > { %v2025_v5 = vadd.f32 %v3737_v6, %v1957_v3 }
 0x240   : > { %v1700_v7 = vpop.f32.mrf.mxu2  ;;  %v1364_v12 = vpop.f32.mrf.mxu0 }
 0x241   : > { %v1869_v8 = vpop.f32.mrf.mxu3  ;;  %v2089_v10 = vmax.f32 %v2025_v5, 0.0  ;;  %v1701_v11 = vadd.f32 %v1700_v7, %v1532_v4  ;;  %v1533_v13 = vpop.f32.mrf.mxu1 }
 0x242   : > { %v1534_v15 = vadd.f32 %v1533_v13, %v1364_v12 }
 0x243   : > { %v3224_v14 = vpack.c.bf16 %v2089_v10, %v2088_v9  ;;  %v1870_v20 = vadd.f32 %v1869_v8, %v1701_v11 }
 0x245   : > { %3284 = vst [vmem:[%s3548_s21 + $0xc0] sm:$0xff] %v3224_v14   ;;  %v1958_v18 = vmul.f32 %v3718_v29, %v1870_v20 }
 0x247   : > { %v2026_v24 = vadd.f32 %v3737_v6, %v1958_v18 }
 0x248   : > { %v1702_v16 = vpop.f32.mrf.mxu2  ;;  %v1367_v21 = vpop.f32.mrf.mxu0 }
 0x249   : > { %v1871_v17 = vpop.f32.mrf.mxu3  ;;  %v1703_v19 = vadd.f32 %v1702_v16, %v1534_v15  ;;  %v1536_v22 = vpop.f32.mrf.mxu1  ;;  %v2090_v31 = vmax.f32 %v2026_v24, 0.0 }
 0x24a   : > { %v1537_v26 = vadd.f32 %v1536_v22, %v1367_v21 }
 0x24b   : > { %v1872_v23 = vadd.f32 %v1871_v17, %v1703_v19 }
 0x24d   : > { %v1959_v25 = vmul.f32 %v3718_v29, %v1872_v23 }
 0x24f   : > { %v2027_v27 = vadd.f32 %v3737_v6, %v1959_v25 }
 0x250   : > { %v1705_v28 = vpop.f32.mrf.mxu2  ;;  %v1369_v34 = vpop.f32.mrf.mxu0 }
 0x251   : > { %v1874_v30 = vpop.f32.mrf.mxu3  ;;  %v2091_v32 = vmax.f32 %v2027_v27, 0.0  ;;  %v1706_v33 = vadd.f32 %v1705_v28, %v1537_v26  ;;  %v1538_v35 = vpop.f32.mrf.mxu1 }
 0x252   : > { %v1539_v39 = vadd.f32 %v1538_v35, %v1369_v34 }
 0x253   : > { %v3229_v37 = vpack.c.bf16 %v2091_v32, %v2090_v31  ;;  %v1875_v38 = vadd.f32 %v1874_v30, %v1706_v33 }
 0x255   : > { %3285 = vst [vmem:[%s3548_s21 + $0xc8] sm:$0xff] %v3229_v37   ;;  %v1960_v42 = vmul.f32 %v3718_v29, %v1875_v38 }
 0x257   : > { %v2028_v47 = vadd.f32 %v3737_v6, %v1960_v42 }
 0x258   : > { %v1707_v40 = vpop.f32.mrf.mxu2  ;;  %v1372_v44 = vpop.f32.mrf.mxu0 }
 0x259   : > { %v1876_v41 = vpop.f32.mrf.mxu3  ;;  %v1708_v43 = vadd.f32 %v1707_v40, %v1539_v39  ;;  %v1541_v45 = vpop.f32.mrf.mxu1  ;;  %v2092_v53 = vmax.f32 %v2028_v47, 0.0 }
 0x25a   : > { %v1542_v49 = vadd.f32 %v1541_v45, %v1372_v44 }
 0x25b   : > { %v1877_v46 = vadd.f32 %v1876_v41, %v1708_v43 }
 0x25d   : > { %v1961_v48 = vmul.f32 %v3718_v29, %v1877_v46 }
 0x25f   : > { %v2029_v50 = vadd.f32 %v3737_v6, %v1961_v48 }
 0x260   : > { %v1710_v51 = vpop.f32.mrf.mxu2  ;;  %v1374_v56 = vpop.f32.mrf.mxu0 }
 0x261   : > { %v1879_v52 = vpop.f32.mrf.mxu3  ;;  %v2093_v54 = vmax.f32 %v2029_v50, 0.0  ;;  %v1711_v55 = vadd.f32 %v1710_v51, %v1542_v49  ;;  %v1543_v36 = vpop.f32.mrf.mxu1 }
 0x262   : > { %v1544_v59 = vadd.f32 %v1543_v36, %v1374_v56 }
 0x263   : > { %v3234_v57 = vpack.c.bf16 %v2093_v54, %v2092_v53  ;;  %v1880_v58 = vadd.f32 %v1879_v52, %v1711_v55 }
 0x265   : > { %3286 = vst [vmem:[%s3548_s21 + $0xd0] sm:$0xff] %v3234_v57   ;;  %v1962_v62 = vmul.f32 %v3718_v29, %v1880_v58 }
 0x267   : > { %v2030_v3 = vadd.f32 %v3737_v6, %v1962_v62 }
 0x268   : > { %v1712_v60 = vpop.f32.mrf.mxu2  ;;  %v1377_v0 = vpop.f32.mrf.mxu0 }
 0x269   : > { %v1881_v61 = vpop.f32.mrf.mxu3  ;;  %v1713_v63 = vadd.f32 %v1712_v60, %v1544_v59  ;;  %v1546_v1 = vpop.f32.mrf.mxu1  ;;  %v2094_v10 = vmax.f32 %v2030_v3, 0.0 }
 0x26a   : > { %v1547_v5 = vadd.f32 %v1546_v1, %v1377_v0 }
 0x26b   : > { %v1882_v2 = vadd.f32 %v1881_v61, %v1713_v63 }
 0x26d   : > { %v1963_v4 = vmul.f32 %v3718_v29, %v1882_v2 }
 0x26f   : > { %v2031_v7 = vadd.f32 %v3737_v6, %v1963_v4 }
 0x270   : > { %v1715_v8 = vpop.f32.mrf.mxu2  ;;  %v1379_v13 = vpop.f32.mrf.mxu0 }
 0x271   : > { %v1884_v9 = vpop.f32.mrf.mxu3  ;;  %v2095_v11 = vmax.f32 %v2031_v7, 0.0  ;;  %v1716_v12 = vadd.f32 %v1715_v8, %v1547_v5  ;;  %v1548_v14 = vpop.f32.mrf.mxu1 }
 0x272   : > { %v1549_v16 = vadd.f32 %v1548_v14, %v1379_v13 }
 0x273   : > { %v3239_v20 = vpack.c.bf16 %v2095_v11, %v2094_v10  ;;  %v1885_v15 = vadd.f32 %v1884_v9, %v1716_v12 }
 0x275   : > { %3287 = vst [vmem:[%s3548_s21 + $0xd8] sm:$0xff] %v3239_v20   ;;  %v1964_v19 = vmul.f32 %v3718_v29, %v1885_v15 }
 0x277   : > { %v2032_v25 = vadd.f32 %v3737_v6, %v1964_v19 }
 0x278   : > { %v1717_v17 = vpop.f32.mrf.mxu2  ;;  %v1382_v22 = vpop.f32.mrf.mxu0 }
 0x279   : > { %v1886_v18 = vpop.f32.mrf.mxu3  ;;  %v1718_v21 = vadd.f32 %v1717_v17, %v1549_v16  ;;  %v1551_v23 = vpop.f32.mrf.mxu1  ;;  %v2096_v32 = vmax.f32 %v2032_v25, 0.0 }
 0x27a   : > { %v1552_v27 = vadd.f32 %v1551_v23, %v1382_v22 }
 0x27b   : > { %v1887_v24 = vadd.f32 %v1886_v18, %v1718_v21 }
 0x27d   : > { %v1965_v26 = vmul.f32 %v3718_v29, %v1887_v24 }
 0x27f   : > { %v2033_v28 = vadd.f32 %v3737_v6, %v1965_v26 }
 0x280   : > { %v1720_v30 = vpop.f32.mrf.mxu2  ;;  %v1384_v35 = vpop.f32.mrf.mxu0 }
 0x281   : > { %v1889_v31 = vpop.f32.mrf.mxu3  ;;  %v2097_v33 = vmax.f32 %v2033_v28, 0.0  ;;  %v1721_v34 = vadd.f32 %v1720_v30, %v1552_v27  ;;  %v1553_v37 = vpop.f32.mrf.mxu1 }
 0x282   : > { %v1554_v40 = vadd.f32 %v1553_v37, %v1384_v35 }
 0x283   : > { %v3244_v38 = vpack.c.bf16 %v2097_v33, %v2096_v32  ;;  %v1890_v39 = vadd.f32 %v1889_v31, %v1721_v34 }
 0x285   : > { %3288 = vst [vmem:[%s3548_s21 + $0xe0] sm:$0xff] %v3244_v38   ;;  %v1966_v43 = vmul.f32 %v3718_v29, %v1890_v39 }
 0x287   : > { %v2034_v48 = vadd.f32 %v3737_v6, %v1966_v43 }
 0x288   : > { %v1722_v41 = vpop.f32.mrf.mxu2  ;;  %v1387_v45 = vpop.f32.mrf.mxu0 }
 0x289   : > { %v1891_v42 = vpop.f32.mrf.mxu3  ;;  %v1723_v44 = vadd.f32 %v1722_v41, %v1554_v40  ;;  %v1556_v46 = vpop.f32.mrf.mxu1  ;;  %v2098_v54 = vmax.f32 %v2034_v48, 0.0 }
 0x28a   : > { %v1557_v50 = vadd.f32 %v1556_v46, %v1387_v45 }
 0x28b   : > { %v1892_v47 = vadd.f32 %v1891_v42, %v1723_v44 }
 0x28d   : > { %v1967_v49 = vmul.f32 %v3718_v29, %v1892_v47  ;;  %v3304_v29 = vld [vmem:[%s3896_s2] ss:$0 sm:$0xff] }
 0x28f   : > { %v2035_v51 = vadd.f32 %v3737_v6, %v1967_v49 }
 0x290   : > { %v1725_v52 = vpop.f32.mrf.mxu2  ;;  %v1389_v36 = vpop.f32.mrf.mxu0 }
 0x291   : > { %v1894_v53 = vpop.f32.mrf.mxu3  ;;  %v2099_v55 = vmax.f32 %v2035_v51, 0.0  ;;  %v1726_v56 = vadd.f32 %v1725_v52, %v1557_v50  ;;  %v1558_v57 = vpop.f32.mrf.mxu1 }
 0x292   : > { %v1559_v60 = vadd.f32 %v1558_v57, %v1389_v36 }
 0x293   : > { %v3249_v58 = vpack.c.bf16 %v2099_v55, %v2098_v54  ;;  %v1895_v59 = vadd.f32 %v1894_v53, %v1726_v56 }
 0x295   : > { %3289 = vst [vmem:[%s3548_s21 + $0xe8] sm:$0xff] %v3249_v58   ;;  %v1968_v63 = vmul.f32 %v3304_v29, %v1895_v59 }
 0x297   : > { %v2036_v4 = vadd.f32 %v3737_v6, %v1968_v63 }
 0x298   : > { %v1727_v61 = vpop.f32.mrf.mxu2  ;;  %v1392_v1 = vpop.f32.mrf.mxu0 }
 0x299   : > { %v1896_v62 = vpop.f32.mrf.mxu3  ;;  %v1728_v0 = vadd.f32 %v1727_v61, %v1559_v60  ;;  %v1561_v2 = vpop.f32.mrf.mxu1  ;;  %v2100_v11 = vmax.f32 %v2036_v4, 0.0 }
 0x29a   : > { %v1562_v7 = vadd.f32 %v1561_v2, %v1392_v1 }
 0x29b   : > { %v1897_v3 = vadd.f32 %v1896_v62, %v1728_v0 }
 0x29d   : > { %v1969_v5 = vmul.f32 %v3304_v29, %v1897_v3 }
 0x29f   : > { %v2037_v8 = vadd.f32 %v3737_v6, %v1969_v5 }
 0x2a0   : > { %v1730_v9 = vpop.f32.mrf.mxu2  ;;  %v1394_v20 = vpop.f32.mrf.mxu0 }
 0x2a1   : > { %v1899_v10 = vpop.f32.mrf.mxu3  ;;  %v2101_v12 = vmax.f32 %v2037_v8, 0.0  ;;  %v1731_v13 = vadd.f32 %v1730_v9, %v1562_v7  ;;  %v1563_v15 = vpop.f32.mrf.mxu1 }
 0x2a2   : > { %v1564_v17 = vadd.f32 %v1563_v15, %v1394_v20 }
 0x2a3   : > { %v3254_v14 = vpack.c.bf16 %v2101_v12, %v2100_v11  ;;  %v1900_v16 = vadd.f32 %v1899_v10, %v1731_v13 }
 0x2a5   : > { %3290 = vst [vmem:[%s3548_s21 + $0xf0] sm:$0xff] %v3254_v14   ;;  %v1970_v19 = vmul.f32 %v3304_v29, %v1900_v16 }
 0x2a7   : > { %v2038_v24 = vadd.f32 %v3737_v6, %v1970_v19 }
 0x2a8   : > { %v1732_v18 = vpop.f32.mrf.mxu2 }
 0x2a9   : > { %v1733_v21 = vadd.f32 %v1732_v18, %v1564_v17  ;;  %v1901_v22 = vpop.f32.mrf.mxu3  ;;  %v2102_v27 = vmax.f32 %v2038_v24, 0.0 }
 0x2ab   : > { %v1902_v23 = vadd.f32 %v1901_v22, %v1733_v21 }
 0x2ad   : > { %v1971_v25 = vmul.f32 %v3304_v29, %v1902_v23 }
 0x2af   : > { %v2039_v26 = vadd.f32 %v3737_v6, %v1971_v25 }
 0x2b1   : > { %v2103_v28 = vmax.f32 %v2039_v26, 0.0 }
 0x2b3   : > { %v3259_v30 = vpack.c.bf16 %v2103_v28, %v2102_v27 }
 0x2b5   : > { %3291 = vst [vmem:[%s3548_s21 + $0xf8] sm:$0xff] %v3259_v30  }
 0x2b6 PF: > { %s14_s15 = sadd.s32 1, %s3311_s15  }
 0x2b7   : > { %p11_p4 = scmp.ge.s32.totalorder %s14_s15, 4  }
 0x2b9   :  { %13 = sbr.rel (!%p11_p4) target bundleno = 1 (0x1), region = 66 }

// kernel: _lambda_.26
= control target key start
LH: loop header
LB: loop body
LE: loop exit
PB: predicated region body
PF: predicated region fallthrough
CT: control target
= control target key end

     0   :  { %s1427_s1 = inlined_call_operand.vmem [shape: bf16[256,128], index: 1, kind: input, shape index: {}]   ;;  %s1428_s0 = inlined_call_operand.vmem [shape: bf16[256,256], index: 0, kind: input, shape index: {}]   ;;  %s1429_s2 = inlined_call_operand.vmem [shape: f32[1,128], index: 2, kind: input, shape index: {}]   ;;  %s1430_s3 = inlined_call_operand.vmem [shape: f32[1,128], index: 3, kind: input, shape index: {}]   ;;  %s1431_s4 = inlined_call_operand.vmem [shape: bf16[256,128], index: 4, kind: output, shape index: {}]  }
   0x1   :  { %v918_v0 = vld [vmem:[%s1427_s1 + $0x38] sm:$0xff]  ;;  %v917_v2 = vld [vmem:[%s1427_s1 + $0x30] sm:$0xff]  ;;  %v916_v4 = vld [vmem:[%s1427_s1 + $0x28] sm:$0xff] }
   0x2   :  { %v926_v1 = vld [vmem:[%s1427_s1 + $0x78] sm:$0xff]  ;;  %337 = vmatpush.bf16.msra.mxu0 %v918_v0  ;;  %1022 = vmatpush.bf16.msra.mxu2 %v918_v0  ;;  %v925_v3 = vld [vmem:[%s1427_s1 + $0x70] sm:$0xff]  ;;  %v924_v5 = vld [vmem:[%s1427_s1 + $0x68] sm:$0xff] }
   0x3   :  { %426 = vmatpush.bf16.msra.mxu1 %v926_v1  ;;  %1030 = vmatpush.bf16.msra.mxu3 %v926_v1  ;;  %v915_v6 = vld [vmem:[%s1427_s1 + $0x20] sm:$0xff]  ;;  %v914_v8 = vld [vmem:[%s1427_s1 + $0x18] sm:$0xff]  ;;  %v913_v10 = vld [vmem:[%s1427_s1 + $0x10] sm:$0xff] }
   0x4   :  { %v923_v7 = vld [vmem:[%s1427_s1 + $0x60] sm:$0xff]  ;;  %v922_v9 = vld [vmem:[%s1427_s1 + $0x58] sm:$0xff]  ;;  %v921_v11 = vld [vmem:[%s1427_s1 + $0x50] sm:$0xff] }
   0x5   :  { %v912_v12 = vld [vmem:[%s1427_s1 + $0x8] sm:$0xff]  ;;  %v911_v14 = vld [vmem:[%s1427_s1] sm:$0xff]  ;;  %v697_v28 = vld [vmem:[%s1428_s0 + $0x10] sm:$0xf] }
   0x6   :  { %338 = vmatpush.bf16.msra.mxu0 %v917_v2  ;;  %1023 = vmatpush.bf16.msra.mxu2 %v917_v2  ;;  %v920_v13 = vld [vmem:[%s1427_s1 + $0x48] sm:$0xff]  ;;  %v919_v15 = vld [vmem:[%s1427_s1 + $0x40] sm:$0xff]  ;;  %v882_v29 = vld [vmem:[%s1428_s0 + $0x14] sm:$0xf0] }
   0x7   :  { %427 = vmatpush.bf16.msra.mxu1 %v925_v3  ;;  %1031 = vmatpush.bf16.msra.mxu3 %v925_v3  ;;  %v689_v16 = vld [vmem:[%s1428_s0] sm:$0xf]  ;;  %v880_v17 = vld [vmem:[%s1428_s0 + $0x4] sm:$0xf0]  ;;  %v879_v20 = vld [vmem:[%s1428_s0 + $0x4] sm:$0xf]  ;;  %v698_v36 = vor.u32 %v882_v29, %v697_v28 }
   0x8   :  { %v753_v18 = vld [vmem:[%s1428_s0 + $0x80] sm:$0xf]  ;;  %v896_v19 = vld [vmem:[%s1428_s0 + $0x84] sm:$0xf0]  ;;  %v691_v21 = vld [vmem:[%s1428_s0 + $0x8] sm:$0xf0]  ;;  %v690_v24 = vor.u32 %v880_v17, %v689_v16 }
   0x9   :  { %v895_v22 = vld [vmem:[%s1428_s0 + $0x84] sm:$0xf]  ;;  %v755_v23 = vld [vmem:[%s1428_s0 + $0x88] sm:$0xf0]  ;;  %v754_v25 = vor.u32 %v896_v19, %v753_v18  ;;  %v694_v26 = vor.u32 %v879_v20, %v691_v21  ;;  %v761_v30 = vld [vmem:[%s1428_s0 + $0x90] sm:$0xf] }
   0xa   :  { %339 = vmatpush.bf16.msra.mxu0 %v916_v4  ;;  %1024 = vmatpush.bf16.msra.mxu2 %v916_v4  ;;  %v758_v27 = vor.u32 %v895_v22, %v755_v23  ;;  %v898_v31 = vld [vmem:[%s1428_s0 + $0x94] sm:$0xf0]  ;;  %v881_v32 = vld [vmem:[%s1428_s0 + $0x14] sm:$0xf]  ;;  %v699_v33 = vld [vmem:[%s1428_s0 + $0x18] sm:$0xf0] }
   0xb   :  { %428 = vmatpush.bf16.msra.mxu1 %v924_v5  ;;  %1032 = vmatpush.bf16.msra.mxu3 %v924_v5  ;;  %v897_v34 = vld [vmem:[%s1428_s0 + $0x94] sm:$0xf]  ;;  %v763_v35 = vld [vmem:[%s1428_s0 + $0x98] sm:$0xf0]  ;;  %v762_v37 = vor.u32 %v898_v31, %v761_v30  ;;  %v702_v38 = vor.u32 %v881_v32, %v699_v33  ;;  %v705_v40 = vld [vmem:[%s1428_s0 + $0x20] sm:$0xf] }
   0xc   :  { %v766_v39 = vor.u32 %v897_v34, %v763_v35  ;;  %v884_v41 = vld [vmem:[%s1428_s0 + $0x24] sm:$0xf0]  ;;  %v769_v42 = vld [vmem:[%s1428_s0 + $0xa0] sm:$0xf]  ;;  %v883_v44 = vld [vmem:[%s1428_s0 + $0x24] sm:$0xf] }
   0xd   :  { %v900_v43 = vld [vmem:[%s1428_s0 + $0xa4] sm:$0xf0]  ;;  %v707_v45 = vld [vmem:[%s1428_s0 + $0x28] sm:$0xf0]  ;;  %v899_v46 = vld [vmem:[%s1428_s0 + $0xa4] sm:$0xf]  ;;  %v706_v48 = vor.u32 %v884_v41, %v705_v40 }
   0xe   :  { %340 = vmatpush.bf16.msra.mxu0 %v915_v6  ;;  %1025 = vmatpush.bf16.msra.mxu2 %v915_v6  ;;  %v771_v47 = vld [vmem:[%s1428_s0 + $0xa8] sm:$0xf0]  ;;  %v770_v49 = vor.u32 %v900_v43, %v769_v42  ;;  %v710_v50 = vor.u32 %v883_v44, %v707_v45  ;;  %v713_v52 = vld [vmem:[%s1428_s0 + $0x30] sm:$0xf]  ;;  %v886_v53 = vld [vmem:[%s1428_s0 + $0x34] sm:$0xf0] }
   0xf   :  { %429 = vmatpush.bf16.msra.mxu1 %v923_v7  ;;  %1033 = vmatpush.bf16.msra.mxu3 %v923_v7  ;;  %v774_v51 = vor.u32 %v899_v46, %v771_v47  ;;  %v777_v54 = vld [vmem:[%s1428_s0 + $0xb0] sm:$0xf]  ;;  %v902_v55 = vld [vmem:[%s1428_s0 + $0xb4] sm:$0xf0]  ;;  %v885_v56 = vld [vmem:[%s1428_s0 + $0x34] sm:$0xf]  ;;  %v714_v60 = vor.u32 %v886_v53, %v713_v52 }
  0x10   :  { %v715_v57 = vld [vmem:[%s1428_s0 + $0x38] sm:$0xf0]  ;;  %v901_v58 = vld [vmem:[%s1428_s0 + $0xb4] sm:$0xf]  ;;  %v778_v61 = vor.u32 %v902_v55, %v777_v54  ;;  %v721_v0 = vld [vmem:[%s1428_s0 + $0x40] sm:$0xf] }
  0x11   :  { %v779_v59 = vld [vmem:[%s1428_s0 + $0xb8] sm:$0xf0]  ;;  %v718_v62 = vor.u32 %v885_v56, %v715_v57  ;;  %v888_v1 = vld [vmem:[%s1428_s0 + $0x44] sm:$0xf0]  ;;  %v785_v2 = vld [vmem:[%s1428_s0 + $0xc0] sm:$0xf] }
  0x12   :  { %341 = vmatpush.bf16.msra.mxu0 %v914_v8  ;;  %1026 = vmatpush.bf16.msra.mxu2 %v914_v8  ;;  %v782_v63 = vor.u32 %v901_v58, %v779_v59  ;;  %v904_v3 = vld [vmem:[%s1428_s0 + $0xc4] sm:$0xf0]  ;;  %v887_v4 = vld [vmem:[%s1428_s0 + $0x44] sm:$0xf]  ;;  %v723_v5 = vld [vmem:[%s1428_s0 + $0x48] sm:$0xf0]  ;;  %v722_v8 = vor.u32 %v888_v1, %v721_v0 }
  0x13   :  { %430 = vmatpush.bf16.msra.mxu1 %v922_v9  ;;  %1034 = vmatpush.bf16.msra.mxu3 %v922_v9  ;;  %v903_v6 = vld [vmem:[%s1428_s0 + $0xc4] sm:$0xf]  ;;  %v787_v7 = vld [vmem:[%s1428_s0 + $0xc8] sm:$0xf0]  ;;  %v786_v9 = vor.u32 %v904_v3, %v785_v2  ;;  %v889_v16 = vld [vmem:[%s1428_s0 + $0x54] sm:$0xf] }
  0x14   :  { %v731_v17 = vld [vmem:[%s1428_s0 + $0x58] sm:$0xf0]  ;;  %v905_v18 = vld [vmem:[%s1428_s0 + $0xd4] sm:$0xf]  ;;  %v891_v28 = vld [vmem:[%s1428_s0 + $0x64] sm:$0xf] }
  0x15   :  { %v795_v19 = vld [vmem:[%s1428_s0 + $0xd8] sm:$0xf0]  ;;  %v734_v22 = vor.u32 %v889_v16, %v731_v17  ;;  %v739_v29 = vld [vmem:[%s1428_s0 + $0x68] sm:$0xf0]  ;;  %v907_v30 = vld [vmem:[%s1428_s0 + $0xe4] sm:$0xf] }
  0x16   :  { %342 = vmatpush.bf16.msra.mxu0 %v913_v10  ;;  %1027 = vmatpush.bf16.msra.mxu2 %v913_v10  ;;  %v726_v10 = vor.u32 %v887_v4, %v723_v5  ;;  %v798_v23 = vor.u32 %v905_v18, %v795_v19  ;;  %v803_v31 = vld [vmem:[%s1428_s0 + $0xe8] sm:$0xf0]  ;;  %v742_v34 = vor.u32 %v891_v28, %v739_v29  ;;  %v893_v40 = vld [vmem:[%s1428_s0 + $0x74] sm:$0xf]  ;;  %v747_v41 = vld [vmem:[%s1428_s0 + $0x78] sm:$0xf0] }
  0x17   :  { %431 = vmatpush.bf16.msra.mxu1 %v921_v11  ;;  %1035 = vmatpush.bf16.msra.mxu3 %v921_v11  ;;  %v790_v11 = vor.u32 %v903_v6, %v787_v7  ;;  %v806_v35 = vor.u32 %v907_v30, %v803_v31  ;;  %v909_v42 = vld [vmem:[%s1428_s0 + $0xf4] sm:$0xf]  ;;  %v811_v43 = vld [vmem:[%s1428_s0 + $0xf8] sm:$0xf0]  ;;  %v750_v46 = vor.u32 %v893_v40, %v747_v41  ;;  %v1314_v55 = vld [vmem:[%s1430_s3] ss:$0 sm:$0xff] }
  0x18   :  { %v814_v47 = vor.u32 %v909_v42, %v811_v43 }
  0x1a   :  { %343 = vmatpush.bf16.msra.mxu0 %v912_v12  ;;  %1028 = vmatpush.bf16.msra.mxu2 %v912_v12  ;;  %v729_v12 = vld [vmem:[%s1428_s0 + $0x50] sm:$0xf] }
  0x1b   :  { %432 = vmatpush.bf16.msra.mxu1 %v920_v13  ;;  %1036 = vmatpush.bf16.msra.mxu3 %v920_v13  ;;  %v890_v13 = vld [vmem:[%s1428_s0 + $0x54] sm:$0xf0] }
  0x1c   :  { %v730_v20 = vor.u32 %v890_v13, %v729_v12 }
  0x1e   :  { %344 = vmatpush.bf16.msra.mxu0 %v911_v14  ;;  %1029 = vmatpush.bf16.msra.mxu2 %v911_v14  ;;  %v793_v14 = vld [vmem:[%s1428_s0 + $0xd0] sm:$0xf] }
  0x1f   :  { %433 = vmatpush.bf16.msra.mxu1 %v919_v15  ;;  %1037 = vmatpush.bf16.msra.mxu3 %v919_v15  ;;  %v906_v15 = vld [vmem:[%s1428_s0 + $0xd4] sm:$0xf0] }
  0x20   :  { %v794_v21 = vor.u32 %v906_v15, %v793_v14 }
  0x21   :  { %345 = vmatmul.bf16.vlgmr.msra.gmra.mxu0 %v690_v24  ;;  %385 = vmatmul.bf16.vlgmr.msra.gmra.mxu2 %v754_v25  ;;  %v737_v24 = vld [vmem:[%s1428_s0 + $0x60] sm:$0xf]  ;;  %v892_v25 = vld [vmem:[%s1428_s0 + $0x64] sm:$0xf0] }
  0x22   :  { %434 = vmatmul.bf16.vlgmr.msra.gmra.mxu1 %v694_v26  ;;  %474 = vmatmul.bf16.vlgmr.msra.gmra.mxu3 %v758_v27  ;;  %v801_v26 = vld [vmem:[%s1428_s0 + $0xe0] sm:$0xf]  ;;  %v908_v27 = vld [vmem:[%s1428_s0 + $0xe4] sm:$0xf0]  ;;  %v738_v32 = vor.u32 %v892_v25, %v737_v24 }
  0x23   :  { %v802_v33 = vor.u32 %v908_v27, %v801_v26 }
  0x31   :  { %350 = vmatmul.bf16.gmra.mxu0 %v698_v36  ;;  %390 = vmatmul.bf16.gmra.mxu2 %v762_v37  ;;  %v745_v36 = vld [vmem:[%s1428_s0 + $0x70] sm:$0xf]  ;;  %v894_v37 = vld [vmem:[%s1428_s0 + $0x74] sm:$0xf0] }
  0x32   :  { %439 = vmatmul.bf16.gmra.mxu1 %v702_v38  ;;  %479 = vmatmul.bf16.gmra.mxu3 %v766_v39  ;;  %v809_v38 = vld [vmem:[%s1428_s0 + $0xf0] sm:$0xf]  ;;  %v910_v39 = vld [vmem:[%s1428_s0 + $0xf4] sm:$0xf0]  ;;  %v746_v44 = vor.u32 %v894_v37, %v745_v36 }
  0x33   :  { %v810_v45 = vor.u32 %v910_v39, %v809_v38 }
  0x41   :  { %355 = vmatmul.bf16.gmra.mxu0 %v706_v48  ;;  %395 = vmatmul.bf16.gmra.mxu2 %v770_v49 }
  0x42   :  { %444 = vmatmul.bf16.gmra.mxu1 %v710_v50  ;;  %484 = vmatmul.bf16.gmra.mxu3 %v774_v51  ;;  %v1308_v51 = vld [vmem:[%s1429_s2] ss:$0 sm:$0xff] }
  0x51   :  { %360 = vmatmul.bf16.gmra.mxu0 %v714_v60  ;;  %400 = vmatmul.bf16.gmra.mxu2 %v778_v61 }
  0x52   :  { %449 = vmatmul.bf16.gmra.mxu1 %v718_v62  ;;  %489 = vmatmul.bf16.gmra.mxu3 %v782_v63 }
  0x61   :  { %365 = vmatmul.bf16.gmra.mxu0 %v722_v8  ;;  %405 = vmatmul.bf16.gmra.mxu2 %v786_v9 }
  0x62   :  { %454 = vmatmul.bf16.gmra.mxu1 %v726_v10  ;;  %494 = vmatmul.bf16.gmra.mxu3 %v790_v11 }
  0x71   :  { %370 = vmatmul.bf16.gmra.mxu0 %v730_v20  ;;  %410 = vmatmul.bf16.gmra.mxu2 %v794_v21 }
  0x72   :  { %459 = vmatmul.bf16.gmra.mxu1 %v734_v22  ;;  %499 = vmatmul.bf16.gmra.mxu3 %v798_v23 }
  0x81   :  { %375 = vmatmul.bf16.gmra.mxu0 %v738_v32  ;;  %415 = vmatmul.bf16.gmra.mxu2 %v802_v33 }
  0x82   :  { %464 = vmatmul.bf16.gmra.mxu1 %v742_v34  ;;  %504 = vmatmul.bf16.gmra.mxu3 %v806_v35 }
  0x91   :  { %380 = vmatmul.bf16.gmra.mxu0 %v746_v44  ;;  %420 = vmatmul.bf16.gmra.mxu2 %v810_v45 }
  0x92   :  { %469 = vmatmul.bf16.gmra.mxu1 %v750_v46  ;;  %509 = vmatmul.bf16.gmra.mxu3 %v814_v47 }
  0x9e   :  { %v346_v48 = vpop.f32.mrf.mxu0 }
  0x9f   :  { %v435_v49 = vpop.f32.mrf.mxu1 }
  0xa0   :  { %v436_v50 = vadd.f32 %v435_v49, %v346_v48 }
  0xa2   :  { %v519_v54 = vmul.f32 %v1308_v51, %v436_v50 }
  0xa4   :  { %v386_v52 = vpop.f32.mrf.mxu2  ;;  %v555_v60 = vadd.f32 %v1314_v55, %v519_v54 }
  0xa5   :  { %v475_v53 = vpop.f32.mrf.mxu3 }
  0xa6   :  { %v348_v56 = vpop.f32.mrf.mxu0  ;;  %v476_v58 = vadd.f32 %v475_v53, %v386_v52  ;;  %v587_v2 = vmax.f32 %v555_v60, 0.0 }
  0xa7   :  { %v437_v57 = vpop.f32.mrf.mxu1 }
  0xa8   :  { %v438_v59 = vadd.f32 %v437_v57, %v348_v56  ;;  %v535_v62 = vmul.f32 %v1308_v51, %v476_v58 }
  0xaa   :  { %v520_v61 = vmul.f32 %v1308_v51, %v438_v59  ;;  %v571_v7 = vadd.f32 %v1314_v55, %v535_v62 }
  0xac   :  { %v556_v63 = vadd.f32 %v1314_v55, %v520_v61  ;;  %v388_v0 = vpop.f32.mrf.mxu2  ;;  %v603_v12 = vmax.f32 %v571_v7, 0.0 }
  0xad   :  { %v477_v1 = vpop.f32.mrf.mxu3 }
  0xae   :  { %v588_v3 = vmax.f32 %v556_v63, 0.0  ;;  %v478_v4 = vadd.f32 %v477_v1, %v388_v0  ;;  %v351_v5 = vpop.f32.mrf.mxu0 }
  0xaf   :  { %v440_v6 = vpop.f32.mrf.mxu1 }
  0xb0   :  { %v930_v8 = vpack.c.bf16 %v588_v3, %v587_v2  ;;  %v536_v9 = vmul.f32 %v1308_v51, %v478_v4  ;;  %v441_v11 = vadd.f32 %v440_v6, %v351_v5 }
  0xb2   :  { %931 = vst [vmem:[%s1431_s4] sm:$0xff] %v930_v8   ;;  %v572_v10 = vadd.f32 %v1314_v55, %v536_v9  ;;  %v521_v17 = vmul.f32 %v1308_v51, %v441_v11 }
  0xb4   :  { %v604_v13 = vmax.f32 %v572_v10, 0.0  ;;  %v391_v14 = vpop.f32.mrf.mxu2  ;;  %v557_v22 = vadd.f32 %v1314_v55, %v521_v17 }
  0xb5   :  { %v480_v15 = vpop.f32.mrf.mxu3 }
  0xb6   :  { %v970_v16 = vpack.c.bf16 %v604_v13, %v603_v12  ;;  %v353_v18 = vpop.f32.mrf.mxu0  ;;  %v481_v20 = vadd.f32 %v480_v15, %v391_v14  ;;  %v589_v28 = vmax.f32 %v557_v22, 0.0 }
  0xb7   :  { %v442_v19 = vpop.f32.mrf.mxu1 }
  0xb8   :  { %1014 = vst [vmem:[%s1431_s4 + $0x40] sm:$0xff] %v970_v16   ;;  %v443_v21 = vadd.f32 %v442_v19, %v353_v18  ;;  %v537_v24 = vmul.f32 %v1308_v51, %v481_v20 }
  0xba   :  { %v522_v23 = vmul.f32 %v1308_v51, %v443_v21  ;;  %v573_v33 = vadd.f32 %v1314_v55, %v537_v24 }
  0xbc   :  { %v558_v25 = vadd.f32 %v1314_v55, %v522_v23  ;;  %v393_v26 = vpop.f32.mrf.mxu2  ;;  %v605_v38 = vmax.f32 %v573_v33, 0.0 }
  0xbd   :  { %v482_v27 = vpop.f32.mrf.mxu3 }
  0xbe   :  { %v590_v29 = vmax.f32 %v558_v25, 0.0  ;;  %v483_v30 = vadd.f32 %v482_v27, %v393_v26  ;;  %v356_v31 = vpop.f32.mrf.mxu0 }
  0xbf   :  { %v445_v32 = vpop.f32.mrf.mxu1 }
  0xc0   :  { %v935_v34 = vpack.c.bf16 %v590_v29, %v589_v28  ;;  %v538_v35 = vmul.f32 %v1308_v51, %v483_v30  ;;  %v446_v37 = vadd.f32 %v445_v32, %v356_v31 }
  0xc2   :  { %1007 = vst [vmem:[%s1431_s4 + $0x8] sm:$0xff] %v935_v34   ;;  %v574_v36 = vadd.f32 %v1314_v55, %v538_v35  ;;  %v523_v43 = vmul.f32 %v1308_v51, %v446_v37 }
  0xc4   :  { %v606_v39 = vmax.f32 %v574_v36, 0.0  ;;  %v396_v40 = vpop.f32.mrf.mxu2  ;;  %v559_v48 = vadd.f32 %v1314_v55, %v523_v43 }
  0xc5   :  { %v485_v41 = vpop.f32.mrf.mxu3 }
  0xc6   :  { %v975_v42 = vpack.c.bf16 %v606_v39, %v605_v38  ;;  %v358_v44 = vpop.f32.mrf.mxu0  ;;  %v486_v46 = vadd.f32 %v485_v41, %v396_v40  ;;  %v591_v56 = vmax.f32 %v559_v48, 0.0 }
  0xc7   :  { %v447_v45 = vpop.f32.mrf.mxu1 }
  0xc8   :  { %1015 = vst [vmem:[%s1431_s4 + $0x48] sm:$0xff] %v975_v42   ;;  %v448_v47 = vadd.f32 %v447_v45, %v358_v44  ;;  %v539_v50 = vmul.f32 %v1308_v51, %v486_v46 }
  0xca   :  { %v524_v49 = vmul.f32 %v1308_v51, %v448_v47  ;;  %v575_v61 = vadd.f32 %v1314_v55, %v539_v50 }
  0xcc   :  { %v560_v52 = vadd.f32 %v1314_v55, %v524_v49  ;;  %v398_v53 = vpop.f32.mrf.mxu2  ;;  %v607_v2 = vmax.f32 %v575_v61, 0.0 }
  0xcd   :  { %v487_v54 = vpop.f32.mrf.mxu3 }
  0xce   :  { %v592_v57 = vmax.f32 %v560_v52, 0.0  ;;  %v488_v58 = vadd.f32 %v487_v54, %v398_v53  ;;  %v361_v59 = vpop.f32.mrf.mxu0 }
  0xcf   :  { %v450_v60 = vpop.f32.mrf.mxu1 }
  0xd0   :  { %v940_v62 = vpack.c.bf16 %v592_v57, %v591_v56  ;;  %v540_v63 = vmul.f32 %v1308_v51, %v488_v58  ;;  %v451_v1 = vadd.f32 %v450_v60, %v361_v59 }
  0xd2   :  { %1008 = vst [vmem:[%s1431_s4 + $0x10] sm:$0xff] %v940_v62   ;;  %v576_v0 = vadd.f32 %v1314_v55, %v540_v63  ;;  %v525_v7 = vmul.f32 %v1308_v51, %v451_v1 }
  0xd4   :  { %v608_v3 = vmax.f32 %v576_v0, 0.0  ;;  %v401_v4 = vpop.f32.mrf.mxu2  ;;  %v561_v12 = vadd.f32 %v1314_v55, %v525_v7 }
  0xd5   :  { %v490_v5 = vpop.f32.mrf.mxu3 }
  0xd6   :  { %v980_v6 = vpack.c.bf16 %v608_v3, %v607_v2  ;;  %v363_v8 = vpop.f32.mrf.mxu0  ;;  %v491_v10 = vadd.f32 %v490_v5, %v401_v4  ;;  %v593_v18 = vmax.f32 %v561_v12, 0.0 }
  0xd7   :  { %v452_v9 = vpop.f32.mrf.mxu1 }
  0xd8   :  { %1016 = vst [vmem:[%s1431_s4 + $0x50] sm:$0xff] %v980_v6   ;;  %v453_v11 = vadd.f32 %v452_v9, %v363_v8  ;;  %v541_v14 = vmul.f32 %v1308_v51, %v491_v10 }
  0xda   :  { %v526_v13 = vmul.f32 %v1308_v51, %v453_v11  ;;  %v577_v23 = vadd.f32 %v1314_v55, %v541_v14 }
  0xdc   :  { %v562_v15 = vadd.f32 %v1314_v55, %v526_v13  ;;  %v403_v16 = vpop.f32.mrf.mxu2  ;;  %v609_v28 = vmax.f32 %v577_v23, 0.0 }
  0xdd   :  { %v492_v17 = vpop.f32.mrf.mxu3 }
  0xde   :  { %v594_v19 = vmax.f32 %v562_v15, 0.0  ;;  %v493_v20 = vadd.f32 %v492_v17, %v403_v16  ;;  %v366_v21 = vpop.f32.mrf.mxu0 }
  0xdf   :  { %v455_v22 = vpop.f32.mrf.mxu1 }
  0xe0   :  { %v945_v24 = vpack.c.bf16 %v594_v19, %v593_v18  ;;  %v542_v25 = vmul.f32 %v1308_v51, %v493_v20  ;;  %v456_v27 = vadd.f32 %v455_v22, %v366_v21 }
  0xe2   :  { %1009 = vst [vmem:[%s1431_s4 + $0x18] sm:$0xff] %v945_v24   ;;  %v578_v26 = vadd.f32 %v1314_v55, %v542_v25  ;;  %v527_v33 = vmul.f32 %v1308_v51, %v456_v27 }
  0xe4   :  { %v610_v29 = vmax.f32 %v578_v26, 0.0  ;;  %v406_v30 = vpop.f32.mrf.mxu2  ;;  %v563_v38 = vadd.f32 %v1314_v55, %v527_v33 }
  0xe5   :  { %v495_v31 = vpop.f32.mrf.mxu3 }
  0xe6   :  { %v985_v32 = vpack.c.bf16 %v610_v29, %v609_v28  ;;  %v368_v34 = vpop.f32.mrf.mxu0  ;;  %v496_v36 = vadd.f32 %v495_v31, %v406_v30  ;;  %v595_v44 = vmax.f32 %v563_v38, 0.0 }
  0xe7   :  { %v457_v35 = vpop.f32.mrf.mxu1 }
  0xe8   :  { %1017 = vst [vmem:[%s1431_s4 + $0x58] sm:$0xff] %v985_v32   ;;  %v458_v37 = vadd.f32 %v457_v35, %v368_v34  ;;  %v543_v40 = vmul.f32 %v1308_v51, %v496_v36 }
  0xea   :  { %v528_v39 = vmul.f32 %v1308_v51, %v458_v37  ;;  %v579_v49 = vadd.f32 %v1314_v55, %v543_v40 }
  0xec   :  { %v564_v41 = vadd.f32 %v1314_v55, %v528_v39  ;;  %v408_v42 = vpop.f32.mrf.mxu2  ;;  %v611_v56 = vmax.f32 %v579_v49, 0.0 }
  0xed   :  { %v497_v43 = vpop.f32.mrf.mxu3 }
  0xee   :  { %v596_v45 = vmax.f32 %v564_v41, 0.0  ;;  %v498_v46 = vadd.f32 %v497_v43, %v408_v42  ;;  %v371_v47 = vpop.f32.mrf.mxu0 }
  0xef   :  { %v460_v48 = vpop.f32.mrf.mxu1 }
  0xf0   :  { %v950_v50 = vpack.c.bf16 %v596_v45, %v595_v44  ;;  %v544_v52 = vmul.f32 %v1308_v51, %v498_v46  ;;  %v461_v54 = vadd.f32 %v460_v48, %v371_v47 }
  0xf2   :  { %1010 = vst [vmem:[%s1431_s4 + $0x20] sm:$0xff] %v950_v50   ;;  %v580_v53 = vadd.f32 %v1314_v55, %v544_v52  ;;  %v529_v61 = vmul.f32 %v1308_v51, %v461_v54 }
  0xf4   :  { %v612_v57 = vmax.f32 %v580_v53, 0.0  ;;  %v411_v58 = vpop.f32.mrf.mxu2  ;;  %v565_v2 = vadd.f32 %v1314_v55, %v529_v61 }
  0xf5   :  { %v500_v59 = vpop.f32.mrf.mxu3 }
  0xf6   :  { %v990_v60 = vpack.c.bf16 %v612_v57, %v611_v56  ;;  %v373_v62 = vpop.f32.mrf.mxu0  ;;  %v501_v0 = vadd.f32 %v500_v59, %v411_v58  ;;  %v597_v8 = vmax.f32 %v565_v2, 0.0 }
  0xf7   :  { %v462_v63 = vpop.f32.mrf.mxu1 }
  0xf8   :  { %1018 = vst [vmem:[%s1431_s4 + $0x60] sm:$0xff] %v990_v60   ;;  %v463_v1 = vadd.f32 %v462_v63, %v373_v62  ;;  %v545_v4 = vmul.f32 %v1308_v51, %v501_v0 }
  0xfa   :  { %v530_v3 = vmul.f32 %v1308_v51, %v463_v1  ;;  %v581_v13 = vadd.f32 %v1314_v55, %v545_v4 }
  0xfc   :  { %v566_v5 = vadd.f32 %v1314_v55, %v530_v3  ;;  %v413_v6 = vpop.f32.mrf.mxu2  ;;  %v613_v18 = vmax.f32 %v581_v13, 0.0 }
  0xfd   :  { %v502_v7 = vpop.f32.mrf.mxu3 }
  0xfe   :  { %v598_v9 = vmax.f32 %v566_v5, 0.0  ;;  %v503_v10 = vadd.f32 %v502_v7, %v413_v6  ;;  %v376_v11 = vpop.f32.mrf.mxu0 }
  0xff   :  { %v465_v12 = vpop.f32.mrf.mxu1 }
 0x100   :  { %v955_v14 = vpack.c.bf16 %v598_v9, %v597_v8  ;;  %v546_v15 = vmul.f32 %v1308_v51, %v503_v10  ;;  %v466_v17 = vadd.f32 %v465_v12, %v376_v11 }
 0x102   :  { %1011 = vst [vmem:[%s1431_s4 + $0x28] sm:$0xff] %v955_v14   ;;  %v582_v16 = vadd.f32 %v1314_v55, %v546_v15  ;;  %v531_v23 = vmul.f32 %v1308_v51, %v466_v17 }
 0x104   :  { %v614_v19 = vmax.f32 %v582_v16, 0.0  ;;  %v416_v20 = vpop.f32.mrf.mxu2  ;;  %v567_v28 = vadd.f32 %v1314_v55, %v531_v23 }
 0x105   :  { %v505_v21 = vpop.f32.mrf.mxu3 }
 0x106   :  { %v995_v22 = vpack.c.bf16 %v614_v19, %v613_v18  ;;  %v378_v24 = vpop.f32.mrf.mxu0  ;;  %v506_v26 = vadd.f32 %v505_v21, %v416_v20  ;;  %v599_v34 = vmax.f32 %v567_v28, 0.0 }
 0x107   :  { %v467_v25 = vpop.f32.mrf.mxu1 }
 0x108   :  { %1019 = vst [vmem:[%s1431_s4 + $0x68] sm:$0xff] %v995_v22   ;;  %v468_v27 = vadd.f32 %v467_v25, %v378_v24  ;;  %v547_v30 = vmul.f32 %v1308_v51, %v506_v26 }
 0x10a   :  { %v532_v29 = vmul.f32 %v1308_v51, %v468_v27  ;;  %v583_v39 = vadd.f32 %v1314_v55, %v547_v30 }
 0x10c   :  { %v568_v31 = vadd.f32 %v1314_v55, %v532_v29  ;;  %v418_v32 = vpop.f32.mrf.mxu2  ;;  %v615_v44 = vmax.f32 %v583_v39, 0.0 }
 0x10d   :  { %v507_v33 = vpop.f32.mrf.mxu3 }
 0x10e   :  { %v600_v35 = vmax.f32 %v568_v31, 0.0  ;;  %v508_v36 = vadd.f32 %v507_v33, %v418_v32  ;;  %v381_v37 = vpop.f32.mrf.mxu0 }
 0x10f   :  { %v470_v38 = vpop.f32.mrf.mxu1 }
 0x110   :  { %v960_v40 = vpack.c.bf16 %v600_v35, %v599_v34  ;;  %v548_v41 = vmul.f32 %v1308_v51, %v508_v36  ;;  %v471_v43 = vadd.f32 %v470_v38, %v381_v37 }
 0x112   :  { %1012 = vst [vmem:[%s1431_s4 + $0x30] sm:$0xff] %v960_v40   ;;  %v584_v42 = vadd.f32 %v1314_v55, %v548_v41  ;;  %v533_v49 = vmul.f32 %v1308_v51, %v471_v43 }
 0x114   :  { %v616_v45 = vmax.f32 %v584_v42, 0.0  ;;  %v421_v46 = vpop.f32.mrf.mxu2  ;;  %v569_v56 = vadd.f32 %v1314_v55, %v533_v49 }
 0x115   :  { %v510_v47 = vpop.f32.mrf.mxu3 }
 0x116   :  { %v1000_v48 = vpack.c.bf16 %v616_v45, %v615_v44  ;;  %v383_v50 = vpop.f32.mrf.mxu0  ;;  %v511_v53 = vadd.f32 %v510_v47, %v421_v46  ;;  %v601_v62 = vmax.f32 %v569_v56, 0.0 }
 0x117   :  { %v472_v52 = vpop.f32.mrf.mxu1 }
 0x118   :  { %1020 = vst [vmem:[%s1431_s4 + $0x70] sm:$0xff] %v1000_v48   ;;  %v473_v54 = vadd.f32 %v472_v52, %v383_v50  ;;  %v549_v58 = vmul.f32 %v1308_v51, %v511_v53 }
 0x11a   :  { %v534_v57 = vmul.f32 %v1308_v51, %v473_v54  ;;  %v585_v1 = vadd.f32 %v1314_v55, %v549_v58 }
 0x11c   :  { %v570_v59 = vadd.f32 %v1314_v55, %v534_v57  ;;  %v423_v60 = vpop.f32.mrf.mxu2  ;;  %v617_v5 = vmax.f32 %v585_v1, 0.0 }
 0x11d   :  { %v512_v61 = vpop.f32.mrf.mxu3 }
 0x11e   :  { %v602_v63 = vmax.f32 %v570_v59, 0.0  ;;  %v513_v0 = vadd.f32 %v512_v61, %v423_v60 }
 0x120   :  { %v965_v2 = vpack.c.bf16 %v602_v63, %v601_v62  ;;  %v550_v3 = vmul.f32 %v1308_v51, %v513_v0 }
 0x122   :  { %1013 = vst [vmem:[%s1431_s4 + $0x38] sm:$0xff] %v965_v2   ;;  %v586_v4 = vadd.f32 %v1314_v55, %v550_v3 }
 0x124   :  { %v618_v6 = vmax.f32 %v586_v4, 0.0 }
 0x126   :  { %v1005_v7 = vpack.c.bf16 %v618_v6, %v617_v5 }
 0x128   :  { %1021 = vst [vmem:[%s1431_s4 + $0x78] sm:$0xff] %v1005_v7  }

// kernel: _lambda_.27
= control target key start
LH: loop header
LB: loop body
LE: loop exit
PB: predicated region body
PF: predicated region fallthrough
CT: control target
= control target key end

     0   :  { %s898_s1 = inlined_call_operand.vmem [shape: bf16[128,128], index: 1, kind: input, shape index: {}]   ;;  %s899_s2 = inlined_call_operand.vmem [shape: f32[1,128], index: 2, kind: input, shape index: {}]   ;;  %s900_s3 = inlined_call_operand.vmem [shape: f32[1,128], index: 3, kind: input, shape index: {}]   ;;  %s901_s0 = inlined_call_operand.vmem [shape: bf16[256,128], index: 0, kind: input, shape index: {}]   ;;  %s902_s4 = inlined_call_operand.vmem [shape: bf16[256,128], index: 4, kind: output, shape index: {}]  }
   0x1   :  { %v557_v0 = vld [vmem:[%s898_s1 + $0x38] sm:$0xff]  ;;  %v556_v1 = vld [vmem:[%s898_s1 + $0x30] sm:$0xff]  ;;  %v555_v2 = vld [vmem:[%s898_s1 + $0x28] sm:$0xff] }
   0x2   :  { %209 = vmatpush.bf16.msra.mxu0 %v557_v0  ;;  %653 = vmatpush.bf16.msra.mxu1 %v557_v0  ;;  %v554_v3 = vld [vmem:[%s898_s1 + $0x20] sm:$0xff]  ;;  %v553_v4 = vld [vmem:[%s898_s1 + $0x18] sm:$0xff]  ;;  %v552_v5 = vld [vmem:[%s898_s1 + $0x10] sm:$0xff] }
   0x3   :  { %654 = vmatpush.bf16.msra.mxu2 %v557_v0  ;;  %655 = vmatpush.bf16.msra.mxu3 %v557_v0  ;;  %v551_v6 = vld [vmem:[%s898_s1 + $0x8] sm:$0xff]  ;;  %v550_v7 = vld [vmem:[%s898_s1] sm:$0xff]  ;;  %v536_v16 = vld [vmem:[%s901_s0 + $0x10] sm:$0xff] }
   0x4   :  { %v534_v8 = vld [vmem:[%s901_s0] sm:$0xff]  ;;  %v535_v12 = vld [vmem:[%s901_s0 + $0x8] sm:$0xff]  ;;  %v540_v17 = vld [vmem:[%s901_s0 + $0x30] sm:$0xff] }
   0x5   :  { %v538_v9 = vld [vmem:[%s901_s0 + $0x20] sm:$0xff]  ;;  %v539_v13 = vld [vmem:[%s901_s0 + $0x28] sm:$0xff]  ;;  %v544_v18 = vld [vmem:[%s901_s0 + $0x50] sm:$0xff] }
   0x6   :  { %210 = vmatpush.bf16.msra.mxu0 %v556_v1  ;;  %656 = vmatpush.bf16.msra.mxu1 %v556_v1  ;;  %v542_v10 = vld [vmem:[%s901_s0 + $0x40] sm:$0xff]  ;;  %v543_v14 = vld [vmem:[%s901_s0 + $0x48] sm:$0xff]  ;;  %v548_v19 = vld [vmem:[%s901_s0 + $0x70] sm:$0xff] }
   0x7   :  { %657 = vmatpush.bf16.msra.mxu2 %v556_v1  ;;  %658 = vmatpush.bf16.msra.mxu3 %v556_v1  ;;  %v546_v11 = vld [vmem:[%s901_s0 + $0x60] sm:$0xff]  ;;  %v547_v15 = vld [vmem:[%s901_s0 + $0x68] sm:$0xff]  ;;  %v537_v20 = vld [vmem:[%s901_s0 + $0x18] sm:$0xff] }
   0x8   :  { %v541_v21 = vld [vmem:[%s901_s0 + $0x38] sm:$0xff]  ;;  %v779_v26 = vld [vmem:[%s899_s2] ss:$0 sm:$0xff] }
   0x9   :  { %v545_v22 = vld [vmem:[%s901_s0 + $0x58] sm:$0xff]  ;;  %v785_v28 = vld [vmem:[%s900_s3] ss:$0 sm:$0xff] }
   0xa   :  { %211 = vmatpush.bf16.msra.mxu0 %v555_v2  ;;  %659 = vmatpush.bf16.msra.mxu1 %v555_v2  ;;  %v549_v23 = vld [vmem:[%s901_s0 + $0x78] sm:$0xff] }
   0xb   :  { %660 = vmatpush.bf16.msra.mxu2 %v555_v2  ;;  %661 = vmatpush.bf16.msra.mxu3 %v555_v2 }
   0xe   :  { %212 = vmatpush.bf16.msra.mxu0 %v554_v3  ;;  %662 = vmatpush.bf16.msra.mxu1 %v554_v3 }
   0xf   :  { %663 = vmatpush.bf16.msra.mxu2 %v554_v3  ;;  %664 = vmatpush.bf16.msra.mxu3 %v554_v3 }
  0x12   :  { %213 = vmatpush.bf16.msra.mxu0 %v553_v4  ;;  %665 = vmatpush.bf16.msra.mxu1 %v553_v4 }
  0x13   :  { %666 = vmatpush.bf16.msra.mxu2 %v553_v4  ;;  %667 = vmatpush.bf16.msra.mxu3 %v553_v4 }
  0x16   :  { %214 = vmatpush.bf16.msra.mxu0 %v552_v5  ;;  %668 = vmatpush.bf16.msra.mxu1 %v552_v5 }
  0x17   :  { %669 = vmatpush.bf16.msra.mxu2 %v552_v5  ;;  %670 = vmatpush.bf16.msra.mxu3 %v552_v5 }
  0x1a   :  { %215 = vmatpush.bf16.msra.mxu0 %v551_v6  ;;  %671 = vmatpush.bf16.msra.mxu1 %v551_v6 }
  0x1b   :  { %672 = vmatpush.bf16.msra.mxu2 %v551_v6  ;;  %673 = vmatpush.bf16.msra.mxu3 %v551_v6 }
  0x1e   :  { %216 = vmatpush.bf16.msra.mxu0 %v550_v7  ;;  %674 = vmatpush.bf16.msra.mxu1 %v550_v7 }
  0x1f   :  { %675 = vmatpush.bf16.msra.mxu2 %v550_v7  ;;  %676 = vmatpush.bf16.msra.mxu3 %v550_v7 }
  0x21   :  { %217 = vmatmul.bf16.vlgmr.msra.gmra.mxu0 %v534_v8  ;;  %237 = vmatmul.bf16.vlgmr.msra.gmra.mxu1 %v538_v9 }
  0x22   :  { %257 = vmatmul.bf16.vlgmr.msra.gmra.mxu2 %v542_v10  ;;  %277 = vmatmul.bf16.vlgmr.msra.gmra.mxu3 %v546_v11 }
  0x31   :  { %222 = vmatmul.bf16.gmra.mxu0 %v535_v12  ;;  %242 = vmatmul.bf16.gmra.mxu1 %v539_v13 }
  0x32   :  { %262 = vmatmul.bf16.gmra.mxu2 %v543_v14  ;;  %282 = vmatmul.bf16.gmra.mxu3 %v547_v15 }
  0x41   :  { %227 = vmatmul.bf16.gmra.mxu0 %v536_v16  ;;  %247 = vmatmul.bf16.gmra.mxu1 %v540_v17 }
  0x42   :  { %267 = vmatmul.bf16.gmra.mxu2 %v544_v18  ;;  %287 = vmatmul.bf16.gmra.mxu3 %v548_v19 }
  0x51   :  { %232 = vmatmul.bf16.gmra.mxu0 %v537_v20  ;;  %252 = vmatmul.bf16.gmra.mxu1 %v541_v21 }
  0x52   :  { %272 = vmatmul.bf16.gmra.mxu2 %v545_v22  ;;  %292 = vmatmul.bf16.gmra.mxu3 %v549_v23 }
  0x9e   :  { %v218_v24 = vpop.f32.mrf.mxu0  ;;  %v238_v25 = vpop.f32.mrf.mxu1 }
  0x9f   :  { %v302_v27 = vmul.f32 %v779_v26, %v218_v24  ;;  %v310_v29 = vmul.f32 %v779_v26, %v238_v25 }
  0xa1   :  { %v338_v36 = vadd.f32 %v785_v28, %v302_v27  ;;  %v346_v37 = vadd.f32 %v785_v28, %v310_v29 }
  0xa5   :  { %v258_v30 = vpop.f32.mrf.mxu2  ;;  %v278_v31 = vpop.f32.mrf.mxu3 }
  0xa6   :  { %v220_v32 = vpop.f32.mrf.mxu0  ;;  %v240_v33 = vpop.f32.mrf.mxu1  ;;  %v318_v42 = vmul.f32 %v779_v26, %v258_v30  ;;  %v326_v43 = vmul.f32 %v779_v26, %v278_v31 }
  0xa7   :  { %v303_v34 = vmul.f32 %v779_v26, %v220_v32  ;;  %v311_v35 = vmul.f32 %v779_v26, %v240_v33 }
  0xa8   :  { %v354_v50 = vadd.f32 %v785_v28, %v318_v42  ;;  %v362_v51 = vadd.f32 %v785_v28, %v326_v43 }
  0xa9   :  { %v339_v38 = vadd.f32 %v785_v28, %v303_v34  ;;  %v347_v39 = vadd.f32 %v785_v28, %v311_v35 }
  0xab   :  { %v561_v40 = vpack.c.bf16 %v339_v38, %v338_v36  ;;  %v581_v41 = vpack.c.bf16 %v347_v39, %v346_v37 }
  0xad   :  { %562 = vst [vmem:[%s902_s4] sm:$0xff] %v561_v40   ;;  %v260_v44 = vpop.f32.mrf.mxu2  ;;  %v280_v45 = vpop.f32.mrf.mxu3 }
  0xae   :  { %641 = vst [vmem:[%s902_s4 + $0x20] sm:$0xff] %v581_v41   ;;  %v319_v46 = vmul.f32 %v779_v26, %v260_v44  ;;  %v327_v47 = vmul.f32 %v779_v26, %v280_v45  ;;  %v223_v48 = vpop.f32.mrf.mxu0  ;;  %v243_v49 = vpop.f32.mrf.mxu1 }
  0xaf   :  { %v304_v56 = vmul.f32 %v779_v26, %v223_v48  ;;  %v312_v57 = vmul.f32 %v779_v26, %v243_v49 }
  0xb0   :  { %v355_v52 = vadd.f32 %v785_v28, %v319_v46  ;;  %v363_v53 = vadd.f32 %v785_v28, %v327_v47 }
  0xb1   :  { %v340_v0 = vadd.f32 %v785_v28, %v304_v56  ;;  %v348_v1 = vadd.f32 %v785_v28, %v312_v57 }
  0xb2   :  { %v601_v54 = vpack.c.bf16 %v355_v52, %v354_v50  ;;  %v621_v55 = vpack.c.bf16 %v363_v53, %v362_v51 }
  0xb4   :  { %645 = vst [vmem:[%s902_s4 + $0x40] sm:$0xff] %v601_v54  }
  0xb5   :  { %649 = vst [vmem:[%s902_s4 + $0x60] sm:$0xff] %v621_v55   ;;  %v263_v58 = vpop.f32.mrf.mxu2  ;;  %v283_v59 = vpop.f32.mrf.mxu3 }
  0xb6   :  { %v225_v60 = vpop.f32.mrf.mxu0  ;;  %v245_v61 = vpop.f32.mrf.mxu1  ;;  %v320_v6 = vmul.f32 %v779_v26, %v263_v58  ;;  %v328_v7 = vmul.f32 %v779_v26, %v283_v59 }
  0xb7   :  { %v305_v62 = vmul.f32 %v779_v26, %v225_v60  ;;  %v313_v63 = vmul.f32 %v779_v26, %v245_v61 }
  0xb8   :  { %v356_v14 = vadd.f32 %v785_v28, %v320_v6  ;;  %v364_v15 = vadd.f32 %v785_v28, %v328_v7 }
  0xb9   :  { %v341_v2 = vadd.f32 %v785_v28, %v305_v62  ;;  %v349_v3 = vadd.f32 %v785_v28, %v313_v63 }
  0xbb   :  { %v566_v4 = vpack.c.bf16 %v341_v2, %v340_v0  ;;  %v586_v5 = vpack.c.bf16 %v349_v3, %v348_v1 }
  0xbd   :  { %638 = vst [vmem:[%s902_s4 + $0x8] sm:$0xff] %v566_v4   ;;  %v265_v8 = vpop.f32.mrf.mxu2  ;;  %v285_v9 = vpop.f32.mrf.mxu3 }
  0xbe   :  { %642 = vst [vmem:[%s902_s4 + $0x28] sm:$0xff] %v586_v5   ;;  %v321_v10 = vmul.f32 %v779_v26, %v265_v8  ;;  %v329_v11 = vmul.f32 %v779_v26, %v285_v9  ;;  %v228_v12 = vpop.f32.mrf.mxu0  ;;  %v248_v13 = vpop.f32.mrf.mxu1 }
  0xbf   :  { %v306_v20 = vmul.f32 %v779_v26, %v228_v12  ;;  %v314_v21 = vmul.f32 %v779_v26, %v248_v13 }
  0xc0   :  { %v357_v16 = vadd.f32 %v785_v28, %v321_v10  ;;  %v365_v17 = vadd.f32 %v785_v28, %v329_v11 }
  0xc1   :  { %v342_v30 = vadd.f32 %v785_v28, %v306_v20  ;;  %v350_v31 = vadd.f32 %v785_v28, %v314_v21 }
  0xc2   :  { %v606_v18 = vpack.c.bf16 %v357_v16, %v356_v14  ;;  %v626_v19 = vpack.c.bf16 %v365_v17, %v364_v15 }
  0xc4   :  { %646 = vst [vmem:[%s902_s4 + $0x48] sm:$0xff] %v606_v18  }
  0xc5   :  { %650 = vst [vmem:[%s902_s4 + $0x68] sm:$0xff] %v626_v19   ;;  %v268_v22 = vpop.f32.mrf.mxu2  ;;  %v288_v23 = vpop.f32.mrf.mxu3 }
  0xc6   :  { %v230_v24 = vpop.f32.mrf.mxu0  ;;  %v250_v25 = vpop.f32.mrf.mxu1  ;;  %v322_v36 = vmul.f32 %v779_v26, %v268_v22  ;;  %v330_v37 = vmul.f32 %v779_v26, %v288_v23 }
  0xc7   :  { %v307_v27 = vmul.f32 %v779_v26, %v230_v24  ;;  %v315_v29 = vmul.f32 %v779_v26, %v250_v25 }
  0xc8   :  { %v358_v44 = vadd.f32 %v785_v28, %v322_v36  ;;  %v366_v45 = vadd.f32 %v785_v28, %v330_v37 }
  0xc9   :  { %v343_v32 = vadd.f32 %v785_v28, %v307_v27  ;;  %v351_v33 = vadd.f32 %v785_v28, %v315_v29 }
  0xcb   :  { %v571_v34 = vpack.c.bf16 %v343_v32, %v342_v30  ;;  %v591_v35 = vpack.c.bf16 %v351_v33, %v350_v31 }
  0xcd   :  { %639 = vst [vmem:[%s902_s4 + $0x10] sm:$0xff] %v571_v34   ;;  %v270_v38 = vpop.f32.mrf.mxu2  ;;  %v290_v39 = vpop.f32.mrf.mxu3 }
  0xce   :  { %643 = vst [vmem:[%s902_s4 + $0x30] sm:$0xff] %v591_v35   ;;  %v323_v40 = vmul.f32 %v779_v26, %v270_v38  ;;  %v331_v41 = vmul.f32 %v779_v26, %v290_v39  ;;  %v233_v42 = vpop.f32.mrf.mxu0  ;;  %v253_v43 = vpop.f32.mrf.mxu1 }
  0xcf   :  { %v308_v50 = vmul.f32 %v779_v26, %v233_v42  ;;  %v316_v51 = vmul.f32 %v779_v26, %v253_v43 }
  0xd0   :  { %v359_v46 = vadd.f32 %v785_v28, %v323_v40  ;;  %v367_v47 = vadd.f32 %v785_v28, %v331_v41 }
  0xd1   :  { %v344_v58 = vadd.f32 %v785_v28, %v308_v50  ;;  %v352_v59 = vadd.f32 %v785_v28, %v316_v51 }
  0xd2   :  { %v611_v48 = vpack.c.bf16 %v359_v46, %v358_v44  ;;  %v631_v49 = vpack.c.bf16 %v367_v47, %v366_v45 }
  0xd4   :  { %647 = vst [vmem:[%s902_s4 + $0x50] sm:$0xff] %v611_v48  }
  0xd5   :  { %651 = vst [vmem:[%s902_s4 + $0x70] sm:$0xff] %v631_v49   ;;  %v273_v52 = vpop.f32.mrf.mxu2  ;;  %v293_v53 = vpop.f32.mrf.mxu3 }
  0xd6   :  { %v235_v54 = vpop.f32.mrf.mxu0  ;;  %v255_v55 = vpop.f32.mrf.mxu1  ;;  %v324_v0 = vmul.f32 %v779_v26, %v273_v52  ;;  %v332_v1 = vmul.f32 %v779_v26, %v293_v53 }
  0xd7   :  { %v309_v56 = vmul.f32 %v779_v26, %v235_v54  ;;  %v317_v57 = vmul.f32 %v779_v26, %v255_v55 }
  0xd8   :  { %v360_v6 = vadd.f32 %v785_v28, %v324_v0  ;;  %v368_v7 = vadd.f32 %v785_v28, %v332_v1 }
  0xd9   :  { %v345_v60 = vadd.f32 %v785_v28, %v309_v56  ;;  %v353_v61 = vadd.f32 %v785_v28, %v317_v57 }
  0xdb   :  { %v576_v62 = vpack.c.bf16 %v345_v60, %v344_v58  ;;  %v596_v63 = vpack.c.bf16 %v353_v61, %v352_v59 }
  0xdd   :  { %640 = vst [vmem:[%s902_s4 + $0x18] sm:$0xff] %v576_v62   ;;  %v275_v2 = vpop.f32.mrf.mxu2  ;;  %v295_v3 = vpop.f32.mrf.mxu3 }
  0xde   :  { %644 = vst [vmem:[%s902_s4 + $0x38] sm:$0xff] %v596_v63   ;;  %v325_v4 = vmul.f32 %v779_v26, %v275_v2  ;;  %v333_v5 = vmul.f32 %v779_v26, %v295_v3 }
  0xe0   :  { %v361_v8 = vadd.f32 %v785_v28, %v325_v4  ;;  %v369_v9 = vadd.f32 %v785_v28, %v333_v5 }
  0xe2   :  { %v616_v10 = vpack.c.bf16 %v361_v8, %v360_v6  ;;  %v636_v11 = vpack.c.bf16 %v369_v9, %v368_v7 }
  0xe4   :  { %648 = vst [vmem:[%s902_s4 + $0x58] sm:$0xff] %v616_v10  }
  0xe5   :  { %652 = vst [vmem:[%s902_s4 + $0x78] sm:$0xff] %v636_v11  }

// kernel: _lambda_.29
= control target key start
LH: loop header
LB: loop body
LE: loop exit
PB: predicated region body
PF: predicated region fallthrough
CT: control target
= control target key end

     0   :  { %s930_s1 = inlined_call_operand.vmem [shape: bf16[128,128], index: 1, kind: input, shape index: {}]   ;;  %s931_s2 = inlined_call_operand.vmem [shape: f32[1,128], index: 2, kind: input, shape index: {}]   ;;  %s932_s3 = inlined_call_operand.vmem [shape: f32[1,128], index: 3, kind: input, shape index: {}]   ;;  %s933_s0 = inlined_call_operand.vmem [shape: bf16[256,128], index: 0, kind: input, shape index: {}]   ;;  %s934_s4 = inlined_call_operand.vmem [shape: bf16[256,128], index: 4, kind: output, shape index: {}]  }
   0x1   :  { %v589_v0 = vld [vmem:[%s930_s1 + $0x38] sm:$0xff]  ;;  %v588_v1 = vld [vmem:[%s930_s1 + $0x30] sm:$0xff]  ;;  %v587_v2 = vld [vmem:[%s930_s1 + $0x28] sm:$0xff] }
   0x2   :  { %209 = vmatpush.bf16.msra.mxu0 %v589_v0  ;;  %685 = vmatpush.bf16.msra.mxu1 %v589_v0  ;;  %v586_v3 = vld [vmem:[%s930_s1 + $0x20] sm:$0xff]  ;;  %v585_v4 = vld [vmem:[%s930_s1 + $0x18] sm:$0xff]  ;;  %v584_v5 = vld [vmem:[%s930_s1 + $0x10] sm:$0xff] }
   0x3   :  { %686 = vmatpush.bf16.msra.mxu2 %v589_v0  ;;  %687 = vmatpush.bf16.msra.mxu3 %v589_v0  ;;  %v583_v6 = vld [vmem:[%s930_s1 + $0x8] sm:$0xff]  ;;  %v582_v7 = vld [vmem:[%s930_s1] sm:$0xff]  ;;  %v568_v16 = vld [vmem:[%s933_s0 + $0x10] sm:$0xff] }
   0x4   :  { %v566_v8 = vld [vmem:[%s933_s0] sm:$0xff]  ;;  %v567_v12 = vld [vmem:[%s933_s0 + $0x8] sm:$0xff]  ;;  %v572_v17 = vld [vmem:[%s933_s0 + $0x30] sm:$0xff] }
   0x5   :  { %v570_v9 = vld [vmem:[%s933_s0 + $0x20] sm:$0xff]  ;;  %v571_v13 = vld [vmem:[%s933_s0 + $0x28] sm:$0xff]  ;;  %v576_v18 = vld [vmem:[%s933_s0 + $0x50] sm:$0xff] }
   0x6   :  { %210 = vmatpush.bf16.msra.mxu0 %v588_v1  ;;  %688 = vmatpush.bf16.msra.mxu1 %v588_v1  ;;  %v574_v10 = vld [vmem:[%s933_s0 + $0x40] sm:$0xff]  ;;  %v575_v14 = vld [vmem:[%s933_s0 + $0x48] sm:$0xff]  ;;  %v580_v19 = vld [vmem:[%s933_s0 + $0x70] sm:$0xff] }
   0x7   :  { %689 = vmatpush.bf16.msra.mxu2 %v588_v1  ;;  %690 = vmatpush.bf16.msra.mxu3 %v588_v1  ;;  %v578_v11 = vld [vmem:[%s933_s0 + $0x60] sm:$0xff]  ;;  %v579_v15 = vld [vmem:[%s933_s0 + $0x68] sm:$0xff]  ;;  %v569_v20 = vld [vmem:[%s933_s0 + $0x18] sm:$0xff] }
   0x8   :  { %v573_v21 = vld [vmem:[%s933_s0 + $0x38] sm:$0xff]  ;;  %v811_v26 = vld [vmem:[%s931_s2] ss:$0 sm:$0xff] }
   0x9   :  { %v577_v22 = vld [vmem:[%s933_s0 + $0x58] sm:$0xff]  ;;  %v817_v28 = vld [vmem:[%s932_s3] ss:$0 sm:$0xff] }
   0xa   :  { %211 = vmatpush.bf16.msra.mxu0 %v587_v2  ;;  %691 = vmatpush.bf16.msra.mxu1 %v587_v2  ;;  %v581_v23 = vld [vmem:[%s933_s0 + $0x78] sm:$0xff] }
   0xb   :  { %692 = vmatpush.bf16.msra.mxu2 %v587_v2  ;;  %693 = vmatpush.bf16.msra.mxu3 %v587_v2 }
   0xe   :  { %212 = vmatpush.bf16.msra.mxu0 %v586_v3  ;;  %694 = vmatpush.bf16.msra.mxu1 %v586_v3 }
   0xf   :  { %695 = vmatpush.bf16.msra.mxu2 %v586_v3  ;;  %696 = vmatpush.bf16.msra.mxu3 %v586_v3 }
  0x12   :  { %213 = vmatpush.bf16.msra.mxu0 %v585_v4  ;;  %697 = vmatpush.bf16.msra.mxu1 %v585_v4 }
  0x13   :  { %698 = vmatpush.bf16.msra.mxu2 %v585_v4  ;;  %699 = vmatpush.bf16.msra.mxu3 %v585_v4 }
  0x16   :  { %214 = vmatpush.bf16.msra.mxu0 %v584_v5  ;;  %700 = vmatpush.bf16.msra.mxu1 %v584_v5 }
  0x17   :  { %701 = vmatpush.bf16.msra.mxu2 %v584_v5  ;;  %702 = vmatpush.bf16.msra.mxu3 %v584_v5 }
  0x1a   :  { %215 = vmatpush.bf16.msra.mxu0 %v583_v6  ;;  %703 = vmatpush.bf16.msra.mxu1 %v583_v6 }
  0x1b   :  { %704 = vmatpush.bf16.msra.mxu2 %v583_v6  ;;  %705 = vmatpush.bf16.msra.mxu3 %v583_v6 }
  0x1e   :  { %216 = vmatpush.bf16.msra.mxu0 %v582_v7  ;;  %706 = vmatpush.bf16.msra.mxu1 %v582_v7 }
  0x1f   :  { %707 = vmatpush.bf16.msra.mxu2 %v582_v7  ;;  %708 = vmatpush.bf16.msra.mxu3 %v582_v7 }
  0x21   :  { %217 = vmatmul.bf16.vlgmr.msra.gmra.mxu0 %v566_v8  ;;  %237 = vmatmul.bf16.vlgmr.msra.gmra.mxu1 %v570_v9 }
  0x22   :  { %257 = vmatmul.bf16.vlgmr.msra.gmra.mxu2 %v574_v10  ;;  %277 = vmatmul.bf16.vlgmr.msra.gmra.mxu3 %v578_v11 }
  0x31   :  { %222 = vmatmul.bf16.gmra.mxu0 %v567_v12  ;;  %242 = vmatmul.bf16.gmra.mxu1 %v571_v13 }
  0x32   :  { %262 = vmatmul.bf16.gmra.mxu2 %v575_v14  ;;  %282 = vmatmul.bf16.gmra.mxu3 %v579_v15 }
  0x41   :  { %227 = vmatmul.bf16.gmra.mxu0 %v568_v16  ;;  %247 = vmatmul.bf16.gmra.mxu1 %v572_v17 }
  0x42   :  { %267 = vmatmul.bf16.gmra.mxu2 %v576_v18  ;;  %287 = vmatmul.bf16.gmra.mxu3 %v580_v19 }
  0x51   :  { %232 = vmatmul.bf16.gmra.mxu0 %v569_v20  ;;  %252 = vmatmul.bf16.gmra.mxu1 %v573_v21 }
  0x52   :  { %272 = vmatmul.bf16.gmra.mxu2 %v577_v22  ;;  %292 = vmatmul.bf16.gmra.mxu3 %v581_v23 }
  0x9e   :  { %v218_v24 = vpop.f32.mrf.mxu0  ;;  %v238_v25 = vpop.f32.mrf.mxu1 }
  0x9f   :  { %v302_v27 = vmul.f32 %v811_v26, %v218_v24  ;;  %v310_v29 = vmul.f32 %v811_v26, %v238_v25 }
  0xa1   :  { %v338_v34 = vadd.f32 %v817_v28, %v302_v27  ;;  %v346_v35 = vadd.f32 %v817_v28, %v310_v29 }
  0xa3   :  { %v370_v42 = vmax.f32 %v338_v34, 0.0  ;;  %v378_v43 = vmax.f32 %v346_v35, 0.0 }
  0xa5   :  { %v258_v30 = vpop.f32.mrf.mxu2  ;;  %v278_v31 = vpop.f32.mrf.mxu3 }
  0xa6   :  { %v220_v32 = vpop.f32.mrf.mxu0  ;;  %v240_v33 = vpop.f32.mrf.mxu1  ;;  %v318_v40 = vmul.f32 %v811_v26, %v258_v30  ;;  %v326_v41 = vmul.f32 %v811_v26, %v278_v31 }
  0xa7   :  { %v303_v36 = vmul.f32 %v811_v26, %v220_v32  ;;  %v311_v37 = vmul.f32 %v811_v26, %v240_v33 }
  0xa8   :  { %v354_v50 = vadd.f32 %v817_v28, %v318_v40  ;;  %v362_v51 = vadd.f32 %v817_v28, %v326_v41 }
  0xa9   :  { %v339_v38 = vadd.f32 %v817_v28, %v303_v36  ;;  %v347_v39 = vadd.f32 %v817_v28, %v311_v37 }
  0xaa   :  { %v386_v58 = vmax.f32 %v354_v50, 0.0  ;;  %v394_v59 = vmax.f32 %v362_v51, 0.0 }
  0xab   :  { %v371_v44 = vmax.f32 %v339_v38, 0.0  ;;  %v379_v45 = vmax.f32 %v347_v39, 0.0 }
  0xad   :  { %v593_v46 = vpack.c.bf16 %v371_v44, %v370_v42  ;;  %v613_v47 = vpack.c.bf16 %v379_v45, %v378_v43  ;;  %v260_v48 = vpop.f32.mrf.mxu2  ;;  %v280_v49 = vpop.f32.mrf.mxu3 }
  0xae   :  { %v319_v52 = vmul.f32 %v811_v26, %v260_v48  ;;  %v327_v53 = vmul.f32 %v811_v26, %v280_v49  ;;  %v223_v54 = vpop.f32.mrf.mxu0  ;;  %v243_v55 = vpop.f32.mrf.mxu1 }
  0xaf   :  { %594 = vst [vmem:[%s934_s4] sm:$0xff] %v593_v46   ;;  %v304_v62 = vmul.f32 %v811_v26, %v223_v54  ;;  %v312_v63 = vmul.f32 %v811_v26, %v243_v55 }
  0xb0   :  { %673 = vst [vmem:[%s934_s4 + $0x20] sm:$0xff] %v613_v47   ;;  %v355_v56 = vadd.f32 %v817_v28, %v319_v52  ;;  %v363_v57 = vadd.f32 %v817_v28, %v327_v53 }
  0xb1   :  { %v340_v6 = vadd.f32 %v817_v28, %v304_v62  ;;  %v348_v7 = vadd.f32 %v817_v28, %v312_v63 }
  0xb2   :  { %v387_v60 = vmax.f32 %v355_v56, 0.0  ;;  %v395_v61 = vmax.f32 %v363_v57, 0.0 }
  0xb3   :  { %v372_v14 = vmax.f32 %v340_v6, 0.0  ;;  %v380_v15 = vmax.f32 %v348_v7, 0.0 }
  0xb4   :  { %v633_v0 = vpack.c.bf16 %v387_v60, %v386_v58  ;;  %v653_v1 = vpack.c.bf16 %v395_v61, %v394_v59 }
  0xb5   :  { %v263_v2 = vpop.f32.mrf.mxu2  ;;  %v283_v3 = vpop.f32.mrf.mxu3 }
  0xb6   :  { %677 = vst [vmem:[%s934_s4 + $0x40] sm:$0xff] %v633_v0   ;;  %v225_v4 = vpop.f32.mrf.mxu0  ;;  %v245_v5 = vpop.f32.mrf.mxu1  ;;  %v320_v12 = vmul.f32 %v811_v26, %v263_v2  ;;  %v328_v13 = vmul.f32 %v811_v26, %v283_v3 }
  0xb7   :  { %681 = vst [vmem:[%s934_s4 + $0x60] sm:$0xff] %v653_v1   ;;  %v305_v8 = vmul.f32 %v811_v26, %v225_v4  ;;  %v313_v9 = vmul.f32 %v811_v26, %v245_v5 }
  0xb8   :  { %v356_v22 = vadd.f32 %v817_v28, %v320_v12  ;;  %v364_v23 = vadd.f32 %v817_v28, %v328_v13 }
  0xb9   :  { %v341_v10 = vadd.f32 %v817_v28, %v305_v8  ;;  %v349_v11 = vadd.f32 %v817_v28, %v313_v9 }
  0xba   :  { %v388_v32 = vmax.f32 %v356_v22, 0.0  ;;  %v396_v33 = vmax.f32 %v364_v23, 0.0 }
  0xbb   :  { %v373_v16 = vmax.f32 %v341_v10, 0.0  ;;  %v381_v17 = vmax.f32 %v349_v11, 0.0 }
  0xbd   :  { %v598_v18 = vpack.c.bf16 %v373_v16, %v372_v14  ;;  %v618_v19 = vpack.c.bf16 %v381_v17, %v380_v15  ;;  %v265_v20 = vpop.f32.mrf.mxu2  ;;  %v285_v21 = vpop.f32.mrf.mxu3 }
  0xbe   :  { %v321_v24 = vmul.f32 %v811_v26, %v265_v20  ;;  %v329_v25 = vmul.f32 %v811_v26, %v285_v21  ;;  %v228_v27 = vpop.f32.mrf.mxu0  ;;  %v248_v29 = vpop.f32.mrf.mxu1 }
  0xbf   :  { %670 = vst [vmem:[%s934_s4 + $0x8] sm:$0xff] %v598_v18   ;;  %v306_v36 = vmul.f32 %v811_v26, %v228_v27  ;;  %v314_v37 = vmul.f32 %v811_v26, %v248_v29 }
  0xc0   :  { %674 = vst [vmem:[%s934_s4 + $0x28] sm:$0xff] %v618_v19   ;;  %v357_v30 = vadd.f32 %v817_v28, %v321_v24  ;;  %v365_v31 = vadd.f32 %v817_v28, %v329_v25 }
  0xc1   :  { %v342_v44 = vadd.f32 %v817_v28, %v306_v36  ;;  %v350_v45 = vadd.f32 %v817_v28, %v314_v37 }
  0xc2   :  { %v389_v34 = vmax.f32 %v357_v30, 0.0  ;;  %v397_v35 = vmax.f32 %v365_v31, 0.0 }
  0xc3   :  { %v374_v52 = vmax.f32 %v342_v44, 0.0  ;;  %v382_v53 = vmax.f32 %v350_v45, 0.0 }
  0xc4   :  { %v638_v38 = vpack.c.bf16 %v389_v34, %v388_v32  ;;  %v658_v39 = vpack.c.bf16 %v397_v35, %v396_v33 }
  0xc5   :  { %v268_v40 = vpop.f32.mrf.mxu2  ;;  %v288_v41 = vpop.f32.mrf.mxu3 }
  0xc6   :  { %678 = vst [vmem:[%s934_s4 + $0x48] sm:$0xff] %v638_v38   ;;  %v230_v42 = vpop.f32.mrf.mxu0  ;;  %v250_v43 = vpop.f32.mrf.mxu1  ;;  %v322_v50 = vmul.f32 %v811_v26, %v268_v40  ;;  %v330_v51 = vmul.f32 %v811_v26, %v288_v41 }
  0xc7   :  { %682 = vst [vmem:[%s934_s4 + $0x68] sm:$0xff] %v658_v39   ;;  %v307_v46 = vmul.f32 %v811_v26, %v230_v42  ;;  %v315_v47 = vmul.f32 %v811_v26, %v250_v43 }
  0xc8   :  { %v358_v60 = vadd.f32 %v817_v28, %v322_v50  ;;  %v366_v61 = vadd.f32 %v817_v28, %v330_v51 }
  0xc9   :  { %v343_v48 = vadd.f32 %v817_v28, %v307_v46  ;;  %v351_v49 = vadd.f32 %v817_v28, %v315_v47 }
  0xca   :  { %v390_v4 = vmax.f32 %v358_v60, 0.0  ;;  %v398_v5 = vmax.f32 %v366_v61, 0.0 }
  0xcb   :  { %v375_v54 = vmax.f32 %v343_v48, 0.0  ;;  %v383_v55 = vmax.f32 %v351_v49, 0.0 }
  0xcd   :  { %v603_v56 = vpack.c.bf16 %v375_v54, %v374_v52  ;;  %v623_v57 = vpack.c.bf16 %v383_v55, %v382_v53  ;;  %v270_v58 = vpop.f32.mrf.mxu2  ;;  %v290_v59 = vpop.f32.mrf.mxu3 }
  0xce   :  { %v323_v62 = vmul.f32 %v811_v26, %v270_v58  ;;  %v331_v63 = vmul.f32 %v811_v26, %v290_v59  ;;  %v233_v0 = vpop.f32.mrf.mxu0  ;;  %v253_v1 = vpop.f32.mrf.mxu1 }
  0xcf   :  { %671 = vst [vmem:[%s934_s4 + $0x10] sm:$0xff] %v603_v56   ;;  %v308_v8 = vmul.f32 %v811_v26, %v233_v0  ;;  %v316_v9 = vmul.f32 %v811_v26, %v253_v1 }
  0xd0   :  { %675 = vst [vmem:[%s934_s4 + $0x30] sm:$0xff] %v623_v57   ;;  %v359_v2 = vadd.f32 %v817_v28, %v323_v62  ;;  %v367_v3 = vadd.f32 %v817_v28, %v331_v63 }
  0xd1   :  { %v344_v16 = vadd.f32 %v817_v28, %v308_v8  ;;  %v352_v17 = vadd.f32 %v817_v28, %v316_v9 }
  0xd2   :  { %v391_v6 = vmax.f32 %v359_v2, 0.0  ;;  %v399_v7 = vmax.f32 %v367_v3, 0.0 }
  0xd3   :  { %v376_v24 = vmax.f32 %v344_v16, 0.0  ;;  %v384_v25 = vmax.f32 %v352_v17, 0.0 }
  0xd4   :  { %v643_v10 = vpack.c.bf16 %v391_v6, %v390_v4  ;;  %v663_v11 = vpack.c.bf16 %v399_v7, %v398_v5 }
  0xd5   :  { %v273_v12 = vpop.f32.mrf.mxu2  ;;  %v293_v13 = vpop.f32.mrf.mxu3 }
  0xd6   :  { %679 = vst [vmem:[%s934_s4 + $0x50] sm:$0xff] %v643_v10   ;;  %v235_v14 = vpop.f32.mrf.mxu0  ;;  %v255_v15 = vpop.f32.mrf.mxu1  ;;  %v324_v22 = vmul.f32 %v811_v26, %v273_v12  ;;  %v332_v23 = vmul.f32 %v811_v26, %v293_v13 }
  0xd7   :  { %683 = vst [vmem:[%s934_s4 + $0x70] sm:$0xff] %v663_v11   ;;  %v309_v18 = vmul.f32 %v811_v26, %v235_v14  ;;  %v317_v19 = vmul.f32 %v811_v26, %v255_v15 }
  0xd8   :  { %v360_v34 = vadd.f32 %v817_v28, %v324_v22  ;;  %v368_v35 = vadd.f32 %v817_v28, %v332_v23 }
  0xd9   :  { %v345_v20 = vadd.f32 %v817_v28, %v309_v18  ;;  %v353_v21 = vadd.f32 %v817_v28, %v317_v19 }
  0xda   :  { %v392_v40 = vmax.f32 %v360_v34, 0.0  ;;  %v400_v41 = vmax.f32 %v368_v35, 0.0 }
  0xdb   :  { %v377_v27 = vmax.f32 %v345_v20, 0.0  ;;  %v385_v29 = vmax.f32 %v353_v21, 0.0 }
  0xdd   :  { %v608_v30 = vpack.c.bf16 %v377_v27, %v376_v24  ;;  %v628_v31 = vpack.c.bf16 %v385_v29, %v384_v25  ;;  %v275_v32 = vpop.f32.mrf.mxu2  ;;  %v295_v33 = vpop.f32.mrf.mxu3 }
  0xde   :  { %v325_v36 = vmul.f32 %v811_v26, %v275_v32  ;;  %v333_v37 = vmul.f32 %v811_v26, %v295_v33 }
  0xdf   :  { %672 = vst [vmem:[%s934_s4 + $0x18] sm:$0xff] %v608_v30  }
  0xe0   :  { %676 = vst [vmem:[%s934_s4 + $0x38] sm:$0xff] %v628_v31   ;;  %v361_v38 = vadd.f32 %v817_v28, %v325_v36  ;;  %v369_v39 = vadd.f32 %v817_v28, %v333_v37 }
  0xe2   :  { %v393_v42 = vmax.f32 %v361_v38, 0.0  ;;  %v401_v43 = vmax.f32 %v369_v39, 0.0 }
  0xe4   :  { %v648_v44 = vpack.c.bf16 %v393_v42, %v392_v40  ;;  %v668_v45 = vpack.c.bf16 %v401_v43, %v400_v41 }
  0xe6   :  { %680 = vst [vmem:[%s934_s4 + $0x58] sm:$0xff] %v648_v44  }
  0xe7   :  { %684 = vst [vmem:[%s934_s4 + $0x78] sm:$0xff] %v668_v45  }

// kernel: _lambda_.28
= control target key start
LH: loop header
LB: loop body
LE: loop exit
PB: predicated region body
PF: predicated region fallthrough
CT: control target
= control target key end

     0   :  { %s1161_s1 = inlined_call_operand.vmem [shape: bf16[128,128], index: 1, kind: input, shape index: {}]   ;;  %s1162_s2 = inlined_call_operand.vmem [shape: f32[1,128], index: 2, kind: input, shape index: {}]   ;;  %s1163_s3 = inlined_call_operand.vmem [shape: f32[1,128], index: 3, kind: input, shape index: {}]   ;;  %s1164_s0 = inlined_call_operand.vmem [shape: bf16[256,128], index: 0, kind: input, shape index: {}]   ;;  %s1165_s4 = inlined_call_operand.vmem [shape: bf16[256,128], index: 4, kind: input, shape index: {}]   ;;  %s1166_s5 = inlined_call_operand.vmem [shape: bf16[256,128], index: 5, kind: output, shape index: {}]  }
   0x1   :  { %v688_v0 = vld [vmem:[%s1161_s1 + $0x38] sm:$0xff]  ;;  %v687_v1 = vld [vmem:[%s1161_s1 + $0x30] sm:$0xff]  ;;  %v686_v2 = vld [vmem:[%s1161_s1 + $0x28] sm:$0xff] }
   0x2   :  { %212 = vmatpush.bf16.msra.mxu0 %v688_v0  ;;  %863 = vmatpush.bf16.msra.mxu1 %v688_v0  ;;  %v685_v3 = vld [vmem:[%s1161_s1 + $0x20] sm:$0xff]  ;;  %v684_v4 = vld [vmem:[%s1161_s1 + $0x18] sm:$0xff]  ;;  %v683_v5 = vld [vmem:[%s1161_s1 + $0x10] sm:$0xff] }
   0x3   :  { %864 = vmatpush.bf16.msra.mxu2 %v688_v0  ;;  %865 = vmatpush.bf16.msra.mxu3 %v688_v0  ;;  %v682_v6 = vld [vmem:[%s1161_s1 + $0x8] sm:$0xff]  ;;  %v681_v7 = vld [vmem:[%s1161_s1] sm:$0xff]  ;;  %v667_v16 = vld [vmem:[%s1164_s0 + $0x10] sm:$0xff] }
   0x4   :  { %v665_v8 = vld [vmem:[%s1164_s0] sm:$0xff]  ;;  %v666_v12 = vld [vmem:[%s1164_s0 + $0x8] sm:$0xff]  ;;  %v671_v17 = vld [vmem:[%s1164_s0 + $0x30] sm:$0xff] }
   0x5   :  { %v669_v9 = vld [vmem:[%s1164_s0 + $0x20] sm:$0xff]  ;;  %v670_v13 = vld [vmem:[%s1164_s0 + $0x28] sm:$0xff]  ;;  %v675_v18 = vld [vmem:[%s1164_s0 + $0x50] sm:$0xff] }
   0x6   :  { %213 = vmatpush.bf16.msra.mxu0 %v687_v1  ;;  %866 = vmatpush.bf16.msra.mxu1 %v687_v1  ;;  %v673_v10 = vld [vmem:[%s1164_s0 + $0x40] sm:$0xff]  ;;  %v674_v14 = vld [vmem:[%s1164_s0 + $0x48] sm:$0xff]  ;;  %v679_v19 = vld [vmem:[%s1164_s0 + $0x70] sm:$0xff] }
   0x7   :  { %867 = vmatpush.bf16.msra.mxu2 %v687_v1  ;;  %868 = vmatpush.bf16.msra.mxu3 %v687_v1  ;;  %v677_v11 = vld [vmem:[%s1164_s0 + $0x60] sm:$0xff]  ;;  %v678_v15 = vld [vmem:[%s1164_s0 + $0x68] sm:$0xff]  ;;  %v668_v20 = vld [vmem:[%s1164_s0 + $0x18] sm:$0xff] }
   0x8   :  { %v672_v21 = vld [vmem:[%s1164_s0 + $0x38] sm:$0xff]  ;;  %v994_v24 = vld [vmem:[%s1162_s2] ss:$0 sm:$0xff] }
   0x9   :  { %v676_v22 = vld [vmem:[%s1164_s0 + $0x58] sm:$0xff]  ;;  %v1000_v28 = vld [vmem:[%s1163_s3] ss:$0 sm:$0xff] }
   0xa   :  { %214 = vmatpush.bf16.msra.mxu0 %v686_v2  ;;  %869 = vmatpush.bf16.msra.mxu1 %v686_v2  ;;  %v680_v23 = vld [vmem:[%s1164_s0 + $0x78] sm:$0xff]  ;;  %v690_v30 = vld [vmem:[%s1165_s4] sm:$0xff]  }
   0xb   :  { %870 = vmatpush.bf16.msra.mxu2 %v686_v2  ;;  %871 = vmatpush.bf16.msra.mxu3 %v686_v2  ;;  %v836_v31 = vld [vmem:[%s1165_s4 + $0x20] sm:$0xff]   ;;  %v691_v33 = vunpack.c.l.bf16 %v690_v30  ;;  %v692_v41 = vunpack.c.h.bf16 %v690_v30 }
   0xc   :  { %v707_v35 = vunpack.c.l.bf16 %v836_v31  ;;  %v708_v43 = vunpack.c.h.bf16 %v836_v31  ;;  %v840_v48 = vld [vmem:[%s1165_s4 + $0x40] sm:$0xff]  }
   0xd   :  { %v844_v49 = vld [vmem:[%s1165_s4 + $0x60] sm:$0xff]   ;;  %v723_v55 = vunpack.c.l.bf16 %v840_v48  ;;  %v724_v1 = vunpack.c.h.bf16 %v840_v48 }
   0xe   :  { %215 = vmatpush.bf16.msra.mxu0 %v685_v3  ;;  %872 = vmatpush.bf16.msra.mxu1 %v685_v3  ;;  %v739_v57 = vunpack.c.l.bf16 %v844_v49 }
   0xf   :  { %873 = vmatpush.bf16.msra.mxu2 %v685_v3  ;;  %874 = vmatpush.bf16.msra.mxu3 %v685_v3  ;;  %v740_v3 = vunpack.c.h.bf16 %v844_v49 }
  0x12   :  { %216 = vmatpush.bf16.msra.mxu0 %v684_v4  ;;  %875 = vmatpush.bf16.msra.mxu1 %v684_v4 }
  0x13   :  { %876 = vmatpush.bf16.msra.mxu2 %v684_v4  ;;  %877 = vmatpush.bf16.msra.mxu3 %v684_v4 }
  0x16   :  { %217 = vmatpush.bf16.msra.mxu0 %v683_v5  ;;  %878 = vmatpush.bf16.msra.mxu1 %v683_v5 }
  0x17   :  { %879 = vmatpush.bf16.msra.mxu2 %v683_v5  ;;  %880 = vmatpush.bf16.msra.mxu3 %v683_v5 }
  0x1a   :  { %218 = vmatpush.bf16.msra.mxu0 %v682_v6  ;;  %881 = vmatpush.bf16.msra.mxu1 %v682_v6 }
  0x1b   :  { %882 = vmatpush.bf16.msra.mxu2 %v682_v6  ;;  %883 = vmatpush.bf16.msra.mxu3 %v682_v6 }
  0x1e   :  { %219 = vmatpush.bf16.msra.mxu0 %v681_v7  ;;  %884 = vmatpush.bf16.msra.mxu1 %v681_v7 }
  0x1f   :  { %885 = vmatpush.bf16.msra.mxu2 %v681_v7  ;;  %886 = vmatpush.bf16.msra.mxu3 %v681_v7 }
  0x21   :  { %220 = vmatmul.bf16.vlgmr.msra.gmra.mxu0 %v665_v8  ;;  %240 = vmatmul.bf16.vlgmr.msra.gmra.mxu1 %v669_v9 }
  0x22   :  { %260 = vmatmul.bf16.vlgmr.msra.gmra.mxu2 %v673_v10  ;;  %280 = vmatmul.bf16.vlgmr.msra.gmra.mxu3 %v677_v11 }
  0x31   :  { %225 = vmatmul.bf16.gmra.mxu0 %v666_v12  ;;  %245 = vmatmul.bf16.gmra.mxu1 %v670_v13 }
  0x32   :  { %265 = vmatmul.bf16.gmra.mxu2 %v674_v14  ;;  %285 = vmatmul.bf16.gmra.mxu3 %v678_v15 }
  0x41   :  { %230 = vmatmul.bf16.gmra.mxu0 %v667_v16  ;;  %250 = vmatmul.bf16.gmra.mxu1 %v671_v17  ;;  %v833_v16 = vld [vmem:[%s1165_s4 + $0x8] sm:$0xff]  }
  0x42   :  { %270 = vmatmul.bf16.gmra.mxu2 %v675_v18  ;;  %290 = vmatmul.bf16.gmra.mxu3 %v679_v19  ;;  %v837_v17 = vld [vmem:[%s1165_s4 + $0x28] sm:$0xff]  }
  0x51   :  { %235 = vmatmul.bf16.gmra.mxu0 %v668_v20  ;;  %255 = vmatmul.bf16.gmra.mxu1 %v672_v21 }
  0x52   :  { %275 = vmatmul.bf16.gmra.mxu2 %v676_v22  ;;  %295 = vmatmul.bf16.gmra.mxu3 %v680_v23  ;;  %v695_v23 = vunpack.c.l.bf16 %v833_v16 }
  0x9e   :  { %v221_v25 = vpop.f32.mrf.mxu0  ;;  %v241_v26 = vpop.f32.mrf.mxu1 }
  0x9f   :  { %v305_v27 = vmul.f32 %v994_v24, %v221_v25  ;;  %v313_v29 = vmul.f32 %v994_v24, %v241_v26  ;;  %v711_v26 = vunpack.c.l.bf16 %v837_v17 }
  0xa1   :  { %v341_v32 = vadd.f32 %v1000_v28, %v305_v27  ;;  %v349_v34 = vadd.f32 %v1000_v28, %v313_v29 }
  0xa3   :  { %v437_v46 = vadd.f32 %v691_v33, %v341_v32  ;;  %v445_v47 = vadd.f32 %v707_v35, %v349_v34  ;;  %v696_v35 = vunpack.c.h.bf16 %v833_v16 }
  0xa5   :  { %v261_v36 = vpop.f32.mrf.mxu2  ;;  %v281_v37 = vpop.f32.mrf.mxu3  ;;  %v469_v58 = vmax.f32 %v437_v46, 0.0  ;;  %v477_v59 = vmax.f32 %v445_v47, 0.0 }
  0xa6   :  { %v223_v38 = vpop.f32.mrf.mxu0  ;;  %v243_v39 = vpop.f32.mrf.mxu1  ;;  %v321_v44 = vmul.f32 %v994_v24, %v261_v36  ;;  %v329_v45 = vmul.f32 %v994_v24, %v281_v37  ;;  %v712_v37 = vunpack.c.h.bf16 %v837_v17 }
  0xa7   :  { %v306_v40 = vmul.f32 %v994_v24, %v223_v38  ;;  %v314_v42 = vmul.f32 %v994_v24, %v243_v39 }
  0xa8   :  { %v357_v54 = vadd.f32 %v1000_v28, %v321_v44  ;;  %v365_v56 = vadd.f32 %v1000_v28, %v329_v45 }
  0xa9   :  { %v342_v50 = vadd.f32 %v1000_v28, %v306_v40  ;;  %v350_v51 = vadd.f32 %v1000_v28, %v314_v42  ;;  %v841_v42 = vld [vmem:[%s1165_s4 + $0x48] sm:$0xff]  }
  0xaa   :  { %v453_v8 = vadd.f32 %v723_v55, %v357_v54  ;;  %v461_v9 = vadd.f32 %v739_v57, %v365_v56  ;;  %v727_v49 = vunpack.c.l.bf16 %v841_v42 }
  0xab   :  { %v438_v52 = vadd.f32 %v692_v41, %v342_v50  ;;  %v446_v53 = vadd.f32 %v708_v43, %v350_v51  ;;  %v845_v43 = vld [vmem:[%s1165_s4 + $0x68] sm:$0xff]  }
  0xac   :  { %v485_v18 = vmax.f32 %v453_v8, 0.0  ;;  %v493_v19 = vmax.f32 %v461_v9, 0.0  ;;  %v743_v51 = vunpack.c.l.bf16 %v845_v43 }
  0xad   :  { %v470_v60 = vmax.f32 %v438_v52, 0.0  ;;  %v478_v61 = vmax.f32 %v446_v53, 0.0  ;;  %v263_v62 = vpop.f32.mrf.mxu2  ;;  %v283_v63 = vpop.f32.mrf.mxu3 }
  0xae   :  { %v322_v0 = vmul.f32 %v994_v24, %v263_v62  ;;  %v330_v2 = vmul.f32 %v994_v24, %v283_v63  ;;  %v226_v4 = vpop.f32.mrf.mxu0  ;;  %v246_v5 = vpop.f32.mrf.mxu1 }
  0xaf   :  { %v756_v6 = vpack.c.bf16 %v470_v60, %v469_v58  ;;  %v776_v7 = vpack.c.bf16 %v478_v61, %v477_v59  ;;  %v307_v12 = vmul.f32 %v994_v24, %v226_v4  ;;  %v315_v13 = vmul.f32 %v994_v24, %v246_v5 }
  0xb0   :  { %v358_v10 = vadd.f32 %v1000_v28, %v322_v0  ;;  %v366_v11 = vadd.f32 %v1000_v28, %v330_v2  ;;  %v728_v59 = vunpack.c.h.bf16 %v841_v42  ;;  %v744_v61 = vunpack.c.h.bf16 %v845_v43 }
  0xb1   :  { %757 = vst [vmem:[%s1166_s5] sm:$0xff] %v756_v6   ;;  %v343_v22 = vadd.f32 %v1000_v28, %v307_v12  ;;  %v351_v25 = vadd.f32 %v1000_v28, %v315_v13 }
  0xb2   :  { %851 = vst [vmem:[%s1166_s5 + $0x20] sm:$0xff] %v776_v7   ;;  %v454_v14 = vadd.f32 %v724_v1, %v358_v10  ;;  %v462_v15 = vadd.f32 %v740_v3, %v366_v11  ;;  %v834_v10 = vld [vmem:[%s1165_s4 + $0x10] sm:$0xff]  }
  0xb3   :  { %v439_v40 = vadd.f32 %v695_v23, %v343_v22  ;;  %v447_v41 = vadd.f32 %v711_v26, %v351_v25  ;;  %v838_v11 = vld [vmem:[%s1165_s4 + $0x30] sm:$0xff]   ;;  %v699_v17 = vunpack.c.l.bf16 %v834_v10 }
  0xb4   :  { %v486_v20 = vmax.f32 %v454_v14, 0.0  ;;  %v494_v21 = vmax.f32 %v462_v15, 0.0 }
  0xb5   :  { %v266_v27 = vpop.f32.mrf.mxu2  ;;  %v286_v29 = vpop.f32.mrf.mxu3  ;;  %v471_v52 = vmax.f32 %v439_v40, 0.0  ;;  %v479_v53 = vmax.f32 %v447_v41, 0.0 }
  0xb6   :  { %v796_v30 = vpack.c.bf16 %v486_v20, %v485_v18  ;;  %v816_v31 = vpack.c.bf16 %v494_v21, %v493_v19  ;;  %v228_v32 = vpop.f32.mrf.mxu0  ;;  %v248_v33 = vpop.f32.mrf.mxu1  ;;  %v323_v38 = vmul.f32 %v994_v24, %v266_v27  ;;  %v331_v39 = vmul.f32 %v994_v24, %v286_v29 }
  0xb7   :  { %v308_v34 = vmul.f32 %v994_v24, %v228_v32  ;;  %v316_v36 = vmul.f32 %v994_v24, %v248_v33  ;;  %v715_v19 = vunpack.c.l.bf16 %v838_v11  ;;  %v700_v29 = vunpack.c.h.bf16 %v834_v10 }
  0xb8   :  { %855 = vst [vmem:[%s1166_s5 + $0x40] sm:$0xff] %v796_v30   ;;  %v359_v48 = vadd.f32 %v1000_v28, %v323_v38  ;;  %v367_v50 = vadd.f32 %v1000_v28, %v331_v39 }
  0xb9   :  { %859 = vst [vmem:[%s1166_s5 + $0x60] sm:$0xff] %v816_v31   ;;  %v344_v44 = vadd.f32 %v1000_v28, %v308_v34  ;;  %v352_v45 = vadd.f32 %v1000_v28, %v316_v36  ;;  %v716_v31 = vunpack.c.h.bf16 %v838_v11  ;;  %v842_v36 = vld [vmem:[%s1165_s4 + $0x50] sm:$0xff]  }
  0xba   :  { %v455_v2 = vadd.f32 %v727_v49, %v359_v48  ;;  %v463_v3 = vadd.f32 %v743_v51, %v367_v50  ;;  %v731_v43 = vunpack.c.l.bf16 %v842_v36 }
  0xbb   :  { %v440_v46 = vadd.f32 %v696_v35, %v344_v44  ;;  %v448_v47 = vadd.f32 %v712_v37, %v352_v45  ;;  %v846_v37 = vld [vmem:[%s1165_s4 + $0x70] sm:$0xff]  }
  0xbc   :  { %v487_v12 = vmax.f32 %v455_v2, 0.0  ;;  %v495_v13 = vmax.f32 %v463_v3, 0.0  ;;  %v747_v45 = vunpack.c.l.bf16 %v846_v37 }
  0xbd   :  { %v472_v54 = vmax.f32 %v440_v46, 0.0  ;;  %v480_v55 = vmax.f32 %v448_v47, 0.0  ;;  %v268_v56 = vpop.f32.mrf.mxu2  ;;  %v288_v57 = vpop.f32.mrf.mxu3 }
  0xbe   :  { %v324_v58 = vmul.f32 %v994_v24, %v268_v56  ;;  %v332_v60 = vmul.f32 %v994_v24, %v288_v57  ;;  %v231_v62 = vpop.f32.mrf.mxu0  ;;  %v251_v63 = vpop.f32.mrf.mxu1 }
  0xbf   :  { %v761_v0 = vpack.c.bf16 %v472_v54, %v471_v52  ;;  %v781_v1 = vpack.c.bf16 %v480_v55, %v479_v53  ;;  %v309_v6 = vmul.f32 %v994_v24, %v231_v62  ;;  %v317_v7 = vmul.f32 %v994_v24, %v251_v63 }
  0xc0   :  { %v360_v4 = vadd.f32 %v1000_v28, %v324_v58  ;;  %v368_v5 = vadd.f32 %v1000_v28, %v332_v60  ;;  %v732_v53 = vunpack.c.h.bf16 %v842_v36  ;;  %v748_v55 = vunpack.c.h.bf16 %v846_v37 }
  0xc1   :  { %848 = vst [vmem:[%s1166_s5 + $0x8] sm:$0xff] %v761_v0   ;;  %v345_v16 = vadd.f32 %v1000_v28, %v309_v6  ;;  %v353_v18 = vadd.f32 %v1000_v28, %v317_v7 }
  0xc2   :  { %852 = vst [vmem:[%s1166_s5 + $0x28] sm:$0xff] %v781_v1   ;;  %v456_v8 = vadd.f32 %v728_v59, %v360_v4  ;;  %v464_v9 = vadd.f32 %v744_v61, %v368_v5  ;;  %v835_v4 = vld [vmem:[%s1165_s4 + $0x18] sm:$0xff]  }
  0xc3   :  { %v441_v34 = vadd.f32 %v699_v17, %v345_v16  ;;  %v449_v35 = vadd.f32 %v715_v19, %v353_v18  ;;  %v839_v5 = vld [vmem:[%s1165_s4 + $0x38] sm:$0xff]   ;;  %v703_v11 = vunpack.c.l.bf16 %v835_v4 }
  0xc4   :  { %v488_v14 = vmax.f32 %v456_v8, 0.0  ;;  %v496_v15 = vmax.f32 %v464_v9, 0.0 }
  0xc5   :  { %v271_v20 = vpop.f32.mrf.mxu2  ;;  %v291_v21 = vpop.f32.mrf.mxu3  ;;  %v473_v46 = vmax.f32 %v441_v34, 0.0  ;;  %v481_v47 = vmax.f32 %v449_v35, 0.0 }
  0xc6   :  { %v801_v22 = vpack.c.bf16 %v488_v14, %v487_v12  ;;  %v821_v23 = vpack.c.bf16 %v496_v15, %v495_v13  ;;  %v233_v25 = vpop.f32.mrf.mxu0  ;;  %v253_v26 = vpop.f32.mrf.mxu1  ;;  %v325_v32 = vmul.f32 %v994_v24, %v271_v20  ;;  %v333_v33 = vmul.f32 %v994_v24, %v291_v21 }
  0xc7   :  { %v310_v27 = vmul.f32 %v994_v24, %v233_v25  ;;  %v318_v30 = vmul.f32 %v994_v24, %v253_v26  ;;  %v719_v13 = vunpack.c.l.bf16 %v839_v5  ;;  %v704_v21 = vunpack.c.h.bf16 %v835_v4 }
  0xc8   :  { %856 = vst [vmem:[%s1166_s5 + $0x48] sm:$0xff] %v801_v22   ;;  %v361_v42 = vadd.f32 %v1000_v28, %v325_v32  ;;  %v369_v44 = vadd.f32 %v1000_v28, %v333_v33 }
  0xc9   :  { %860 = vst [vmem:[%s1166_s5 + $0x68] sm:$0xff] %v821_v23   ;;  %v346_v38 = vadd.f32 %v1000_v28, %v310_v27  ;;  %v354_v39 = vadd.f32 %v1000_v28, %v318_v30  ;;  %v720_v23 = vunpack.c.h.bf16 %v839_v5  ;;  %v843_v30 = vld [vmem:[%s1165_s4 + $0x58] sm:$0xff]  }
  0xca   :  { %v457_v60 = vadd.f32 %v731_v43, %v361_v42  ;;  %v465_v61 = vadd.f32 %v747_v45, %v369_v44  ;;  %v735_v37 = vunpack.c.l.bf16 %v843_v30 }
  0xcb   :  { %v442_v40 = vadd.f32 %v700_v29, %v346_v38  ;;  %v450_v41 = vadd.f32 %v716_v31, %v354_v39  ;;  %v847_v31 = vld [vmem:[%s1165_s4 + $0x78] sm:$0xff]  }
  0xcc   :  { %v489_v6 = vmax.f32 %v457_v60, 0.0  ;;  %v497_v7 = vmax.f32 %v465_v61, 0.0  ;;  %v751_v39 = vunpack.c.l.bf16 %v847_v31 }
  0xcd   :  { %v474_v48 = vmax.f32 %v442_v40, 0.0  ;;  %v482_v49 = vmax.f32 %v450_v41, 0.0  ;;  %v273_v50 = vpop.f32.mrf.mxu2  ;;  %v293_v51 = vpop.f32.mrf.mxu3 }
  0xce   :  { %v326_v52 = vmul.f32 %v994_v24, %v273_v50  ;;  %v334_v54 = vmul.f32 %v994_v24, %v293_v51  ;;  %v236_v56 = vpop.f32.mrf.mxu0  ;;  %v256_v57 = vpop.f32.mrf.mxu1 }
  0xcf   :  { %v766_v58 = vpack.c.bf16 %v474_v48, %v473_v46  ;;  %v786_v59 = vpack.c.bf16 %v482_v49, %v481_v47  ;;  %v311_v0 = vmul.f32 %v994_v24, %v236_v56  ;;  %v319_v1 = vmul.f32 %v994_v24, %v256_v57 }
  0xd0   :  { %v362_v62 = vadd.f32 %v1000_v28, %v326_v52  ;;  %v370_v63 = vadd.f32 %v1000_v28, %v334_v54  ;;  %v736_v47 = vunpack.c.h.bf16 %v843_v30  ;;  %v752_v49 = vunpack.c.h.bf16 %v847_v31 }
  0xd1   :  { %849 = vst [vmem:[%s1166_s5 + $0x10] sm:$0xff] %v766_v58   ;;  %v347_v10 = vadd.f32 %v1000_v28, %v311_v0  ;;  %v355_v12 = vadd.f32 %v1000_v28, %v319_v1 }
  0xd2   :  { %853 = vst [vmem:[%s1166_s5 + $0x30] sm:$0xff] %v786_v59   ;;  %v458_v2 = vadd.f32 %v732_v53, %v362_v62  ;;  %v466_v3 = vadd.f32 %v748_v55, %v370_v63 }
  0xd3   :  { %v443_v27 = vadd.f32 %v703_v11, %v347_v10  ;;  %v451_v29 = vadd.f32 %v719_v13, %v355_v12 }
  0xd4   :  { %v490_v8 = vmax.f32 %v458_v2, 0.0  ;;  %v498_v9 = vmax.f32 %v466_v3, 0.0 }
  0xd5   :  { %v276_v14 = vpop.f32.mrf.mxu2  ;;  %v296_v15 = vpop.f32.mrf.mxu3  ;;  %v475_v40 = vmax.f32 %v443_v27, 0.0  ;;  %v483_v41 = vmax.f32 %v451_v29, 0.0 }
  0xd6   :  { %v806_v16 = vpack.c.bf16 %v490_v8, %v489_v6  ;;  %v826_v17 = vpack.c.bf16 %v498_v9, %v497_v7  ;;  %v238_v18 = vpop.f32.mrf.mxu0  ;;  %v258_v19 = vpop.f32.mrf.mxu1  ;;  %v327_v25 = vmul.f32 %v994_v24, %v276_v14  ;;  %v335_v26 = vmul.f32 %v994_v24, %v296_v15 }
  0xd7   :  { %v312_v20 = vmul.f32 %v994_v24, %v238_v18  ;;  %v320_v22 = vmul.f32 %v994_v24, %v258_v19 }
  0xd8   :  { %857 = vst [vmem:[%s1166_s5 + $0x50] sm:$0xff] %v806_v16   ;;  %v363_v36 = vadd.f32 %v1000_v28, %v327_v25  ;;  %v371_v38 = vadd.f32 %v1000_v28, %v335_v26 }
  0xd9   :  { %861 = vst [vmem:[%s1166_s5 + $0x70] sm:$0xff] %v826_v17   ;;  %v348_v32 = vadd.f32 %v1000_v28, %v312_v20  ;;  %v356_v33 = vadd.f32 %v1000_v28, %v320_v22 }
  0xda   :  { %v459_v52 = vadd.f32 %v735_v37, %v363_v36  ;;  %v467_v53 = vadd.f32 %v751_v39, %v371_v38 }
  0xdb   :  { %v444_v34 = vadd.f32 %v704_v21, %v348_v32  ;;  %v452_v35 = vadd.f32 %v720_v23, %v356_v33 }
  0xdc   :  { %v499_v58 = vmax.f32 %v467_v53, 0.0 }
  0xdd   :  { %v476_v42 = vmax.f32 %v444_v34, 0.0  ;;  %v484_v43 = vmax.f32 %v452_v35, 0.0  ;;  %v278_v44 = vpop.f32.mrf.mxu2  ;;  %v298_v45 = vpop.f32.mrf.mxu3 }
  0xde   :  { %v328_v46 = vmul.f32 %v994_v24, %v278_v44  ;;  %v336_v48 = vmul.f32 %v994_v24, %v298_v45  ;;  %v491_v24 = vmax.f32 %v459_v52, 0.0 }
  0xdf   :  { %v771_v50 = vpack.c.bf16 %v476_v42, %v475_v40  ;;  %v791_v51 = vpack.c.bf16 %v484_v43, %v483_v41 }
  0xe0   :  { %v364_v54 = vadd.f32 %v1000_v28, %v328_v46  ;;  %v372_v55 = vadd.f32 %v1000_v28, %v336_v48 }
  0xe1   :  { %850 = vst [vmem:[%s1166_s5 + $0x18] sm:$0xff] %v771_v50  }
  0xe2   :  { %854 = vst [vmem:[%s1166_s5 + $0x38] sm:$0xff] %v791_v51   ;;  %v460_v56 = vadd.f32 %v736_v47, %v364_v54  ;;  %v468_v57 = vadd.f32 %v752_v49, %v372_v55 }
  0xe4   :  { %v492_v59 = vmax.f32 %v460_v56, 0.0  ;;  %v500_v60 = vmax.f32 %v468_v57, 0.0 }
  0xe6   :  { %v811_v61 = vpack.c.bf16 %v492_v59, %v491_v24  ;;  %v831_v62 = vpack.c.bf16 %v500_v60, %v499_v58 }
  0xe8   :  { %858 = vst [vmem:[%s1166_s5 + $0x58] sm:$0xff] %v811_v61  }
  0xe9   :  { %862 = vst [vmem:[%s1166_s5 + $0x78] sm:$0xff] %v831_v62  }

// kernel: _lambda_.31
= control target key start
LH: loop header
LB: loop body
LE: loop exit
PB: predicated region body
PF: predicated region fallthrough
CT: control target
= control target key end

     0   :  { %s891_s1 = inlined_call_operand.vmem [shape: bf16[256,128], index: 1, kind: input, shape index: {}]   ;;  %s892_s0 = inlined_call_operand.vmem [shape: bf16[128,256], index: 0, kind: input, shape index: {}]   ;;  %s893_s2 = inlined_call_operand.vmem [shape: f32[1,128], index: 2, kind: input, shape index: {}]   ;;  %s894_s3 = inlined_call_operand.vmem [shape: f32[1,128], index: 3, kind: input, shape index: {}]   ;;  %s895_s4 = inlined_call_operand.vmem [shape: bf16[128,128], index: 4, kind: output, shape index: {}]  }
   0x1   :  { %v582_v0 = vld [vmem:[%s891_s1 + $0x38] sm:$0xff]  ;;  %v581_v2 = vld [vmem:[%s891_s1 + $0x30] sm:$0xff]  ;;  %v580_v4 = vld [vmem:[%s891_s1 + $0x28] sm:$0xff] }
   0x2   :  { %v590_v1 = vld [vmem:[%s891_s1 + $0x78] sm:$0xff]  ;;  %241 = vmatpush.bf16.msra.mxu0 %v582_v0  ;;  %638 = vmatpush.bf16.msra.mxu2 %v582_v0  ;;  %v589_v3 = vld [vmem:[%s891_s1 + $0x70] sm:$0xff]  ;;  %v588_v5 = vld [vmem:[%s891_s1 + $0x68] sm:$0xff] }
   0x3   :  { %290 = vmatpush.bf16.msra.mxu1 %v590_v1  ;;  %646 = vmatpush.bf16.msra.mxu3 %v590_v1  ;;  %v579_v6 = vld [vmem:[%s891_s1 + $0x20] sm:$0xff]  ;;  %v578_v8 = vld [vmem:[%s891_s1 + $0x18] sm:$0xff]  ;;  %v577_v10 = vld [vmem:[%s891_s1 + $0x10] sm:$0xff] }
   0x4   :  { %v587_v7 = vld [vmem:[%s891_s1 + $0x60] sm:$0xff]  ;;  %v586_v9 = vld [vmem:[%s891_s1 + $0x58] sm:$0xff]  ;;  %v585_v11 = vld [vmem:[%s891_s1 + $0x50] sm:$0xff] }
   0x5   :  { %v576_v12 = vld [vmem:[%s891_s1 + $0x8] sm:$0xff]  ;;  %v575_v14 = vld [vmem:[%s891_s1] sm:$0xff]  ;;  %v441_v28 = vld [vmem:[%s892_s0 + $0x10] sm:$0xf] }
   0x6   :  { %242 = vmatpush.bf16.msra.mxu0 %v581_v2  ;;  %639 = vmatpush.bf16.msra.mxu2 %v581_v2  ;;  %v584_v13 = vld [vmem:[%s891_s1 + $0x48] sm:$0xff]  ;;  %v583_v15 = vld [vmem:[%s891_s1 + $0x40] sm:$0xff]  ;;  %v562_v29 = vld [vmem:[%s892_s0 + $0x14] sm:$0xf0] }
   0x7   :  { %291 = vmatpush.bf16.msra.mxu1 %v589_v3  ;;  %647 = vmatpush.bf16.msra.mxu3 %v589_v3  ;;  %v433_v16 = vld [vmem:[%s892_s0] sm:$0xf]  ;;  %v560_v17 = vld [vmem:[%s892_s0 + $0x4] sm:$0xf0]  ;;  %v559_v20 = vld [vmem:[%s892_s0 + $0x4] sm:$0xf]  ;;  %v442_v36 = vor.u32 %v562_v29, %v441_v28 }
   0x8   :  { %v465_v18 = vld [vmem:[%s892_s0 + $0x40] sm:$0xf]  ;;  %v568_v19 = vld [vmem:[%s892_s0 + $0x44] sm:$0xf0]  ;;  %v435_v21 = vld [vmem:[%s892_s0 + $0x8] sm:$0xf0]  ;;  %v434_v24 = vor.u32 %v560_v17, %v433_v16 }
   0x9   :  { %v567_v22 = vld [vmem:[%s892_s0 + $0x44] sm:$0xf]  ;;  %v467_v23 = vld [vmem:[%s892_s0 + $0x48] sm:$0xf0]  ;;  %v466_v25 = vor.u32 %v568_v19, %v465_v18  ;;  %v438_v26 = vor.u32 %v559_v20, %v435_v21  ;;  %v473_v30 = vld [vmem:[%s892_s0 + $0x50] sm:$0xf] }
   0xa   :  { %243 = vmatpush.bf16.msra.mxu0 %v580_v4  ;;  %640 = vmatpush.bf16.msra.mxu2 %v580_v4  ;;  %v470_v27 = vor.u32 %v567_v22, %v467_v23  ;;  %v570_v31 = vld [vmem:[%s892_s0 + $0x54] sm:$0xf0]  ;;  %v561_v32 = vld [vmem:[%s892_s0 + $0x14] sm:$0xf]  ;;  %v443_v33 = vld [vmem:[%s892_s0 + $0x18] sm:$0xf0] }
   0xb   :  { %292 = vmatpush.bf16.msra.mxu1 %v588_v5  ;;  %648 = vmatpush.bf16.msra.mxu3 %v588_v5  ;;  %v569_v34 = vld [vmem:[%s892_s0 + $0x54] sm:$0xf]  ;;  %v475_v35 = vld [vmem:[%s892_s0 + $0x58] sm:$0xf0]  ;;  %v474_v37 = vor.u32 %v570_v31, %v473_v30  ;;  %v446_v38 = vor.u32 %v561_v32, %v443_v33  ;;  %v449_v40 = vld [vmem:[%s892_s0 + $0x20] sm:$0xf] }
   0xc   :  { %v478_v39 = vor.u32 %v569_v34, %v475_v35  ;;  %v564_v41 = vld [vmem:[%s892_s0 + $0x24] sm:$0xf0]  ;;  %v481_v42 = vld [vmem:[%s892_s0 + $0x60] sm:$0xf]  ;;  %v563_v44 = vld [vmem:[%s892_s0 + $0x24] sm:$0xf] }
   0xd   :  { %v572_v43 = vld [vmem:[%s892_s0 + $0x64] sm:$0xf0]  ;;  %v451_v45 = vld [vmem:[%s892_s0 + $0x28] sm:$0xf0]  ;;  %v571_v46 = vld [vmem:[%s892_s0 + $0x64] sm:$0xf]  ;;  %v450_v48 = vor.u32 %v564_v41, %v449_v40 }
   0xe   :  { %244 = vmatpush.bf16.msra.mxu0 %v579_v6  ;;  %641 = vmatpush.bf16.msra.mxu2 %v579_v6  ;;  %v483_v47 = vld [vmem:[%s892_s0 + $0x68] sm:$0xf0]  ;;  %v482_v49 = vor.u32 %v572_v43, %v481_v42  ;;  %v454_v50 = vor.u32 %v563_v44, %v451_v45  ;;  %v457_v52 = vld [vmem:[%s892_s0 + $0x30] sm:$0xf]  ;;  %v566_v53 = vld [vmem:[%s892_s0 + $0x34] sm:$0xf0] }
   0xf   :  { %293 = vmatpush.bf16.msra.mxu1 %v587_v7  ;;  %649 = vmatpush.bf16.msra.mxu3 %v587_v7  ;;  %v486_v51 = vor.u32 %v571_v46, %v483_v47  ;;  %v489_v54 = vld [vmem:[%s892_s0 + $0x70] sm:$0xf]  ;;  %v574_v55 = vld [vmem:[%s892_s0 + $0x74] sm:$0xf0]  ;;  %v565_v56 = vld [vmem:[%s892_s0 + $0x34] sm:$0xf]  ;;  %v458_v60 = vor.u32 %v566_v53, %v457_v52 }
  0x10   :  { %v459_v57 = vld [vmem:[%s892_s0 + $0x38] sm:$0xf0]  ;;  %v573_v58 = vld [vmem:[%s892_s0 + $0x74] sm:$0xf]  ;;  %v490_v61 = vor.u32 %v574_v55, %v489_v54  ;;  %v828_v3 = vld [vmem:[%s893_s2] ss:$0 sm:$0xff] }
  0x11   :  { %v491_v59 = vld [vmem:[%s892_s0 + $0x78] sm:$0xf0]  ;;  %v462_v62 = vor.u32 %v565_v56, %v459_v57  ;;  %v834_v7 = vld [vmem:[%s894_s3] ss:$0 sm:$0xff] }
  0x12   :  { %245 = vmatpush.bf16.msra.mxu0 %v578_v8  ;;  %642 = vmatpush.bf16.msra.mxu2 %v578_v8  ;;  %v494_v63 = vor.u32 %v573_v58, %v491_v59 }
  0x13   :  { %294 = vmatpush.bf16.msra.mxu1 %v586_v9  ;;  %650 = vmatpush.bf16.msra.mxu3 %v586_v9 }
  0x16   :  { %246 = vmatpush.bf16.msra.mxu0 %v577_v10  ;;  %643 = vmatpush.bf16.msra.mxu2 %v577_v10 }
  0x17   :  { %295 = vmatpush.bf16.msra.mxu1 %v585_v11  ;;  %651 = vmatpush.bf16.msra.mxu3 %v585_v11 }
  0x1a   :  { %247 = vmatpush.bf16.msra.mxu0 %v576_v12  ;;  %644 = vmatpush.bf16.msra.mxu2 %v576_v12 }
  0x1b   :  { %296 = vmatpush.bf16.msra.mxu1 %v584_v13  ;;  %652 = vmatpush.bf16.msra.mxu3 %v584_v13 }
  0x1e   :  { %248 = vmatpush.bf16.msra.mxu0 %v575_v14  ;;  %645 = vmatpush.bf16.msra.mxu2 %v575_v14 }
  0x1f   :  { %297 = vmatpush.bf16.msra.mxu1 %v583_v15  ;;  %653 = vmatpush.bf16.msra.mxu3 %v583_v15 }
  0x21   :  { %249 = vmatmul.bf16.vlgmr.msra.gmra.mxu0 %v434_v24  ;;  %269 = vmatmul.bf16.vlgmr.msra.gmra.mxu2 %v466_v25 }
  0x22   :  { %298 = vmatmul.bf16.vlgmr.msra.gmra.mxu1 %v438_v26  ;;  %318 = vmatmul.bf16.vlgmr.msra.gmra.mxu3 %v470_v27 }
  0x31   :  { %254 = vmatmul.bf16.gmra.mxu0 %v442_v36  ;;  %274 = vmatmul.bf16.gmra.mxu2 %v474_v37 }
  0x32   :  { %303 = vmatmul.bf16.gmra.mxu1 %v446_v38  ;;  %323 = vmatmul.bf16.gmra.mxu3 %v478_v39 }
  0x41   :  { %259 = vmatmul.bf16.gmra.mxu0 %v450_v48  ;;  %279 = vmatmul.bf16.gmra.mxu2 %v482_v49 }
  0x42   :  { %308 = vmatmul.bf16.gmra.mxu1 %v454_v50  ;;  %328 = vmatmul.bf16.gmra.mxu3 %v486_v51 }
  0x51   :  { %264 = vmatmul.bf16.gmra.mxu0 %v458_v60  ;;  %284 = vmatmul.bf16.gmra.mxu2 %v490_v61 }
  0x52   :  { %313 = vmatmul.bf16.gmra.mxu1 %v462_v62  ;;  %333 = vmatmul.bf16.gmra.mxu3 %v494_v63 }
  0x9e   :  { %v250_v0 = vpop.f32.mrf.mxu0 }
  0x9f   :  { %v299_v1 = vpop.f32.mrf.mxu1 }
  0xa0   :  { %v300_v2 = vadd.f32 %v299_v1, %v250_v0 }
  0xa2   :  { %v343_v6 = vmul.f32 %v828_v3, %v300_v2 }
  0xa4   :  { %v270_v4 = vpop.f32.mrf.mxu2  ;;  %v363_v12 = vadd.f32 %v834_v7, %v343_v6 }
  0xa5   :  { %v319_v5 = vpop.f32.mrf.mxu3 }
  0xa6   :  { %v252_v8 = vpop.f32.mrf.mxu0  ;;  %v320_v10 = vadd.f32 %v319_v5, %v270_v4  ;;  %v379_v18 = vmax.f32 %v363_v12, 0.0 }
  0xa7   :  { %v301_v9 = vpop.f32.mrf.mxu1 }
  0xa8   :  { %v302_v11 = vadd.f32 %v301_v9, %v252_v8  ;;  %v351_v14 = vmul.f32 %v828_v3, %v320_v10 }
  0xaa   :  { %v344_v13 = vmul.f32 %v828_v3, %v302_v11  ;;  %v371_v23 = vadd.f32 %v834_v7, %v351_v14 }
  0xac   :  { %v364_v15 = vadd.f32 %v834_v7, %v344_v13  ;;  %v272_v16 = vpop.f32.mrf.mxu2  ;;  %v387_v28 = vmax.f32 %v371_v23, 0.0 }
  0xad   :  { %v321_v17 = vpop.f32.mrf.mxu3 }
  0xae   :  { %v380_v19 = vmax.f32 %v364_v15, 0.0  ;;  %v322_v20 = vadd.f32 %v321_v17, %v272_v16  ;;  %v255_v21 = vpop.f32.mrf.mxu0 }
  0xaf   :  { %v304_v22 = vpop.f32.mrf.mxu1 }
  0xb0   :  { %v594_v24 = vpack.c.bf16 %v380_v19, %v379_v18  ;;  %v352_v25 = vmul.f32 %v828_v3, %v322_v20  ;;  %v305_v27 = vadd.f32 %v304_v22, %v255_v21 }
  0xb2   :  { %595 = vst [vmem:[%s895_s4] sm:$0xff] %v594_v24   ;;  %v372_v26 = vadd.f32 %v834_v7, %v352_v25  ;;  %v345_v33 = vmul.f32 %v828_v3, %v305_v27 }
  0xb4   :  { %v388_v29 = vmax.f32 %v372_v26, 0.0  ;;  %v275_v30 = vpop.f32.mrf.mxu2  ;;  %v365_v38 = vadd.f32 %v834_v7, %v345_v33 }
  0xb5   :  { %v324_v31 = vpop.f32.mrf.mxu3 }
  0xb6   :  { %v614_v32 = vpack.c.bf16 %v388_v29, %v387_v28  ;;  %v257_v34 = vpop.f32.mrf.mxu0  ;;  %v325_v36 = vadd.f32 %v324_v31, %v275_v30  ;;  %v381_v44 = vmax.f32 %v365_v38, 0.0 }
  0xb7   :  { %v306_v35 = vpop.f32.mrf.mxu1 }
  0xb8   :  { %634 = vst [vmem:[%s895_s4 + $0x20] sm:$0xff] %v614_v32   ;;  %v307_v37 = vadd.f32 %v306_v35, %v257_v34  ;;  %v353_v40 = vmul.f32 %v828_v3, %v325_v36 }
  0xba   :  { %v346_v39 = vmul.f32 %v828_v3, %v307_v37  ;;  %v373_v49 = vadd.f32 %v834_v7, %v353_v40 }
  0xbc   :  { %v366_v41 = vadd.f32 %v834_v7, %v346_v39  ;;  %v277_v42 = vpop.f32.mrf.mxu2  ;;  %v389_v54 = vmax.f32 %v373_v49, 0.0 }
  0xbd   :  { %v326_v43 = vpop.f32.mrf.mxu3 }
  0xbe   :  { %v382_v45 = vmax.f32 %v366_v41, 0.0  ;;  %v327_v46 = vadd.f32 %v326_v43, %v277_v42  ;;  %v260_v47 = vpop.f32.mrf.mxu0 }
  0xbf   :  { %v309_v48 = vpop.f32.mrf.mxu1 }
  0xc0   :  { %v599_v50 = vpack.c.bf16 %v382_v45, %v381_v44  ;;  %v354_v51 = vmul.f32 %v828_v3, %v327_v46  ;;  %v310_v53 = vadd.f32 %v309_v48, %v260_v47 }
  0xc2   :  { %631 = vst [vmem:[%s895_s4 + $0x8] sm:$0xff] %v599_v50   ;;  %v374_v52 = vadd.f32 %v834_v7, %v354_v51  ;;  %v347_v59 = vmul.f32 %v828_v3, %v310_v53 }
  0xc4   :  { %v390_v55 = vmax.f32 %v374_v52, 0.0  ;;  %v280_v56 = vpop.f32.mrf.mxu2  ;;  %v367_v0 = vadd.f32 %v834_v7, %v347_v59 }
  0xc5   :  { %v329_v57 = vpop.f32.mrf.mxu3 }
  0xc6   :  { %v619_v58 = vpack.c.bf16 %v390_v55, %v389_v54  ;;  %v262_v60 = vpop.f32.mrf.mxu0  ;;  %v330_v62 = vadd.f32 %v329_v57, %v280_v56  ;;  %v383_v8 = vmax.f32 %v367_v0, 0.0 }
  0xc7   :  { %v311_v61 = vpop.f32.mrf.mxu1 }
  0xc8   :  { %635 = vst [vmem:[%s895_s4 + $0x28] sm:$0xff] %v619_v58   ;;  %v312_v63 = vadd.f32 %v311_v61, %v262_v60  ;;  %v355_v2 = vmul.f32 %v828_v3, %v330_v62 }
  0xca   :  { %v348_v1 = vmul.f32 %v828_v3, %v312_v63  ;;  %v375_v13 = vadd.f32 %v834_v7, %v355_v2 }
  0xcc   :  { %v368_v4 = vadd.f32 %v834_v7, %v348_v1  ;;  %v282_v5 = vpop.f32.mrf.mxu2  ;;  %v391_v18 = vmax.f32 %v375_v13, 0.0 }
  0xcd   :  { %v331_v6 = vpop.f32.mrf.mxu3 }
  0xce   :  { %v384_v9 = vmax.f32 %v368_v4, 0.0  ;;  %v332_v10 = vadd.f32 %v331_v6, %v282_v5  ;;  %v265_v11 = vpop.f32.mrf.mxu0 }
  0xcf   :  { %v314_v12 = vpop.f32.mrf.mxu1 }
  0xd0   :  { %v604_v14 = vpack.c.bf16 %v384_v9, %v383_v8  ;;  %v356_v15 = vmul.f32 %v828_v3, %v332_v10  ;;  %v315_v17 = vadd.f32 %v314_v12, %v265_v11 }
  0xd2   :  { %632 = vst [vmem:[%s895_s4 + $0x10] sm:$0xff] %v604_v14   ;;  %v376_v16 = vadd.f32 %v834_v7, %v356_v15  ;;  %v349_v23 = vmul.f32 %v828_v3, %v315_v17 }
  0xd4   :  { %v392_v19 = vmax.f32 %v376_v16, 0.0  ;;  %v285_v20 = vpop.f32.mrf.mxu2  ;;  %v369_v28 = vadd.f32 %v834_v7, %v349_v23 }
  0xd5   :  { %v334_v21 = vpop.f32.mrf.mxu3 }
  0xd6   :  { %v624_v22 = vpack.c.bf16 %v392_v19, %v391_v18  ;;  %v267_v24 = vpop.f32.mrf.mxu0  ;;  %v335_v26 = vadd.f32 %v334_v21, %v285_v20  ;;  %v385_v34 = vmax.f32 %v369_v28, 0.0 }
  0xd7   :  { %v316_v25 = vpop.f32.mrf.mxu1 }
  0xd8   :  { %636 = vst [vmem:[%s895_s4 + $0x30] sm:$0xff] %v624_v22   ;;  %v317_v27 = vadd.f32 %v316_v25, %v267_v24  ;;  %v357_v30 = vmul.f32 %v828_v3, %v335_v26 }
  0xda   :  { %v350_v29 = vmul.f32 %v828_v3, %v317_v27  ;;  %v377_v37 = vadd.f32 %v834_v7, %v357_v30 }
  0xdc   :  { %v370_v31 = vadd.f32 %v834_v7, %v350_v29  ;;  %v287_v32 = vpop.f32.mrf.mxu2  ;;  %v393_v41 = vmax.f32 %v377_v37, 0.0 }
  0xdd   :  { %v336_v33 = vpop.f32.mrf.mxu3 }
  0xde   :  { %v386_v35 = vmax.f32 %v370_v31, 0.0  ;;  %v337_v36 = vadd.f32 %v336_v33, %v287_v32 }
  0xe0   :  { %v609_v38 = vpack.c.bf16 %v386_v35, %v385_v34  ;;  %v358_v39 = vmul.f32 %v828_v3, %v337_v36 }
  0xe2   :  { %633 = vst [vmem:[%s895_s4 + $0x18] sm:$0xff] %v609_v38   ;;  %v378_v40 = vadd.f32 %v834_v7, %v358_v39 }
  0xe4   :  { %v394_v42 = vmax.f32 %v378_v40, 0.0 }
  0xe6   :  { %v629_v43 = vpack.c.bf16 %v394_v42, %v393_v41 }
  0xe8   :  { %637 = vst [vmem:[%s895_s4 + $0x38] sm:$0xff] %v629_v43  }

// kernel: _lambda_.32
= control target key start
LH: loop header
LB: loop body
LE: loop exit
PB: predicated region body
PF: predicated region fallthrough
CT: control target
= control target key end

     0   :  { %s1010_s1 = inlined_call_operand.vmem [shape: bf16[256,128], index: 1, kind: input, shape index: {}]   ;;  %s1011_s0 = inlined_call_operand.vmem [shape: bf16[128,256], index: 0, kind: input, shape index: {}]   ;;  %s1012_s2 = inlined_call_operand.vmem [shape: f32[1,128], index: 2, kind: input, shape index: {}]   ;;  %s1013_s3 = inlined_call_operand.vmem [shape: f32[1,128], index: 3, kind: input, shape index: {}]   ;;  %s1014_s4 = inlined_call_operand.vmem [shape: bf16[128,128], index: 4, kind: input, shape index: {}]   ;;  %s1015_s5 = inlined_call_operand.vmem [shape: bf16[128,128], index: 5, kind: output, shape index: {}]  }
   0x1   :  { %v633_v0 = vld [vmem:[%s1010_s1 + $0x38] sm:$0xff]  ;;  %v632_v2 = vld [vmem:[%s1010_s1 + $0x30] sm:$0xff]  ;;  %v631_v4 = vld [vmem:[%s1010_s1 + $0x28] sm:$0xff] }
   0x2   :  { %v641_v1 = vld [vmem:[%s1010_s1 + $0x78] sm:$0xff]  ;;  %244 = vmatpush.bf16.msra.mxu0 %v633_v0  ;;  %728 = vmatpush.bf16.msra.mxu2 %v633_v0  ;;  %v640_v3 = vld [vmem:[%s1010_s1 + $0x70] sm:$0xff]  ;;  %v639_v5 = vld [vmem:[%s1010_s1 + $0x68] sm:$0xff] }
   0x3   :  { %293 = vmatpush.bf16.msra.mxu1 %v641_v1  ;;  %736 = vmatpush.bf16.msra.mxu3 %v641_v1  ;;  %v630_v6 = vld [vmem:[%s1010_s1 + $0x20] sm:$0xff]  ;;  %v629_v8 = vld [vmem:[%s1010_s1 + $0x18] sm:$0xff]  ;;  %v628_v10 = vld [vmem:[%s1010_s1 + $0x10] sm:$0xff] }
   0x4   :  { %v638_v7 = vld [vmem:[%s1010_s1 + $0x60] sm:$0xff]  ;;  %v637_v9 = vld [vmem:[%s1010_s1 + $0x58] sm:$0xff]  ;;  %v636_v11 = vld [vmem:[%s1010_s1 + $0x50] sm:$0xff] }
   0x5   :  { %v627_v12 = vld [vmem:[%s1010_s1 + $0x8] sm:$0xff]  ;;  %v626_v14 = vld [vmem:[%s1010_s1] sm:$0xff]  ;;  %v492_v28 = vld [vmem:[%s1011_s0 + $0x10] sm:$0xf] }
   0x6   :  { %245 = vmatpush.bf16.msra.mxu0 %v632_v2  ;;  %729 = vmatpush.bf16.msra.mxu2 %v632_v2  ;;  %v635_v13 = vld [vmem:[%s1010_s1 + $0x48] sm:$0xff]  ;;  %v634_v15 = vld [vmem:[%s1010_s1 + $0x40] sm:$0xff]  ;;  %v613_v29 = vld [vmem:[%s1011_s0 + $0x14] sm:$0xf0] }
   0x7   :  { %294 = vmatpush.bf16.msra.mxu1 %v640_v3  ;;  %737 = vmatpush.bf16.msra.mxu3 %v640_v3  ;;  %v484_v16 = vld [vmem:[%s1011_s0] sm:$0xf]  ;;  %v611_v17 = vld [vmem:[%s1011_s0 + $0x4] sm:$0xf0]  ;;  %v610_v20 = vld [vmem:[%s1011_s0 + $0x4] sm:$0xf]  ;;  %v493_v36 = vor.u32 %v613_v29, %v492_v28 }
   0x8   :  { %v516_v18 = vld [vmem:[%s1011_s0 + $0x40] sm:$0xf]  ;;  %v619_v19 = vld [vmem:[%s1011_s0 + $0x44] sm:$0xf0]  ;;  %v486_v21 = vld [vmem:[%s1011_s0 + $0x8] sm:$0xf0]  ;;  %v485_v24 = vor.u32 %v611_v17, %v484_v16 }
   0x9   :  { %v618_v22 = vld [vmem:[%s1011_s0 + $0x44] sm:$0xf]  ;;  %v518_v23 = vld [vmem:[%s1011_s0 + $0x48] sm:$0xf0]  ;;  %v517_v25 = vor.u32 %v619_v19, %v516_v18  ;;  %v489_v26 = vor.u32 %v610_v20, %v486_v21  ;;  %v524_v30 = vld [vmem:[%s1011_s0 + $0x50] sm:$0xf] }
   0xa   :  { %246 = vmatpush.bf16.msra.mxu0 %v631_v4  ;;  %730 = vmatpush.bf16.msra.mxu2 %v631_v4  ;;  %v521_v27 = vor.u32 %v618_v22, %v518_v23  ;;  %v621_v31 = vld [vmem:[%s1011_s0 + $0x54] sm:$0xf0]  ;;  %v612_v32 = vld [vmem:[%s1011_s0 + $0x14] sm:$0xf]  ;;  %v494_v33 = vld [vmem:[%s1011_s0 + $0x18] sm:$0xf0] }
   0xb   :  { %295 = vmatpush.bf16.msra.mxu1 %v639_v5  ;;  %738 = vmatpush.bf16.msra.mxu3 %v639_v5  ;;  %v620_v34 = vld [vmem:[%s1011_s0 + $0x54] sm:$0xf]  ;;  %v526_v35 = vld [vmem:[%s1011_s0 + $0x58] sm:$0xf0]  ;;  %v525_v37 = vor.u32 %v621_v31, %v524_v30  ;;  %v497_v38 = vor.u32 %v612_v32, %v494_v33  ;;  %v500_v40 = vld [vmem:[%s1011_s0 + $0x20] sm:$0xf] }
   0xc   :  { %v529_v39 = vor.u32 %v620_v34, %v526_v35  ;;  %v615_v41 = vld [vmem:[%s1011_s0 + $0x24] sm:$0xf0]  ;;  %v532_v42 = vld [vmem:[%s1011_s0 + $0x60] sm:$0xf]  ;;  %v614_v44 = vld [vmem:[%s1011_s0 + $0x24] sm:$0xf] }
   0xd   :  { %v623_v43 = vld [vmem:[%s1011_s0 + $0x64] sm:$0xf0]  ;;  %v502_v45 = vld [vmem:[%s1011_s0 + $0x28] sm:$0xf0]  ;;  %v622_v46 = vld [vmem:[%s1011_s0 + $0x64] sm:$0xf]  ;;  %v501_v48 = vor.u32 %v615_v41, %v500_v40 }
   0xe   :  { %247 = vmatpush.bf16.msra.mxu0 %v630_v6  ;;  %731 = vmatpush.bf16.msra.mxu2 %v630_v6  ;;  %v534_v47 = vld [vmem:[%s1011_s0 + $0x68] sm:$0xf0]  ;;  %v533_v49 = vor.u32 %v623_v43, %v532_v42  ;;  %v505_v50 = vor.u32 %v614_v44, %v502_v45  ;;  %v508_v52 = vld [vmem:[%s1011_s0 + $0x30] sm:$0xf]  ;;  %v617_v53 = vld [vmem:[%s1011_s0 + $0x34] sm:$0xf0] }
   0xf   :  { %296 = vmatpush.bf16.msra.mxu1 %v638_v7  ;;  %739 = vmatpush.bf16.msra.mxu3 %v638_v7  ;;  %v537_v51 = vor.u32 %v622_v46, %v534_v47  ;;  %v540_v54 = vld [vmem:[%s1011_s0 + $0x70] sm:$0xf]  ;;  %v625_v55 = vld [vmem:[%s1011_s0 + $0x74] sm:$0xf0]  ;;  %v616_v56 = vld [vmem:[%s1011_s0 + $0x34] sm:$0xf]  ;;  %v509_v60 = vor.u32 %v617_v53, %v508_v52 }
  0x10   :  { %v510_v57 = vld [vmem:[%s1011_s0 + $0x38] sm:$0xf0]  ;;  %v624_v58 = vld [vmem:[%s1011_s0 + $0x74] sm:$0xf]  ;;  %v541_v61 = vor.u32 %v625_v55, %v540_v54  ;;  %v923_v3 = vld [vmem:[%s1012_s2] ss:$0 sm:$0xff] }
  0x11   :  { %v542_v59 = vld [vmem:[%s1011_s0 + $0x78] sm:$0xf0]  ;;  %v513_v62 = vor.u32 %v616_v56, %v510_v57  ;;  %v929_v5 = vld [vmem:[%s1013_s3] ss:$0 sm:$0xff]  ;;  %v714_v40 = vld [vmem:[%s1014_s4 + $0x8] sm:$0xff]  }
  0x12   :  { %248 = vmatpush.bf16.msra.mxu0 %v629_v8  ;;  %732 = vmatpush.bf16.msra.mxu2 %v629_v8  ;;  %v545_v63 = vor.u32 %v624_v58, %v542_v59  ;;  %v643_v7 = vld [vmem:[%s1014_s4] sm:$0xff]   ;;  %v649_v53 = vunpack.c.h.bf16 %v714_v40  ;;  %v718_v54 = vld [vmem:[%s1014_s4 + $0x28] sm:$0xff]  }
  0x13   :  { %297 = vmatpush.bf16.msra.mxu1 %v637_v9  ;;  %740 = vmatpush.bf16.msra.mxu3 %v637_v9  ;;  %v645_v17 = vunpack.c.h.bf16 %v643_v7  ;;  %v717_v18 = vld [vmem:[%s1014_s4 + $0x20] sm:$0xff]  }
  0x14   :  { %v661_v28 = vunpack.c.h.bf16 %v717_v18 }
  0x16   :  { %249 = vmatpush.bf16.msra.mxu0 %v628_v10  ;;  %733 = vmatpush.bf16.msra.mxu2 %v628_v10 }
  0x17   :  { %298 = vmatpush.bf16.msra.mxu1 %v636_v11  ;;  %741 = vmatpush.bf16.msra.mxu3 %v636_v11 }
  0x1a   :  { %250 = vmatpush.bf16.msra.mxu0 %v627_v12  ;;  %734 = vmatpush.bf16.msra.mxu2 %v627_v12 }
  0x1b   :  { %299 = vmatpush.bf16.msra.mxu1 %v635_v13  ;;  %742 = vmatpush.bf16.msra.mxu3 %v635_v13  ;;  %v644_v13 = vunpack.c.l.bf16 %v643_v7 }
  0x1e   :  { %251 = vmatpush.bf16.msra.mxu0 %v626_v14  ;;  %735 = vmatpush.bf16.msra.mxu2 %v626_v14 }
  0x1f   :  { %300 = vmatpush.bf16.msra.mxu1 %v634_v15  ;;  %743 = vmatpush.bf16.msra.mxu3 %v634_v15 }
  0x21   :  { %252 = vmatmul.bf16.vlgmr.msra.gmra.mxu0 %v485_v24  ;;  %272 = vmatmul.bf16.vlgmr.msra.gmra.mxu2 %v517_v25  ;;  %v660_v24 = vunpack.c.l.bf16 %v717_v18 }
  0x22   :  { %301 = vmatmul.bf16.vlgmr.msra.gmra.mxu1 %v489_v26  ;;  %321 = vmatmul.bf16.vlgmr.msra.gmra.mxu3 %v521_v27 }
  0x31   :  { %257 = vmatmul.bf16.gmra.mxu0 %v493_v36  ;;  %277 = vmatmul.bf16.gmra.mxu2 %v525_v37 }
  0x32   :  { %306 = vmatmul.bf16.gmra.mxu1 %v497_v38  ;;  %326 = vmatmul.bf16.gmra.mxu3 %v529_v39 }
  0x41   :  { %262 = vmatmul.bf16.gmra.mxu0 %v501_v48  ;;  %282 = vmatmul.bf16.gmra.mxu2 %v533_v49  ;;  %v648_v49 = vunpack.c.l.bf16 %v714_v40 }
  0x42   :  { %311 = vmatmul.bf16.gmra.mxu1 %v505_v50  ;;  %331 = vmatmul.bf16.gmra.mxu3 %v537_v51 }
  0x51   :  { %267 = vmatmul.bf16.gmra.mxu0 %v509_v60  ;;  %287 = vmatmul.bf16.gmra.mxu2 %v541_v61  ;;  %v664_v60 = vunpack.c.l.bf16 %v718_v54 }
  0x52   :  { %316 = vmatmul.bf16.gmra.mxu1 %v513_v62  ;;  %336 = vmatmul.bf16.gmra.mxu3 %v545_v63 }
  0x9e   :  { %v253_v0 = vpop.f32.mrf.mxu0 }
  0x9f   :  { %v302_v1 = vpop.f32.mrf.mxu1 }
  0xa0   :  { %v303_v2 = vadd.f32 %v302_v1, %v253_v0  ;;  %v665_v0 = vunpack.c.h.bf16 %v718_v54 }
  0xa2   :  { %v346_v4 = vmul.f32 %v923_v3, %v303_v2 }
  0xa4   :  { %v273_v6 = vpop.f32.mrf.mxu2  ;;  %v366_v12 = vadd.f32 %v929_v5, %v346_v4 }
  0xa5   :  { %v322_v8 = vpop.f32.mrf.mxu3 }
  0xa6   :  { %v323_v9 = vadd.f32 %v322_v8, %v273_v6  ;;  %v255_v10 = vpop.f32.mrf.mxu0  ;;  %v414_v19 = vadd.f32 %v644_v13, %v366_v12 }
  0xa7   :  { %v304_v11 = vpop.f32.mrf.mxu1 }
  0xa8   :  { %v305_v14 = vadd.f32 %v304_v11, %v255_v10  ;;  %v354_v15 = vmul.f32 %v923_v3, %v323_v9  ;;  %v430_v30 = vmax.f32 %v414_v19, 0.0 }
  0xaa   :  { %v347_v16 = vmul.f32 %v923_v3, %v305_v14  ;;  %v374_v23 = vadd.f32 %v929_v5, %v354_v15  ;;  %v715_v14 = vld [vmem:[%s1014_s4 + $0x10] sm:$0xff]  }
  0xac   :  { %v367_v20 = vadd.f32 %v929_v5, %v347_v16  ;;  %v275_v21 = vpop.f32.mrf.mxu2  ;;  %v422_v34 = vadd.f32 %v660_v24, %v374_v23  ;;  %v652_v23 = vunpack.c.l.bf16 %v715_v14 }
  0xad   :  { %v324_v22 = vpop.f32.mrf.mxu3 }
  0xae   :  { %v415_v25 = vadd.f32 %v645_v17, %v367_v20  ;;  %v325_v26 = vadd.f32 %v324_v22, %v275_v21  ;;  %v258_v27 = vpop.f32.mrf.mxu0  ;;  %v438_v42 = vmax.f32 %v422_v34, 0.0 }
  0xaf   :  { %v307_v29 = vpop.f32.mrf.mxu1 }
  0xb0   :  { %v431_v31 = vmax.f32 %v415_v25, 0.0  ;;  %v355_v32 = vmul.f32 %v923_v3, %v325_v26  ;;  %v308_v33 = vadd.f32 %v307_v29, %v258_v27  ;;  %v653_v27 = vunpack.c.h.bf16 %v715_v14 }
  0xb2   :  { %v677_v35 = vpack.c.bf16 %v431_v31, %v430_v30  ;;  %v375_v36 = vadd.f32 %v929_v5, %v355_v32  ;;  %v348_v38 = vmul.f32 %v923_v3, %v308_v33 }
  0xb4   :  { %678 = vst [vmem:[%s1015_s5] sm:$0xff] %v677_v35   ;;  %v423_v37 = vadd.f32 %v661_v28, %v375_v36  ;;  %v278_v39 = vpop.f32.mrf.mxu2  ;;  %v368_v48 = vadd.f32 %v929_v5, %v348_v38  ;;  %v719_v28 = vld [vmem:[%s1014_s4 + $0x30] sm:$0xff]  }
  0xb5   :  { %v327_v41 = vpop.f32.mrf.mxu3  ;;  %v668_v34 = vunpack.c.l.bf16 %v719_v28  ;;  %v669_v38 = vunpack.c.h.bf16 %v719_v28 }
  0xb6   :  { %v439_v43 = vmax.f32 %v423_v37, 0.0  ;;  %v328_v44 = vadd.f32 %v327_v41, %v278_v39  ;;  %v260_v45 = vpop.f32.mrf.mxu0  ;;  %v416_v55 = vadd.f32 %v648_v49, %v368_v48 }
  0xb7   :  { %v309_v46 = vpop.f32.mrf.mxu1 }
  0xb8   :  { %v697_v47 = vpack.c.bf16 %v439_v43, %v438_v42  ;;  %v310_v50 = vadd.f32 %v309_v46, %v260_v45  ;;  %v356_v51 = vmul.f32 %v923_v3, %v328_v44  ;;  %v432_v2 = vmax.f32 %v416_v55, 0.0 }
  0xba   :  { %724 = vst [vmem:[%s1015_s5 + $0x20] sm:$0xff] %v697_v47   ;;  %v349_v52 = vmul.f32 %v923_v3, %v310_v50  ;;  %v376_v59 = vadd.f32 %v929_v5, %v356_v51  ;;  %v716_v50 = vld [vmem:[%s1014_s4 + $0x18] sm:$0xff]  }
  0xbc   :  { %v369_v56 = vadd.f32 %v929_v5, %v349_v52  ;;  %v280_v57 = vpop.f32.mrf.mxu2  ;;  %v424_v8 = vadd.f32 %v664_v60, %v376_v59  ;;  %v656_v59 = vunpack.c.l.bf16 %v716_v50 }
  0xbd   :  { %v329_v58 = vpop.f32.mrf.mxu3 }
  0xbe   :  { %v417_v61 = vadd.f32 %v649_v53, %v369_v56  ;;  %v330_v62 = vadd.f32 %v329_v58, %v280_v57  ;;  %v263_v63 = vpop.f32.mrf.mxu0  ;;  %v440_v16 = vmax.f32 %v424_v8, 0.0 }
  0xbf   :  { %v312_v1 = vpop.f32.mrf.mxu1 }
  0xc0   :  { %v433_v4 = vmax.f32 %v417_v61, 0.0  ;;  %v357_v6 = vmul.f32 %v923_v3, %v330_v62  ;;  %v313_v7 = vadd.f32 %v312_v1, %v263_v63  ;;  %v657_v63 = vunpack.c.h.bf16 %v716_v50 }
  0xc2   :  { %v682_v9 = vpack.c.bf16 %v433_v4, %v432_v2  ;;  %v377_v10 = vadd.f32 %v929_v5, %v357_v6  ;;  %v350_v12 = vmul.f32 %v923_v3, %v313_v7 }
  0xc4   :  { %721 = vst [vmem:[%s1015_s5 + $0x8] sm:$0xff] %v682_v9   ;;  %v425_v11 = vadd.f32 %v665_v0, %v377_v10  ;;  %v283_v13 = vpop.f32.mrf.mxu2  ;;  %v370_v22 = vadd.f32 %v929_v5, %v350_v12  ;;  %v720_v0 = vld [vmem:[%s1014_s4 + $0x38] sm:$0xff]  }
  0xc5   :  { %v332_v15 = vpop.f32.mrf.mxu3  ;;  %v672_v8 = vunpack.c.l.bf16 %v720_v0  ;;  %v673_v14 = vunpack.c.h.bf16 %v720_v0 }
  0xc6   :  { %v441_v17 = vmax.f32 %v425_v11, 0.0  ;;  %v333_v18 = vadd.f32 %v332_v15, %v283_v13  ;;  %v265_v19 = vpop.f32.mrf.mxu0  ;;  %v418_v29 = vadd.f32 %v652_v23, %v370_v22 }
  0xc7   :  { %v314_v20 = vpop.f32.mrf.mxu1 }
  0xc8   :  { %v702_v21 = vpack.c.bf16 %v441_v17, %v440_v16  ;;  %v315_v24 = vadd.f32 %v314_v20, %v265_v19  ;;  %v358_v25 = vmul.f32 %v923_v3, %v333_v18  ;;  %v434_v40 = vmax.f32 %v418_v29, 0.0 }
  0xca   :  { %725 = vst [vmem:[%s1015_s5 + $0x28] sm:$0xff] %v702_v21   ;;  %v351_v26 = vmul.f32 %v923_v3, %v315_v24  ;;  %v378_v33 = vadd.f32 %v929_v5, %v358_v25 }
  0xcc   :  { %v371_v30 = vadd.f32 %v929_v5, %v351_v26  ;;  %v285_v31 = vpop.f32.mrf.mxu2  ;;  %v426_v44 = vadd.f32 %v668_v34, %v378_v33 }
  0xcd   :  { %v334_v32 = vpop.f32.mrf.mxu3 }
  0xce   :  { %v419_v35 = vadd.f32 %v653_v27, %v371_v30  ;;  %v335_v36 = vadd.f32 %v334_v32, %v285_v31  ;;  %v268_v37 = vpop.f32.mrf.mxu0  ;;  %v442_v52 = vmax.f32 %v426_v44, 0.0 }
  0xcf   :  { %v317_v39 = vpop.f32.mrf.mxu1 }
  0xd0   :  { %v435_v41 = vmax.f32 %v419_v35, 0.0  ;;  %v359_v42 = vmul.f32 %v923_v3, %v335_v36  ;;  %v318_v43 = vadd.f32 %v317_v39, %v268_v37 }
  0xd2   :  { %v687_v45 = vpack.c.bf16 %v435_v41, %v434_v40  ;;  %v379_v46 = vadd.f32 %v929_v5, %v359_v42  ;;  %v352_v48 = vmul.f32 %v923_v3, %v318_v43 }
  0xd4   :  { %722 = vst [vmem:[%s1015_s5 + $0x10] sm:$0xff] %v687_v45   ;;  %v427_v47 = vadd.f32 %v669_v38, %v379_v46  ;;  %v288_v49 = vpop.f32.mrf.mxu2  ;;  %v372_v58 = vadd.f32 %v929_v5, %v352_v48 }
  0xd5   :  { %v337_v51 = vpop.f32.mrf.mxu3 }
  0xd6   :  { %v443_v53 = vmax.f32 %v427_v47, 0.0  ;;  %v338_v54 = vadd.f32 %v337_v51, %v288_v49  ;;  %v270_v55 = vpop.f32.mrf.mxu0  ;;  %v420_v1 = vadd.f32 %v656_v59, %v372_v58 }
  0xd7   :  { %v319_v56 = vpop.f32.mrf.mxu1 }
  0xd8   :  { %v707_v57 = vpack.c.bf16 %v443_v53, %v442_v52  ;;  %v320_v60 = vadd.f32 %v319_v56, %v270_v55  ;;  %v360_v61 = vmul.f32 %v923_v3, %v338_v54  ;;  %v436_v11 = vmax.f32 %v420_v1, 0.0 }
  0xda   :  { %726 = vst [vmem:[%s1015_s5 + $0x30] sm:$0xff] %v707_v57   ;;  %v353_v62 = vmul.f32 %v923_v3, %v320_v60  ;;  %v380_v7 = vadd.f32 %v929_v5, %v360_v61 }
  0xdc   :  { %v373_v2 = vadd.f32 %v929_v5, %v353_v62  ;;  %v290_v4 = vpop.f32.mrf.mxu2  ;;  %v428_v15 = vadd.f32 %v672_v8, %v380_v7 }
  0xdd   :  { %v339_v6 = vpop.f32.mrf.mxu3 }
  0xde   :  { %v421_v9 = vadd.f32 %v657_v63, %v373_v2  ;;  %v340_v10 = vadd.f32 %v339_v6, %v290_v4  ;;  %v444_v19 = vmax.f32 %v428_v15, 0.0 }
  0xe0   :  { %v437_v12 = vmax.f32 %v421_v9, 0.0  ;;  %v361_v13 = vmul.f32 %v923_v3, %v340_v10 }
  0xe2   :  { %v692_v16 = vpack.c.bf16 %v437_v12, %v436_v11  ;;  %v381_v17 = vadd.f32 %v929_v5, %v361_v13 }
  0xe4   :  { %723 = vst [vmem:[%s1015_s5 + $0x18] sm:$0xff] %v692_v16   ;;  %v429_v18 = vadd.f32 %v673_v14, %v381_v17 }
  0xe6   :  { %v445_v20 = vmax.f32 %v429_v18, 0.0 }
  0xe8   :  { %v712_v21 = vpack.c.bf16 %v445_v20, %v444_v19 }
  0xea   :  { %727 = vst [vmem:[%s1015_s5 + $0x38] sm:$0xff] %v712_v21  }

// kernel: _lambda_.36
= control target key start
LH: loop header
LB: loop body
LE: loop exit
PB: predicated region body
PF: predicated region fallthrough
CT: control target
= control target key end

     0   :  { %s1057_s1 = inlined_call_operand.vmem [shape: bf16[512,128], index: 1, kind: input, shape index: {}]   ;;  %s1058_s0 = inlined_call_operand.vmem [shape: bf16[64,512], index: 0, kind: input, shape index: {}]   ;;  %s1059_s2 = inlined_call_operand.vmem [shape: f32[1,128], index: 2, kind: input, shape index: {}]   ;;  %s1060_s3 = inlined_call_operand.vmem [shape: f32[1,128], index: 3, kind: input, shape index: {}]   ;;  %s1061_s4 = inlined_call_operand.vmem [shape: bf16[64,128], index: 4, kind: output, shape index: {}]  }
   0x1   :  { %v752_v0 = vld [vmem:[%s1057_s1 + $0x38] sm:$0xff]  ;;  %v751_v4 = vld [vmem:[%s1057_s1 + $0x30] sm:$0xff]  ;;  %v750_v8 = vld [vmem:[%s1057_s1 + $0x28] sm:$0xff] }
   0x2   :  { %v760_v1 = vld [vmem:[%s1057_s1 + $0x78] sm:$0xff]  ;;  %369 = vmatpush.bf16.msra.mxu0 %v752_v0  ;;  %v759_v5 = vld [vmem:[%s1057_s1 + $0x70] sm:$0xff]  ;;  %v758_v9 = vld [vmem:[%s1057_s1 + $0x68] sm:$0xff] }
   0x3   :  { %v768_v2 = vld [vmem:[%s1057_s1 + $0xb8] sm:$0xff]  ;;  %398 = vmatpush.bf16.msra.mxu1 %v760_v1  ;;  %v767_v6 = vld [vmem:[%s1057_s1 + $0xb0] sm:$0xff]  ;;  %v766_v10 = vld [vmem:[%s1057_s1 + $0xa8] sm:$0xff] }
   0x4   :  { %v776_v3 = vld [vmem:[%s1057_s1 + $0xf8] sm:$0xff]  ;;  %427 = vmatpush.bf16.msra.mxu2 %v768_v2  ;;  %v775_v7 = vld [vmem:[%s1057_s1 + $0xf0] sm:$0xff]  ;;  %v774_v11 = vld [vmem:[%s1057_s1 + $0xe8] sm:$0xff] }
   0x5   :  { %456 = vmatpush.bf16.msra.mxu3 %v776_v3  ;;  %v749_v12 = vld [vmem:[%s1057_s1 + $0x20] sm:$0xff]  ;;  %v748_v16 = vld [vmem:[%s1057_s1 + $0x18] sm:$0xff]  ;;  %v747_v20 = vld [vmem:[%s1057_s1 + $0x10] sm:$0xff] }
   0x6   :  { %370 = vmatpush.bf16.msra.mxu0 %v751_v4  ;;  %v757_v13 = vld [vmem:[%s1057_s1 + $0x60] sm:$0xff]  ;;  %v756_v17 = vld [vmem:[%s1057_s1 + $0x58] sm:$0xff]  ;;  %v755_v21 = vld [vmem:[%s1057_s1 + $0x50] sm:$0xff] }
   0x7   :  { %399 = vmatpush.bf16.msra.mxu1 %v759_v5  ;;  %v765_v14 = vld [vmem:[%s1057_s1 + $0xa0] sm:$0xff]  ;;  %v764_v18 = vld [vmem:[%s1057_s1 + $0x98] sm:$0xff]  ;;  %v763_v22 = vld [vmem:[%s1057_s1 + $0x90] sm:$0xff] }
   0x8   :  { %428 = vmatpush.bf16.msra.mxu2 %v767_v6  ;;  %v773_v15 = vld [vmem:[%s1057_s1 + $0xe0] sm:$0xff]  ;;  %v772_v19 = vld [vmem:[%s1057_s1 + $0xd8] sm:$0xff]  ;;  %v771_v23 = vld [vmem:[%s1057_s1 + $0xd0] sm:$0xff] }
   0x9   :  { %457 = vmatpush.bf16.msra.mxu3 %v775_v7  ;;  %v746_v24 = vld [vmem:[%s1057_s1 + $0x8] sm:$0xff]  ;;  %v745_v28 = vld [vmem:[%s1057_s1] sm:$0xff]  ;;  %v731_v33 = vld [vmem:[%s1058_s0 + $0xc] sm:$0xf0] }
   0xa   :  { %371 = vmatpush.bf16.msra.mxu0 %v750_v8  ;;  %v754_v25 = vld [vmem:[%s1057_s1 + $0x48] sm:$0xff]  ;;  %v753_v29 = vld [vmem:[%s1057_s1 + $0x40] sm:$0xff]  ;;  %v541_v35 = vld [vmem:[%s1058_s0 + $0x10] sm:$0xf0] }
   0xb   :  { %400 = vmatpush.bf16.msra.mxu1 %v758_v9  ;;  %v762_v26 = vld [vmem:[%s1057_s1 + $0x88] sm:$0xff]  ;;  %v761_v30 = vld [vmem:[%s1057_s1 + $0x80] sm:$0xff]  ;;  %v732_v37 = vld [vmem:[%s1058_s0 + $0x14] sm:$0xf0] }
   0xc   :  { %429 = vmatpush.bf16.msra.mxu2 %v766_v10  ;;  %v770_v27 = vld [vmem:[%s1057_s1 + $0xc8] sm:$0xff]  ;;  %v769_v31 = vld [vmem:[%s1057_s1 + $0xc0] sm:$0xff]  ;;  %v549_v39 = vld [vmem:[%s1058_s0 + $0x18] sm:$0xf0] }
   0xd   :  { %458 = vmatpush.bf16.msra.mxu3 %v774_v11  ;;  %v539_v32 = vld [vmem:[%s1058_s0] sm:$0xf]  ;;  %v729_v34 = vld [vmem:[%s1058_s0 + $0x4] sm:$0xf]  ;;  %v547_v36 = vld [vmem:[%s1058_s0 + $0x8] sm:$0xf] }
   0xe   :  { %372 = vmatpush.bf16.msra.mxu0 %v749_v12  ;;  %v730_v38 = vld [vmem:[%s1058_s0 + $0xc] sm:$0xf]  ;;  %v540_v40 = vor.u32 %v731_v33, %v539_v32  ;;  %v544_v41 = vor.u32 %v729_v34, %v541_v35  ;;  %v548_v42 = vor.u32 %v732_v37, %v547_v36  ;;  %v555_v44 = vld [vmem:[%s1058_s0 + $0x20] sm:$0xf]  ;;  %v735_v45 = vld [vmem:[%s1058_s0 + $0x2c] sm:$0xf0] }
   0xf   :  { %401 = vmatpush.bf16.msra.mxu1 %v757_v13  ;;  %v552_v43 = vor.u32 %v730_v38, %v549_v39  ;;  %v733_v46 = vld [vmem:[%s1058_s0 + $0x24] sm:$0xf]  ;;  %v557_v47 = vld [vmem:[%s1058_s0 + $0x30] sm:$0xf0]  ;;  %v563_v48 = vld [vmem:[%s1058_s0 + $0x28] sm:$0xf]  ;;  %v556_v52 = vor.u32 %v735_v45, %v555_v44 }
  0x10   :  { %430 = vmatpush.bf16.msra.mxu2 %v765_v14  ;;  %v736_v49 = vld [vmem:[%s1058_s0 + $0x34] sm:$0xf0]  ;;  %v734_v50 = vld [vmem:[%s1058_s0 + $0x2c] sm:$0xf]  ;;  %v565_v51 = vld [vmem:[%s1058_s0 + $0x38] sm:$0xf0]  ;;  %v560_v53 = vor.u32 %v733_v46, %v557_v47 }
  0x11   :  { %459 = vmatpush.bf16.msra.mxu3 %v773_v15  ;;  %v564_v54 = vor.u32 %v736_v49, %v563_v48  ;;  %v568_v55 = vor.u32 %v734_v50, %v565_v51  ;;  %v571_v56 = vld [vmem:[%s1058_s0 + $0x40] sm:$0xf]  ;;  %v739_v57 = vld [vmem:[%s1058_s0 + $0x4c] sm:$0xf0]  ;;  %v737_v58 = vld [vmem:[%s1058_s0 + $0x44] sm:$0xf] }
  0x12   :  { %373 = vmatpush.bf16.msra.mxu0 %v748_v16  ;;  %v573_v59 = vld [vmem:[%s1058_s0 + $0x50] sm:$0xf0]  ;;  %v579_v60 = vld [vmem:[%s1058_s0 + $0x48] sm:$0xf]  ;;  %v740_v61 = vld [vmem:[%s1058_s0 + $0x54] sm:$0xf0]  ;;  %v572_v0 = vor.u32 %v739_v57, %v571_v56 }
  0x13   :  { %402 = vmatpush.bf16.msra.mxu1 %v756_v17  ;;  %v738_v62 = vld [vmem:[%s1058_s0 + $0x4c] sm:$0xf]  ;;  %v581_v63 = vld [vmem:[%s1058_s0 + $0x58] sm:$0xf0]  ;;  %v576_v1 = vor.u32 %v737_v58, %v573_v59  ;;  %v580_v2 = vor.u32 %v740_v61, %v579_v60  ;;  %v587_v4 = vld [vmem:[%s1058_s0 + $0x60] sm:$0xf] }
  0x14   :  { %431 = vmatpush.bf16.msra.mxu2 %v764_v18  ;;  %v584_v3 = vor.u32 %v738_v62, %v581_v63  ;;  %v743_v5 = vld [vmem:[%s1058_s0 + $0x6c] sm:$0xf0]  ;;  %v741_v6 = vld [vmem:[%s1058_s0 + $0x64] sm:$0xf]  ;;  %v589_v7 = vld [vmem:[%s1058_s0 + $0x70] sm:$0xf0] }
  0x15   :  { %460 = vmatpush.bf16.msra.mxu3 %v772_v19  ;;  %v595_v8 = vld [vmem:[%s1058_s0 + $0x68] sm:$0xf]  ;;  %v744_v9 = vld [vmem:[%s1058_s0 + $0x74] sm:$0xf0]  ;;  %v742_v10 = vld [vmem:[%s1058_s0 + $0x6c] sm:$0xf]  ;;  %v588_v12 = vor.u32 %v743_v5, %v587_v4  ;;  %v592_v13 = vor.u32 %v741_v6, %v589_v7 }
  0x16   :  { %374 = vmatpush.bf16.msra.mxu0 %v747_v20  ;;  %v597_v11 = vld [vmem:[%s1058_s0 + $0x78] sm:$0xf0]  ;;  %v596_v14 = vor.u32 %v744_v9, %v595_v8 }
  0x17   :  { %403 = vmatpush.bf16.msra.mxu1 %v755_v21  ;;  %v600_v15 = vor.u32 %v742_v10, %v597_v11 }
  0x18   :  { %432 = vmatpush.bf16.msra.mxu2 %v763_v22 }
  0x19   :  { %461 = vmatpush.bf16.msra.mxu3 %v771_v23 }
  0x1a   :  { %375 = vmatpush.bf16.msra.mxu0 %v746_v24 }
  0x1b   :  { %404 = vmatpush.bf16.msra.mxu1 %v754_v25  ;;  %v1022_v25 = vld [vmem:[%s1059_s2] ss:$0 sm:$0xff] }
  0x1c   :  { %433 = vmatpush.bf16.msra.mxu2 %v762_v26 }
  0x1d   :  { %462 = vmatpush.bf16.msra.mxu3 %v770_v27 }
  0x1e   :  { %376 = vmatpush.bf16.msra.mxu0 %v745_v28 }
  0x1f   :  { %405 = vmatpush.bf16.msra.mxu1 %v753_v29 }
  0x20   :  { %434 = vmatpush.bf16.msra.mxu2 %v761_v30  ;;  %v1028_v30 = vld [vmem:[%s1060_s3] ss:$0 sm:$0xff] }
  0x21   :  { %463 = vmatpush.bf16.msra.mxu3 %v769_v31  ;;  %377 = vmatmul.bf16.vlgmr.msra.gmra.mxu0 %v540_v40 }
  0x22   :  { %406 = vmatmul.bf16.vlgmr.msra.gmra.mxu1 %v544_v41 }
  0x23   :  { %435 = vmatmul.bf16.vlgmr.msra.gmra.mxu2 %v548_v42 }
  0x24   :  { %464 = vmatmul.bf16.vlgmr.msra.gmra.mxu3 %v552_v43 }
  0x31   :  { %382 = vmatmul.bf16.gmra.mxu0 %v556_v52 }
  0x32   :  { %411 = vmatmul.bf16.gmra.mxu1 %v560_v53 }
  0x33   :  { %440 = vmatmul.bf16.gmra.mxu2 %v564_v54 }
  0x34   :  { %469 = vmatmul.bf16.gmra.mxu3 %v568_v55 }
  0x41   :  { %387 = vmatmul.bf16.gmra.mxu0 %v572_v0 }
  0x42   :  { %416 = vmatmul.bf16.gmra.mxu1 %v576_v1 }
  0x43   :  { %445 = vmatmul.bf16.gmra.mxu2 %v580_v2 }
  0x44   :  { %474 = vmatmul.bf16.gmra.mxu3 %v584_v3 }
  0x51   :  { %392 = vmatmul.bf16.gmra.mxu0 %v588_v12 }
  0x52   :  { %421 = vmatmul.bf16.gmra.mxu1 %v592_v13 }
  0x53   :  { %450 = vmatmul.bf16.gmra.mxu2 %v596_v14 }
  0x54   :  { %479 = vmatmul.bf16.gmra.mxu3 %v600_v15 }
  0x9e   :  { %v378_v16 = vpop.f32.mrf.mxu0 }
  0x9f   :  { %v407_v17 = vpop.f32.mrf.mxu1 }
  0xa0   :  { %v408_v18 = vadd.f32 %v407_v17, %v378_v16 }
  0xa6   :  { %v436_v19 = vpop.f32.mrf.mxu2  ;;  %v380_v22 = vpop.f32.mrf.mxu0 }
  0xa7   :  { %v465_v20 = vpop.f32.mrf.mxu3  ;;  %v437_v21 = vadd.f32 %v436_v19, %v408_v18  ;;  %v409_v23 = vpop.f32.mrf.mxu1 }
  0xa8   :  { %v410_v26 = vadd.f32 %v409_v23, %v380_v22 }
  0xa9   :  { %v466_v24 = vadd.f32 %v465_v20, %v437_v21 }
  0xab   :  { %v489_v29 = vmul.f32 %v1022_v25, %v466_v24 }
  0xad   :  { %v501_v35 = vadd.f32 %v1028_v30, %v489_v29 }
  0xae   :  { %v438_v27 = vpop.f32.mrf.mxu2  ;;  %v383_v32 = vpop.f32.mrf.mxu0 }
  0xaf   :  { %v467_v28 = vpop.f32.mrf.mxu3  ;;  %v439_v31 = vadd.f32 %v438_v27, %v410_v26  ;;  %v412_v33 = vpop.f32.mrf.mxu1  ;;  %v509_v41 = vmax.f32 %v501_v35, 0.0 }
  0xb0   :  { %v413_v37 = vadd.f32 %v412_v33, %v383_v32 }
  0xb1   :  { %v468_v34 = vadd.f32 %v467_v28, %v439_v31 }
  0xb3   :  { %v490_v36 = vmul.f32 %v1022_v25, %v468_v34 }
  0xb5   :  { %v502_v38 = vadd.f32 %v1028_v30, %v490_v36 }
  0xb6   :  { %v441_v39 = vpop.f32.mrf.mxu2  ;;  %v385_v44 = vpop.f32.mrf.mxu0 }
  0xb7   :  { %v470_v40 = vpop.f32.mrf.mxu3  ;;  %v510_v42 = vmax.f32 %v502_v38, 0.0  ;;  %v442_v43 = vadd.f32 %v441_v39, %v413_v37  ;;  %v414_v45 = vpop.f32.mrf.mxu1 }
  0xb8   :  { %v415_v48 = vadd.f32 %v414_v45, %v385_v44 }
  0xb9   :  { %v780_v46 = vpack.c.bf16 %v510_v42, %v509_v41  ;;  %v471_v47 = vadd.f32 %v470_v40, %v442_v43 }
  0xbb   :  { %781 = vst [vmem:[%s1061_s4] sm:$0xff] %v780_v46   ;;  %v491_v51 = vmul.f32 %v1022_v25, %v471_v47 }
  0xbd   :  { %v503_v56 = vadd.f32 %v1028_v30, %v491_v51 }
  0xbe   :  { %v443_v49 = vpop.f32.mrf.mxu2  ;;  %v388_v53 = vpop.f32.mrf.mxu0 }
  0xbf   :  { %v472_v50 = vpop.f32.mrf.mxu3  ;;  %v444_v52 = vadd.f32 %v443_v49, %v415_v48  ;;  %v417_v54 = vpop.f32.mrf.mxu1  ;;  %v511_v62 = vmax.f32 %v503_v56, 0.0 }
  0xc0   :  { %v418_v58 = vadd.f32 %v417_v54, %v388_v53 }
  0xc1   :  { %v473_v55 = vadd.f32 %v472_v50, %v444_v52 }
  0xc3   :  { %v492_v57 = vmul.f32 %v1022_v25, %v473_v55 }
  0xc5   :  { %v504_v59 = vadd.f32 %v1028_v30, %v492_v57 }
  0xc6   :  { %v446_v60 = vpop.f32.mrf.mxu2  ;;  %v390_v1 = vpop.f32.mrf.mxu0 }
  0xc7   :  { %v475_v61 = vpop.f32.mrf.mxu3  ;;  %v512_v63 = vmax.f32 %v504_v59, 0.0  ;;  %v447_v0 = vadd.f32 %v446_v60, %v418_v58  ;;  %v419_v2 = vpop.f32.mrf.mxu1 }
  0xc8   :  { %v420_v5 = vadd.f32 %v419_v2, %v390_v1 }
  0xc9   :  { %v785_v3 = vpack.c.bf16 %v512_v63, %v511_v62  ;;  %v476_v4 = vadd.f32 %v475_v61, %v447_v0 }
  0xcb   :  { %797 = vst [vmem:[%s1061_s4 + $0x8] sm:$0xff] %v785_v3   ;;  %v493_v8 = vmul.f32 %v1022_v25, %v476_v4 }
  0xcd   :  { %v505_v13 = vadd.f32 %v1028_v30, %v493_v8 }
  0xce   :  { %v448_v6 = vpop.f32.mrf.mxu2  ;;  %v393_v10 = vpop.f32.mrf.mxu0 }
  0xcf   :  { %v477_v7 = vpop.f32.mrf.mxu3  ;;  %v449_v9 = vadd.f32 %v448_v6, %v420_v5  ;;  %v422_v11 = vpop.f32.mrf.mxu1  ;;  %v513_v19 = vmax.f32 %v505_v13, 0.0 }
  0xd0   :  { %v423_v15 = vadd.f32 %v422_v11, %v393_v10 }
  0xd1   :  { %v478_v12 = vadd.f32 %v477_v7, %v449_v9 }
  0xd3   :  { %v494_v14 = vmul.f32 %v1022_v25, %v478_v12 }
  0xd5   :  { %v506_v16 = vadd.f32 %v1028_v30, %v494_v14 }
  0xd6   :  { %v451_v17 = vpop.f32.mrf.mxu2  ;;  %v395_v23 = vpop.f32.mrf.mxu0 }
  0xd7   :  { %v480_v18 = vpop.f32.mrf.mxu3  ;;  %v514_v20 = vmax.f32 %v506_v16, 0.0  ;;  %v452_v21 = vadd.f32 %v451_v17, %v423_v15  ;;  %v424_v24 = vpop.f32.mrf.mxu1 }
  0xd8   :  { %v425_v27 = vadd.f32 %v424_v24, %v395_v23 }
  0xd9   :  { %v790_v22 = vpack.c.bf16 %v514_v20, %v513_v19  ;;  %v481_v26 = vadd.f32 %v480_v18, %v452_v21 }
  0xdb   :  { %798 = vst [vmem:[%s1061_s4 + $0x10] sm:$0xff] %v790_v22   ;;  %v495_v29 = vmul.f32 %v1022_v25, %v481_v26 }
  0xdd   :  { %v507_v34 = vadd.f32 %v1028_v30, %v495_v29 }
  0xde   :  { %v453_v28 = vpop.f32.mrf.mxu2 }
  0xdf   :  { %v454_v31 = vadd.f32 %v453_v28, %v425_v27  ;;  %v482_v32 = vpop.f32.mrf.mxu3  ;;  %v515_v37 = vmax.f32 %v507_v34, 0.0 }
  0xe1   :  { %v483_v33 = vadd.f32 %v482_v32, %v454_v31 }
  0xe3   :  { %v496_v35 = vmul.f32 %v1022_v25, %v483_v33 }
  0xe5   :  { %v508_v36 = vadd.f32 %v1028_v30, %v496_v35 }
  0xe7   :  { %v516_v38 = vmax.f32 %v508_v36, 0.0 }
  0xe9   :  { %v795_v39 = vpack.c.bf16 %v516_v38, %v515_v37 }
  0xeb   :  { %799 = vst [vmem:[%s1061_s4 + $0x18] sm:$0xff] %v795_v39  }

// kernel: _lambda_.37
= control target key start
LH: loop header
LB: loop body
LE: loop exit
PB: predicated region body
PF: predicated region fallthrough
CT: control target
= control target key end

     0   :  { %s374_s1 = inlined_call_operand.vmem [shape: bf16[128,128], index: 1, kind: input, shape index: {}]   ;;  %s375_s2 = inlined_call_operand.vmem [shape: f32[1,128], index: 2, kind: input, shape index: {}]   ;;  %s376_s3 = inlined_call_operand.vmem [shape: f32[1,128], index: 3, kind: input, shape index: {}]   ;;  %s377_s0 = inlined_call_operand.vmem [shape: bf16[64,128], index: 0, kind: input, shape index: {}]   ;;  %s378_s4 = inlined_call_operand.vmem [shape: bf16[64,128], index: 4, kind: output, shape index: {}]  }
   0x1   :  { %v245_v0 = vld [vmem:[%s374_s1 + $0x38] sm:$0xff]  ;;  %v244_v1 = vld [vmem:[%s374_s1 + $0x30] sm:$0xff]  ;;  %v243_v2 = vld [vmem:[%s374_s1 + $0x28] sm:$0xff] }
   0x2   :  { %113 = vmatpush.bf16.msra.mxu0 %v245_v0  ;;  %269 = vmatpush.bf16.msra.mxu1 %v245_v0  ;;  %v242_v3 = vld [vmem:[%s374_s1 + $0x20] sm:$0xff]  ;;  %v241_v4 = vld [vmem:[%s374_s1 + $0x18] sm:$0xff]  ;;  %v240_v5 = vld [vmem:[%s374_s1 + $0x10] sm:$0xff] }
   0x3   :  { %270 = vmatpush.bf16.msra.mxu2 %v245_v0  ;;  %271 = vmatpush.bf16.msra.mxu3 %v245_v0  ;;  %v239_v6 = vld [vmem:[%s374_s1 + $0x8] sm:$0xff]  ;;  %v238_v7 = vld [vmem:[%s374_s1] sm:$0xff]  ;;  %v236_v10 = vld [vmem:[%s377_s0 + $0x10] sm:$0xff] }
   0x4   :  { %v234_v8 = vld [vmem:[%s377_s0] sm:$0xff]  ;;  %v235_v9 = vld [vmem:[%s377_s0 + $0x8] sm:$0xff]  ;;  %v237_v11 = vld [vmem:[%s377_s0 + $0x18] sm:$0xff] }
   0x5   :  { %v293_v14 = vld [vmem:[%s375_s2] ss:$0 sm:$0xff] }
   0x6   :  { %114 = vmatpush.bf16.msra.mxu0 %v244_v1  ;;  %272 = vmatpush.bf16.msra.mxu1 %v244_v1  ;;  %v294_v16 = vld [vmem:[%s376_s3] ss:$0 sm:$0xff] }
   0x7   :  { %273 = vmatpush.bf16.msra.mxu2 %v244_v1  ;;  %274 = vmatpush.bf16.msra.mxu3 %v244_v1 }
   0xa   :  { %115 = vmatpush.bf16.msra.mxu0 %v243_v2  ;;  %275 = vmatpush.bf16.msra.mxu1 %v243_v2 }
   0xb   :  { %276 = vmatpush.bf16.msra.mxu2 %v243_v2  ;;  %277 = vmatpush.bf16.msra.mxu3 %v243_v2 }
   0xe   :  { %116 = vmatpush.bf16.msra.mxu0 %v242_v3  ;;  %278 = vmatpush.bf16.msra.mxu1 %v242_v3 }
   0xf   :  { %279 = vmatpush.bf16.msra.mxu2 %v242_v3  ;;  %280 = vmatpush.bf16.msra.mxu3 %v242_v3 }
  0x12   :  { %117 = vmatpush.bf16.msra.mxu0 %v241_v4  ;;  %281 = vmatpush.bf16.msra.mxu1 %v241_v4 }
  0x13   :  { %282 = vmatpush.bf16.msra.mxu2 %v241_v4  ;;  %283 = vmatpush.bf16.msra.mxu3 %v241_v4 }
  0x16   :  { %118 = vmatpush.bf16.msra.mxu0 %v240_v5  ;;  %284 = vmatpush.bf16.msra.mxu1 %v240_v5 }
  0x17   :  { %285 = vmatpush.bf16.msra.mxu2 %v240_v5  ;;  %286 = vmatpush.bf16.msra.mxu3 %v240_v5 }
  0x1a   :  { %119 = vmatpush.bf16.msra.mxu0 %v239_v6  ;;  %287 = vmatpush.bf16.msra.mxu1 %v239_v6 }
  0x1b   :  { %288 = vmatpush.bf16.msra.mxu2 %v239_v6  ;;  %289 = vmatpush.bf16.msra.mxu3 %v239_v6 }
  0x1e   :  { %120 = vmatpush.bf16.msra.mxu0 %v238_v7  ;;  %290 = vmatpush.bf16.msra.mxu1 %v238_v7 }
  0x1f   :  { %291 = vmatpush.bf16.msra.mxu2 %v238_v7  ;;  %292 = vmatpush.bf16.msra.mxu3 %v238_v7 }
  0x21   :  { %121 = vmatmul.bf16.vlgmr.msra.gmra.mxu0 %v234_v8  ;;  %126 = vmatmul.bf16.vlgmr.msra.gmra.mxu1 %v235_v9 }
  0x22   :  { %131 = vmatmul.bf16.vlgmr.msra.gmra.mxu2 %v236_v10  ;;  %136 = vmatmul.bf16.vlgmr.msra.gmra.mxu3 %v237_v11 }
  0x9e   :  { %v122_v12 = vpop.f32.mrf.mxu0  ;;  %v127_v13 = vpop.f32.mrf.mxu1 }
  0x9f   :  { %v146_v15 = vmul.f32 %v293_v14, %v122_v12  ;;  %v148_v17 = vmul.f32 %v293_v14, %v127_v13 }
  0xa1   :  { %v158_v24 = vadd.f32 %v294_v16, %v146_v15  ;;  %v160_v25 = vadd.f32 %v294_v16, %v148_v17 }
  0xa5   :  { %v132_v18 = vpop.f32.mrf.mxu2  ;;  %v137_v19 = vpop.f32.mrf.mxu3 }
  0xa6   :  { %v124_v20 = vpop.f32.mrf.mxu0  ;;  %v129_v21 = vpop.f32.mrf.mxu1  ;;  %v150_v30 = vmul.f32 %v293_v14, %v132_v18  ;;  %v152_v31 = vmul.f32 %v293_v14, %v137_v19 }
  0xa7   :  { %v147_v22 = vmul.f32 %v293_v14, %v124_v20  ;;  %v149_v23 = vmul.f32 %v293_v14, %v129_v21 }
  0xa8   :  { %v162_v36 = vadd.f32 %v294_v16, %v150_v30  ;;  %v164_v37 = vadd.f32 %v294_v16, %v152_v31 }
  0xa9   :  { %v159_v26 = vadd.f32 %v294_v16, %v147_v22  ;;  %v161_v27 = vadd.f32 %v294_v16, %v149_v23 }
  0xab   :  { %v249_v28 = vpack.c.bf16 %v159_v26, %v158_v24  ;;  %v254_v29 = vpack.c.bf16 %v161_v27, %v160_v25 }
  0xad   :  { %250 = vst [vmem:[%s378_s4] sm:$0xff] %v249_v28   ;;  %v134_v32 = vpop.f32.mrf.mxu2  ;;  %v139_v33 = vpop.f32.mrf.mxu3 }
  0xae   :  { %266 = vst [vmem:[%s378_s4 + $0x8] sm:$0xff] %v254_v29   ;;  %v151_v34 = vmul.f32 %v293_v14, %v134_v32  ;;  %v153_v35 = vmul.f32 %v293_v14, %v139_v33 }
  0xb0   :  { %v163_v38 = vadd.f32 %v294_v16, %v151_v34  ;;  %v165_v39 = vadd.f32 %v294_v16, %v153_v35 }
  0xb2   :  { %v259_v40 = vpack.c.bf16 %v163_v38, %v162_v36  ;;  %v264_v41 = vpack.c.bf16 %v165_v39, %v164_v37 }
  0xb4   :  { %267 = vst [vmem:[%s378_s4 + $0x10] sm:$0xff] %v259_v40  }
  0xb5   :  { %268 = vst [vmem:[%s378_s4 + $0x18] sm:$0xff] %v264_v41  }

// kernel: _lambda_.38
= control target key start
LH: loop header
LB: loop body
LE: loop exit
PB: predicated region body
PF: predicated region fallthrough
CT: control target
= control target key end

     0   :  { %s1120_s1 = inlined_call_operand.vmem [shape: bf16[512,128], index: 1, kind: input, shape index: {}]   ;;  %s1121_s0 = inlined_call_operand.vmem [shape: bf16[64,512], index: 0, kind: input, shape index: {}]   ;;  %s1122_s2 = inlined_call_operand.vmem [shape: f32[1,128], index: 2, kind: input, shape index: {}]   ;;  %s1123_s3 = inlined_call_operand.vmem [shape: f32[1,128], index: 3, kind: input, shape index: {}]   ;;  %s1124_s4 = inlined_call_operand.vmem [shape: bf16[64,128], index: 4, kind: input, shape index: {}]   ;;  %s1125_s5 = inlined_call_operand.vmem [shape: bf16[64,128], index: 5, kind: output, shape index: {}]  }
   0x1   :  { %v779_v0 = vld [vmem:[%s1120_s1 + $0x38] sm:$0xff]  ;;  %v778_v4 = vld [vmem:[%s1120_s1 + $0x30] sm:$0xff]  ;;  %v777_v8 = vld [vmem:[%s1120_s1 + $0x28] sm:$0xff] }
   0x2   :  { %v787_v1 = vld [vmem:[%s1120_s1 + $0x78] sm:$0xff]  ;;  %372 = vmatpush.bf16.msra.mxu0 %v779_v0  ;;  %v786_v5 = vld [vmem:[%s1120_s1 + $0x70] sm:$0xff]  ;;  %v785_v9 = vld [vmem:[%s1120_s1 + $0x68] sm:$0xff] }
   0x3   :  { %v795_v2 = vld [vmem:[%s1120_s1 + $0xb8] sm:$0xff]  ;;  %401 = vmatpush.bf16.msra.mxu1 %v787_v1  ;;  %v794_v6 = vld [vmem:[%s1120_s1 + $0xb0] sm:$0xff]  ;;  %v793_v10 = vld [vmem:[%s1120_s1 + $0xa8] sm:$0xff] }
   0x4   :  { %v803_v3 = vld [vmem:[%s1120_s1 + $0xf8] sm:$0xff]  ;;  %430 = vmatpush.bf16.msra.mxu2 %v795_v2  ;;  %v802_v7 = vld [vmem:[%s1120_s1 + $0xf0] sm:$0xff]  ;;  %v801_v11 = vld [vmem:[%s1120_s1 + $0xe8] sm:$0xff] }
   0x5   :  { %459 = vmatpush.bf16.msra.mxu3 %v803_v3  ;;  %v776_v12 = vld [vmem:[%s1120_s1 + $0x20] sm:$0xff]  ;;  %v775_v16 = vld [vmem:[%s1120_s1 + $0x18] sm:$0xff]  ;;  %v774_v20 = vld [vmem:[%s1120_s1 + $0x10] sm:$0xff] }
   0x6   :  { %373 = vmatpush.bf16.msra.mxu0 %v778_v4  ;;  %v784_v13 = vld [vmem:[%s1120_s1 + $0x60] sm:$0xff]  ;;  %v783_v17 = vld [vmem:[%s1120_s1 + $0x58] sm:$0xff]  ;;  %v782_v21 = vld [vmem:[%s1120_s1 + $0x50] sm:$0xff] }
   0x7   :  { %402 = vmatpush.bf16.msra.mxu1 %v786_v5  ;;  %v792_v14 = vld [vmem:[%s1120_s1 + $0xa0] sm:$0xff]  ;;  %v791_v18 = vld [vmem:[%s1120_s1 + $0x98] sm:$0xff]  ;;  %v790_v22 = vld [vmem:[%s1120_s1 + $0x90] sm:$0xff] }
   0x8   :  { %431 = vmatpush.bf16.msra.mxu2 %v794_v6  ;;  %v800_v15 = vld [vmem:[%s1120_s1 + $0xe0] sm:$0xff]  ;;  %v799_v19 = vld [vmem:[%s1120_s1 + $0xd8] sm:$0xff]  ;;  %v798_v23 = vld [vmem:[%s1120_s1 + $0xd0] sm:$0xff] }
   0x9   :  { %460 = vmatpush.bf16.msra.mxu3 %v802_v7  ;;  %v773_v24 = vld [vmem:[%s1120_s1 + $0x8] sm:$0xff]  ;;  %v772_v28 = vld [vmem:[%s1120_s1] sm:$0xff]  ;;  %v758_v33 = vld [vmem:[%s1121_s0 + $0xc] sm:$0xf0] }
   0xa   :  { %374 = vmatpush.bf16.msra.mxu0 %v777_v8  ;;  %v781_v25 = vld [vmem:[%s1120_s1 + $0x48] sm:$0xff]  ;;  %v780_v29 = vld [vmem:[%s1120_s1 + $0x40] sm:$0xff]  ;;  %v568_v35 = vld [vmem:[%s1121_s0 + $0x10] sm:$0xf0] }
   0xb   :  { %403 = vmatpush.bf16.msra.mxu1 %v785_v9  ;;  %v789_v26 = vld [vmem:[%s1120_s1 + $0x88] sm:$0xff]  ;;  %v788_v30 = vld [vmem:[%s1120_s1 + $0x80] sm:$0xff]  ;;  %v759_v37 = vld [vmem:[%s1121_s0 + $0x14] sm:$0xf0] }
   0xc   :  { %432 = vmatpush.bf16.msra.mxu2 %v793_v10  ;;  %v797_v27 = vld [vmem:[%s1120_s1 + $0xc8] sm:$0xff]  ;;  %v796_v31 = vld [vmem:[%s1120_s1 + $0xc0] sm:$0xff]  ;;  %v576_v39 = vld [vmem:[%s1121_s0 + $0x18] sm:$0xf0] }
   0xd   :  { %461 = vmatpush.bf16.msra.mxu3 %v801_v11  ;;  %v566_v32 = vld [vmem:[%s1121_s0] sm:$0xf]  ;;  %v756_v34 = vld [vmem:[%s1121_s0 + $0x4] sm:$0xf]  ;;  %v574_v36 = vld [vmem:[%s1121_s0 + $0x8] sm:$0xf] }
   0xe   :  { %375 = vmatpush.bf16.msra.mxu0 %v776_v12  ;;  %v757_v38 = vld [vmem:[%s1121_s0 + $0xc] sm:$0xf]  ;;  %v567_v40 = vor.u32 %v758_v33, %v566_v32  ;;  %v571_v41 = vor.u32 %v756_v34, %v568_v35  ;;  %v575_v42 = vor.u32 %v759_v37, %v574_v36  ;;  %v582_v44 = vld [vmem:[%s1121_s0 + $0x20] sm:$0xf]  ;;  %v762_v45 = vld [vmem:[%s1121_s0 + $0x2c] sm:$0xf0] }
   0xf   :  { %404 = vmatpush.bf16.msra.mxu1 %v784_v13  ;;  %v579_v43 = vor.u32 %v757_v38, %v576_v39  ;;  %v760_v46 = vld [vmem:[%s1121_s0 + $0x24] sm:$0xf]  ;;  %v584_v47 = vld [vmem:[%s1121_s0 + $0x30] sm:$0xf0]  ;;  %v590_v48 = vld [vmem:[%s1121_s0 + $0x28] sm:$0xf]  ;;  %v583_v52 = vor.u32 %v762_v45, %v582_v44 }
  0x10   :  { %433 = vmatpush.bf16.msra.mxu2 %v792_v14  ;;  %v763_v49 = vld [vmem:[%s1121_s0 + $0x34] sm:$0xf0]  ;;  %v761_v50 = vld [vmem:[%s1121_s0 + $0x2c] sm:$0xf]  ;;  %v592_v51 = vld [vmem:[%s1121_s0 + $0x38] sm:$0xf0]  ;;  %v587_v53 = vor.u32 %v760_v46, %v584_v47 }
  0x11   :  { %462 = vmatpush.bf16.msra.mxu3 %v800_v15  ;;  %v591_v54 = vor.u32 %v763_v49, %v590_v48  ;;  %v595_v55 = vor.u32 %v761_v50, %v592_v51  ;;  %v598_v56 = vld [vmem:[%s1121_s0 + $0x40] sm:$0xf]  ;;  %v766_v57 = vld [vmem:[%s1121_s0 + $0x4c] sm:$0xf0]  ;;  %v764_v58 = vld [vmem:[%s1121_s0 + $0x44] sm:$0xf] }
  0x12   :  { %376 = vmatpush.bf16.msra.mxu0 %v775_v16  ;;  %v600_v59 = vld [vmem:[%s1121_s0 + $0x50] sm:$0xf0]  ;;  %v606_v60 = vld [vmem:[%s1121_s0 + $0x48] sm:$0xf]  ;;  %v767_v61 = vld [vmem:[%s1121_s0 + $0x54] sm:$0xf0]  ;;  %v599_v0 = vor.u32 %v766_v57, %v598_v56 }
  0x13   :  { %405 = vmatpush.bf16.msra.mxu1 %v783_v17  ;;  %v765_v62 = vld [vmem:[%s1121_s0 + $0x4c] sm:$0xf]  ;;  %v608_v63 = vld [vmem:[%s1121_s0 + $0x58] sm:$0xf0]  ;;  %v603_v1 = vor.u32 %v764_v58, %v600_v59  ;;  %v607_v2 = vor.u32 %v767_v61, %v606_v60  ;;  %v614_v4 = vld [vmem:[%s1121_s0 + $0x60] sm:$0xf] }
  0x14   :  { %434 = vmatpush.bf16.msra.mxu2 %v791_v18  ;;  %v611_v3 = vor.u32 %v765_v62, %v608_v63  ;;  %v770_v5 = vld [vmem:[%s1121_s0 + $0x6c] sm:$0xf0]  ;;  %v768_v6 = vld [vmem:[%s1121_s0 + $0x64] sm:$0xf]  ;;  %v616_v7 = vld [vmem:[%s1121_s0 + $0x70] sm:$0xf0] }
  0x15   :  { %463 = vmatpush.bf16.msra.mxu3 %v799_v19  ;;  %v622_v8 = vld [vmem:[%s1121_s0 + $0x68] sm:$0xf]  ;;  %v771_v9 = vld [vmem:[%s1121_s0 + $0x74] sm:$0xf0]  ;;  %v769_v10 = vld [vmem:[%s1121_s0 + $0x6c] sm:$0xf]  ;;  %v615_v12 = vor.u32 %v770_v5, %v614_v4  ;;  %v619_v13 = vor.u32 %v768_v6, %v616_v7 }
  0x16   :  { %377 = vmatpush.bf16.msra.mxu0 %v774_v20  ;;  %v624_v11 = vld [vmem:[%s1121_s0 + $0x78] sm:$0xf0]  ;;  %v623_v14 = vor.u32 %v771_v9, %v622_v8 }
  0x17   :  { %406 = vmatpush.bf16.msra.mxu1 %v782_v21  ;;  %v627_v15 = vor.u32 %v769_v10, %v624_v11 }
  0x18   :  { %435 = vmatpush.bf16.msra.mxu2 %v790_v22 }
  0x19   :  { %464 = vmatpush.bf16.msra.mxu3 %v798_v23 }
  0x1a   :  { %378 = vmatpush.bf16.msra.mxu0 %v773_v24 }
  0x1b   :  { %407 = vmatpush.bf16.msra.mxu1 %v781_v25  ;;  %v1073_v25 = vld [vmem:[%s1122_s2] ss:$0 sm:$0xff] }
  0x1c   :  { %436 = vmatpush.bf16.msra.mxu2 %v789_v26 }
  0x1d   :  { %465 = vmatpush.bf16.msra.mxu3 %v797_v27  ;;  %v1079_v27 = vld [vmem:[%s1123_s3] ss:$0 sm:$0xff] }
  0x1e   :  { %379 = vmatpush.bf16.msra.mxu0 %v772_v28 }
  0x1f   :  { %408 = vmatpush.bf16.msra.mxu1 %v780_v29  ;;  %v805_v29 = vld [vmem:[%s1124_s4] sm:$0xff]  }
  0x20   :  { %437 = vmatpush.bf16.msra.mxu2 %v788_v30  ;;  %v806_v36 = vunpack.c.l.bf16 %v805_v29  ;;  %v807_v39 = vunpack.c.h.bf16 %v805_v29 }
  0x21   :  { %466 = vmatpush.bf16.msra.mxu3 %v796_v31  ;;  %380 = vmatmul.bf16.vlgmr.msra.gmra.mxu0 %v567_v40 }
  0x22   :  { %409 = vmatmul.bf16.vlgmr.msra.gmra.mxu1 %v571_v41 }
  0x23   :  { %438 = vmatmul.bf16.vlgmr.msra.gmra.mxu2 %v575_v42 }
  0x24   :  { %467 = vmatmul.bf16.vlgmr.msra.gmra.mxu3 %v579_v43 }
  0x31   :  { %385 = vmatmul.bf16.gmra.mxu0 %v583_v52 }
  0x32   :  { %414 = vmatmul.bf16.gmra.mxu1 %v587_v53 }
  0x33   :  { %443 = vmatmul.bf16.gmra.mxu2 %v591_v54 }
  0x34   :  { %472 = vmatmul.bf16.gmra.mxu3 %v595_v55  ;;  %v840_v55 = vld [vmem:[%s1124_s4 + $0x8] sm:$0xff]  }
  0x35   :  { %v810_v62 = vunpack.c.l.bf16 %v840_v55 }
  0x41   :  { %390 = vmatmul.bf16.gmra.mxu0 %v599_v0 }
  0x42   :  { %419 = vmatmul.bf16.gmra.mxu1 %v603_v1  ;;  %v811_v1 = vunpack.c.h.bf16 %v840_v55 }
  0x43   :  { %448 = vmatmul.bf16.gmra.mxu2 %v607_v2 }
  0x44   :  { %477 = vmatmul.bf16.gmra.mxu3 %v611_v3 }
  0x51   :  { %395 = vmatmul.bf16.gmra.mxu0 %v615_v12 }
  0x52   :  { %424 = vmatmul.bf16.gmra.mxu1 %v619_v13 }
  0x53   :  { %453 = vmatmul.bf16.gmra.mxu2 %v623_v14 }
  0x54   :  { %482 = vmatmul.bf16.gmra.mxu3 %v627_v15 }
  0x9e   :  { %v381_v16 = vpop.f32.mrf.mxu0 }
  0x9f   :  { %v410_v17 = vpop.f32.mrf.mxu1 }
  0xa0   :  { %v411_v18 = vadd.f32 %v410_v17, %v381_v16  ;;  %v841_v17 = vld [vmem:[%s1124_s4 + $0x10] sm:$0xff]  }
  0xa1   :  { %v815_v29 = vunpack.c.h.bf16 %v841_v17 }
  0xa6   :  { %v439_v19 = vpop.f32.mrf.mxu2  ;;  %v383_v22 = vpop.f32.mrf.mxu0 }
  0xa7   :  { %v468_v20 = vpop.f32.mrf.mxu3  ;;  %v440_v21 = vadd.f32 %v439_v19, %v411_v18  ;;  %v412_v23 = vpop.f32.mrf.mxu1 }
  0xa8   :  { %v413_v28 = vadd.f32 %v412_v23, %v383_v22 }
  0xa9   :  { %v469_v24 = vadd.f32 %v468_v20, %v440_v21 }
  0xab   :  { %v492_v26 = vmul.f32 %v1073_v25, %v469_v24  ;;  %v814_v24 = vunpack.c.l.bf16 %v841_v17 }
  0xad   :  { %v504_v35 = vadd.f32 %v1079_v27, %v492_v26 }
  0xae   :  { %v441_v30 = vpop.f32.mrf.mxu2  ;;  %v386_v33 = vpop.f32.mrf.mxu0 }
  0xaf   :  { %v470_v31 = vpop.f32.mrf.mxu3  ;;  %v442_v32 = vadd.f32 %v441_v30, %v413_v28  ;;  %v415_v34 = vpop.f32.mrf.mxu1  ;;  %v528_v41 = vadd.f32 %v806_v36, %v504_v35 }
  0xb0   :  { %v416_v40 = vadd.f32 %v415_v34, %v386_v33 }
  0xb1   :  { %v471_v37 = vadd.f32 %v470_v31, %v442_v32  ;;  %v536_v49 = vmax.f32 %v528_v41, 0.0 }
  0xb3   :  { %v493_v38 = vmul.f32 %v1073_v25, %v471_v37 }
  0xb5   :  { %v505_v42 = vadd.f32 %v1079_v27, %v493_v38 }
  0xb6   :  { %v444_v43 = vpop.f32.mrf.mxu2  ;;  %v388_v47 = vpop.f32.mrf.mxu0 }
  0xb7   :  { %v473_v44 = vpop.f32.mrf.mxu3  ;;  %v529_v45 = vadd.f32 %v807_v39, %v505_v42  ;;  %v445_v46 = vadd.f32 %v444_v43, %v416_v40  ;;  %v417_v48 = vpop.f32.mrf.mxu1 }
  0xb8   :  { %v418_v54 = vadd.f32 %v417_v48, %v388_v47 }
  0xb9   :  { %v537_v50 = vmax.f32 %v529_v45, 0.0  ;;  %v474_v51 = vadd.f32 %v473_v44, %v445_v46  ;;  %v842_v45 = vld [vmem:[%s1124_s4 + $0x18] sm:$0xff]  }
  0xbb   :  { %v823_v52 = vpack.c.bf16 %v537_v50, %v536_v49  ;;  %v494_v53 = vmul.f32 %v1073_v25, %v474_v51  ;;  %v818_v50 = vunpack.c.l.bf16 %v842_v45 }
  0xbd   :  { %824 = vst [vmem:[%s1125_s5] sm:$0xff] %v823_v52   ;;  %v506_v61 = vadd.f32 %v1079_v27, %v494_v53  ;;  %v819_v53 = vunpack.c.h.bf16 %v842_v45 }
  0xbe   :  { %v446_v56 = vpop.f32.mrf.mxu2  ;;  %v391_v59 = vpop.f32.mrf.mxu0 }
  0xbf   :  { %v475_v57 = vpop.f32.mrf.mxu3  ;;  %v447_v58 = vadd.f32 %v446_v56, %v418_v54  ;;  %v420_v60 = vpop.f32.mrf.mxu1  ;;  %v530_v3 = vadd.f32 %v810_v62, %v506_v61 }
  0xc0   :  { %v421_v2 = vadd.f32 %v420_v60, %v391_v59 }
  0xc1   :  { %v476_v63 = vadd.f32 %v475_v57, %v447_v58  ;;  %v538_v11 = vmax.f32 %v530_v3, 0.0 }
  0xc3   :  { %v495_v0 = vmul.f32 %v1073_v25, %v476_v63 }
  0xc5   :  { %v507_v4 = vadd.f32 %v1079_v27, %v495_v0 }
  0xc6   :  { %v449_v5 = vpop.f32.mrf.mxu2  ;;  %v393_v9 = vpop.f32.mrf.mxu0 }
  0xc7   :  { %v478_v6 = vpop.f32.mrf.mxu3  ;;  %v531_v7 = vadd.f32 %v811_v1, %v507_v4  ;;  %v450_v8 = vadd.f32 %v449_v5, %v421_v2  ;;  %v422_v10 = vpop.f32.mrf.mxu1 }
  0xc8   :  { %v423_v16 = vadd.f32 %v422_v10, %v393_v9 }
  0xc9   :  { %v539_v12 = vmax.f32 %v531_v7, 0.0  ;;  %v479_v13 = vadd.f32 %v478_v6, %v450_v8 }
  0xcb   :  { %v828_v14 = vpack.c.bf16 %v539_v12, %v538_v11  ;;  %v496_v15 = vmul.f32 %v1073_v25, %v479_v13 }
  0xcd   :  { %843 = vst [vmem:[%s1125_s5 + $0x8] sm:$0xff] %v828_v14   ;;  %v508_v23 = vadd.f32 %v1079_v27, %v496_v15 }
  0xce   :  { %v451_v18 = vpop.f32.mrf.mxu2  ;;  %v396_v21 = vpop.f32.mrf.mxu0 }
  0xcf   :  { %v480_v19 = vpop.f32.mrf.mxu3  ;;  %v452_v20 = vadd.f32 %v451_v18, %v423_v16  ;;  %v425_v22 = vpop.f32.mrf.mxu1  ;;  %v532_v31 = vadd.f32 %v814_v24, %v508_v23 }
  0xd0   :  { %v426_v30 = vadd.f32 %v425_v22, %v396_v21 }
  0xd1   :  { %v481_v26 = vadd.f32 %v480_v19, %v452_v20  ;;  %v540_v37 = vmax.f32 %v532_v31, 0.0 }
  0xd3   :  { %v497_v28 = vmul.f32 %v1073_v25, %v481_v26 }
  0xd5   :  { %v509_v32 = vadd.f32 %v1079_v27, %v497_v28 }
  0xd6   :  { %v454_v33 = vpop.f32.mrf.mxu2  ;;  %v398_v40 = vpop.f32.mrf.mxu0 }
  0xd7   :  { %v483_v34 = vpop.f32.mrf.mxu3  ;;  %v533_v35 = vadd.f32 %v815_v29, %v509_v32  ;;  %v455_v36 = vadd.f32 %v454_v33, %v426_v30  ;;  %v427_v41 = vpop.f32.mrf.mxu1 }
  0xd8   :  { %v428_v44 = vadd.f32 %v427_v41, %v398_v40 }
  0xd9   :  { %v541_v38 = vmax.f32 %v533_v35, 0.0  ;;  %v484_v39 = vadd.f32 %v483_v34, %v455_v36 }
  0xdb   :  { %v833_v42 = vpack.c.bf16 %v541_v38, %v540_v37  ;;  %v498_v43 = vmul.f32 %v1073_v25, %v484_v39 }
  0xdd   :  { %844 = vst [vmem:[%s1125_s5 + $0x10] sm:$0xff] %v833_v42   ;;  %v510_v49 = vadd.f32 %v1079_v27, %v498_v43 }
  0xde   :  { %v456_v46 = vpop.f32.mrf.mxu2 }
  0xdf   :  { %v457_v47 = vadd.f32 %v456_v46, %v428_v44  ;;  %v485_v48 = vpop.f32.mrf.mxu3  ;;  %v534_v54 = vadd.f32 %v818_v50, %v510_v49 }
  0xe1   :  { %v486_v51 = vadd.f32 %v485_v48, %v457_v47  ;;  %v542_v57 = vmax.f32 %v534_v54, 0.0 }
  0xe3   :  { %v499_v52 = vmul.f32 %v1073_v25, %v486_v51 }
  0xe5   :  { %v511_v55 = vadd.f32 %v1079_v27, %v499_v52 }
  0xe7   :  { %v535_v56 = vadd.f32 %v819_v53, %v511_v55 }
  0xe9   :  { %v543_v58 = vmax.f32 %v535_v56, 0.0 }
  0xeb   :  { %v838_v59 = vpack.c.bf16 %v543_v58, %v542_v57 }
  0xed   :  { %845 = vst [vmem:[%s1125_s5 + $0x18] sm:$0xff] %v838_v59  }

// kernel: _lambda_.41
= control target key start
LH: loop header
LB: loop body
LE: loop exit
PB: predicated region body
PF: predicated region fallthrough
CT: control target
= control target key end

     0   :  { %s477_s1 = inlined_call_operand.vmem [shape: bf16[256,128], index: 1, kind: input, shape index: {}]   ;;  %s478_s0 = inlined_call_operand.vmem [shape: bf16[32,256], index: 0, kind: input, shape index: {}]   ;;  %s479_s2 = inlined_call_operand.vmem [shape: f32[1,128], index: 2, kind: input, shape index: {}]   ;;  %s480_s3 = inlined_call_operand.vmem [shape: f32[1,128], index: 3, kind: input, shape index: {}]   ;;  %s481_s4 = inlined_call_operand.vmem [shape: bf16[32,128], index: 4, kind: output, shape index: {}]  }
   0x1   :  { %v330_v0 = vld [vmem:[%s477_s1 + $0x38] sm:$0xff]  ;;  %v329_v2 = vld [vmem:[%s477_s1 + $0x30] sm:$0xff]  ;;  %v328_v4 = vld [vmem:[%s477_s1 + $0x28] sm:$0xff] }
   0x2   :  { %v338_v1 = vld [vmem:[%s477_s1 + $0x78] sm:$0xff]  ;;  %169 = vmatpush.bf16.msra.mxu0 %v330_v0  ;;  %350 = vmatpush.bf16.msra.mxu2 %v330_v0  ;;  %v337_v3 = vld [vmem:[%s477_s1 + $0x70] sm:$0xff]  ;;  %v336_v5 = vld [vmem:[%s477_s1 + $0x68] sm:$0xff] }
   0x3   :  { %188 = vmatpush.bf16.msra.mxu1 %v338_v1  ;;  %358 = vmatpush.bf16.msra.mxu3 %v338_v1  ;;  %v327_v6 = vld [vmem:[%s477_s1 + $0x20] sm:$0xff]  ;;  %v326_v8 = vld [vmem:[%s477_s1 + $0x18] sm:$0xff]  ;;  %v325_v10 = vld [vmem:[%s477_s1 + $0x10] sm:$0xff] }
   0x4   :  { %v335_v7 = vld [vmem:[%s477_s1 + $0x60] sm:$0xff]  ;;  %v334_v9 = vld [vmem:[%s477_s1 + $0x58] sm:$0xff]  ;;  %v333_v11 = vld [vmem:[%s477_s1 + $0x50] sm:$0xff] }
   0x5   :  { %v324_v12 = vld [vmem:[%s477_s1 + $0x8] sm:$0xff]  ;;  %v323_v14 = vld [vmem:[%s477_s1] sm:$0xff]  ;;  %v249_v18 = vld [vmem:[%s478_s0 + $0x10] sm:$0xf] }
   0x6   :  { %170 = vmatpush.bf16.msra.mxu0 %v329_v2  ;;  %351 = vmatpush.bf16.msra.mxu2 %v329_v2  ;;  %v332_v13 = vld [vmem:[%s477_s1 + $0x48] sm:$0xff]  ;;  %v331_v15 = vld [vmem:[%s477_s1 + $0x40] sm:$0xff]  ;;  %v322_v19 = vld [vmem:[%s478_s0 + $0x14] sm:$0xf0] }
   0x7   :  { %189 = vmatpush.bf16.msra.mxu1 %v337_v3  ;;  %359 = vmatpush.bf16.msra.mxu3 %v337_v3  ;;  %v241_v16 = vld [vmem:[%s478_s0] sm:$0xf]  ;;  %v320_v17 = vld [vmem:[%s478_s0 + $0x4] sm:$0xf0]  ;;  %v319_v20 = vld [vmem:[%s478_s0 + $0x4] sm:$0xf]  ;;  %v250_v25 = vor.u32 %v322_v19, %v249_v18 }
   0x8   :  { %v243_v21 = vld [vmem:[%s478_s0 + $0x8] sm:$0xf0]  ;;  %v321_v22 = vld [vmem:[%s478_s0 + $0x14] sm:$0xf]  ;;  %v251_v23 = vld [vmem:[%s478_s0 + $0x18] sm:$0xf0]  ;;  %v242_v24 = vor.u32 %v320_v17, %v241_v16 }
   0x9   :  { %v246_v26 = vor.u32 %v319_v20, %v243_v21  ;;  %v254_v27 = vor.u32 %v321_v22, %v251_v23  ;;  %v366_v31 = vld [vmem:[%s479_s2] ss:$0 sm:$0xff] }
   0xa   :  { %171 = vmatpush.bf16.msra.mxu0 %v328_v4  ;;  %352 = vmatpush.bf16.msra.mxu2 %v328_v4  ;;  %v367_v35 = vld [vmem:[%s480_s3] ss:$0 sm:$0xff] }
   0xb   :  { %190 = vmatpush.bf16.msra.mxu1 %v336_v5  ;;  %360 = vmatpush.bf16.msra.mxu3 %v336_v5 }
   0xe   :  { %172 = vmatpush.bf16.msra.mxu0 %v327_v6  ;;  %353 = vmatpush.bf16.msra.mxu2 %v327_v6 }
   0xf   :  { %191 = vmatpush.bf16.msra.mxu1 %v335_v7  ;;  %361 = vmatpush.bf16.msra.mxu3 %v335_v7 }
  0x12   :  { %173 = vmatpush.bf16.msra.mxu0 %v326_v8  ;;  %354 = vmatpush.bf16.msra.mxu2 %v326_v8 }
  0x13   :  { %192 = vmatpush.bf16.msra.mxu1 %v334_v9  ;;  %362 = vmatpush.bf16.msra.mxu3 %v334_v9 }
  0x16   :  { %174 = vmatpush.bf16.msra.mxu0 %v325_v10  ;;  %355 = vmatpush.bf16.msra.mxu2 %v325_v10 }
  0x17   :  { %193 = vmatpush.bf16.msra.mxu1 %v333_v11  ;;  %363 = vmatpush.bf16.msra.mxu3 %v333_v11 }
  0x1a   :  { %175 = vmatpush.bf16.msra.mxu0 %v324_v12  ;;  %356 = vmatpush.bf16.msra.mxu2 %v324_v12 }
  0x1b   :  { %194 = vmatpush.bf16.msra.mxu1 %v332_v13  ;;  %364 = vmatpush.bf16.msra.mxu3 %v332_v13 }
  0x1e   :  { %176 = vmatpush.bf16.msra.mxu0 %v323_v14  ;;  %357 = vmatpush.bf16.msra.mxu2 %v323_v14 }
  0x1f   :  { %195 = vmatpush.bf16.msra.mxu1 %v331_v15  ;;  %365 = vmatpush.bf16.msra.mxu3 %v331_v15 }
  0x21   :  { %177 = vmatmul.bf16.vlgmr.msra.gmra.mxu0 %v242_v24  ;;  %182 = vmatmul.bf16.vlgmr.msra.gmra.mxu2 %v250_v25 }
  0x22   :  { %196 = vmatmul.bf16.vlgmr.msra.gmra.mxu1 %v246_v26  ;;  %201 = vmatmul.bf16.vlgmr.msra.gmra.mxu3 %v254_v27 }
  0x9e   :  { %v178_v28 = vpop.f32.mrf.mxu0 }
  0x9f   :  { %v197_v29 = vpop.f32.mrf.mxu1 }
  0xa0   :  { %v198_v30 = vadd.f32 %v197_v29, %v178_v28 }
  0xa2   :  { %v211_v34 = vmul.f32 %v366_v31, %v198_v30 }
  0xa4   :  { %v183_v32 = vpop.f32.mrf.mxu2  ;;  %v219_v40 = vadd.f32 %v367_v35, %v211_v34 }
  0xa5   :  { %v202_v33 = vpop.f32.mrf.mxu3 }
  0xa6   :  { %v180_v36 = vpop.f32.mrf.mxu0  ;;  %v203_v38 = vadd.f32 %v202_v33, %v183_v32  ;;  %v223_v46 = vmax.f32 %v219_v40, 0.0 }
  0xa7   :  { %v199_v37 = vpop.f32.mrf.mxu1 }
  0xa8   :  { %v200_v39 = vadd.f32 %v199_v37, %v180_v36  ;;  %v213_v42 = vmul.f32 %v366_v31, %v203_v38 }
  0xaa   :  { %v212_v41 = vmul.f32 %v366_v31, %v200_v39  ;;  %v221_v49 = vadd.f32 %v367_v35, %v213_v42 }
  0xac   :  { %v220_v43 = vadd.f32 %v367_v35, %v212_v41  ;;  %v185_v44 = vpop.f32.mrf.mxu2  ;;  %v225_v53 = vmax.f32 %v221_v49, 0.0 }
  0xad   :  { %v204_v45 = vpop.f32.mrf.mxu3 }
  0xae   :  { %v224_v47 = vmax.f32 %v220_v43, 0.0  ;;  %v205_v48 = vadd.f32 %v204_v45, %v185_v44 }
  0xb0   :  { %v342_v50 = vpack.c.bf16 %v224_v47, %v223_v46  ;;  %v214_v51 = vmul.f32 %v366_v31, %v205_v48 }
  0xb2   :  { %343 = vst [vmem:[%s481_s4] sm:$0xff] %v342_v50   ;;  %v222_v52 = vadd.f32 %v367_v35, %v214_v51 }
  0xb4   :  { %v226_v54 = vmax.f32 %v222_v52, 0.0 }
  0xb6   :  { %v347_v55 = vpack.c.bf16 %v226_v54, %v225_v53 }
  0xb8   :  { %349 = vst [vmem:[%s481_s4 + $0x8] sm:$0xff] %v347_v55  }

// kernel: _lambda_.42
= control target key start
LH: loop header
LB: loop body
LE: loop exit
PB: predicated region body
PF: predicated region fallthrough
CT: control target
= control target key end

     0   :  { %s282_s1 = inlined_call_operand.vmem [shape: bf16[128,128], index: 1, kind: input, shape index: {}]   ;;  %s283_s2 = inlined_call_operand.vmem [shape: f32[1,128], index: 2, kind: input, shape index: {}]   ;;  %s284_s3 = inlined_call_operand.vmem [shape: f32[1,128], index: 3, kind: input, shape index: {}]   ;;  %s285_s0 = inlined_call_operand.vmem [shape: bf16[32,128], index: 0, kind: input, shape index: {}]   ;;  %s286_s4 = inlined_call_operand.vmem [shape: bf16[32,128], index: 4, kind: output, shape index: {}]  }
   0x1   :  { %v193_v0 = vld [vmem:[%s282_s1 + $0x38] sm:$0xff]  ;;  %v192_v1 = vld [vmem:[%s282_s1 + $0x30] sm:$0xff]  ;;  %v191_v2 = vld [vmem:[%s282_s1 + $0x28] sm:$0xff] }
   0x2   :  { %97 = vmatpush.bf16.msra.mxu0 %v193_v0  ;;  %205 = vmatpush.bf16.msra.mxu1 %v193_v0  ;;  %v190_v3 = vld [vmem:[%s282_s1 + $0x20] sm:$0xff]  ;;  %v189_v4 = vld [vmem:[%s282_s1 + $0x18] sm:$0xff]  ;;  %v188_v5 = vld [vmem:[%s282_s1 + $0x10] sm:$0xff] }
   0x3   :  { %v187_v6 = vld [vmem:[%s282_s1 + $0x8] sm:$0xff]  ;;  %v186_v7 = vld [vmem:[%s282_s1] sm:$0xff] }
   0x4   :  { %v184_v8 = vld [vmem:[%s285_s0] sm:$0xff]  ;;  %v185_v9 = vld [vmem:[%s285_s0 + $0x8] sm:$0xff] }
   0x5   :  { %v213_v12 = vld [vmem:[%s283_s2] ss:$0 sm:$0xff] }
   0x6   :  { %98 = vmatpush.bf16.msra.mxu0 %v192_v1  ;;  %206 = vmatpush.bf16.msra.mxu1 %v192_v1  ;;  %v214_v14 = vld [vmem:[%s284_s3] ss:$0 sm:$0xff] }
   0xa   :  { %99 = vmatpush.bf16.msra.mxu0 %v191_v2  ;;  %207 = vmatpush.bf16.msra.mxu1 %v191_v2 }
   0xe   :  { %100 = vmatpush.bf16.msra.mxu0 %v190_v3  ;;  %208 = vmatpush.bf16.msra.mxu1 %v190_v3 }
  0x12   :  { %101 = vmatpush.bf16.msra.mxu0 %v189_v4  ;;  %209 = vmatpush.bf16.msra.mxu1 %v189_v4 }
  0x16   :  { %102 = vmatpush.bf16.msra.mxu0 %v188_v5  ;;  %210 = vmatpush.bf16.msra.mxu1 %v188_v5 }
  0x1a   :  { %103 = vmatpush.bf16.msra.mxu0 %v187_v6  ;;  %211 = vmatpush.bf16.msra.mxu1 %v187_v6 }
  0x1e   :  { %104 = vmatpush.bf16.msra.mxu0 %v186_v7  ;;  %212 = vmatpush.bf16.msra.mxu1 %v186_v7 }
  0x21   :  { %105 = vmatmul.bf16.vlgmr.msra.gmra.mxu0 %v184_v8  ;;  %110 = vmatmul.bf16.vlgmr.msra.gmra.mxu1 %v185_v9 }
  0x9e   :  { %v106_v10 = vpop.f32.mrf.mxu0  ;;  %v111_v11 = vpop.f32.mrf.mxu1 }
  0x9f   :  { %v120_v13 = vmul.f32 %v213_v12, %v106_v10  ;;  %v122_v15 = vmul.f32 %v213_v12, %v111_v11 }
  0xa1   :  { %v128_v20 = vadd.f32 %v214_v14, %v120_v13  ;;  %v130_v21 = vadd.f32 %v214_v14, %v122_v15 }
  0xa6   :  { %v108_v16 = vpop.f32.mrf.mxu0  ;;  %v113_v17 = vpop.f32.mrf.mxu1 }
  0xa7   :  { %v121_v18 = vmul.f32 %v213_v12, %v108_v16  ;;  %v123_v19 = vmul.f32 %v213_v12, %v113_v17 }
  0xa9   :  { %v129_v22 = vadd.f32 %v214_v14, %v121_v18  ;;  %v131_v23 = vadd.f32 %v214_v14, %v123_v19 }
  0xab   :  { %v197_v24 = vpack.c.bf16 %v129_v22, %v128_v20  ;;  %v202_v25 = vpack.c.bf16 %v131_v23, %v130_v21 }
  0xad   :  { %198 = vst [vmem:[%s286_s4] sm:$0xff] %v197_v24  }
  0xae   :  { %204 = vst [vmem:[%s286_s4 + $0x8] sm:$0xff] %v202_v25  }

// kernel: _lambda_.43
= control target key start
LH: loop header
LB: loop body
LE: loop exit
PB: predicated region body
PF: predicated region fallthrough
CT: control target
= control target key end

     0   :  { %s512_s1 = inlined_call_operand.vmem [shape: bf16[256,128], index: 1, kind: input, shape index: {}]   ;;  %s513_s0 = inlined_call_operand.vmem [shape: bf16[32,256], index: 0, kind: input, shape index: {}]   ;;  %s514_s2 = inlined_call_operand.vmem [shape: f32[1,128], index: 2, kind: input, shape index: {}]   ;;  %s515_s3 = inlined_call_operand.vmem [shape: f32[1,128], index: 3, kind: input, shape index: {}]   ;;  %s516_s4 = inlined_call_operand.vmem [shape: bf16[32,128], index: 4, kind: input, shape index: {}]   ;;  %s517_s5 = inlined_call_operand.vmem [shape: bf16[32,128], index: 5, kind: output, shape index: {}]  }
   0x1   :  { %v345_v0 = vld [vmem:[%s512_s1 + $0x38] sm:$0xff]  ;;  %v344_v2 = vld [vmem:[%s512_s1 + $0x30] sm:$0xff]  ;;  %v343_v4 = vld [vmem:[%s512_s1 + $0x28] sm:$0xff] }
   0x2   :  { %v353_v1 = vld [vmem:[%s512_s1 + $0x78] sm:$0xff]  ;;  %172 = vmatpush.bf16.msra.mxu0 %v345_v0  ;;  %374 = vmatpush.bf16.msra.mxu2 %v345_v0  ;;  %v352_v3 = vld [vmem:[%s512_s1 + $0x70] sm:$0xff]  ;;  %v351_v5 = vld [vmem:[%s512_s1 + $0x68] sm:$0xff] }
   0x3   :  { %191 = vmatpush.bf16.msra.mxu1 %v353_v1  ;;  %382 = vmatpush.bf16.msra.mxu3 %v353_v1  ;;  %v342_v6 = vld [vmem:[%s512_s1 + $0x20] sm:$0xff]  ;;  %v341_v8 = vld [vmem:[%s512_s1 + $0x18] sm:$0xff]  ;;  %v340_v10 = vld [vmem:[%s512_s1 + $0x10] sm:$0xff] }
   0x4   :  { %v350_v7 = vld [vmem:[%s512_s1 + $0x60] sm:$0xff]  ;;  %v349_v9 = vld [vmem:[%s512_s1 + $0x58] sm:$0xff]  ;;  %v348_v11 = vld [vmem:[%s512_s1 + $0x50] sm:$0xff] }
   0x5   :  { %v339_v12 = vld [vmem:[%s512_s1 + $0x8] sm:$0xff]  ;;  %v338_v14 = vld [vmem:[%s512_s1] sm:$0xff]  ;;  %v264_v18 = vld [vmem:[%s513_s0 + $0x10] sm:$0xf] }
   0x6   :  { %173 = vmatpush.bf16.msra.mxu0 %v344_v2  ;;  %375 = vmatpush.bf16.msra.mxu2 %v344_v2  ;;  %v347_v13 = vld [vmem:[%s512_s1 + $0x48] sm:$0xff]  ;;  %v346_v15 = vld [vmem:[%s512_s1 + $0x40] sm:$0xff]  ;;  %v337_v19 = vld [vmem:[%s513_s0 + $0x14] sm:$0xf0] }
   0x7   :  { %192 = vmatpush.bf16.msra.mxu1 %v352_v3  ;;  %383 = vmatpush.bf16.msra.mxu3 %v352_v3  ;;  %v256_v16 = vld [vmem:[%s513_s0] sm:$0xf]  ;;  %v335_v17 = vld [vmem:[%s513_s0 + $0x4] sm:$0xf0]  ;;  %v334_v20 = vld [vmem:[%s513_s0 + $0x4] sm:$0xf]  ;;  %v265_v25 = vor.u32 %v337_v19, %v264_v18 }
   0x8   :  { %v258_v21 = vld [vmem:[%s513_s0 + $0x8] sm:$0xf0]  ;;  %v336_v22 = vld [vmem:[%s513_s0 + $0x14] sm:$0xf]  ;;  %v266_v23 = vld [vmem:[%s513_s0 + $0x18] sm:$0xf0]  ;;  %v257_v24 = vor.u32 %v335_v17, %v256_v16 }
   0x9   :  { %v261_v26 = vor.u32 %v334_v20, %v258_v21  ;;  %v269_v27 = vor.u32 %v336_v22, %v266_v23  ;;  %v390_v31 = vld [vmem:[%s514_s2] ss:$0 sm:$0xff]  ;;  %v372_v46 = vld [vmem:[%s516_s4 + $0x8] sm:$0xff]  }
   0xa   :  { %174 = vmatpush.bf16.msra.mxu0 %v343_v4  ;;  %376 = vmatpush.bf16.msra.mxu2 %v343_v4  ;;  %v391_v33 = vld [vmem:[%s515_s3] ss:$0 sm:$0xff]  ;;  %v360_v52 = vunpack.c.l.bf16 %v372_v46  ;;  %v361_v58 = vunpack.c.h.bf16 %v372_v46 }
   0xb   :  { %193 = vmatpush.bf16.msra.mxu1 %v351_v5  ;;  %384 = vmatpush.bf16.msra.mxu3 %v351_v5  ;;  %v355_v35 = vld [vmem:[%s516_s4] sm:$0xff]  }
   0xc   :  { %v356_v41 = vunpack.c.l.bf16 %v355_v35  ;;  %v357_v45 = vunpack.c.h.bf16 %v355_v35 }
   0xe   :  { %175 = vmatpush.bf16.msra.mxu0 %v342_v6  ;;  %377 = vmatpush.bf16.msra.mxu2 %v342_v6 }
   0xf   :  { %194 = vmatpush.bf16.msra.mxu1 %v350_v7  ;;  %385 = vmatpush.bf16.msra.mxu3 %v350_v7 }
  0x12   :  { %176 = vmatpush.bf16.msra.mxu0 %v341_v8  ;;  %378 = vmatpush.bf16.msra.mxu2 %v341_v8 }
  0x13   :  { %195 = vmatpush.bf16.msra.mxu1 %v349_v9  ;;  %386 = vmatpush.bf16.msra.mxu3 %v349_v9 }
  0x16   :  { %177 = vmatpush.bf16.msra.mxu0 %v340_v10  ;;  %379 = vmatpush.bf16.msra.mxu2 %v340_v10 }
  0x17   :  { %196 = vmatpush.bf16.msra.mxu1 %v348_v11  ;;  %387 = vmatpush.bf16.msra.mxu3 %v348_v11 }
  0x1a   :  { %178 = vmatpush.bf16.msra.mxu0 %v339_v12  ;;  %380 = vmatpush.bf16.msra.mxu2 %v339_v12 }
  0x1b   :  { %197 = vmatpush.bf16.msra.mxu1 %v347_v13  ;;  %388 = vmatpush.bf16.msra.mxu3 %v347_v13 }
  0x1e   :  { %179 = vmatpush.bf16.msra.mxu0 %v338_v14  ;;  %381 = vmatpush.bf16.msra.mxu2 %v338_v14 }
  0x1f   :  { %198 = vmatpush.bf16.msra.mxu1 %v346_v15  ;;  %389 = vmatpush.bf16.msra.mxu3 %v346_v15 }
  0x21   :  { %180 = vmatmul.bf16.vlgmr.msra.gmra.mxu0 %v257_v24  ;;  %185 = vmatmul.bf16.vlgmr.msra.gmra.mxu2 %v265_v25 }
  0x22   :  { %199 = vmatmul.bf16.vlgmr.msra.gmra.mxu1 %v261_v26  ;;  %204 = vmatmul.bf16.vlgmr.msra.gmra.mxu3 %v269_v27 }
  0x9e   :  { %v181_v28 = vpop.f32.mrf.mxu0 }
  0x9f   :  { %v200_v29 = vpop.f32.mrf.mxu1 }
  0xa0   :  { %v201_v30 = vadd.f32 %v200_v29, %v181_v28 }
  0xa2   :  { %v214_v32 = vmul.f32 %v390_v31, %v201_v30 }
  0xa4   :  { %v186_v34 = vpop.f32.mrf.mxu2  ;;  %v222_v40 = vadd.f32 %v391_v33, %v214_v32 }
  0xa5   :  { %v205_v36 = vpop.f32.mrf.mxu3 }
  0xa6   :  { %v206_v37 = vadd.f32 %v205_v36, %v186_v34  ;;  %v183_v38 = vpop.f32.mrf.mxu0  ;;  %v234_v47 = vadd.f32 %v356_v41, %v222_v40 }
  0xa7   :  { %v202_v39 = vpop.f32.mrf.mxu1 }
  0xa8   :  { %v203_v42 = vadd.f32 %v202_v39, %v183_v38  ;;  %v216_v43 = vmul.f32 %v390_v31, %v206_v37  ;;  %v238_v55 = vmax.f32 %v234_v47, 0.0 }
  0xaa   :  { %v215_v44 = vmul.f32 %v390_v31, %v203_v42  ;;  %v224_v51 = vadd.f32 %v391_v33, %v216_v43 }
  0xac   :  { %v223_v48 = vadd.f32 %v391_v33, %v215_v44  ;;  %v188_v49 = vpop.f32.mrf.mxu2  ;;  %v236_v59 = vadd.f32 %v360_v52, %v224_v51 }
  0xad   :  { %v207_v50 = vpop.f32.mrf.mxu3 }
  0xae   :  { %v235_v53 = vadd.f32 %v357_v45, %v223_v48  ;;  %v208_v54 = vadd.f32 %v207_v50, %v188_v49  ;;  %v240_v63 = vmax.f32 %v236_v59, 0.0 }
  0xb0   :  { %v239_v56 = vmax.f32 %v235_v53, 0.0  ;;  %v217_v57 = vmul.f32 %v390_v31, %v208_v54 }
  0xb2   :  { %v365_v60 = vpack.c.bf16 %v239_v56, %v238_v55  ;;  %v225_v61 = vadd.f32 %v391_v33, %v217_v57 }
  0xb4   :  { %366 = vst [vmem:[%s517_s5] sm:$0xff] %v365_v60   ;;  %v237_v62 = vadd.f32 %v361_v58, %v225_v61 }
  0xb6   :  { %v241_v0 = vmax.f32 %v237_v62, 0.0 }
  0xb8   :  { %v370_v1 = vpack.c.bf16 %v241_v0, %v240_v63 }
  0xba   :  { %373 = vst [vmem:[%s517_s5 + $0x8] sm:$0xff] %v370_v1  }

</bundles_post_ra>
